<compile_context>
chip_gen: v7x
topology: tpu7x:2x2x1
jax: 0.10.0
libtpu: 0.0.40
codegen_flags: <defaults>
</compile_context>

<pallas_src>
import functools
import math

import jax
import jax.numpy as jnp
import numpy as np
from jax.experimental import pallas as pl
from jax.experimental.pallas import tpu as pltpu

EPS = 1e-8          # PyTorch module default (eps=1e-08)
NUM_GROUPS = 32
LANES = 128


def _round_up(x, m):
    return (x + m - 1) // m * m


# -----------------------------------------------------------------------------
# fused kernel: GN+SiLU -> conv3x3 -> GN+SiLU -> conv3x3 -> (+ 1x1 shortcut)
# -----------------------------------------------------------------------------
def _unet_conv_kernel(x_ref, wsc_ref, g1_ref, b1_ref, m1_ref, wc1_ref,
                      g2_ref, b2_ref, m2_ref, wc2_ref, o_ref, hp_ref,
                      *, h, w, eps):
    hw = h * w
    cp = o_ref.shape[-1]

    x = x_ref[0].astype(jnp.float32)                         # (HW, Cp) lane-dense

    # column-index masks for the +/-1 width shift (hoisted, reused by both convs)
    col = jax.lax.broadcasted_iota(jnp.int32, (hw, 1), 0) % w
    first_col = col == 0
    last_col = col == (w - 1)

    def group_norm_silu(z, mavg_ref, gamma_ref, beta_ref):
        # Two-pass GroupNorm (PyTorch semantics) + fused SiLU, all f32.
        # Group reduction = tiny (1,Cp)x(Cp,Cp) matmul against a precomputed
        # group-averaging matrix (zero rows/cols for padded lanes).
        s1 = jnp.sum(z, axis=0, keepdims=True)                         # (1, Cp)
        mu = jnp.dot(s1, mavg_ref[...], preferred_element_type=jnp.float32)
        zc = z - mu
        s2 = jnp.sum(zc * zc, axis=0, keepdims=True)
        var = jnp.dot(s2, mavg_ref[...], preferred_element_type=jnp.float32)
        y = zc * jax.lax.rsqrt(var + eps) * gamma_ref[...] + beta_ref[...]
        return y * jax.nn.sigmoid(y)                          # SiLU (sigmoid on EUP)

    def conv3x3(w9_ref):
        # hp_ref holds the height-padded activation flattened to ((H+2)*W, Cp)
        # with rows [0,W) and [(H+1)*W, (H+2)*W) zero.
        #   H shift -> aligned sublane slice (offset is a multiple of W)
        #   W shift -> pltpu.roll (XLU) + edge mask, no unaligned slices
        acc = jnp.zeros((hw, cp), jnp.float32)
        for dh in range(3):
            base = hp_ref[pl.ds(dh * w, hw), :]
            taps = (
                jnp.where(first_col, 0.0, pltpu.roll(base, 1, axis=0)),     # dw=0
                base,                                                        # dw=1
                jnp.where(last_col, 0.0, pltpu.roll(base, hw - 1, axis=0)),  # dw=2
            )
            for dw in range(3):
                acc += jnp.dot(taps[dw], w9_ref[dh * 3 + dw],
                               preferred_element_type=jnp.float32)
        return acc

    # zero the top/bottom halo rows of the scratch (they stay zero afterwards)
    zrow = jnp.zeros((w, cp), jnp.float32)
    hp_ref[pl.ds(0, w), :] = zrow
    hp_ref[pl.ds((h + 1) * w, w), :] = zrow

    # norm1 + SiLU -> conv1
    hp_ref[pl.ds(w, hw), :] = group_norm_silu(x, m1_ref, g1_ref, b1_ref)
    h1 = conv3x3(wc1_ref)

    # norm2 + SiLU -> conv2 (scratch reused, halo rows still zero)
    hp_ref[pl.ds(w, hw), :] = group_norm_silu(h1, m2_ref, g2_ref, b2_ref)
    h2 = conv3x3(wc2_ref)

    # 1x1 shortcut + residual add; single lane-dense store
    res = jnp.dot(x, wsc_ref[...], preferred_element_type=jnp.float32)
    o_ref[0] = (h2 + res).astype(o_ref.dtype)


# -----------------------------------------------------------------------------
# wrapper (accepts/returns NCHW, like the PyTorch module)
# -----------------------------------------------------------------------------
def _pad_axis(a, axis, new_size):
    pad = [(0, 0)] * a.ndim
    pad[axis] = (0, new_size - a.shape[axis])
    return jnp.pad(a, pad)


def _group_avg_matrix(c, cp, num_groups, hw):
    gs = c // num_groups
    gid = np.arange(c) // gs
    m = np.zeros((cp, cp), np.float32)
    m[:c, :c] = (gid[:, None] == gid[None, :]).astype(np.float32) / float(hw * gs)
    return jnp.asarray(m)


def unet_convolution_forward(x_nchw, params, *, num_groups=NUM_GROUPS, eps=EPS):
    """x_nchw: (N, Cin, H, W) like the PyTorch module.  Returns (N, Cout, H, W)."""
    n, cin, h, w = x_nchw.shape
    cout = params['conv1_w'].shape[-1]
    assert cin % num_groups == 0 and cout % num_groups == 0
    hw = h * w
    cp = max(_round_up(cin, LANES), _round_up(cout, LANES))   # lane-dense channels

    # boundary glue: NCHW -> NHWC, pad channels to cp, flatten spatial
    x = jnp.transpose(x_nchw, (0, 2, 3, 1))
    x = _pad_axis(x, 3, cp).reshape(n, hw, cp)

    # lane-pad parameters (zero pad lanes keep padded channels exactly 0)
    wsc = _pad_axis(_pad_axis(params['shortcut_w'], 0, cp), 1, cp)
    wc1 = _pad_axis(_pad_axis(params['conv1_w'], 2, cp), 3, cp).reshape(9, cp, cp)
    wc2 = _pad_axis(_pad_axis(params['conv2_w'], 2, cp), 3, cp).reshape(9, cp, cp)
    g1 = _pad_axis(params['norm1_g'], 0, cp).reshape(1, cp)
    b1 = _pad_axis(params['norm1_b'], 0, cp).reshape(1, cp)
    g2 = _pad_axis(params['norm2_g'], 0, cp).reshape(1, cp)
    b2 = _pad_axis(params['norm2_b'], 0, cp).reshape(1, cp)
    m1 = _group_avg_matrix(cin, cp, num_groups, hw)
    m2 = _group_avg_matrix(cout, cp, num_groups, hw)

    kernel = functools.partial(_unet_conv_kernel, h=h, w=w, eps=eps)
    rep2 = lambda b: (0, 0)            # broadcast (weight-like) operands
    rep3 = lambda b: (0, 0, 0)
    out = pl.pallas_call(
        kernel,
        out_shape=jax.ShapeDtypeStruct((n, hw, cp), x_nchw.dtype),
        grid=(n,),
        in_specs=[
            pl.BlockSpec((1, hw, cp), lambda b: (b, 0, 0)),   # x
            pl.BlockSpec((cp, cp), rep2),                     # shortcut 1x1 weight
            pl.BlockSpec((1, cp), rep2),                      # gamma1
            pl.BlockSpec((1, cp), rep2),                      # beta1
            pl.BlockSpec((cp, cp), rep2),                     # group-avg matrix 1
            pl.BlockSpec((9, cp, cp), rep3),                  # conv1 3x3 weight
            pl.BlockSpec((1, cp), rep2),                      # gamma2
            pl.BlockSpec((1, cp), rep2),                      # beta2
            pl.BlockSpec((cp, cp), rep2),                     # group-avg matrix 2
            pl.BlockSpec((9, cp, cp), rep3),                  # conv2 3x3 weight
        ],
        out_specs=pl.BlockSpec((1, hw, cp), lambda b: (b, 0, 0)),
        scratch_shapes=[pltpu.VMEM(((h + 2) * w, cp), jnp.float32)],
        compiler_params=pltpu.CompilerParams(
            dimension_semantics=("parallel",)),
    )(x, wsc, g1, b1, m1, wc1, g2, b2, m2, wc2)

    # boundary glue: strip channel pad, back to NCHW
    out = out.reshape(n, h, w, cp)[..., :cout]
    return jnp.transpose(out, (0, 3, 1, 2))


# -----------------------------------------------------------------------------
# parameters (deterministic; bias=False as in the module default)
# -----------------------------------------------------------------------------
def init_params(key, in_channels, out_channels):
    k1, k2, k3 = jax.random.split(key, 3)

    def wconv(k, kh, kw, ci, co):   # HWIO layout
        return jax.random.normal(k, (kh, kw, ci, co), jnp.float32) / math.sqrt(kh * kw * ci)

    return {
        'norm1_g': jnp.ones((in_channels,), jnp.float32),
        'norm1_b': jnp.zeros((in_channels,), jnp.float32),
        'conv1_w': wconv(k1, 3, 3, in_channels, out_channels),
        'norm2_g': jnp.ones((out_channels,), jnp.float32),
        'norm2_b': jnp.zeros((out_channels,), jnp.float32),
        'conv2_w': wconv(k2, 3, 3, out_channels, out_channels),
        'shortcut_w': jax.random.normal(k3, (in_channels, out_channels),
                                        jnp.float32) / math.sqrt(in_channels),
    }


# -----------------------------------------------------------------------------
# pure-JAX reference (true-f32 matmuls) for verification
# -----------------------------------------------------------------------------
def _ref_forward(x_nchw, params, *, num_groups=NUM_GROUPS, eps=EPS):
    hi = jax.lax.Precision.HIGHEST

    def gn(z, g, b):
        n, h, w, c = z.shape
        gs = c // num_groups
        zg = z.reshape(n, h, w, num_groups, gs)
        mu = zg.mean(axis=(1, 2, 4), keepdims=True)
        var = ((zg - mu) ** 2).mean(axis=(1, 2, 4), keepdims=True)
        y = ((zg - mu) * jax.lax.rsqrt(var + eps)).reshape(n, h, w, c)
        return y * g + b

    def silu(z):
        return z * jax.nn.sigmoid(z)

    def conv3(z, wk):
        zp = jnp.pad(z, ((0, 0), (1, 1), (1, 1), (0, 0)))
        h, w = z.shape[1], z.shape[2]
        out = 0.0
        for dh in range(3):
            for dw in range(3):
                out = out + jnp.einsum('nhwc,cd->nhwd',
                                       zp[:, dh:dh + h, dw:dw + w, :],
                                       wk[dh, dw], precision=hi)
        return out

    x = jnp.transpose(x_nchw, (0, 2, 3, 1))
    res = jnp.einsum('nhwc,cd->nhwd', x, params['shortcut_w'], precision=hi)
    hid = conv3(silu(gn(x, params['norm1_g'], params['norm1_b'])), params['conv1_w'])
    hid = conv3(silu(gn(hid, params['norm2_g'], params['norm2_b'])), params['conv2_w'])
    return jnp.transpose(hid + res, (0, 3, 1, 2))


if __name__ == "__main__":
    key = jax.random.PRNGKey(0)
    pkey, xkey = jax.random.split(key)

    IN_CH, OUT_CH = 64, 32          # GroupNorm(32) requires channels % 32 == 0
    N, H, W = 2, 16, 16
    params = init_params(pkey, IN_CH, OUT_CH)
    x = jax.random.normal(xkey, (N, IN_CH, H, W), jnp.float32)   # NCHW like PyTorch

    fwd = jax.jit(unet_convolution_forward)
    out = jax.block_until_ready(fwd(x, params))
    assert out.shape == (N, OUT_CH, H, W), out.shape

    ref = jax.block_until_ready(_ref_forward(x, params))
    err = float(jnp.max(jnp.abs(out - ref)))
    assert err < 5e-4, f"max abs err vs reference: {err}"

    print("KERNEL_OK")
</pallas_src>

<mosaic_0001>
module attributes {stable_mosaic.version = 11 : i64} {
  func.func @_unet_conv_kernel(%arg0: i32, %arg1: memref<1x256x128xf32, #tpu.memory_space<vmem>>, %arg2: memref<128x128xf32, #tpu.memory_space<vmem>>, %arg3: memref<1x128xf32, #tpu.memory_space<vmem>>, %arg4: memref<1x128xf32, #tpu.memory_space<vmem>>, %arg5: memref<128x128xf32, #tpu.memory_space<vmem>>, %arg6: memref<9x128x128xf32, #tpu.memory_space<vmem>>, %arg7: memref<1x128xf32, #tpu.memory_space<vmem>>, %arg8: memref<1x128xf32, #tpu.memory_space<vmem>>, %arg9: memref<128x128xf32, #tpu.memory_space<vmem>>, %arg10: memref<9x128x128xf32, #tpu.memory_space<vmem>>, %arg11: memref<1x256x128xf32, #tpu.memory_space<vmem>>, %arg12: memref<288x128xf32, #tpu.memory_space<vmem>>) attributes {dimension_semantics = [#tpu.dimension_semantics<parallel>], iteration_bounds = array<i64: 2>, scalar_prefetch = 0 : i64, scratch_operands = 1 : i64, tpu.core_type = #tpu.core_type<tc>, window_params = [{transform_indices = @transform_0, window_bounds = array<i64: 1, 256, 128>}, {pipeline_mode = #tpu.pipeline_mode<synchronous>, transform_indices = @transform_1, window_bounds = array<i64: 128, 128>}, {pipeline_mode = #tpu.pipeline_mode<synchronous>, transform_indices = @transform_2, window_bounds = array<i64: 1, 128>}, {pipeline_mode = #tpu.pipeline_mode<synchronous>, transform_indices = @transform_3, window_bounds = array<i64: 1, 128>}, {pipeline_mode = #tpu.pipeline_mode<synchronous>, transform_indices = @transform_4, window_bounds = array<i64: 128, 128>}, {pipeline_mode = #tpu.pipeline_mode<synchronous>, transform_indices = @transform_5, window_bounds = array<i64: 9, 128, 128>}, {pipeline_mode = #tpu.pipeline_mode<synchronous>, transform_indices = @transform_6, window_bounds = array<i64: 1, 128>}, {pipeline_mode = #tpu.pipeline_mode<synchronous>, transform_indices = @transform_7, window_bounds = array<i64: 1, 128>}, {pipeline_mode = #tpu.pipeline_mode<synchronous>, transform_indices = @transform_8, window_bounds = array<i64: 128, 128>}, {pipeline_mode = #tpu.pipeline_mode<synchronous>, transform_indices = @transform_9, window_bounds = array<i64: 9, 128, 128>}, {transform_indices = @transform_10, window_bounds = array<i64: 1, 256, 128>}]} {
    %c0 = arith.constant 0 : index
    %c0_0 = arith.constant 0 : index
    %c0_1 = arith.constant 0 : index
    %0 = vector.load %arg1[%c0, %c0_0, %c0_1] : memref<1x256x128xf32, #tpu.memory_space<vmem>>, vector<1x256x128xf32>
    %1 = vector.shape_cast %0 : vector<1x256x128xf32> to vector<256x128xf32>
    %2 = tpu.iota {dimensions = array<i32: 0>} : vector<256x1xi32>
    %c16_i32 = arith.constant 16 : i32
    %c0_i32 = arith.constant 0 : i32
    %3 = arith.cmpi eq, %c16_i32, %c0_i32 : i32
    %c1_i32 = arith.constant 1 : i32
    %4 = arith.select %3, %c1_i32, %c16_i32 : i32
    %5 = vector.broadcast %4 : i32 to vector<256x1xi32>
    %6 = arith.remsi %2, %5 : vector<256x1xi32>
    %c0_i32_2 = arith.constant 0 : i32
    %7 = vector.broadcast %c0_i32_2 : i32 to vector<256x1xi32>
    %8 = arith.cmpi ne, %6, %7 : vector<256x1xi32>
    %c0_i32_3 = arith.constant 0 : i32
    %9 = vector.broadcast %c0_i32_3 : i32 to vector<256x1xi32>
    %10 = arith.cmpi slt, %6, %9 : vector<256x1xi32>
    %c0_i32_4 = arith.constant 0 : i32
    %11 = arith.cmpi slt, %4, %c0_i32_4 : i32
    %12 = vector.broadcast %11 : i1 to vector<256x1xi1>
    %13 = vector.broadcast %12 : vector<256x1xi1> to vector<256x1xi1>
    %14 = arith.xori %10, %13 : vector<256x1xi1>
    %15 = arith.andi %14, %8 : vector<256x1xi1>
    %16 = vector.broadcast %4 : i32 to vector<256x1xi32>
    %17 = arith.addi %6, %16 : vector<256x1xi32>
    %18 = arith.select %15, %17, %6 : vector<256x1xi1>, vector<256x1xi32>
    %c0_i32_5 = arith.constant 0 : i32
    %19 = vector.broadcast %c0_i32_5 : i32 to vector<256x1xi32>
    %20 = arith.cmpi eq, %18, %19 : vector<256x1xi32>
    %c15_i32 = arith.constant 15 : i32
    %21 = vector.broadcast %c15_i32 : i32 to vector<256x1xi32>
    %22 = arith.cmpi eq, %18, %21 : vector<256x1xi32>
    %cst = arith.constant 0.000000e+00 : f32
    %23 = vector.broadcast %cst : f32 to vector<16x128xf32>
    %c0_6 = arith.constant 0 : index
    %c0_7 = arith.constant 0 : index
    %24 = vector.load %arg12[%c0_6, %c0_7] : memref<288x128xf32, #tpu.memory_space<vmem>>, vector<16x128xf32>
    tpu.vector_store %arg12[%c0_6, %c0_7], %23 {strides = array<i32>} : memref<288x128xf32, #tpu.memory_space<vmem>>, vector<16x128xf32>,
    %c272 = arith.constant 272 : index
    %c0_8 = arith.constant 0 : index
    %25 = vector.load %arg12[%c272, %c0_8] : memref<288x128xf32, #tpu.memory_space<vmem>>, vector<16x128xf32>
    tpu.vector_store %arg12[%c272, %c0_8], %23 {strides = array<i32>} : memref<288x128xf32, #tpu.memory_space<vmem>>, vector<16x128xf32>,
    %cst_9 = arith.constant dense<0.000000e+00> : vector<128xf32>
    %26 = vector.multi_reduction <add>, %1, %cst_9 [0] : vector<256x128xf32> to vector<128xf32>
    %27 = vector.shape_cast %26 : vector<128xf32> to vector<1x128xf32>
    %c0_10 = arith.constant 0 : index
    %c0_11 = arith.constant 0 : index
    %28 = vector.load %arg5[%c0_10, %c0_11] : memref<128x128xf32, #tpu.memory_space<vmem>>, vector<128x128xf32>
    %cst_12 = arith.constant dense<0.000000e+00> : vector<1x128xf32>
    %29 = tpu.matmul %27, %28, %cst_12 {dimension_numbers = #tpu.dot_dimension_numbers<[1], [0], [0], [1], [0, 0, 1, 1], [], []>} : vector<1x128xf32>, vector<128x128xf32>, vector<1x128xf32> -> vector<1x128xf32>
    %30 = vector.broadcast %29 : vector<1x128xf32> to vector<256x128xf32>
    %31 = arith.subf %1, %30 : vector<256x128xf32>
    %32 = arith.mulf %31, %31 : vector<256x128xf32>
    %cst_13 = arith.constant dense<0.000000e+00> : vector<128xf32>
    %33 = vector.multi_reduction <add>, %32, %cst_13 [0] : vector<256x128xf32> to vector<128xf32>
    %34 = vector.shape_cast %33 : vector<128xf32> to vector<1x128xf32>
    %c0_14 = arith.constant 0 : index
    %c0_15 = arith.constant 0 : index
    %35 = vector.load %arg5[%c0_14, %c0_15] : memref<128x128xf32, #tpu.memory_space<vmem>>, vector<128x128xf32>
    %cst_16 = arith.constant dense<0.000000e+00> : vector<1x128xf32>
    %36 = tpu.matmul %34, %35, %cst_16 {dimension_numbers = #tpu.dot_dimension_numbers<[1], [0], [0], [1], [0, 0, 1, 1], [], []>} : vector<1x128xf32>, vector<128x128xf32>, vector<1x128xf32> -> vector<1x128xf32>
    %cst_17 = arith.constant 9.99999993E-9 : f32
    %37 = vector.broadcast %cst_17 : f32 to vector<1x128xf32>
    %38 = arith.addf %36, %37 : vector<1x128xf32>
    %39 = math.rsqrt %38 : vector<1x128xf32>
    %40 = vector.broadcast %39 : vector<1x128xf32> to vector<256x128xf32>
    %41 = arith.mulf %31, %40 : vector<256x128xf32>
    %c0_18 = arith.constant 0 : index
    %c0_19 = arith.constant 0 : index
    %42 = vector.load %arg3[%c0_18, %c0_19] : memref<1x128xf32, #tpu.memory_space<vmem>>, vector<1x128xf32>
    %43 = vector.broadcast %42 : vector<1x128xf32> to vector<256x128xf32>
    %44 = arith.mulf %41, %43 : vector<256x128xf32>
    %c0_20 = arith.constant 0 : index
    %c0_21 = arith.constant 0 : index
    %45 = vector.load %arg4[%c0_20, %c0_21] : memref<1x128xf32, #tpu.memory_space<vmem>>, vector<1x128xf32>
    %46 = vector.broadcast %45 : vector<1x128xf32> to vector<256x128xf32>
    %47 = arith.addf %44, %46 : vector<256x128xf32>
    %48 = arith.negf %47 : vector<256x128xf32>
    %49 = math.exp %48 : vector<256x128xf32>
    %cst_22 = arith.constant 1.000000e+00 : f32
    %50 = vector.broadcast %cst_22 : f32 to vector<256x128xf32>
    %51 = arith.addf %50, %49 : vector<256x128xf32>
    %52 = arith.divf %50, %51 : vector<256x128xf32>
    %53 = arith.mulf %47, %52 : vector<256x128xf32>
    %c16 = arith.constant 16 : index
    %c0_23 = arith.constant 0 : index
    %54 = vector.load %arg12[%c16, %c0_23] : memref<288x128xf32, #tpu.memory_space<vmem>>, vector<256x128xf32>
    tpu.vector_store %arg12[%c16, %c0_23], %53 {strides = array<i32>} : memref<288x128xf32, #tpu.memory_space<vmem>>, vector<256x128xf32>,
    %cst_24 = arith.constant 0.000000e+00 : f32
    %55 = vector.broadcast %cst_24 : f32 to vector<256x128xf32>
    %c0_25 = arith.constant 0 : index
    %c0_26 = arith.constant 0 : index
    %56 = vector.load %arg12[%c0_25, %c0_26] : memref<288x128xf32, #tpu.memory_space<vmem>>, vector<256x128xf32>
    %c1_i32_27 = arith.constant 1 : i32
    %57 = tpu.dynamic_rotate %56 by %c1_i32_27 dim 0 : vector<256x128xf32>, i32 -> vector<256x128xf32>
    %cst_28 = arith.constant 0.000000e+00 : f32
    %58 = vector.shape_cast %20 : vector<256x1xi1> to vector<256x1xi1>
    %59 = vector.broadcast %58 : vector<256x1xi1> to vector<256x128xi1>
    %60 = vector.broadcast %cst_28 : f32 to vector<256x128xf32>
    %61 = arith.select %59, %60, %57 : vector<256x128xi1>, vector<256x128xf32>
    %c255_i32 = arith.constant 255 : i32
    %62 = tpu.dynamic_rotate %56 by %c255_i32 dim 0 : vector<256x128xf32>, i32 -> vector<256x128xf32>
    %cst_29 = arith.constant 0.000000e+00 : f32
    %63 = vector.shape_cast %22 : vector<256x1xi1> to vector<256x1xi1>
    %64 = vector.broadcast %63 : vector<256x1xi1> to vector<256x128xi1>
    %65 = vector.broadcast %cst_29 : f32 to vector<256x128xf32>
    %66 = arith.select %64, %65, %62 : vector<256x128xi1>, vector<256x128xf32>
    %c0_30 = arith.constant 0 : index
    %c0_31 = arith.constant 0 : index
    %c0_32 = arith.constant 0 : index
    %67 = vector.load %arg6[%c0_30, %c0_31, %c0_32] : memref<9x128x128xf32, #tpu.memory_space<vmem>>, vector<1x128x128xf32>
    %68 = vector.shape_cast %67 : vector<1x128x128xf32> to vector<128x128xf32>
    %cst_33 = arith.constant dense<0.000000e+00> : vector<256x128xf32>
    %69 = tpu.matmul %61, %68, %cst_33 {dimension_numbers = #tpu.dot_dimension_numbers<[1], [0], [0], [1], [0, 0, 1, 1], [], []>} : vector<256x128xf32>, vector<128x128xf32>, vector<256x128xf32> -> vector<256x128xf32>
    %70 = arith.addf %55, %69 : vector<256x128xf32>
    %c1 = arith.constant 1 : index
    %c0_34 = arith.constant 0 : index
    %c0_35 = arith.constant 0 : index
    %71 = vector.load %arg6[%c1, %c0_34, %c0_35] : memref<9x128x128xf32, #tpu.memory_space<vmem>>, vector<1x128x128xf32>
    %72 = vector.shape_cast %71 : vector<1x128x128xf32> to vector<128x128xf32>
    %cst_36 = arith.constant dense<0.000000e+00> : vector<256x128xf32>
    %73 = tpu.matmul %56, %72, %cst_36 {dimension_numbers = #tpu.dot_dimension_numbers<[1], [0], [0], [1], [0, 0, 1, 1], [], []>} : vector<256x128xf32>, vector<128x128xf32>, vector<256x128xf32> -> vector<256x128xf32>
    %74 = arith.addf %70, %73 : vector<256x128xf32>
    %c2 = arith.constant 2 : index
    %c0_37 = arith.constant 0 : index
    %c0_38 = arith.constant 0 : index
    %75 = vector.load %arg6[%c2, %c0_37, %c0_38] : memref<9x128x128xf32, #tpu.memory_space<vmem>>, vector<1x128x128xf32>
    %76 = vector.shape_cast %75 : vector<1x128x128xf32> to vector<128x128xf32>
    %cst_39 = arith.constant dense<0.000000e+00> : vector<256x128xf32>
    %77 = tpu.matmul %66, %76, %cst_39 {dimension_numbers = #tpu.dot_dimension_numbers<[1], [0], [0], [1], [0, 0, 1, 1], [], []>} : vector<256x128xf32>, vector<128x128xf32>, vector<256x128xf32> -> vector<256x128xf32>
    %78 = arith.addf %74, %77 : vector<256x128xf32>
    %c16_40 = arith.constant 16 : index
    %c0_41 = arith.constant 0 : index
    %79 = vector.load %arg12[%c16_40, %c0_41] : memref<288x128xf32, #tpu.memory_space<vmem>>, vector<256x128xf32>
    %c1_i32_42 = arith.constant 1 : i32
    %80 = tpu.dynamic_rotate %79 by %c1_i32_42 dim 0 : vector<256x128xf32>, i32 -> vector<256x128xf32>
    %cst_43 = arith.constant 0.000000e+00 : f32
    %81 = vector.shape_cast %20 : vector<256x1xi1> to vector<256x1xi1>
    %82 = vector.broadcast %81 : vector<256x1xi1> to vector<256x128xi1>
    %83 = vector.broadcast %cst_43 : f32 to vector<256x128xf32>
    %84 = arith.select %82, %83, %80 : vector<256x128xi1>, vector<256x128xf32>
    %c255_i32_44 = arith.constant 255 : i32
    %85 = tpu.dynamic_rotate %79 by %c255_i32_44 dim 0 : vector<256x128xf32>, i32 -> vector<256x128xf32>
    %cst_45 = arith.constant 0.000000e+00 : f32
    %86 = vector.shape_cast %22 : vector<256x1xi1> to vector<256x1xi1>
    %87 = vector.broadcast %86 : vector<256x1xi1> to vector<256x128xi1>
    %88 = vector.broadcast %cst_45 : f32 to vector<256x128xf32>
    %89 = arith.select %87, %88, %85 : vector<256x128xi1>, vector<256x128xf32>
    %c3 = arith.constant 3 : index
    %c0_46 = arith.constant 0 : index
    %c0_47 = arith.constant 0 : index
    %90 = vector.load %arg6[%c3, %c0_46, %c0_47] : memref<9x128x128xf32, #tpu.memory_space<vmem>>, vector<1x128x128xf32>
    %91 = vector.shape_cast %90 : vector<1x128x128xf32> to vector<128x128xf32>
    %cst_48 = arith.constant dense<0.000000e+00> : vector<256x128xf32>
    %92 = tpu.matmul %84, %91, %cst_48 {dimension_numbers = #tpu.dot_dimension_numbers<[1], [0], [0], [1], [0, 0, 1, 1], [], []>} : vector<256x128xf32>, vector<128x128xf32>, vector<256x128xf32> -> vector<256x128xf32>
    %93 = arith.addf %78, %92 : vector<256x128xf32>
    %c4 = arith.constant 4 : index
    %c0_49 = arith.constant 0 : index
    %c0_50 = arith.constant 0 : index
    %94 = vector.load %arg6[%c4, %c0_49, %c0_50] : memref<9x128x128xf32, #tpu.memory_space<vmem>>, vector<1x128x128xf32>
    %95 = vector.shape_cast %94 : vector<1x128x128xf32> to vector<128x128xf32>
    %cst_51 = arith.constant dense<0.000000e+00> : vector<256x128xf32>
    %96 = tpu.matmul %79, %95, %cst_51 {dimension_numbers = #tpu.dot_dimension_numbers<[1], [0], [0], [1], [0, 0, 1, 1], [], []>} : vector<256x128xf32>, vector<128x128xf32>, vector<256x128xf32> -> vector<256x128xf32>
    %97 = arith.addf %93, %96 : vector<256x128xf32>
    %c5 = arith.constant 5 : index
    %c0_52 = arith.constant 0 : index
    %c0_53 = arith.constant 0 : index
    %98 = vector.load %arg6[%c5, %c0_52, %c0_53] : memref<9x128x128xf32, #tpu.memory_space<vmem>>, vector<1x128x128xf32>
    %99 = vector.shape_cast %98 : vector<1x128x128xf32> to vector<128x128xf32>
    %cst_54 = arith.constant dense<0.000000e+00> : vector<256x128xf32>
    %100 = tpu.matmul %89, %99, %cst_54 {dimension_numbers = #tpu.dot_dimension_numbers<[1], [0], [0], [1], [0, 0, 1, 1], [], []>} : vector<256x128xf32>, vector<128x128xf32>, vector<256x128xf32> -> vector<256x128xf32>
    %101 = arith.addf %97, %100 : vector<256x128xf32>
    %c32 = arith.constant 32 : index
    %c0_55 = arith.constant 0 : index
    %102 = vector.load %arg12[%c32, %c0_55] : memref<288x128xf32, #tpu.memory_space<vmem>>, vector<256x128xf32>
    %c1_i32_56 = arith.constant 1 : i32
    %103 = tpu.dynamic_rotate %102 by %c1_i32_56 dim 0 : vector<256x128xf32>, i32 -> vector<256x128xf32>
    %cst_57 = arith.constant 0.000000e+00 : f32
    %104 = vector.shape_cast %20 : vector<256x1xi1> to vector<256x1xi1>
    %105 = vector.broadcast %104 : vector<256x1xi1> to vector<256x128xi1>
    %106 = vector.broadcast %cst_57 : f32 to vector<256x128xf32>
    %107 = arith.select %105, %106, %103 : vector<256x128xi1>, vector<256x128xf32>
    %c255_i32_58 = arith.constant 255 : i32
    %108 = tpu.dynamic_rotate %102 by %c255_i32_58 dim 0 : vector<256x128xf32>, i32 -> vector<256x128xf32>
    %cst_59 = arith.constant 0.000000e+00 : f32
    %109 = vector.shape_cast %22 : vector<256x1xi1> to vector<256x1xi1>
    %110 = vector.broadcast %109 : vector<256x1xi1> to vector<256x128xi1>
    %111 = vector.broadcast %cst_59 : f32 to vector<256x128xf32>
    %112 = arith.select %110, %111, %108 : vector<256x128xi1>, vector<256x128xf32>
    %c6 = arith.constant 6 : index
    %c0_60 = arith.constant 0 : index
    %c0_61 = arith.constant 0 : index
    %113 = vector.load %arg6[%c6, %c0_60, %c0_61] : memref<9x128x128xf32, #tpu.memory_space<vmem>>, vector<1x128x128xf32>
    %114 = vector.shape_cast %113 : vector<1x128x128xf32> to vector<128x128xf32>
    %cst_62 = arith.constant dense<0.000000e+00> : vector<256x128xf32>
    %115 = tpu.matmul %107, %114, %cst_62 {dimension_numbers = #tpu.dot_dimension_numbers<[1], [0], [0], [1], [0, 0, 1, 1], [], []>} : vector<256x128xf32>, vector<128x128xf32>, vector<256x128xf32> -> vector<256x128xf32>
    %116 = arith.addf %101, %115 : vector<256x128xf32>
    %c7 = arith.constant 7 : index
    %c0_63 = arith.constant 0 : index
    %c0_64 = arith.constant 0 : index
    %117 = vector.load %arg6[%c7, %c0_63, %c0_64] : memref<9x128x128xf32, #tpu.memory_space<vmem>>, vector<1x128x128xf32>
    %118 = vector.shape_cast %117 : vector<1x128x128xf32> to vector<128x128xf32>
    %cst_65 = arith.constant dense<0.000000e+00> : vector<256x128xf32>
    %119 = tpu.matmul %102, %118, %cst_65 {dimension_numbers = #tpu.dot_dimension_numbers<[1], [0], [0], [1], [0, 0, 1, 1], [], []>} : vector<256x128xf32>, vector<128x128xf32>, vector<256x128xf32> -> vector<256x128xf32>
    %120 = arith.addf %116, %119 : vector<256x128xf32>
    %c8 = arith.constant 8 : index
    %c0_66 = arith.constant 0 : index
    %c0_67 = arith.constant 0 : index
    %121 = vector.load %arg6[%c8, %c0_66, %c0_67] : memref<9x128x128xf32, #tpu.memory_space<vmem>>, vector<1x128x128xf32>
    %122 = vector.shape_cast %121 : vector<1x128x128xf32> to vector<128x128xf32>
    %cst_68 = arith.constant dense<0.000000e+00> : vector<256x128xf32>
    %123 = tpu.matmul %112, %122, %cst_68 {dimension_numbers = #tpu.dot_dimension_numbers<[1], [0], [0], [1], [0, 0, 1, 1], [], []>} : vector<256x128xf32>, vector<128x128xf32>, vector<256x128xf32> -> vector<256x128xf32>
    %124 = arith.addf %120, %123 : vector<256x128xf32>
    %cst_69 = arith.constant dense<0.000000e+00> : vector<128xf32>
    %125 = vector.multi_reduction <add>, %124, %cst_69 [0] : vector<256x128xf32> to vector<128xf32>
    %126 = vector.shape_cast %125 : vector<128xf32> to vector<1x128xf32>
    %c0_70 = arith.constant 0 : index
    %c0_71 = arith.constant 0 : index
    %127 = vector.load %arg9[%c0_70, %c0_71] : memref<128x128xf32, #tpu.memory_space<vmem>>, vector<128x128xf32>
    %cst_72 = arith.constant dense<0.000000e+00> : vector<1x128xf32>
    %128 = tpu.matmul %126, %127, %cst_72 {dimension_numbers = #tpu.dot_dimension_numbers<[1], [0], [0], [1], [0, 0, 1, 1], [], []>} : vector<1x128xf32>, vector<128x128xf32>, vector<1x128xf32> -> vector<1x128xf32>
    %129 = vector.broadcast %128 : vector<1x128xf32> to vector<256x128xf32>
    %130 = arith.subf %124, %129 : vector<256x128xf32>
    %131 = arith.mulf %130, %130 : vector<256x128xf32>
    %cst_73 = arith.constant dense<0.000000e+00> : vector<128xf32>
    %132 = vector.multi_reduction <add>, %131, %cst_73 [0] : vector<256x128xf32> to vector<128xf32>
    %133 = vector.shape_cast %132 : vector<128xf32> to vector<1x128xf32>
    %c0_74 = arith.constant 0 : index
    %c0_75 = arith.constant 0 : index
    %134 = vector.load %arg9[%c0_74, %c0_75] : memref<128x128xf32, #tpu.memory_space<vmem>>, vector<128x128xf32>
    %cst_76 = arith.constant dense<0.000000e+00> : vector<1x128xf32>
    %135 = tpu.matmul %133, %134, %cst_76 {dimension_numbers = #tpu.dot_dimension_numbers<[1], [0], [0], [1], [0, 0, 1, 1], [], []>} : vector<1x128xf32>, vector<128x128xf32>, vector<1x128xf32> -> vector<1x128xf32>
    %cst_77 = arith.constant 9.99999993E-9 : f32
    %136 = vector.broadcast %cst_77 : f32 to vector<1x128xf32>
    %137 = arith.addf %135, %136 : vector<1x128xf32>
    %138 = math.rsqrt %137 : vector<1x128xf32>
    %139 = vector.broadcast %138 : vector<1x128xf32> to vector<256x128xf32>
    %140 = arith.mulf %130, %139 : vector<256x128xf32>
    %c0_78 = arith.constant 0 : index
    %c0_79 = arith.constant 0 : index
    %141 = vector.load %arg7[%c0_78, %c0_79] : memref<1x128xf32, #tpu.memory_space<vmem>>, vector<1x128xf32>
    %142 = vector.broadcast %141 : vector<1x128xf32> to vector<256x128xf32>
    %143 = arith.mulf %140, %142 : vector<256x128xf32>
    %c0_80 = arith.constant 0 : index
    %c0_81 = arith.constant 0 : index
    %144 = vector.load %arg8[%c0_80, %c0_81] : memref<1x128xf32, #tpu.memory_space<vmem>>, vector<1x128xf32>
    %145 = vector.broadcast %144 : vector<1x128xf32> to vector<256x128xf32>
    %146 = arith.addf %143, %145 : vector<256x128xf32>
    %147 = arith.negf %146 : vector<256x128xf32>
    %148 = math.exp %147 : vector<256x128xf32>
    %cst_82 = arith.constant 1.000000e+00 : f32
    %149 = vector.broadcast %cst_82 : f32 to vector<256x128xf32>
    %150 = arith.addf %149, %148 : vector<256x128xf32>
    %151 = arith.divf %149, %150 : vector<256x128xf32>
    %152 = arith.mulf %146, %151 : vector<256x128xf32>
    %c16_83 = arith.constant 16 : index
    %c0_84 = arith.constant 0 : index
    %153 = vector.load %arg12[%c16_83, %c0_84] : memref<288x128xf32, #tpu.memory_space<vmem>>, vector<256x128xf32>
    tpu.vector_store %arg12[%c16_83, %c0_84], %152 {strides = array<i32>} : memref<288x128xf32, #tpu.memory_space<vmem>>, vector<256x128xf32>,
    %cst_85 = arith.constant 0.000000e+00 : f32
    %154 = vector.broadcast %cst_85 : f32 to vector<256x128xf32>
    %c0_86 = arith.constant 0 : index
    %c0_87 = arith.constant 0 : index
    %155 = vector.load %arg12[%c0_86, %c0_87] : memref<288x128xf32, #tpu.memory_space<vmem>>, vector<256x128xf32>
    %c1_i32_88 = arith.constant 1 : i32
    %156 = tpu.dynamic_rotate %155 by %c1_i32_88 dim 0 : vector<256x128xf32>, i32 -> vector<256x128xf32>
    %cst_89 = arith.constant 0.000000e+00 : f32
    %157 = vector.shape_cast %20 : vector<256x1xi1> to vector<256x1xi1>
    %158 = vector.broadcast %157 : vector<256x1xi1> to vector<256x128xi1>
    %159 = vector.broadcast %cst_89 : f32 to vector<256x128xf32>
    %160 = arith.select %158, %159, %156 : vector<256x128xi1>, vector<256x128xf32>
    %c255_i32_90 = arith.constant 255 : i32
    %161 = tpu.dynamic_rotate %155 by %c255_i32_90 dim 0 : vector<256x128xf32>, i32 -> vector<256x128xf32>
    %cst_91 = arith.constant 0.000000e+00 : f32
    %162 = vector.shape_cast %22 : vector<256x1xi1> to vector<256x1xi1>
    %163 = vector.broadcast %162 : vector<256x1xi1> to vector<256x128xi1>
    %164 = vector.broadcast %cst_91 : f32 to vector<256x128xf32>
    %165 = arith.select %163, %164, %161 : vector<256x128xi1>, vector<256x128xf32>
    %c0_92 = arith.constant 0 : index
    %c0_93 = arith.constant 0 : index
    %c0_94 = arith.constant 0 : index
    %166 = vector.load %arg10[%c0_92, %c0_93, %c0_94] : memref<9x128x128xf32, #tpu.memory_space<vmem>>, vector<1x128x128xf32>
    %167 = vector.shape_cast %166 : vector<1x128x128xf32> to vector<128x128xf32>
    %cst_95 = arith.constant dense<0.000000e+00> : vector<256x128xf32>
    %168 = tpu.matmul %160, %167, %cst_95 {dimension_numbers = #tpu.dot_dimension_numbers<[1], [0], [0], [1], [0, 0, 1, 1], [], []>} : vector<256x128xf32>, vector<128x128xf32>, vector<256x128xf32> -> vector<256x128xf32>
    %169 = arith.addf %154, %168 : vector<256x128xf32>
    %c1_96 = arith.constant 1 : index
    %c0_97 = arith.constant 0 : index
    %c0_98 = arith.constant 0 : index
    %170 = vector.load %arg10[%c1_96, %c0_97, %c0_98] : memref<9x128x128xf32, #tpu.memory_space<vmem>>, vector<1x128x128xf32>
    %171 = vector.shape_cast %170 : vector<1x128x128xf32> to vector<128x128xf32>
    %cst_99 = arith.constant dense<0.000000e+00> : vector<256x128xf32>
    %172 = tpu.matmul %155, %171, %cst_99 {dimension_numbers = #tpu.dot_dimension_numbers<[1], [0], [0], [1], [0, 0, 1, 1], [], []>} : vector<256x128xf32>, vector<128x128xf32>, vector<256x128xf32> -> vector<256x128xf32>
    %173 = arith.addf %169, %172 : vector<256x128xf32>
    %c2_100 = arith.constant 2 : index
    %c0_101 = arith.constant 0 : index
    %c0_102 = arith.constant 0 : index
    %174 = vector.load %arg10[%c2_100, %c0_101, %c0_102] : memref<9x128x128xf32, #tpu.memory_space<vmem>>, vector<1x128x128xf32>
    %175 = vector.shape_cast %174 : vector<1x128x128xf32> to vector<128x128xf32>
    %cst_103 = arith.constant dense<0.000000e+00> : vector<256x128xf32>
    %176 = tpu.matmul %165, %175, %cst_103 {dimension_numbers = #tpu.dot_dimension_numbers<[1], [0], [0], [1], [0, 0, 1, 1], [], []>} : vector<256x128xf32>, vector<128x128xf32>, vector<256x128xf32> -> vector<256x128xf32>
    %177 = arith.addf %173, %176 : vector<256x128xf32>
    %c16_104 = arith.constant 16 : index
    %c0_105 = arith.constant 0 : index
    %178 = vector.load %arg12[%c16_104, %c0_105] : memref<288x128xf32, #tpu.memory_space<vmem>>, vector<256x128xf32>
    %c1_i32_106 = arith.constant 1 : i32
    %179 = tpu.dynamic_rotate %178 by %c1_i32_106 dim 0 : vector<256x128xf32>, i32 -> vector<256x128xf32>
    %cst_107 = arith.constant 0.000000e+00 : f32
    %180 = vector.shape_cast %20 : vector<256x1xi1> to vector<256x1xi1>
    %181 = vector.broadcast %180 : vector<256x1xi1> to vector<256x128xi1>
    %182 = vector.broadcast %cst_107 : f32 to vector<256x128xf32>
    %183 = arith.select %181, %182, %179 : vector<256x128xi1>, vector<256x128xf32>
    %c255_i32_108 = arith.constant 255 : i32
    %184 = tpu.dynamic_rotate %178 by %c255_i32_108 dim 0 : vector<256x128xf32>, i32 -> vector<256x128xf32>
    %cst_109 = arith.constant 0.000000e+00 : f32
    %185 = vector.shape_cast %22 : vector<256x1xi1> to vector<256x1xi1>
    %186 = vector.broadcast %185 : vector<256x1xi1> to vector<256x128xi1>
    %187 = vector.broadcast %cst_109 : f32 to vector<256x128xf32>
    %188 = arith.select %186, %187, %184 : vector<256x128xi1>, vector<256x128xf32>
    %c3_110 = arith.constant 3 : index
    %c0_111 = arith.constant 0 : index
    %c0_112 = arith.constant 0 : index
    %189 = vector.load %arg10[%c3_110, %c0_111, %c0_112] : memref<9x128x128xf32, #tpu.memory_space<vmem>>, vector<1x128x128xf32>
    %190 = vector.shape_cast %189 : vector<1x128x128xf32> to vector<128x128xf32>
    %cst_113 = arith.constant dense<0.000000e+00> : vector<256x128xf32>
    %191 = tpu.matmul %183, %190, %cst_113 {dimension_numbers = #tpu.dot_dimension_numbers<[1], [0], [0], [1], [0, 0, 1, 1], [], []>} : vector<256x128xf32>, vector<128x128xf32>, vector<256x128xf32> -> vector<256x128xf32>
    %192 = arith.addf %177, %191 : vector<256x128xf32>
    %c4_114 = arith.constant 4 : index
    %c0_115 = arith.constant 0 : index
    %c0_116 = arith.constant 0 : index
    %193 = vector.load %arg10[%c4_114, %c0_115, %c0_116] : memref<9x128x128xf32, #tpu.memory_space<vmem>>, vector<1x128x128xf32>
    %194 = vector.shape_cast %193 : vector<1x128x128xf32> to vector<128x128xf32>
    %cst_117 = arith.constant dense<0.000000e+00> : vector<256x128xf32>
    %195 = tpu.matmul %178, %194, %cst_117 {dimension_numbers = #tpu.dot_dimension_numbers<[1], [0], [0], [1], [0, 0, 1, 1], [], []>} : vector<256x128xf32>, vector<128x128xf32>, vector<256x128xf32> -> vector<256x128xf32>
    %196 = arith.addf %192, %195 : vector<256x128xf32>
    %c5_118 = arith.constant 5 : index
    %c0_119 = arith.constant 0 : index
    %c0_120 = arith.constant 0 : index
    %197 = vector.load %arg10[%c5_118, %c0_119, %c0_120] : memref<9x128x128xf32, #tpu.memory_space<vmem>>, vector<1x128x128xf32>
    %198 = vector.shape_cast %197 : vector<1x128x128xf32> to vector<128x128xf32>
    %cst_121 = arith.constant dense<0.000000e+00> : vector<256x128xf32>
    %199 = tpu.matmul %188, %198, %cst_121 {dimension_numbers = #tpu.dot_dimension_numbers<[1], [0], [0], [1], [0, 0, 1, 1], [], []>} : vector<256x128xf32>, vector<128x128xf32>, vector<256x128xf32> -> vector<256x128xf32>
    %200 = arith.addf %196, %199 : vector<256x128xf32>
    %c32_122 = arith.constant 32 : index
    %c0_123 = arith.constant 0 : index
    %201 = vector.load %arg12[%c32_122, %c0_123] : memref<288x128xf32, #tpu.memory_space<vmem>>, vector<256x128xf32>
    %c1_i32_124 = arith.constant 1 : i32
    %202 = tpu.dynamic_rotate %201 by %c1_i32_124 dim 0 : vector<256x128xf32>, i32 -> vector<256x128xf32>
    %cst_125 = arith.constant 0.000000e+00 : f32
    %203 = vector.shape_cast %20 : vector<256x1xi1> to vector<256x1xi1>
    %204 = vector.broadcast %203 : vector<256x1xi1> to vector<256x128xi1>
    %205 = vector.broadcast %cst_125 : f32 to vector<256x128xf32>
    %206 = arith.select %204, %205, %202 : vector<256x128xi1>, vector<256x128xf32>
    %c255_i32_126 = arith.constant 255 : i32
    %207 = tpu.dynamic_rotate %201 by %c255_i32_126 dim 0 : vector<256x128xf32>, i32 -> vector<256x128xf32>
    %cst_127 = arith.constant 0.000000e+00 : f32
    %208 = vector.shape_cast %22 : vector<256x1xi1> to vector<256x1xi1>
    %209 = vector.broadcast %208 : vector<256x1xi1> to vector<256x128xi1>
    %210 = vector.broadcast %cst_127 : f32 to vector<256x128xf32>
    %211 = arith.select %209, %210, %207 : vector<256x128xi1>, vector<256x128xf32>
    %c6_128 = arith.constant 6 : index
    %c0_129 = arith.constant 0 : index
    %c0_130 = arith.constant 0 : index
    %212 = vector.load %arg10[%c6_128, %c0_129, %c0_130] : memref<9x128x128xf32, #tpu.memory_space<vmem>>, vector<1x128x128xf32>
    %213 = vector.shape_cast %212 : vector<1x128x128xf32> to vector<128x128xf32>
    %cst_131 = arith.constant dense<0.000000e+00> : vector<256x128xf32>
    %214 = tpu.matmul %206, %213, %cst_131 {dimension_numbers = #tpu.dot_dimension_numbers<[1], [0], [0], [1], [0, 0, 1, 1], [], []>} : vector<256x128xf32>, vector<128x128xf32>, vector<256x128xf32> -> vector<256x128xf32>
    %215 = arith.addf %200, %214 : vector<256x128xf32>
    %c7_132 = arith.constant 7 : index
    %c0_133 = arith.constant 0 : index
    %c0_134 = arith.constant 0 : index
    %216 = vector.load %arg10[%c7_132, %c0_133, %c0_134] : memref<9x128x128xf32, #tpu.memory_space<vmem>>, vector<1x128x128xf32>
    %217 = vector.shape_cast %216 : vector<1x128x128xf32> to vector<128x128xf32>
    %cst_135 = arith.constant dense<0.000000e+00> : vector<256x128xf32>
    %218 = tpu.matmul %201, %217, %cst_135 {dimension_numbers = #tpu.dot_dimension_numbers<[1], [0], [0], [1], [0, 0, 1, 1], [], []>} : vector<256x128xf32>, vector<128x128xf32>, vector<256x128xf32> -> vector<256x128xf32>
    %219 = arith.addf %215, %218 : vector<256x128xf32>
    %c8_136 = arith.constant 8 : index
    %c0_137 = arith.constant 0 : index
    %c0_138 = arith.constant 0 : index
    %220 = vector.load %arg10[%c8_136, %c0_137, %c0_138] : memref<9x128x128xf32, #tpu.memory_space<vmem>>, vector<1x128x128xf32>
    %221 = vector.shape_cast %220 : vector<1x128x128xf32> to vector<128x128xf32>
    %cst_139 = arith.constant dense<0.000000e+00> : vector<256x128xf32>
    %222 = tpu.matmul %211, %221, %cst_139 {dimension_numbers = #tpu.dot_dimension_numbers<[1], [0], [0], [1], [0, 0, 1, 1], [], []>} : vector<256x128xf32>, vector<128x128xf32>, vector<256x128xf32> -> vector<256x128xf32>
    %223 = arith.addf %219, %222 : vector<256x128xf32>
    %c0_140 = arith.constant 0 : index
    %c0_141 = arith.constant 0 : index
    %224 = vector.load %arg2[%c0_140, %c0_141] : memref<128x128xf32, #tpu.memory_space<vmem>>, vector<128x128xf32>
    %cst_142 = arith.constant dense<0.000000e+00> : vector<256x128xf32>
    %225 = tpu.matmul %1, %224, %cst_142 {dimension_numbers = #tpu.dot_dimension_numbers<[1], [0], [0], [1], [0, 0, 1, 1], [], []>} : vector<256x128xf32>, vector<128x128xf32>, vector<256x128xf32> -> vector<256x128xf32>
    %226 = arith.addf %223, %225 : vector<256x128xf32>
    %c0_143 = arith.constant 0 : index
    %c0_144 = arith.constant 0 : index
    %c0_145 = arith.constant 0 : index
    %227 = vector.load %arg11[%c0_143, %c0_144, %c0_145] : memref<1x256x128xf32, #tpu.memory_space<vmem>>, vector<1x256x128xf32>
    %228 = vector.shape_cast %227 : vector<1x256x128xf32> to vector<256x128xf32>
    %229 = vector.shape_cast %226 : vector<256x128xf32> to vector<1x256x128xf32>
    tpu.vector_store %arg11[%c0_143, %c0_144, %c0_145], %229 {strides = array<i32>} : memref<1x256x128xf32, #tpu.memory_space<vmem>>, vector<1x256x128xf32>,
    return
  }
  func.func @transform_0(%arg0: i32) -> (i32, i32, i32) {
    %c0_i32 = arith.constant 0 : i32
    %c0_i32_0 = arith.constant 0 : i32
    %c0_i32_1 = arith.constant 0 : i32
    return %arg0, %c0_i32, %c0_i32_0 : i32, i32, i32
  }
  func.func @transform_1(%arg0: i32) -> (i32, i32) {
    %c0_i32 = arith.constant 0 : i32
    %c0_i32_0 = arith.constant 0 : i32
    %c0_i32_1 = arith.constant 0 : i32
    return %c0_i32, %c0_i32_0 : i32, i32
  }
  func.func @transform_2(%arg0: i32) -> (i32, i32) {
    %c0_i32 = arith.constant 0 : i32
    %c0_i32_0 = arith.constant 0 : i32
    %c0_i32_1 = arith.constant 0 : i32
    return %c0_i32, %c0_i32_0 : i32, i32
  }
  func.func @transform_3(%arg0: i32) -> (i32, i32) {
    %c0_i32 = arith.constant 0 : i32
    %c0_i32_0 = arith.constant 0 : i32
    %c0_i32_1 = arith.constant 0 : i32
    return %c0_i32, %c0_i32_0 : i32, i32
  }
  func.func @transform_4(%arg0: i32) -> (i32, i32) {
    %c0_i32 = arith.constant 0 : i32
    %c0_i32_0 = arith.constant 0 : i32
    %c0_i32_1 = arith.constant 0 : i32
    return %c0_i32, %c0_i32_0 : i32, i32
  }
  func.func @transform_5(%arg0: i32) -> (i32, i32, i32) {
    %c0_i32 = arith.constant 0 : i32
    %c0_i32_0 = arith.constant 0 : i32
    %c0_i32_1 = arith.constant 0 : i32
    %c0_i32_2 = arith.constant 0 : i32
    return %c0_i32, %c0_i32_0, %c0_i32_1 : i32, i32, i32
  }
  func.func @transform_6(%arg0: i32) -> (i32, i32) {
    %c0_i32 = arith.constant 0 : i32
    %c0_i32_0 = arith.constant 0 : i32
    %c0_i32_1 = arith.constant 0 : i32
    return %c0_i32, %c0_i32_0 : i32, i32
  }
  func.func @transform_7(%arg0: i32) -> (i32, i32) {
    %c0_i32 = arith.constant 0 : i32
    %c0_i32_0 = arith.constant 0 : i32
    %c0_i32_1 = arith.constant 0 : i32
    return %c0_i32, %c0_i32_0 : i32, i32
  }
  func.func @transform_8(%arg0: i32) -> (i32, i32) {
    %c0_i32 = arith.constant 0 : i32
    %c0_i32_0 = arith.constant 0 : i32
    %c0_i32_1 = arith.constant 0 : i32
    return %c0_i32, %c0_i32_0 : i32, i32
  }
  func.func @transform_9(%arg0: i32) -> (i32, i32, i32) {
    %c0_i32 = arith.constant 0 : i32
    %c0_i32_0 = arith.constant 0 : i32
    %c0_i32_1 = arith.constant 0 : i32
    %c0_i32_2 = arith.constant 0 : i32
    return %c0_i32, %c0_i32_0, %c0_i32_1 : i32, i32, i32
  }
  func.func @transform_10(%arg0: i32) -> (i32, i32, i32) {
    %c0_i32 = arith.constant 0 : i32
    %c0_i32_0 = arith.constant 0 : i32
    %c0_i32_1 = arith.constant 0 : i32
    return %arg0, %c0_i32, %c0_i32_0 : i32, i32, i32
  }
}

</mosaic_0001>

<bundles_post_ra>
// kernel: unet_convolution_forward.1
= control target key start
LH: loop header
LB: loop body
LE: loop exit
PB: predicated region body
PF: predicated region fallthrough
CT: control target
= control target key end

     0   :  { %s13863_s13 = smov 0   ;;  %s18268_s0 = inlined_call_operand.vmem [shape: f32[2,256,128], index: 0, kind: input, shape index: {}]   ;;  %s18269_s1 = inlined_call_operand.vmem [shape: f32[128,128], index: 1, kind: input, shape index: {}]   ;;  %s18270_s2 = inlined_call_operand.vmem [shape: f32[1,128], index: 2, kind: input, shape index: {}]   ;;  %s18271_s3 = inlined_call_operand.vmem [shape: f32[1,128], index: 3, kind: input, shape index: {}]   ;;  %s18272_s4 = inlined_call_operand.vmem [shape: f32[128,128], index: 4, kind: input, shape index: {}]   ;;  %s18273_s5 = inlined_call_operand.vmem [shape: f32[9,128,128], index: 5, kind: input, shape index: {}]   ;;  %s18274_s6 = inlined_call_operand.vmem [shape: f32[1,128], index: 6, kind: input, shape index: {}]   ;;  %s18275_s7 = inlined_call_operand.vmem [shape: f32[1,128], index: 7, kind: input, shape index: {}]   ;;  %s18276_s8 = inlined_call_operand.vmem [shape: f32[128,128], index: 8, kind: input, shape index: {}]   ;;  %s18277_s9 = inlined_call_operand.vmem [shape: f32[9,128,128], index: 9, kind: input, shape index: {}]   ;;  %s18278_s10 = inlined_call_operand.vmem [shape: f32[2,256,128], index: 10, kind: output, shape index: {}]  }
   0x1 LB: > { %s8851_s14 = sadd.s32 4294967295, %s13803_s13   ;;  %p8855_p0 = scmp.ge.s32.totalorder %s13803_s13, 1  ;;  %s13803_s13 = sphi %s13863_s13, %s20_s13  }
   0x2   : > { %p312_p1 = scmp.lt.s32.totalorder %s13803_s13, 3 }
   0x4   : > { %p313_p2 = pnand %p8855_p0, %p312_p1 }
   0x6   : > { %316 = sbr.rel (%p313_p2) target bundleno = 2829 (0xb0d), region = 60 }
   0xd   : > { %v914_v0 = vld [vmem:[%s18272_s4] sm:$0xff]  ;;  %v915_v1 = vld [vmem:[%s18272_s4 + $0x8] sm:$0xff]  ;;  %v916_v2 = vld [vmem:[%s18272_s4 + $0x10] sm:$0xff]  ;;  %v18279_v3 = vmov 0.0|0.0   ;;  %vm18326_vm0 = vmmov 0   ;;  %v18281_v6 = vmov 0.0  }
   0xe   : > { %12244 = vmatprep.subr.bf16.mxu0 %v18279_v3  ;;  %v12245_v4 = vpack.c.bf16 %v915_v1, %v914_v0  ;;  %v917_v5 = vld [vmem:[%s18272_s4 + $0x18] sm:$0xff]  ;;  %10616 = vmatprep.mubr.msk.f32.mxu0 %vm18326_vm0, %v18281_v6  ;;  %p350_p3 = scmp.lt.s32.totalorder %s8851_s14, 1  ;;  %v918_v8 = vld [vmem:[%s18272_s4 + $0x20] sm:$0xff]  ;;  %v919_v9 = vld [vmem:[%s18272_s4 + $0x28] sm:$0xff] }
   0xf   : > { %12268 = vmatprep.subr.bf16.mxu1 %v18279_v3  ;;  %10651 = vmatprep.mubr.msk.f32.mxu1 %vm18326_vm0, %v18281_v6  ;;  %v12248_v7 = vpack.c.bf16 %v917_v5, %v916_v2  ;;  %v12251_v10 = vpack.c.bf16 %v919_v9, %v918_v8  ;;  %v920_v14 = vld [vmem:[%s18272_s4 + $0x30] sm:$0xff]  ;;  %v921_v15 = vld [vmem:[%s18272_s4 + $0x38] sm:$0xff]  ;;  %v922_v21 = vld [vmem:[%s18272_s4 + $0x40] sm:$0xff] }
  0x10   : > { %12246 = vmatpush3.bf16.msra.mxu0 %v12245_v4  ;;  %s19398_s14 = smov (!%p350_p3, %s8851_s14), 1  ;;  %12270 = vmatpush3.bf16.msra.mxu1 %v12245_v4  ;;  %v12254_v19 = vpack.c.bf16 %v921_v15, %v920_v14  ;;  %v923_v22 = vld [vmem:[%s18272_s4 + $0x48] sm:$0xff]  ;;  %v924_v28 = vld [vmem:[%s18272_s4 + $0x50] sm:$0xff]  ;;  %v925_v29 = vld [vmem:[%s18272_s4 + $0x58] sm:$0xff] }
  0x11   : > { %12247 = vmatprep.subr.bf16.mxu0 %v18279_v3  ;;  %12271 = vmatprep.subr.bf16.mxu1 %v18279_v3  ;;  %s9570_s27 = sshll.u32 %s19398_s14, 8  ;;  %v12257_v26 = vpack.c.bf16 %v923_v22, %v922_v21  ;;  %v12260_v33 = vpack.c.bf16 %v925_v29, %v924_v28  ;;  %v926_v35 = vld [vmem:[%s18272_s4 + $0x60] sm:$0xff]  ;;  %v927_v36 = vld [vmem:[%s18272_s4 + $0x68] sm:$0xff]  ;;  %v928_v42 = vld [vmem:[%s18272_s4 + $0x70] sm:$0xff] }
  0x12   : > { %s13905_s30 = scalar_lea.vmem %s18268_s0, %s9570_s27  ;;  %v12263_v40 = vpack.c.bf16 %v927_v36, %v926_v35  ;;  %v929_v43 = vld [vmem:[%s18272_s4 + $0x78] sm:$0xff]  ;;  %s18199_s15 = scalar_lea.vmem %s18278_s10, %s9570_s27 }
  0x13   : > { %v13908_v11 = vld [vmem:[%s13905_s30] sm:$0xff]  ;;  %v13911_v12 = vld [vmem:[%s13905_s30 + $0x8] sm:$0xff]  ;;  %v13914_v13 = vld [vmem:[%s13905_s30 + $0x10] sm:$0xff]  ;;  %v12266_v47 = vpack.c.bf16 %v929_v43, %v928_v42 }
  0x14   : > { %12249 = vmatpush3.bf16.msra.mxu0 %v12248_v7  ;;  %12273 = vmatpush3.bf16.msra.mxu1 %v12248_v7  ;;  %v877_v16 = vadd.f32 %v13911_v12, %v13908_v11  ;;  %v13927_v17 = vld [vmem:[%s13905_s30 + $0x18] sm:$0xff]  ;;  %v13931_v20 = vld [vmem:[%s13905_s30 + $0x20] sm:$0xff]  ;;  %v13943_v24 = vld [vmem:[%s13905_s30 + $0x28] sm:$0xff] }
  0x15   : > { %12250 = vmatprep.subr.bf16.mxu0 %v18279_v3  ;;  %12274 = vmatprep.subr.bf16.mxu1 %v18279_v3  ;;  %v13947_v27 = vld [vmem:[%s13905_s30 + $0x30] sm:$0xff]  ;;  %v13959_v31 = vld [vmem:[%s13905_s30 + $0x38] sm:$0xff]  ;;  %v13963_v34 = vld [vmem:[%s13905_s30 + $0x40] sm:$0xff] }
  0x16   : > { %v878_v18 = vadd.f32 %v877_v16, %v13914_v13  ;;  %v13975_v38 = vld [vmem:[%s13905_s30 + $0x48] sm:$0xff]  ;;  %v13979_v41 = vld [vmem:[%s13905_s30 + $0x50] sm:$0xff]  ;;  %v13991_v45 = vld [vmem:[%s13905_s30 + $0x58] sm:$0xff] }
  0x17   : > { %v13995_v48 = vld [vmem:[%s13905_s30 + $0x60] sm:$0xff]  ;;  %v14001_v50 = vld [vmem:[%s13905_s30 + $0x68] sm:$0xff]  ;;  %v14005_v52 = vld [vmem:[%s13905_s30 + $0x70] sm:$0xff] }
  0x18   : > { %12252 = vmatpush3.bf16.msra.mxu0 %v12251_v10  ;;  %12276 = vmatpush3.bf16.msra.mxu1 %v12251_v10  ;;  %v879_v23 = vadd.f32 %v878_v18, %v13927_v17  ;;  %v14010_v54 = vld [vmem:[%s13905_s30 + $0x78] sm:$0xff]  ;;  %v14014_v56 = vld [vmem:[%s13905_s30 + $0x80] sm:$0xff]  ;;  %v14018_v58 = vld [vmem:[%s13905_s30 + $0x88] sm:$0xff] }
  0x19   : > { %12253 = vmatprep.subr.bf16.mxu0 %v18279_v3  ;;  %12277 = vmatprep.subr.bf16.mxu1 %v18279_v3  ;;  %v14022_v60 = vld [vmem:[%s13905_s30 + $0x90] sm:$0xff]  ;;  %v14026_v62 = vld [vmem:[%s13905_s30 + $0x98] sm:$0xff]  ;;  %v14030_v0 = vld [vmem:[%s13905_s30 + $0xa0] sm:$0xff] }
  0x1a   : > { %v880_v25 = vadd.f32 %v879_v23, %v13931_v20  ;;  %v14034_v2 = vld [vmem:[%s13905_s30 + $0xa8] sm:$0xff]  ;;  %v14038_v5 = vld [vmem:[%s13905_s30 + $0xb0] sm:$0xff]  ;;  %v14042_v8 = vld [vmem:[%s13905_s30 + $0xb8] sm:$0xff] }
  0x1b   : > { %v14046_v10 = vld [vmem:[%s13905_s30 + $0xc0] sm:$0xff]  ;;  %v14050_v15 = vld [vmem:[%s13905_s30 + $0xc8] sm:$0xff]  ;;  %v14054_v18 = vld [vmem:[%s13905_s30 + $0xd0] sm:$0xff] }
  0x1c   : > { %12255 = vmatpush3.bf16.msra.mxu0 %v12254_v19  ;;  %12279 = vmatpush3.bf16.msra.mxu1 %v12254_v19  ;;  %v881_v30 = vadd.f32 %v880_v25, %v13943_v24  ;;  %v14058_v21 = vld [vmem:[%s13905_s30 + $0xd8] sm:$0xff]  ;;  %v14062_v23 = vld [vmem:[%s13905_s30 + $0xe0] sm:$0xff]  ;;  %v14070_v29 = vld [vmem:[%s13905_s30 + $0xf0] sm:$0xff] }
  0x1d   : > { %12256 = vmatprep.subr.bf16.mxu0 %v18279_v3  ;;  %12280 = vmatprep.subr.bf16.mxu1 %v18279_v3 }
  0x1e   : > { %v882_v32 = vadd.f32 %v881_v30, %v13947_v27 }
  0x20   : > { %12258 = vmatpush3.bf16.msra.mxu0 %v12257_v26  ;;  %12282 = vmatpush3.bf16.msra.mxu1 %v12257_v26  ;;  %v883_v37 = vadd.f32 %v882_v32, %v13959_v31  ;;  %v14066_v26 = vld [vmem:[%s13905_s30 + $0xe8] sm:$0xff]  ;;  %v14074_v32 = vld [vmem:[%s13905_s30 + $0xf8] sm:$0xff] }
  0x21   : > { %12259 = vmatprep.subr.bf16.mxu0 %v18279_v3  ;;  %12283 = vmatprep.subr.bf16.mxu1 %v18279_v3 }
  0x22   : > { %v884_v39 = vadd.f32 %v883_v37, %v13963_v34 }
  0x24   : > { %12261 = vmatpush3.bf16.msra.mxu0 %v12260_v33  ;;  %12285 = vmatpush3.bf16.msra.mxu1 %v12260_v33  ;;  %v885_v44 = vadd.f32 %v884_v39, %v13975_v38 }
  0x25   : > { %12262 = vmatprep.subr.bf16.mxu0 %v18279_v3  ;;  %12286 = vmatprep.subr.bf16.mxu1 %v18279_v3 }
  0x26   : > { %v886_v46 = vadd.f32 %v885_v44, %v13979_v41  ;;  %v392_v44 = vlaneseq }
  0x28   : > { %12264 = vmatpush3.bf16.msra.mxu0 %v12263_v40  ;;  %12288 = vmatpush3.bf16.msra.mxu1 %v12263_v40  ;;  %v887_v49 = vadd.f32 %v886_v46, %v13991_v45  ;;  %v14079_v46 = vshrl.u32 %v392_v44, 7 }
  0x29   : > { %12265 = vmatprep.subr.bf16.mxu0 %v18279_v3  ;;  %12289 = vmatprep.subr.bf16.mxu1 %v18279_v3 }
  0x2a   : > { %v888_v51 = vadd.f32 %v887_v49, %v13995_v48  ;;  %vm18345_vm1 = vcmp.lt.s32.totalorder %v14079_v46, 1 }
  0x2c   : > { %12267 = vmatpush3.bf16.msra.mxu0 %v12266_v47  ;;  %12291 = vmatpush3.bf16.msra.mxu1 %v12266_v47  ;;  %v889_v53 = vadd.f32 %v888_v51, %v14001_v50  ;;  %v14082_v51 = vsub.s32 0, %v14079_v46 }
  0x2d   : > { %12580 = vmatprep.subr.bf16.mxu1 %v18279_v3  ;;  %v8952_v3 = vld [vmem:[%s18273_s5 + $0x150] sm:$0xff] }
  0x2e   : > { %v890_v55 = vadd.f32 %v889_v53, %v14005_v52  ;;  %18624 = vst [vmem:[#allocation3_spill] sm:$0xff] %v14082_v51 }
  0x30   : > { %v891_v57 = vadd.f32 %v890_v55, %v14010_v54 }
  0x32   : > { %v892_v59 = vadd.f32 %v891_v57, %v14014_v56 }
  0x34   : > { %v893_v61 = vadd.f32 %v892_v59, %v14018_v58 }
  0x36   : > { %v894_v63 = vadd.f32 %v893_v61, %v14022_v60 }
  0x38   : > { %v895_v1 = vadd.f32 %v894_v63, %v14026_v62 }
  0x3a   : > { %v896_v4 = vadd.f32 %v895_v1, %v14030_v0 }
  0x3c   : > { %v897_v7 = vadd.f32 %v896_v4, %v14034_v2 }
  0x3e   : > { %v898_v9 = vadd.f32 %v897_v7, %v14038_v5 }
  0x40   : > { %v899_v14 = vadd.f32 %v898_v9, %v14042_v8 }
  0x42   : > { %v900_v16 = vadd.f32 %v899_v14, %v14046_v10 }
  0x44   : > { %v901_v19 = vadd.f32 %v900_v16, %v14050_v15 }
  0x46   : > { %v902_v22 = vadd.f32 %v901_v19, %v14054_v18 }
  0x48   : > { %v903_v25 = vadd.f32 %v902_v22, %v14058_v21 }
  0x4a   : > { %v904_v28 = vadd.f32 %v903_v25, %v14062_v23 }
  0x4c   : > { %v905_v30 = vadd.f32 %v904_v28, %v14066_v26 }
  0x4e   : > { %v906_v33 = vadd.f32 %v905_v30, %v14070_v29 }
  0x50   : > { %v907_v35 = vadd.f32 %v906_v33, %v14074_v32 }
  0x52   : > { %v908_v36 = vrot.slane %v907_v35, 4 }
  0x54   : > { %v909_v37 = vadd.f32 %v908_v36, %v907_v35 }
  0x56   : > { %v910_v39 = vrot.slane %v909_v37, 2 }
  0x58   : > { %v911_v40 = vadd.f32 %v910_v39, %v909_v37 }
  0x5a   : > { %v912_v42 = vrot.slane %v911_v40, 1 }
  0x5c   : > { %v913_v43 = vadd.f32 %v912_v42, %v911_v40 }
  0x5e   : > { %10617 = vmatmul.mubr.f32.vlgmr.msra.gmra.mrb[0].mxu0 %v913_v43 }
  0x5f   : > { %10686 = vmatprep.mubr.f32.mxu0 %v18281_v6 }
 0x131   : > { %v996_v47 = vpop.f32.mrb[0].mxu0 }
 0x132   : > { %v10618_v49 = vpop.f32.mrb[1].mxu0  ;;  %v14085_v53 = vrot.slane %v996_v47, %v14082_v51 }
 0x134   : > { %v14089_v55 = vsub.f32 %v13908_v11, %v14085_v53  ;;  %v14093_v57 = vsub.f32 %v13911_v12, %v14085_v53  ;;  %v14097_v59 = vsub.f32 %v13914_v13, %v14085_v53  ;;  %v14105_v1 = vsub.f32 %v13927_v17, %v14085_v53 }
 0x135   : > { %v14109_v11 = vsub.f32 %v13931_v20, %v14085_v53  ;;  %v14115_v13 = vsub.f32 %v13943_v24, %v14085_v53  ;;  %v14121_v17 = vsub.f32 %v13947_v27, %v14085_v53  ;;  %v14127_v16 = vsub.f32 %v13959_v31, %v14085_v53 }
 0x136   : > { %v1036_v61 = vmul.f32 %v14089_v55, %v14089_v55  ;;  %v1037_v63 = vmul.f32 %v14093_v57, %v14093_v57  ;;  %v1038_v12 = vmul.f32 %v14097_v59, %v14097_v59  ;;  %v1039_v7 = vmul.f32 %v14105_v1, %v14105_v1 }
 0x137   : > { %v1040_v20 = vmul.f32 %v14109_v11, %v14109_v11  ;;  %v1041_v24 = vmul.f32 %v14115_v13, %v14115_v13  ;;  %v14133_v22 = vsub.f32 %v13963_v34, %v14085_v53  ;;  %v1042_v27 = vmul.f32 %v14121_v17, %v14121_v17 }
 0x138   : > { %v1068_v4 = vadd.f32 %v1037_v63, %v1036_v61  ;;  %v14139_v28 = vsub.f32 %v13975_v38, %v14085_v53  ;;  %v1043_v31 = vmul.f32 %v14127_v16, %v14127_v16  ;;  %v14145_v33 = vsub.f32 %v13979_v41, %v14085_v53 }
 0x139   : > { %v1044_v34 = vmul.f32 %v14133_v22, %v14133_v22  ;;  %v14151_v36 = vsub.f32 %v13991_v45, %v14085_v53  ;;  %v14157_v39 = vsub.f32 %v13995_v48, %v14085_v53  ;;  %v14163_v42 = vsub.f32 %v14001_v50, %v14085_v53 }
 0x13a   : > { %v1069_v9 = vadd.f32 %v1068_v4, %v1038_v12  ;;  %v1045_v38 = vmul.f32 %v14139_v28, %v14139_v28  ;;  %v1046_v41 = vmul.f32 %v14145_v33, %v14145_v33  ;;  %v14169_v44 = vsub.f32 %v14005_v52, %v14085_v53 }
 0x13b   : > { %v1047_v45 = vmul.f32 %v14151_v36, %v14151_v36  ;;  %v1048_v48 = vmul.f32 %v14157_v39, %v14157_v39  ;;  %v14175_v49 = vsub.f32 %v14010_v54, %v14085_v53  ;;  %v1049_v50 = vmul.f32 %v14163_v42, %v14163_v42 }
 0x13c   : > { %v1070_v14 = vadd.f32 %v1069_v9, %v1039_v7  ;;  %v14181_v63 = vsub.f32 %v14014_v56, %v14085_v53  ;;  %v1050_v52 = vmul.f32 %v14169_v44, %v14169_v44  ;;  %v14187_v4 = vsub.f32 %v14018_v58, %v14085_v53 }
 0x13d   : > { %v1051_v54 = vmul.f32 %v14175_v49, %v14175_v49  ;;  %v14193_v9 = vsub.f32 %v14022_v60, %v14085_v53 }
 0x13e   : > { %v1071_v19 = vadd.f32 %v1070_v14, %v1040_v20  ;;  %v1052_v56 = vmul.f32 %v14181_v63, %v14181_v63  ;;  %v14199_v14 = vsub.f32 %v14026_v62, %v14085_v53  ;;  %v1053_v58 = vmul.f32 %v14187_v4, %v14187_v4 }
 0x13f   : > { %v1054_v60 = vmul.f32 %v14193_v9, %v14193_v9 }
 0x140   : > { %v1072_v25 = vadd.f32 %v1071_v19, %v1041_v24  ;;  %v14205_v19 = vsub.f32 %v14030_v0, %v14085_v53  ;;  %v1055_v62 = vmul.f32 %v14199_v14, %v14199_v14 }
 0x142   : > { %v1073_v30 = vadd.f32 %v1072_v25, %v1042_v27  ;;  %v14211_v25 = vsub.f32 %v14034_v2, %v14085_v53  ;;  %v1056_v0 = vmul.f32 %v14205_v19, %v14205_v19 }
 0x144   : > { %v1074_v35 = vadd.f32 %v1073_v30, %v1043_v31  ;;  %v14217_v30 = vsub.f32 %v14038_v5, %v14085_v53  ;;  %v1057_v2 = vmul.f32 %v14211_v25, %v14211_v25 }
 0x146   : > { %v1075_v37 = vadd.f32 %v1074_v35, %v1044_v34  ;;  %v14223_v35 = vsub.f32 %v14042_v8, %v14085_v53  ;;  %v1058_v5 = vmul.f32 %v14217_v30, %v14217_v30 }
 0x148   : > { %v1076_v40 = vadd.f32 %v1075_v37, %v1045_v38  ;;  %v14229_v37 = vsub.f32 %v14046_v10, %v14085_v53  ;;  %v1059_v8 = vmul.f32 %v14223_v35, %v14223_v35 }
 0x14a   : > { %v1077_v43 = vadd.f32 %v1076_v40, %v1046_v41  ;;  %v14235_v40 = vsub.f32 %v14050_v15, %v14085_v53  ;;  %v1060_v10 = vmul.f32 %v14229_v37, %v14229_v37 }
 0x14c   : > { %v1078_v47 = vadd.f32 %v1077_v43, %v1047_v45  ;;  %v14241_v43 = vsub.f32 %v14054_v18, %v14085_v53  ;;  %v1061_v15 = vmul.f32 %v14235_v40, %v14235_v40 }
 0x14e   : > { %v1079_v61 = vadd.f32 %v1078_v47, %v1048_v48  ;;  %v14247_v47 = vsub.f32 %v14058_v21, %v14085_v53  ;;  %v1062_v18 = vmul.f32 %v14241_v43, %v14241_v43 }
 0x150   : > { %v1080_v12 = vadd.f32 %v1079_v61, %v1049_v50  ;;  %v14253_v61 = vsub.f32 %v14062_v23, %v14085_v53  ;;  %v1063_v21 = vmul.f32 %v14247_v47, %v14247_v47 }
 0x152   : > { %v1081_v7 = vadd.f32 %v1080_v12, %v1050_v52  ;;  %v14259_v12 = vsub.f32 %v14066_v26, %v14085_v53  ;;  %v1064_v23 = vmul.f32 %v14253_v61, %v14253_v61 }
 0x154   : > { %v1082_v20 = vadd.f32 %v1081_v7, %v1051_v54  ;;  %v14265_v7 = vsub.f32 %v14070_v29, %v14085_v53  ;;  %v1065_v26 = vmul.f32 %v14259_v12, %v14259_v12 }
 0x156   : > { %v1083_v24 = vadd.f32 %v1082_v20, %v1052_v56  ;;  %v14271_v20 = vsub.f32 %v14074_v32, %v14085_v53  ;;  %v8894_v53 = vld [vmem:[%s18273_s5 + $0x80] sm:$0xff] }
 0x158   : > { %v1084_v27 = vadd.f32 %v1083_v24, %v1053_v58  ;;  %v1066_v24 = vmul.f32 %v14265_v7, %v14265_v7  ;;  %v1067_v29 = vmul.f32 %v14271_v20, %v14271_v20 }
 0x15a   : > { %v1085_v31 = vadd.f32 %v1084_v27, %v1054_v60 }
 0x15c   : > { %v1086_v34 = vadd.f32 %v1085_v31, %v1055_v62 }
 0x15e   : > { %v1087_v38 = vadd.f32 %v1086_v34, %v1056_v0 }
 0x160   : > { %v1088_v41 = vadd.f32 %v1087_v38, %v1057_v2 }
 0x162   : > { %v1089_v45 = vadd.f32 %v1088_v41, %v1058_v5  ;;  %v8895_v5 = vld [vmem:[%s18273_s5 + $0x88] sm:$0xff] }
 0x163   : > { %v12292_v41 = vpack.c.bf16 %v8895_v5, %v8894_v53  ;;  %v1903_v53 = vld [vmem:[%s18273_s5 + $0x18] sm:$0xff] }
 0x164   : > { %v1090_v48 = vadd.f32 %v1089_v45, %v1059_v8  ;;  %v8896_v8 = vld [vmem:[%s18273_s5 + $0x90] sm:$0xff]  ;;  %v8897_v45 = vld [vmem:[%s18273_s5 + $0x98] sm:$0xff] }
 0x165   : > { %12293 = vmatprep.subr.bf16.mxu0 %v12292_v41 }
 0x166   : > { %v1091_v50 = vadd.f32 %v1090_v48, %v1060_v10  ;;  %12295 = vmatpush3.bf16.msra.mxu0 %v12292_v41  ;;  %v12296_v10 = vpack.c.bf16 %v8897_v45, %v8896_v8  ;;  %v8898_v48 = vld [vmem:[%s18273_s5 + $0xa0] sm:$0xff]  ;;  %v1905_v8 = vld [vmem:[%s18273_s5 + $0x28] sm:$0xff] }
 0x167   : > { %v1904_v41 = vld [vmem:[%s18273_s5 + $0x20] sm:$0xff] }
 0x168   : > { %v1092_v52 = vadd.f32 %v1091_v50, %v1061_v15  ;;  %v8899_v15 = vld [vmem:[%s18273_s5 + $0xa8] sm:$0xff]  ;;  %12297 = vmatprep.subr.bf16.mxu0 %v12296_v10  ;;  %v12332_v45 = vpack.c.bf16 %v1905_v8, %v1904_v41  ;;  %v14402_v8 = vld [vmem:[%s18271_s3] ss:$0 sm:$0xff] }
 0x169   : > { %v12300_v50 = vpack.c.bf16 %v8899_v15, %v8898_v48  ;;  %v1907_v48 = vld [vmem:[%s18273_s5 + $0x38] sm:$0xff] }
 0x16a   : > { %v1093_v54 = vadd.f32 %v1092_v52, %v1062_v18  ;;  %v8900_v18 = vld [vmem:[%s18273_s5 + $0xb0] sm:$0xff]  ;;  %v8901_v52 = vld [vmem:[%s18273_s5 + $0xb8] sm:$0xff]  ;;  %12299 = vmatpush3.bf16.msra.mxu0 %v12296_v10 }
 0x16b   : > { %12301 = vmatprep.subr.bf16.mxu0 %v12300_v50  ;;  %v1906_v10 = vld [vmem:[%s18273_s5 + $0x30] sm:$0xff] }
 0x16c   : > { %v1094_v56 = vadd.f32 %v1093_v54, %v1063_v21  ;;  %v12304_v21 = vpack.c.bf16 %v8901_v52, %v8900_v18  ;;  %v8902_v54 = vld [vmem:[%s18273_s5 + $0xc0] sm:$0xff]  ;;  %v12336_v15 = vpack.c.bf16 %v1907_v48, %v1906_v10  ;;  %v1909_v18 = vld [vmem:[%s18273_s5 + $0x48] sm:$0xff] }
 0x16e   : > { %v1095_v58 = vadd.f32 %v1094_v56, %v1064_v23  ;;  %v8903_v23 = vld [vmem:[%s18273_s5 + $0xc8] sm:$0xff]  ;;  %12303 = vmatpush3.bf16.msra.mxu0 %v12300_v50  ;;  %v1908_v50 = vld [vmem:[%s18273_s5 + $0x40] sm:$0xff] }
 0x16f   : > { %12305 = vmatprep.subr.bf16.mxu0 %v12304_v21  ;;  %v12308_v56 = vpack.c.bf16 %v8903_v23, %v8902_v54  ;;  %v12340_v52 = vpack.c.bf16 %v1909_v18, %v1908_v50  ;;  %v1911_v54 = vld [vmem:[%s18273_s5 + $0x58] sm:$0xff] }
 0x170   : > { %v1096_v60 = vadd.f32 %v1095_v58, %v1065_v26  ;;  %v8904_v26 = vld [vmem:[%s18273_s5 + $0xd0] sm:$0xff]  ;;  %v8905_v58 = vld [vmem:[%s18273_s5 + $0xd8] sm:$0xff] }
 0x172   : > { %v1097_v27 = vadd.f32 %v1096_v60, %v1066_v24  ;;  %12307 = vmatpush3.bf16.msra.mxu0 %v12304_v21  ;;  %v12312_v24 = vpack.c.bf16 %v8905_v58, %v8904_v26  ;;  %v8906_v60 = vld [vmem:[%s18273_s5 + $0xe0] sm:$0xff]  ;;  %v1910_v21 = vld [vmem:[%s18273_s5 + $0x50] sm:$0xff]  ;;  %v1913_v26 = vld [vmem:[%s18273_s5 + $0x68] sm:$0xff] }
 0x173   : > { %12309 = vmatprep.subr.bf16.mxu0 %v12308_v56  ;;  %v12344_v23 = vpack.c.bf16 %v1911_v54, %v1910_v21 }
 0x174   : > { %v1098_v62 = vadd.f32 %v1097_v27, %v1067_v29  ;;  %v8907_v29 = vld [vmem:[%s18273_s5 + $0xe8] sm:$0xff] }
 0x175   : > { %v12316_v27 = vpack.c.bf16 %v8907_v29, %v8906_v60  ;;  %v1915_v60 = vld [vmem:[%s18273_s5 + $0x78] sm:$0xff] }
 0x176   : > { %v1099_v31 = vrot.slane %v1098_v62, 4  ;;  %12311 = vmatpush3.bf16.msra.mxu0 %v12308_v56  ;;  %v1912_v56 = vld [vmem:[%s18273_s5 + $0x60] sm:$0xff] }
 0x177   : > { %12313 = vmatprep.subr.bf16.mxu0 %v12312_v24  ;;  %v12348_v58 = vpack.c.bf16 %v1913_v26, %v1912_v56 }
 0x178   : > { %v1100_v0 = vadd.f32 %v1099_v31, %v1098_v62  ;;  %v8908_v62 = vld [vmem:[%s18273_s5 + $0xf0] sm:$0xff]  ;;  %v8909_v31 = vld [vmem:[%s18273_s5 + $0xf8] sm:$0xff] }
 0x17a   : > { %v1101_v34 = vrot.slane %v1100_v0, 2  ;;  %12315 = vmatpush3.bf16.msra.mxu0 %v12312_v24  ;;  %v1914_v24 = vld [vmem:[%s18273_s5 + $0x70] sm:$0xff] }
 0x17b   : > { %12317 = vmatprep.subr.bf16.mxu0 %v12316_v27  ;;  %v12352_v29 = vpack.c.bf16 %v1915_v60, %v1914_v24 }
 0x17c   : > { %v1102_v2 = vadd.f32 %v1101_v34, %v1100_v0  ;;  %v12320_v0 = vpack.c.bf16 %v8909_v31, %v8908_v62  ;;  %v1900_v34 = vld [vmem:[%s18273_s5] sm:$0xff]  ;;  %v8943_v62 = vld [vmem:[%s18273_s5 + $0x108] sm:$0xff] }
 0x17e   : > { %v1103_v38 = vrot.slane %v1102_v2, 1  ;;  %12319 = vmatpush3.bf16.msra.mxu0 %v12316_v27  ;;  %v8942_v27 = vld [vmem:[%s18273_s5 + $0x100] sm:$0xff] }
 0x17f   : > { %12321 = vmatprep.subr.bf16.mxu0 %v12320_v0  ;;  %v14384_v31 = vpack.c.bf16 %v8943_v62, %v8942_v27 }
 0x180   : > { %v1104_v32 = vadd.f32 %v1103_v38, %v1102_v2  ;;  %v1901_v2 = vld [vmem:[%s18273_s5 + $0x8] sm:$0xff] }
 0x181   : > { %v12324_v38 = vpack.c.bf16 %v1901_v2, %v1900_v34 }
 0x182   : > { %10652 = vmatmul.mubr.f32.vlgmr.msra.gmra.mrb[0].mxu1 %v1104_v32  ;;  %12323 = vmatpush3.bf16.msra.mxu0 %v12320_v0  ;;  %v1902_v32 = vld [vmem:[%s18273_s5 + $0x10] sm:$0xff] }
 0x183   : > { %11406 = vmatprep.mubr.msk.f32.mxu1 %vm18326_vm0, %v18281_v6  ;;  %12325 = vmatprep.subr.bf16.mxu0 %v12324_v38  ;;  %v12328_v5 = vpack.c.bf16 %v1903_v53, %v1902_v32  ;;  %v14393_v53 = vld [vmem:[%s18270_s2] ss:$0 sm:$0xff] }
 0x185   : > { %10687 = vmatmul.mubr.f32.vlgmr.msra.gmra.mrb[2].mxu0 %v18281_v6 }
 0x186   : > { %12327 = vmatpush3.bf16.msra.mxu0 %v12324_v38 }
 0x187   : > { %12329 = vmatprep.subr.bf16.mxu0 %v12328_v5 }
 0x18a   : > { %12331 = vmatpush3.bf16.msra.mxu0 %v12328_v5 }
 0x18b   : > { %12333 = vmatprep.subr.bf16.mxu0 %v12332_v45 }
 0x18e   : > { %12335 = vmatpush3.bf16.msra.mxu0 %v12332_v45 }
 0x18f   : > { %12337 = vmatprep.subr.bf16.mxu0 %v12336_v15 }
 0x192   : > { %12339 = vmatpush3.bf16.msra.mxu0 %v12336_v15 }
 0x193   : > { %12341 = vmatprep.subr.bf16.mxu0 %v12340_v52 }
 0x196   : > { %12343 = vmatpush3.bf16.msra.mxu0 %v12340_v52 }
 0x197   : > { %12345 = vmatprep.subr.bf16.mxu0 %v12344_v23 }
 0x19a   : > { %12347 = vmatpush3.bf16.msra.mxu0 %v12344_v23 }
 0x19b   : > { %12349 = vmatprep.subr.bf16.mxu0 %v12348_v58 }
 0x19e   : > { %12351 = vmatpush3.bf16.msra.mxu0 %v12348_v58 }
 0x19f   : > { %12353 = vmatprep.subr.bf16.mxu0 %v12352_v29 }
 0x1a2   : > { %12355 = vmatpush3.bf16.msra.mxu0 %v12352_v29 }
 0x1a3   : > { %12357 = vmatprep.subr.bf16.mxu0 %v14384_v31 }
 0x255   : > { %v1171_v0 = vpop.f32.mrb[0].mxu1 }
 0x256   : > { %v1172_v34 = vadd.f32 1e-08, %v1171_v0  ;;  %v10653_v2 = vpop.f32.mrb[1].mxu1 }
 0x258   : > { %13503 = vrsqrt.f32 %v1172_v34 }
 0x262   : > { %v13504_v38 = vpop.eup %13503 }
 0x263   : > { %v14388_v32 = vrot.slane %v13504_v38, %v14082_v51 }
 0x265   : > { %v1180_v5 = vmul.f32 %v14388_v32, %v14089_v55  ;;  %v1181_v41 = vmul.f32 %v14388_v32, %v14093_v57  ;;  %v1182_v45 = vmul.f32 %v14388_v32, %v14097_v59  ;;  %v1183_v10 = vmul.f32 %v14388_v32, %v14105_v1 }
 0x266   : > { %v1184_v48 = vmul.f32 %v14388_v32, %v14109_v11  ;;  %v1185_v55 = vmul.f32 %v14388_v32, %v14115_v13  ;;  %v1186_v50 = vmul.f32 %v14388_v32, %v14121_v17  ;;  %v1187_v54 = vmul.f32 %v14388_v32, %v14127_v16 }
 0x267   : > { %v1219_v15 = vmul.f32 %v14393_v53, %v1180_v5  ;;  %v1220_v57 = vmul.f32 %v14393_v53, %v1181_v41  ;;  %v1221_v18 = vmul.f32 %v14393_v53, %v1182_v45  ;;  %v1222_v59 = vmul.f32 %v14393_v53, %v1183_v10 }
 0x268   : > { %v1223_v52 = vmul.f32 %v14393_v53, %v1184_v48  ;;  %v1224_v1 = vmul.f32 %v14393_v53, %v1185_v55  ;;  %v1225_v21 = vmul.f32 %v14393_v53, %v1186_v50  ;;  %v1226_v16 = vmul.f32 %v14393_v53, %v1187_v54 }
 0x269   : > { %v14421_v11 = vadd.f32 %v14402_v8, %v1219_v15  ;;  %v14424_v13 = vadd.f32 %v14402_v8, %v1220_v57  ;;  %v14430_v17 = vadd.f32 %v14402_v8, %v1221_v18  ;;  %v14433_v23 = vadd.f32 %v14402_v8, %v1222_v59 }
 0x26a   : > { %v14436_v56 = vadd.f32 %v14402_v8, %v1223_v52  ;;  %v14439_v26 = vadd.f32 %v14402_v8, %v1224_v1  ;;  %v14444_v60 = vadd.f32 %v14402_v8, %v1225_v21  ;;  %v1188_v0 = vmul.f32 %v14388_v32, %v14133_v22 }
 0x26b   : > { %v8862_v58 = vmul.f32 -1.442695, %v14421_v11  ;;  %v8863_v24 = vmul.f32 -1.442695, %v14424_v13  ;;  %v8864_v29 = vmul.f32 -1.442695, %v14430_v17  ;;  %v14455_v38 = vadd.f32 %v14402_v8, %v1226_v16 }
 0x26c   : > { %v8865_v27 = vmul.f32 -1.442695, %v14433_v23  ;;  %v8866_v62 = vmul.f32 -1.442695, %v14436_v56  ;;  %v8867_v34 = vmul.f32 -1.442695, %v14439_v26  ;;  %v1227_v5 = vmul.f32 %v14393_v53, %v1188_v0 }
 0x26d   : > { %13505 = vpow2.f32 %v8862_v58  ;;  %v8868_v2 = vmul.f32 -1.442695, %v14444_v60  ;;  %v1189_v41 = vmul.f32 %v14388_v32, %v14139_v28  ;;  %v1190_v45 = vmul.f32 %v14388_v32, %v14145_v33 }
 0x26e   : > { %13507 = vpow2.f32 %v8863_v24  ;;  %v8869_v22 = vmul.f32 -1.442695, %v14455_v38  ;;  %v1191_v10 = vmul.f32 %v14388_v32, %v14151_v36  ;;  %v1192_v48 = vmul.f32 %v14388_v32, %v14157_v39 }
 0x26f   : > { %13509 = vpow2.f32 %v8864_v29  ;;  %v14468_v55 = vadd.f32 %v14402_v8, %v1227_v5  ;;  %v1228_v15 = vmul.f32 %v14393_v53, %v1189_v41  ;;  %v1229_v28 = vmul.f32 %v14393_v53, %v1190_v45 }
 0x270   : > { %13511 = vpow2.f32 %v8865_v27  ;;  %v1230_v33 = vmul.f32 %v14393_v53, %v1191_v10  ;;  %v1231_v57 = vmul.f32 %v14393_v53, %v1192_v48  ;;  %v1193_v50 = vmul.f32 %v14388_v32, %v14163_v42 }
 0x271   : > { %13513 = vpow2.f32 %v8866_v62  ;;  %v8870_v36 = vmul.f32 -1.442695, %v14468_v55  ;;  %v14478_v39 = vadd.f32 %v14402_v8, %v1228_v15  ;;  %v14481_v18 = vadd.f32 %v14402_v8, %v1229_v28 }
 0x272   : > { %13515 = vpow2.f32 %v8867_v34  ;;  %v14484_v59 = vadd.f32 %v14402_v8, %v1230_v33  ;;  %v14487_v52 = vadd.f32 %v14402_v8, %v1231_v57  ;;  %v1232_v1 = vmul.f32 %v14393_v53, %v1193_v50 }
 0x273   : > { %13517 = vpow2.f32 %v8868_v2  ;;  %v8871_v42 = vmul.f32 -1.442695, %v14478_v39  ;;  %v8872_v21 = vmul.f32 -1.442695, %v14481_v18  ;;  %v1194_v54 = vmul.f32 %v14388_v32, %v14169_v44 }
 0x274   : > { %13519 = vpow2.f32 %v8869_v22  ;;  %v8873_v58 = vmul.f32 -1.442695, %v14484_v59  ;;  %v8874_v24 = vmul.f32 -1.442695, %v14487_v52  ;;  %v1195_v29 = vmul.f32 %v14388_v32, %v14175_v49 }
 0x275   : > { %13521 = vpow2.f32 %v8870_v36  ;;  %v1233_v16 = vmul.f32 %v14393_v53, %v1194_v54  ;;  %v1196_v27 = vmul.f32 %v14388_v32, %v14181_v63  ;;  %v14502_v0 = vadd.f32 %v14402_v8, %v1232_v1 }
 0x276   : > { %13523 = vpow2.f32 %v8871_v42  ;;  %v1197_v2 = vmul.f32 %v14388_v32, %v14187_v4  ;;  %v1234_v49 = vmul.f32 %v14393_v53, %v1195_v29  ;;  %v1198_v50 = vmul.f32 %v14388_v32, %v14193_v9 }
 0x277   : > { %v13506_v62 = vpop.eup %13505  ;;  %13525 = vpow2.f32 %v8872_v21  ;;  %v14507_v45 = vadd.f32 %v14402_v8, %v1233_v16  ;;  %v1235_v10 = vmul.f32 %v14393_v53, %v1196_v27  ;;  %v8875_v28 = vmul.f32 -1.442695, %v14502_v0 }
 0x278   : > { %v13508_v44 = vpop.eup %13507  ;;  %v1386_v34 = vadd.f32 1.0, %v13506_v62  ;;  %13527 = vpow2.f32 %v8873_v58  ;;  %v1236_v57 = vmul.f32 %v14393_v53, %v1197_v2  ;;  %v14517_v21 = vadd.f32 %v14402_v8, %v1234_v49 }
 0x279   : > { %v13510_v5 = vpop.eup %13509  ;;  %v1387_v41 = vadd.f32 1.0, %v13508_v44  ;;  %13529 = vpow2.f32 %v8874_v24  ;;  %v8876_v42 = vmul.f32 -1.442695, %v14507_v45  ;;  %v14520_v24 = vadd.f32 %v14402_v8, %v1235_v10 }
 0x27a   : > { %v13512_v63 = vpop.eup %13511  ;;  %13531 = vrcp.f32 %v1386_v34  ;;  %v1388_v22 = vadd.f32 1.0, %v13510_v5  ;;  %v1199_v16 = vmul.f32 %v14388_v32, %v14199_v14  ;;  %v1200_v27 = vmul.f32 %v14388_v32, %v14205_v19 }
 0x27b   : > { %v13514_v48 = vpop.eup %13513  ;;  %13533 = vrcp.f32 %v1387_v41  ;;  %v1389_v15 = vadd.f32 1.0, %v13512_v63  ;;  %v1201_v62 = vmul.f32 %v14388_v32, %v14211_v25  ;;  %v14529_v2 = vadd.f32 %v14402_v8, %v1236_v57 }
 0x27c   : > { %v13516_v33 = vpop.eup %13515  ;;  %13535 = vrcp.f32 %v1388_v22  ;;  %v1390_v4 = vadd.f32 1.0, %v13514_v48  ;;  %v1237_v5 = vmul.f32 %v14393_v53, %v1198_v50  ;;  %v8877_v49 = vmul.f32 -1.442695, %v14517_v21 }
 0x27d   : > { %v13518_v36 = vpop.eup %13517  ;;  %13537 = vrcp.f32 %v1389_v15  ;;  %v1391_v1 = vadd.f32 1.0, %v13516_v33  ;;  %v1238_v63 = vmul.f32 %v14393_v53, %v1199_v16  ;;  %v1239_v25 = vmul.f32 %v14393_v53, %v1200_v27 }
 0x27e   : > { %v13520_v54 = vpop.eup %13519  ;;  %13539 = vrcp.f32 %v1390_v4  ;;  %v1392_v58 = vadd.f32 1.0, %v13518_v36  ;;  %v1202_v10 = vmul.f32 %v14388_v32, %v14217_v30  ;;  %v8878_v33 = vmul.f32 -1.442695, %v14520_v24 }
 0x27f   : > { %v13522_v29 = vpop.eup %13521  ;;  %13541 = vrcp.f32 %v1391_v1  ;;  %v1393_v9 = vadd.f32 1.0, %v13520_v54  ;;  %v1240_v4 = vmul.f32 %v14393_v53, %v1201_v62  ;;  %v14540_v36 = vadd.f32 %v14402_v8, %v1237_v5 }
 0x280   : > { %v13524_v44 = vpop.eup %13523  ;;  %13543 = vrcp.f32 %v1392_v58  ;;  %v1394_v34 = vadd.f32 1.0, %v13522_v29  ;;  %v1241_v1 = vmul.f32 %v14393_v53, %v1202_v10  ;;  %v8879_v30 = vmul.f32 -1.442695, %v14529_v2 }
 0x281   : > { %v13526_v41 = vpop.eup %13525  ;;  %13545 = vrcp.f32 %v1393_v9  ;;  %v1395_v14 = vadd.f32 1.0, %v13524_v44  ;;  %v14548_v16 = vadd.f32 %v14402_v8, %v1238_v63  ;;  %v14554_v27 = vadd.f32 %v14402_v8, %v1239_v25 }
 0x282   : > { %v13528_v22 = vpop.eup %13527  ;;  %13547 = vrcp.f32 %v1394_v34  ;;  %v1396_v19 = vadd.f32 1.0, %v13526_v41  ;;  %v1203_v62 = vmul.f32 %v14388_v32, %v14223_v35  ;;  %v14563_v34 = vadd.f32 %v14402_v8, %v1240_v4 }
 0x283   : > { %v13530_v48 = vpop.eup %13529  ;;  %13549 = vrcp.f32 %v1395_v14  ;;  %v1397_v15 = vadd.f32 1.0, %v13528_v22  ;;  %v8880_v41 = vmul.f32 -1.442695, %v14540_v36  ;;  %v14570_v35 = vadd.f32 %v14402_v8, %v1241_v1 }
 0x284   : > { %v13532_v57 = vpop.eup %13531  ;;  %13551 = vrcp.f32 %v1396_v19  ;;  %v1398_v50 = vadd.f32 1.0, %v13530_v48  ;;  %v1242_v14 = vmul.f32 %v14393_v53, %v1203_v62  ;;  %v8882_v19 = vmul.f32 -1.442695, %v14554_v27 }
 0x285   : > { %v13534_v54 = vpop.eup %13533  ;;  %v14544_v58 = vmul.f32 %v13532_v57, %v14421_v11  ;;  %13553 = vrcp.f32 %v1397_v15  ;;  %v8883_v48 = vmul.f32 -1.442695, %v14563_v34 }
 0x286   : > { %v13536_v29 = vpop.eup %13535  ;;  %v14551_v9 = vmul.f32 %v13534_v54, %v14424_v13  ;;  %13555 = vrcp.f32 %v1398_v50  ;;  %v1204_v13 = vmul.f32 %v14388_v32, %v14229_v37  ;;  %v1205_v37 = vmul.f32 %v14388_v32, %v14235_v40 }
 0x287   : > { %18625 = vst [vmem:[#allocation4_spill] sm:$0xff] %v14544_v58  ;;  %v13538_v44 = vpop.eup %13537  ;;  %10689 = vmatprep.mubr.f32.mxu0 %v14544_v58  ;;  %v14560_v11 = vmul.f32 %v13536_v29, %v14430_v17  ;;  %13557 = vpow2.f32 %v8875_v28  ;;  %v8881_v28 = vmul.f32 -1.442695, %v14548_v16  ;;  %v14583_v25 = vadd.f32 %v14402_v8, %v1242_v14 }
 0x288   : > { %18626 = vst [vmem:[#allocation5_spill] sm:$0xff] %v14551_v9  ;;  %v13540_v5 = vpop.eup %13539  ;;  %10690 = vmatmul.mubr.f32.gmra.mrb[4].mxu0 %v14551_v9  ;;  %13559 = vpow2.f32 %v8876_v42  ;;  %v1243_v63 = vmul.f32 %v14393_v53, %v1204_v13  ;;  %v14579_v42 = vmul.f32 %v13538_v44, %v14433_v23  ;;  %v8884_v23 = vmul.f32 -1.442695, %v14570_v35 }
 0x289   : > { %18627 = vst [vmem:[#allocation6_spill] sm:$0xff] %v14560_v11  ;;  %v13542_v17 = vpop.eup %13541  ;;  %10692 = vmatprep.mubr.f32.mxu0 %v14560_v11  ;;  %13561 = vpow2.f32 %v8877_v49  ;;  %v14586_v49 = vmul.f32 %v13540_v5, %v14436_v56  ;;  %v1244_v4 = vmul.f32 %v14393_v53, %v1205_v37  ;;  %v8885_v50 = vmul.f32 -1.442695, %v14583_v25 }
 0x28a   : > { %v13544_v22 = vpop.eup %13543  ;;  %13563 = vpow2.f32 %v8878_v33  ;;  %v14590_v15 = vadd.f32 %v14402_v8, %v1243_v63  ;;  %v14597_v57 = vmul.f32 %v13542_v17, %v14439_v26  ;;  %v1206_v44 = vmul.f32 %v14388_v32, %v14241_v43 }
 0x28b   : > { %v13546_v10 = vpop.eup %13545  ;;  %13565 = vpow2.f32 %v8879_v30  ;;  %v14601_v54 = vmul.f32 %v13544_v22, %v14444_v60  ;;  %v14607_v26 = vadd.f32 %v14402_v8, %v1244_v4  ;;  %v1208_v63 = vmul.f32 %v14388_v32, %v14253_v61 }
 0x28c   : > { %v13548_v40 = vpop.eup %13547  ;;  %10693 = vmatmul.mubr.f32.gmra.mrb[6].mxu0 %v14579_v42  ;;  %13567 = vpow2.f32 %v8880_v41  ;;  %18628 = vst [vmem:[#allocation7_spill] sm:$0xff] %v14597_v57  ;;  %v8886_v30 = vmul.f32 -1.442695, %v14590_v15  ;;  %v14612_v60 = vmul.f32 %v13546_v10, %v14455_v38  ;;  %v1207_v41 = vmul.f32 %v14388_v32, %v14247_v47 }
 0x28d   : > { %v13550_v33 = vpop.eup %13549  ;;  %10695 = vmatprep.mubr.f32.mxu0 %v14586_v49  ;;  %13569 = vpow2.f32 %v8881_v28  ;;  %v14617_v17 = vmul.f32 %v13548_v40, %v14468_v55  ;;  %v1209_v38 = vmul.f32 %v14388_v32, %v14259_v12  ;;  %v8887_v55 = vmul.f32 -1.442695, %v14607_v26 }
 0x28e   : > { %v13552_v56 = vpop.eup %13551  ;;  %13571 = vpow2.f32 %v8882_v19  ;;  %18629 = vst [vmem:[#allocation8_spill] sm:$0xff] %v14612_v60  ;;  %v1245_v19 = vmul.f32 %v14393_v53, %v1206_v44  ;;  %v14628_v61 = vmul.f32 %v13550_v33, %v14478_v39  ;;  %v1246_v40 = vmul.f32 %v14393_v53, %v1207_v41 }
 0x28f   : > { %v13554_v1 = vpop.eup %13553  ;;  %13573 = vpow2.f32 %v8883_v48  ;;  %18630 = vst [vmem:[#allocation9_spill] sm:$0xff] %v14617_v17  ;;  %v14632_v12 = vmul.f32 %v13552_v56, %v14481_v18 }
 0x290   : > { %v13556_v29 = vpop.eup %13555  ;;  %10696 = vmatmul.mubr.f32.gmra.mrb[8].mxu0 %v14597_v57  ;;  %13575 = vpow2.f32 %v8884_v23  ;;  %18631 = vst [vmem:[#allocation10_spill] sm:$0xff] %v14628_v61  ;;  %v14639_v33 = vadd.f32 %v14402_v8, %v1245_v19  ;;  %v14642_v18 = vmul.f32 %v13554_v1, %v14484_v59  ;;  %v1589_v51 = vrot.slane %v14628_v61, 7 }
 0x291   : > { %v13558_v62 = vpop.eup %13557  ;;  %10698 = vmatprep.mubr.f32.mxu0 %v14601_v54  ;;  %13577 = vpow2.f32 %v8885_v50  ;;  %18632 = vst [vmem:[#allocation11_spill] sm:$0xff] %v14632_v12  ;;  %v1247_v50 = vmul.f32 %v14393_v53, %v1208_v63  ;;  %v14648_v41 = vmul.f32 %v13556_v29, %v14487_v52 }
 0x292   : > { %v13560_v13 = vpop.eup %13559  ;;  %v1399_v5 = vadd.f32 1.0, %v13558_v62  ;;  %13579 = vpow2.f32 %v8886_v30  ;;  %v1248_v62 = vmul.f32 %v14393_v53, %v1209_v38 }
 0x293   : > { %v13562_v14 = vpop.eup %13561  ;;  %v1400_v28 = vadd.f32 1.0, %v13560_v13  ;;  %18633 = vst [vmem:[#allocation12_spill] sm:$0xff] %v14648_v41 }
 0x294   : > { %v13564_v37 = vpop.eup %13563  ;;  %10699 = vmatmul.mubr.f32.gmra.mrb[10].mxu0 %v14612_v60  ;;  %13581 = vrcp.f32 %v1399_v5  ;;  %v1401_v43 = vadd.f32 1.0, %v13562_v14  ;;  %v14645_v5 = vadd.f32 %v14402_v8, %v1246_v40  ;;  %v14651_v14 = vadd.f32 %v14402_v8, %v1247_v50 }
 0x295   : > { %v13566_v22 = vpop.eup %13565  ;;  %10701 = vmatprep.mubr.f32.mxu0 %v14617_v17  ;;  %13583 = vrcp.f32 %v1400_v28  ;;  %v1402_v47 = vadd.f32 1.0, %v13564_v37  ;;  %v14655_v59 = vadd.f32 %v14402_v8, %v1248_v62  ;;  %v8888_v37 = vmul.f32 -1.442695, %v14639_v33 }
 0x296   : > { %v13568_v10 = vpop.eup %13567  ;;  %13585 = vrcp.f32 %v1401_v43  ;;  %v1403_v48 = vadd.f32 1.0, %v13566_v22  ;;  %v8889_v29 = vmul.f32 -1.442695, %v14645_v5  ;;  %v8890_v22 = vmul.f32 -1.442695, %v14651_v14 }
 0x297   : > { %v13570_v23 = vpop.eup %13569  ;;  %13587 = vrcp.f32 %v1402_v47  ;;  %v1404_v4 = vadd.f32 1.0, %v13568_v10 }
 0x298   : > { %v13572_v30 = vpop.eup %13571  ;;  %10702 = vmatmul.mubr.f32.gmra.mrb[12].mxu0 %v14628_v61  ;;  %v1405_v39 = vadd.f32 1.0, %v13570_v23  ;;  %13589 = vpow2.f32 %v8887_v55  ;;  %v8891_v55 = vmul.f32 -1.442695, %v14655_v59 }
 0x299   : > { %v13574_v44 = vpop.eup %13573  ;;  %10704 = vmatprep.mubr.f32.mxu0 %v14632_v12  ;;  %13591 = vrcp.f32 %v1403_v48  ;;  %v1406_v56 = vadd.f32 1.0, %v13572_v30 }
 0x29a   : > { %v13576_v13 = vpop.eup %13575  ;;  %13593 = vrcp.f32 %v1404_v4  ;;  %v1407_v53 = vadd.f32 1.0, %v13574_v44 }
 0x29b   : > { %v13578_v28 = vpop.eup %13577  ;;  %v1408_v63 = vadd.f32 1.0, %v13576_v13  ;;  %13595 = vrcp.f32 %v1405_v39 }
 0x29c   : > { %10705 = vmatmul.mubr.f32.gmra.mrb[14].mxu0 %v14642_v18  ;;  %v13580_v1 = vpop.eup %13579  ;;  %13597 = vrcp.f32 %v1406_v56  ;;  %v1409_v10 = vadd.f32 1.0, %v13578_v28 }
 0x29d   : > { %10707 = vmatprep.mubr.f32.mxu0 %v14648_v41  ;;  %13599 = vrcp.f32 %v1407_v53  ;;  %v1410_v40 = vadd.f32 1.0, %v13580_v1 }
 0x29e   : > { %v13582_v52 = vpop.eup %13581  ;;  %13601 = vrcp.f32 %v1408_v63 }
 0x29f   : > { %v13584_v43 = vpop.eup %13583  ;;  %v14661_v38 = vmul.f32 %v13582_v52, %v14502_v0  ;;  %13603 = vpow2.f32 %v8888_v37 }
 0x2a0   : > { %v13586_v47 = vpop.eup %13585  ;;  %v14665_v8 = vmul.f32 %v13584_v43, %v14507_v45  ;;  %13605 = vpow2.f32 %v8889_v29 }
 0x2a1   : > { %v13588_v19 = vpop.eup %13587  ;;  %10708 = vmatmul.mubr.f32.gmra.mrb[16].mxu0 %v14661_v38  ;;  %v14671_v48 = vmul.f32 %v13586_v47, %v14517_v21  ;;  %13607 = vpow2.f32 %v8890_v22 }
 0x2a2   : > { %10710 = vmatprep.mubr.f32.mxu0 %v14665_v8  ;;  %v13590_v0 = vpop.eup %13589  ;;  %v14674_v45 = vmul.f32 %v13588_v19, %v14520_v24  ;;  %13609 = vpow2.f32 %v8891_v55 }
 0x2a3   : > { %v13592_v23 = vpop.eup %13591  ;;  %13611 = vrcp.f32 %v1409_v10  ;;  %v1411_v50 = vadd.f32 1.0, %v13590_v0 }
 0x2a4   : > { %v13594_v4 = vpop.eup %13593  ;;  %v14679_v62 = vmul.f32 %v13592_v23, %v14529_v2  ;;  %13613 = vrcp.f32 %v1410_v40  ;;  %v429_v40 = vand.u32 15, %v14079_v46  ;;  %v395_v23 = vadd.s32 16, %v14079_v46 }
 0x2a5   : > { %10711 = vmatmul.mubr.f32.gmra.mrb[18].mxu0 %v14671_v48  ;;  %v13596_v30 = vpop.eup %13595  ;;  %v14682_v44 = vmul.f32 %v13594_v4, %v14540_v36  ;;  %13615 = vrcp.f32 %v1411_v50  ;;  %v9510_v50 = vld [vmem:[%s18277_s9 + $0x3b0] sm:$0xff] }
 0x2a6   : > { %10713 = vmatprep.mubr.f32.mxu0 %v14674_v45  ;;  %v13598_v21 = vpop.eup %13597  ;;  %v14687_v56 = vmul.f32 %v13596_v30, %v14548_v16  ;;  %vm14738_vm2 = vcmp.ne.s32.totalorder %v429_v40, 0  ;;  %v8944_v30 = vld [vmem:[%s18273_s5 + $0x110] sm:$0xff]  ;;  %v8949_v40 = vld [vmem:[%s18273_s5 + $0x138] sm:$0xff] }
 0x2a7   : > { %v13600_v39 = vpop.eup %13599  ;;  %v14690_v2 = vmul.f32 %v13598_v21, %v14554_v27  ;;  %v8945_v21 = vld [vmem:[%s18273_s5 + $0x118] sm:$0xff] }
 0x2a8   : > { %v13602_v24 = vpop.eup %13601  ;;  %v14695_v52 = vmul.f32 %v13600_v39, %v14563_v34 }
 0x2a9   : > { %10714 = vmatmul.mubr.f32.gmra.mrb[20].mxu0 %v14679_v62  ;;  %v13604_v13 = vpop.eup %13603  ;;  %v14698_v43 = vmul.f32 %v13602_v24, %v14570_v35  ;;  %v14755_v24 = vrot.slane %v14544_v58, 7 }
 0x2aa   : > { %10716 = vmatprep.mubr.f32.mxu0 %v14682_v44  ;;  %v13606_v53 = vpop.eup %13605  ;;  %v1412_v28 = vadd.f32 1.0, %v13604_v13 }
 0x2ab   : > { %v13608_v63 = vpop.eup %13607  ;;  %v1413_v36 = vadd.f32 1.0, %v13606_v53 }
 0x2ac   : > { %v13610_v1 = vpop.eup %13609  ;;  %13617 = vrcp.f32 %v1412_v28  ;;  %v1414_v37 = vadd.f32 1.0, %v13608_v63  ;;  %v12360_v28 = vpack.c.bf16 %v8945_v21, %v8944_v30  ;;  %v399_v63 = vadd.s32 48, %v14079_v46 }
 0x2ad   : > { %10717 = vmatmul.mubr.f32.gmra.mrb[22].mxu0 %v14687_v56  ;;  %13619 = vrcp.f32 %v1413_v36  ;;  %v1415_v16 = vadd.f32 1.0, %v13610_v1  ;;  %v13612_v29 = vpop.eup %13611  ;;  %v1581_v36 = vrot.slane %v14551_v9, 7  ;;  %v8946_v1 = vld [vmem:[%s18273_s5 + $0x120] sm:$0xff]  ;;  %v403_v21 = vadd.s32 80, %v14079_v46 }
 0x2ae   : > { %10719 = vmatprep.mubr.f32.mxu0 %v14690_v2  ;;  %13621 = vrcp.f32 %v1414_v37  ;;  %v13614_v27 = vpop.eup %13613  ;;  %v14703_v22 = vmul.f32 %v13612_v29, %v14583_v25  ;;  %v8947_v37 = vld [vmem:[%s18273_s5 + $0x128] sm:$0xff]  ;;  %v14777_v29 = vrot.slane %v14560_v11, 7 }
 0x2af   : > { %13623 = vrcp.f32 %v1415_v16  ;;  %v13616_v47 = vpop.eup %13615  ;;  %v14706_v34 = vmul.f32 %v13614_v27, %v14590_v15 }
 0x2b0   : > { %v14711_v35 = vmul.f32 %v13616_v47, %v14607_v26  ;;  %18645 = vst [vmem:[#allocation20_spill] sm:$0xff] %v14777_v29  ;;  %v471_v47 = vand.u32 15, %v399_v63  ;;  %v1585_v63 = vrot.slane %v14597_v57, 7 }
 0x2b1   : > { %10720 = vmatmul.mubr.f32.gmra.mrb[24].mxu0 %v14695_v52 }
 0x2b2   : > { %10722 = vmatprep.mubr.f32.mxu0 %v14698_v43  ;;  %18634 = vst [vmem:[#allocation13_spill] sm:$0xff] %v14711_v35  ;;  %vm14809_vm5 = vcmp.ne.s32.totalorder %v471_v47, 0  ;;  %v499_v47 = vand.u32 15, %v403_v21  ;;  %v1588_v21 = vrot.slane %v14617_v17, 7 }
 0x2b4   : > { %vm14860_vm7 = vcmp.ne.s32.totalorder %v499_v47, 0 }
 0x2b5   : > { %10723 = vmatmul.mubr.f32.gmra.mrb[26].mxu0 %v14703_v22 }
 0x2b6   : > { %10725 = vmatprep.mubr.f32.mxu0 %v14706_v34  ;;  %v13618_v55 = vpop.eup %13617 }
 0x2b7   : > { %v13620_v19 = vpop.eup %13619  ;;  %v14715_v10 = vmul.f32 %v13618_v55, %v14639_v33  ;;  %v14731_v33 = vrot.slane %v18281_v6, 7  ;;  %v401_v55 = vadd.s32 64, %v14079_v46 }
 0x2b8   : > { %v13622_v25 = vpop.eup %13621  ;;  %v14719_v15 = vmul.f32 %v13620_v19, %v14645_v5  ;;  %v12364_v19 = vpack.c.bf16 %v8947_v37, %v8946_v1  ;;  %v1586_v37 = vrot.slane %v14601_v54, 7 }
 0x2b9   : > { %10726 = vmatmul.mubr.f32.gmra.mrb[28].mxu0 %v14711_v35  ;;  %18635 = vst [vmem:[#allocation14_spill] sm:$0xff] %v14715_v10  ;;  %v13624_v0 = vpop.eup %13623  ;;  %v14724_v26 = vmul.f32 %v13622_v25, %v14651_v14  ;;  %18639 = vst [vmem:[#allocation18_spill] sm:$0xff] %v14731_v33  ;;  %v443_v14 = vand.u32 15, %v395_v23  ;;  %v1640_v16 = vsel %vm18345_vm1, %v14731_v33, %v14755_v24  ;;  %v485_v30 = vand.u32 15, %v401_v55 }
 0x2ba   : > { %10728 = vmatprep.mubr.f32.mxu0 %v14715_v10  ;;  %18636 = vst [vmem:[#allocation15_spill] sm:$0xff] %v14719_v15  ;;  %v14727_v4 = vmul.f32 %v13624_v0, %v14655_v59  ;;  %v397_v59 = vadd.s32 32, %v14079_v46  ;;  %v14790_v25 = vsel %vm18345_vm1, %v14755_v24, %v1581_v36  ;;  %v1583_v0 = vrot.slane %v14579_v42, 7 }
 0x2bb   : > { %18637 = vst [vmem:[#allocation16_spill] sm:$0xff] %v14724_v26  ;;  %vm14759_vm3 = vcmp.ne.s32.totalorder %v443_v14, 0  ;;  %v14803_v23 = vsel %vm18345_vm1, %v1581_v36, %v14777_v29  ;;  %v1584_v14 = vrot.slane %v14586_v49, 7  ;;  %v8951_v36 = vld [vmem:[%s18273_s5 + $0x148] sm:$0xff]  ;;  %vm14835_vm6 = vcmp.ne.s32.totalorder %v485_v30, 0 }
 0x2bc   : > { %18638 = vst [vmem:[#allocation17_spill] sm:$0xff] %v14727_v4  ;;  %v14735_v5 = vrot.slane %v14727_v4, 7  ;;  %v457_v53 = vand.u32 15, %v397_v59  ;;  %v405_v55 = vadd.s32 96, %v14079_v46  ;;  %v14854_v30 = vsel %vm18345_vm1, %v1585_v63, %v1586_v37 }
 0x2bd   : > { %10729 = vmatmul.mubr.f32.gmra.mrb[30].mxu0 %v14719_v15  ;;  %v14829_v1 = vsel %vm18345_vm1, %v1583_v0, %v1584_v14 }
 0x2be   : > { %10731 = vmatprep.mubr.f32.mxu0 %v14724_v26  ;;  %18640 = vst [vmem:[#allocation19_spill] sm:$0xff] %v14735_v5  ;;  %v1642_v39 = vsel %vm18345_vm1, %v14735_v5, %v14731_v33  ;;  %vm14782_vm4 = vcmp.ne.s32.totalorder %v457_v53, 0  ;;  %v14817_v53 = vsel %vm18345_vm1, %v14777_v29, %v1583_v0  ;;  %v14842_v0 = vsel %vm18345_vm1, %v1584_v14, %v1585_v63 }
 0x2bf   : > { %v18653_v14 = vmov 0 }
 0x2c0   : > { %v18654_v14 = vsel %vm14860_vm7, 4294967295, %v18653_v14 }
 0x2c1   : > { %10732 = vmatmul.mubr.f32.gmra.mrb[32].mxu0 %v14727_v4  ;;  %18655 = vst [vmem:[#allocation22_spill] sm:$0xff] %v18654_v14  ;;  %v8956_v14 = vld [vmem:[%s18273_s5 + $0x170] sm:$0xff] }
 0x2c2   : > { %10766 = vmatprep.mubr.msk.f32.mxu0 %vm14738_vm2, %v1642_v39 }
 0x2c5   : > { %10767 = vmatmul.mubr.f32.vlgmr.msra.gmra.mrb[2].mxu0 %v14731_v33  ;;  %v8954_v33 = vld [vmem:[%s18273_s5 + $0x160] sm:$0xff] }
 0x2c6   : > { %12359 = vmatpush3.bf16.msra.mxu0 %v14384_v31  ;;  %10769 = vmatprep.mubr.msk.f32.mxu0 %vm14759_vm3, %v1640_v16  ;;  %v8948_v31 = vld [vmem:[%s18273_s5 + $0x130] sm:$0xff]  ;;  %v18650_v16 = vmov 0 }
 0x2c7   : > { %12361 = vmatprep.subr.bf16.mxu0 %v12360_v28  ;;  %v12368_v39 = vpack.c.bf16 %v8949_v40, %v8948_v31  ;;  %v18651_v16 = vsel %vm14835_vm6, 4294967295, %v18650_v16  ;;  %v1587_v40 = vrot.slane %v14612_v60, 7 }
 0x2c8   : > { %18652 = vst [vmem:[#allocation21_spill] sm:$0xff] %v18651_v16  ;;  %v1591_v16 = vrot.slane %v14642_v18, 7 }
 0x2c9   : > { %10770 = vmatmul.mubr.f32.gmra.mrb[4].mxu0 %v14790_v25  ;;  %v14867_v63 = vsel %vm18345_vm1, %v1586_v37, %v1587_v40  ;;  %v14879_v47 = vsel %vm18345_vm1, %v1587_v40, %v1588_v21  ;;  %v18657_v37 = vmov 0  ;;  %v14892_v40 = vsel %vm18345_vm1, %v1588_v21, %v1589_v51 }
 0x2ca   : > { %10772 = vmatprep.mubr.msk.f32.mxu0 %vm14782_vm4, %v14803_v23  ;;  %12363 = vmatpush3.bf16.msra.mxu0 %v12360_v28  ;;  %v8950_v28 = vld [vmem:[%s18273_s5 + $0x140] sm:$0xff]  ;;  %18656 = vst [vmem:[#allocation23_spill] sm:$0xff] %v14879_v47  ;;  %18660 = vst [vmem:[#allocation25_spill] sm:$0xff] %v14892_v40  ;;  %v18662_v21 = vmov 0 }
 0x2cb   : > { %12365 = vmatprep.subr.bf16.mxu0 %v12364_v19  ;;  %v12372_v31 = vpack.c.bf16 %v8951_v36, %v8950_v28  ;;  %v513_v28 = vand.u32 15, %v405_v55  ;;  %v407_v36 = vadd.s32 112, %v14079_v46 }
 0x2cd   : > { %10773 = vmatmul.mubr.f32.gmra.mrb[6].mxu0 %v14817_v53  ;;  %vm14885_vm8 = vcmp.ne.s32.totalorder %v513_v28, 0  ;;  %v527_v55 = vand.u32 15, %v407_v36 }
 0x2ce   : > { %10775 = vmatprep.mubr.msk.f32.mxu0 %vm14809_vm5, %v14829_v1  ;;  %12367 = vmatpush3.bf16.msra.mxu0 %v12364_v19  ;;  %v8953_v19 = vld [vmem:[%s18273_s5 + $0x158] sm:$0xff]  ;;  %v18658_v37 = vsel %vm14885_vm8, 4294967295, %v18657_v37 }
 0x2cf   : > { %12369 = vmatprep.subr.bf16.mxu0 %v12368_v39  ;;  %v12376_v6 = vpack.c.bf16 %v8953_v19, %v8952_v3  ;;  %v1590_v3 = vrot.slane %v14632_v12, 7  ;;  %18659 = vst [vmem:[#allocation24_spill] sm:$0xff] %v18658_v37  ;;  %v409_v19 = vadd.s32 128, %v14079_v46  ;;  %vm14910_vm9 = vcmp.ne.s32.totalorder %v527_v55, 0  ;;  %v8990_v37 = vld [vmem:[%s18273_s5 + $0x180] sm:$0xff] }
 0x2d0   : > { %v18663_v21 = vsel %vm14910_vm9, 4294967295, %v18662_v21 }
 0x2d1   : > { %10776 = vmatmul.mubr.f32.gmra.mrb[8].mxu0 %v14842_v0  ;;  %v14904_v28 = vsel %vm18345_vm1, %v1589_v51, %v1590_v3  ;;  %18664 = vst [vmem:[#allocation27_spill] sm:$0xff] %v18663_v21  ;;  %v541_v36 = vand.u32 15, %v409_v19  ;;  %v14917_v51 = vsel %vm18345_vm1, %v1590_v3, %v1591_v16  ;;  %v18667_v3 = vmov 0 }
 0x2d2   : > { %10778 = vmatprep.mubr.msk.f32.mxu0 %vm14835_vm6, %v14854_v30  ;;  %12371 = vmatpush3.bf16.msra.mxu0 %v12368_v39  ;;  %v8955_v39 = vld [vmem:[%s18273_s5 + $0x168] sm:$0xff]  ;;  %18661 = vst [vmem:[#allocation26_spill] sm:$0xff] %v14904_v28  ;;  %18665 = vst [vmem:[#allocation28_spill] sm:$0xff] %v14917_v51 }
 0x2d3   : > { %12373 = vmatprep.subr.bf16.mxu0 %v12372_v31  ;;  %v12380_v29 = vpack.c.bf16 %v8955_v39, %v8954_v33  ;;  %v1592_v33 = vrot.slane %v14648_v41, 7  ;;  %v411_v39 = vadd.s32 144, %v14079_v46  ;;  %vm14935_vm10 = vcmp.ne.s32.totalorder %v541_v36, 0 }
 0x2d4   : > { %v18668_v3 = vsel %vm14935_vm10, 4294967295, %v18667_v3  ;;  %v1596_v36 = vrot.slane %v14674_v45, 7 }
 0x2d5   : > { %10779 = vmatmul.mubr.f32.gmra.mrb[10].mxu0 %v14867_v63  ;;  %v14929_v55 = vsel %vm18345_vm1, %v1591_v16, %v1592_v33  ;;  %18669 = vst [vmem:[#allocation30_spill] sm:$0xff] %v18668_v3  ;;  %v555_v19 = vand.u32 15, %v411_v39  ;;  %v415_v39 = vadd.s32 176, %v14079_v46  ;;  %v417_v3 = vadd.s32 192, %v14079_v46 }
 0x2d6   : > { %10781 = vmatprep.mubr.msk.f32.mxu0 %vm14860_vm7, %v14879_v47  ;;  %12375 = vmatpush3.bf16.msra.mxu0 %v12372_v31  ;;  %v8957_v31 = vld [vmem:[%s18273_s5 + $0x178] sm:$0xff]  ;;  %v1593_v47 = vrot.slane %v14661_v38, 7  ;;  %18666 = vst [vmem:[#allocation29_spill] sm:$0xff] %v14929_v55 }
 0x2d7   : > { %12377 = vmatprep.subr.bf16.mxu0 %v12376_v6  ;;  %vm14956_vm11 = vcmp.ne.s32.totalorder %v555_v19, 0  ;;  %v1598_v19 = vrot.slane %v14682_v44, 7 }
 0x2d8   : > { %v14944_v16 = vsel %vm18345_vm1, %v1592_v33, %v1593_v47 }
 0x2d9   : > { %10782 = vmatmul.mubr.f32.gmra.mrb[12].mxu0 %v14892_v40  ;;  %v12384_v40 = vpack.c.bf16 %v8957_v31, %v8956_v14  ;;  %v1594_v14 = vrot.slane %v14665_v8, 7  ;;  %v413_v31 = vadd.s32 160, %v14079_v46  ;;  %18670 = vst [vmem:[#allocation31_spill] sm:$0xff] %v14944_v16 }
 0x2da   : > { %10784 = vmatprep.mubr.msk.f32.mxu0 %vm14885_vm8, %v14904_v28  ;;  %12379 = vmatpush3.bf16.msra.mxu0 %v12376_v6  ;;  %v8991_v6 = vld [vmem:[%s18273_s5 + $0x188] sm:$0xff]  ;;  %v1595_v28 = vrot.slane %v14671_v48, 7 }
 0x2db   : > { %12381 = vmatprep.subr.bf16.mxu0 %v12380_v29  ;;  %v569_v33 = vand.u32 15, %v413_v31  ;;  %v18676_v31 = vmov 0 }
 0x2dd   : > { %10785 = vmatmul.mubr.f32.gmra.mrb[14].mxu0 %v14917_v51  ;;  %v14940_v51 = vpack.c.bf16 %v8991_v6, %v8990_v37  ;;  %v18671_v37 = vmov 0  ;;  %v1597_v6 = vrot.slane %v14679_v62, 7  ;;  %vm14976_vm12 = vcmp.ne.s32.totalorder %v569_v33, 0 }
 0x2de   : > { %10787 = vmatprep.mubr.msk.f32.mxu0 %vm14910_vm9, %v14929_v55  ;;  %12383 = vmatpush3.bf16.msra.mxu0 %v12380_v29  ;;  %v14950_v29 = vsel %vm18345_vm1, %v1593_v47, %v1594_v14  ;;  %v18672_v37 = vsel %vm14956_vm11, 4294967295, %v18671_v37  ;;  %v14964_v47 = vsel %vm18345_vm1, %v1594_v14, %v1595_v28  ;;  %v18677_v31 = vsel %vm14976_vm12, 4294967295, %v18676_v31 }
 0x2df   : > { %12385 = vmatprep.subr.bf16.mxu0 %v12384_v40  ;;  %18673 = vst [vmem:[#allocation32_spill] sm:$0xff] %v18672_v37  ;;  %18674 = vst [vmem:[#allocation33_spill] sm:$0xff] %v14964_v47  ;;  %v583_v14 = vand.u32 15, %v415_v39  ;;  %v14989_v21 = vsel %vm18345_vm1, %v1597_v6, %v1598_v19  ;;  %v1600_v33 = vrot.slane %v14690_v2, 7  ;;  %v18681_v39 = vmov 0 }
 0x2e0   : > { %18678 = vst [vmem:[#allocation35_spill] sm:$0xff] %v18677_v31  ;;  %18680 = vst [vmem:[#allocation37_spill] sm:$0xff] %v14989_v21  ;;  %v419_v37 = vadd.s32 208, %v14079_v46  ;;  %v421_v31 = vadd.s32 224, %v14079_v46 }
 0x2e1   : > { %10788 = vmatmul.mubr.f32.gmra.mrb[16].mxu0 %v14944_v16  ;;  %vm14995_vm13 = vcmp.ne.s32.totalorder %v583_v14, 0  ;;  %v1602_v14 = vrot.slane %v14698_v43, 7 }
 0x2e2   : > { %10790 = vmatprep.mubr.msk.f32.mxu0 %vm14935_vm10, %v14950_v29  ;;  %12387 = vmatpush3.bf16.msra.mxu0 %v12384_v40  ;;  %v14970_v40 = vsel %vm18345_vm1, %v1595_v28, %v1596_v36  ;;  %v1599_v28 = vrot.slane %v14687_v56, 7  ;;  %v18682_v39 = vsel %vm14995_vm13, 4294967295, %v18681_v39 }
 0x2e3   : > { %12389 = vmatprep.subr.bf16.mxu0 %v14940_v51  ;;  %18675 = vst [vmem:[#allocation34_spill] sm:$0xff] %v14970_v40  ;;  %18683 = vst [vmem:[#allocation38_spill] sm:$0xff] %v18682_v39  ;;  %v423_v39 = vadd.s32 240, %v14079_v46 }
 0x2e5   : > { %10791 = vmatmul.mubr.f32.gmra.mrb[18].mxu0 %v14964_v47  ;;  %v14983_v47 = vsel %vm18345_vm1, %v1596_v36, %v1597_v6  ;;  %v597_v36 = vand.u32 15, %v417_v3  ;;  %v1601_v6 = vrot.slane %v14695_v52, 7  ;;  %v18686_v3 = vmov 0 }
 0x2e6   : > { %10793 = vmatprep.mubr.msk.f32.mxu0 %vm14956_vm11, %v14970_v40  ;;  %18679 = vst [vmem:[#allocation36_spill] sm:$0xff] %v14983_v47  ;;  %v15008_v40 = vsel %vm18345_vm1, %v1599_v28, %v1600_v33 }
 0x2e7   : > { %18685 = vst [vmem:[#allocation40_spill] sm:$0xff] %v15008_v40  ;;  %vm15014_vm14 = vcmp.ne.s32.totalorder %v597_v36, 0  ;;  %v1604_v36 = vrot.slane %v14706_v34, 7 }
 0x2e8   : > { %v18687_v3 = vsel %vm15014_vm14, 4294967295, %v18686_v3 }
 0x2e9   : > { %10794 = vmatmul.mubr.f32.gmra.mrb[20].mxu0 %v14983_v47  ;;  %v15002_v47 = vsel %vm18345_vm1, %v1598_v19, %v1599_v28  ;;  %18688 = vst [vmem:[#allocation41_spill] sm:$0xff] %v18687_v3  ;;  %v611_v19 = vand.u32 15, %v419_v37  ;;  %v1603_v28 = vrot.slane %v14703_v22, 7  ;;  %v18691_v37 = vmov 0 }
 0x2ea   : > { %10796 = vmatprep.mubr.msk.f32.mxu0 %vm14976_vm12, %v14989_v21  ;;  %18684 = vst [vmem:[#allocation39_spill] sm:$0xff] %v15002_v47  ;;  %v15027_v21 = vsel %vm18345_vm1, %v1601_v6, %v1602_v14 }
 0x2eb   : > { %18690 = vst [vmem:[#allocation43_spill] sm:$0xff] %v15027_v21  ;;  %vm15033_vm15 = vcmp.ne.s32.totalorder %v611_v19, 0  ;;  %v1606_v19 = vrot.slane %v14715_v10, 7 }
 0x2ec   : > { %v18692_v37 = vsel %vm15033_vm15, 4294967295, %v18691_v37 }
 0x2ed   : > { %10797 = vmatmul.mubr.f32.gmra.mrb[22].mxu0 %v15002_v47  ;;  %v15021_v47 = vsel %vm18345_vm1, %v1600_v33, %v1601_v6  ;;  %18693 = vst [vmem:[#allocation44_spill] sm:$0xff] %v18692_v37  ;;  %v625_v33 = vand.u32 15, %v421_v31  ;;  %v1605_v6 = vrot.slane %v14711_v35, 7  ;;  %v18696_v31 = vmov 0 }
 0x2ee   : > { %10799 = vmatprep.mubr.msk.f32.mxu0 %vm14995_vm13, %v15008_v40  ;;  %18689 = vst [vmem:[#allocation42_spill] sm:$0xff] %v15021_v47  ;;  %v15046_v40 = vsel %vm18345_vm1, %v1603_v28, %v1604_v36  ;;  %v1608_v37 = vrot.slane %v14724_v26, 7 }
 0x2ef   : > { %18695 = vst [vmem:[#allocation46_spill] sm:$0xff] %v15046_v40  ;;  %vm15052_vm0 = vcmp.ne.s32.totalorder %v625_v33, 0  ;;  %v15058_v3 = vsel %vm18345_vm1, %v1604_v36, %v1605_v6  ;;  %v18701_v33 = vmov 0 }
 0x2f0   : > { %v18697_v31 = vsel %vm15052_vm0, 4294967295, %v18696_v31  ;;  %18699 = vst [vmem:[#allocation48_spill] sm:$0xff] %v15058_v3 }
 0x2f1   : > { %10800 = vmatmul.mubr.f32.gmra.mrb[24].mxu0 %v15021_v47  ;;  %v15040_v47 = vsel %vm18345_vm1, %v1602_v14, %v1603_v28  ;;  %18698 = vst [vmem:[#allocation47_spill] sm:$0xff] %v18697_v31  ;;  %v639_v14 = vand.u32 15, %v423_v39  ;;  %v15064_v28 = vsel %vm18345_vm1, %v1605_v6, %v1606_v19  ;;  %v394_v39 = vadd.s32 8, %v14079_v46 }
 0x2f2   : > { %10802 = vmatprep.mubr.msk.f32.mxu0 %vm15014_vm14, %v15027_v21  ;;  %18694 = vst [vmem:[#allocation45_spill] sm:$0xff] %v15040_v47  ;;  %18700 = vst [vmem:[#allocation49_spill] sm:$0xff] %v15064_v28 }
 0x2f3   : > { %v436_v31 = vand.u32 15, %v394_v39  ;;  %v8993_v39 = vld [vmem:[%s18273_s5 + $0x198] sm:$0xff] }
 0x2f5   : > { %10803 = vmatmul.mubr.f32.gmra.mrb[26].mxu0 %v15040_v47  ;;  %v1607_v47 = vrot.slane %v14719_v15, 7 }
 0x2f6   : > { %10805 = vmatprep.mubr.msk.f32.mxu0 %vm15033_vm15, %v15046_v40  ;;  %vm15071_vm15 = vcmp.ne.s32.totalorder %v639_v14, 0  ;;  %v396_v14 = vadd.s32 24, %v14079_v46  ;;  %v400_v40 = vadd.s32 56, %v14079_v46 }
 0x2f7   : > { %v18702_v33 = vsel %vm15071_vm15, 4294967295, %v18701_v33  ;;  %v15077_v36 = vsel %vm18345_vm1, %v1606_v19, %v1607_v47  ;;  %v15082_v6 = vsel %vm18345_vm1, %v1607_v47, %v1608_v37  ;;  %v18707_v19 = vmov 0.0   ;;  %v8992_v47 = vld [vmem:[%s18273_s5 + $0x190] sm:$0xff] }
 0x2f8   : > { %18703 = vst [vmem:[#allocation50_spill] sm:$0xff] %v18702_v33  ;;  %18704 = vst [vmem:[#allocation51_spill] sm:$0xff] %v15077_v36  ;;  %v398_v33 = vadd.s32 40, %v14079_v46 }
 0x2f9   : > { %10806 = vmatmul.mubr.f32.gmra.mrb[28].mxu0 %v15058_v3  ;;  %18705 = vst [vmem:[#allocation52_spill] sm:$0xff] %v15082_v6  ;;  %v15094_v3 = vrot.slane %v18707_v19, 1  ;;  %v18710_v19 = vmov 0 }
 0x2fa   : > { %10808 = vmatprep.mubr.msk.f32.mxu0 %vm15052_vm0, %v15064_v28  ;;  %v15091_v28 = vsel %vm18345_vm1, %v1608_v37, %v14735_v5  ;;  %v1742_v37 = vrot.slane %v14551_v9, 1  ;;  %vm15109_vm1 = vcmp.ne.s32.totalorder %v436_v31, 15  ;;  %v12392_v5 = vpack.c.bf16 %v8993_v39, %v8992_v47  ;;  %v8994_v9 = vld [vmem:[%s18273_s5 + $0x1a0] sm:$0xff]  ;;  %v8995_v31 = vld [vmem:[%s18273_s5 + $0x1a8] sm:$0xff] }
 0x2fb   : > { %18706 = vst [vmem:[#allocation53_spill] sm:$0xff] %v15091_v28  ;;  %18708 = vst [vmem:[#allocation54_spill] sm:$0xff] %v15094_v3  ;;  %v18711_v19 = vsel %vm15109_vm1, 4294967295, %v18710_v19  ;;  %v1744_v47 = vrot.slane %v14579_v42, 1  ;;  %v18715_v39 = vmov 0 }
 0x2fc   : > { %18712 = vst [vmem:[#allocation56_spill] sm:$0xff] %v18711_v19  ;;  %v1745_v19 = vrot.slane %v14586_v49, 1 }
 0x2fd   : > { %10809 = vmatmul.mubr.f32.gmra.mrb[30].mxu0 %v15077_v36  ;;  %v15097_v36 = vrot.slane %v14544_v58, 1  ;;  %v450_v58 = vand.u32 15, %v396_v14 }
 0x2fe   : > { %10811 = vmatprep.mubr.msk.f32.mxu0 %vm15071_vm15, %v15082_v6  ;;  %vm18476_vm15 = vcmp.lt.s32.totalorder %v14079_v46, 7 }
 0x2ff   : > { %18709 = vst [vmem:[#allocation55_spill] sm:$0xff] %v15097_v36  ;;  %v1801_v6 = vsel %vm18476_vm15, %v15094_v3, %v15097_v36  ;;  %v15132_v14 = vsel %vm18476_vm15, %v15097_v36, %v1742_v37  ;;  %vm15137_vm0 = vcmp.ne.s32.totalorder %v450_v58, 15  ;;  %v8997_v58 = vld [vmem:[%s18273_s5 + $0x1b8] sm:$0xff] }
 0x300   : > { %18714 = vst [vmem:[#allocation58_spill] sm:$0xff] %v15132_v14  ;;  %v18716_v39 = vsel %vm15137_vm0, 4294967295, %v18715_v39 }
 0x301   : > { %10812 = vmatmul.mubr.f32.gmra.mrb[32].mxu0 %v15091_v28  ;;  %v15119_v28 = vrot.slane %v14560_v11, 1  ;;  %18717 = vst [vmem:[#allocation59_spill] sm:$0xff] %v18716_v39  ;;  %v464_v11 = vand.u32 15, %v398_v33  ;;  %v1746_v33 = vrot.slane %v14597_v57, 1  ;;  %v1211_v39 = vmul.f32 %v14388_v32, %v14271_v20 }
 0x302   : > { %10846 = vmatprep.mubr.f32.mxu0 %v15094_v3  ;;  %v1747_v57 = vrot.slane %v14601_v54, 1 }
 0x303   : > { %18713 = vst [vmem:[#allocation57_spill] sm:$0xff] %v15119_v28  ;;  %v15145_v36 = vsel %vm18476_vm15, %v1742_v37, %v15119_v28  ;;  %v18720_v37 = vmov 0  ;;  %v15187_v20 = vsel %vm18476_vm15, %v1745_v19, %v1746_v33 }
 0x304   : > { %18718 = vst [vmem:[#allocation60_spill] sm:$0xff] %v15145_v36  ;;  %18724 = vst [vmem:[#allocation64_spill] sm:$0xff] %v15187_v20 }
 0x305   : > { %10847 = vmatmul.mubr.msk.f32.vlgmr.msra.gmra.mrb[2].mxu0 %vm15109_vm1, %v1801_v6  ;;  %v12396_v6 = vpack.c.bf16 %v8995_v31, %v8994_v9  ;;  %v15160_v9 = vsel %vm18476_vm15, %v15119_v28, %v1744_v47  ;;  %vm15164_vm1 = vcmp.ne.s32.totalorder %v464_v11, 15  ;;  %v478_v31 = vand.u32 15, %v400_v40  ;;  %v8998_v11 = vld [vmem:[%s18273_s5 + $0x1c0] sm:$0xff] }
 0x306   : > { %12391 = vmatpush3.bf16.msra.mxu0 %v14940_v51  ;;  %10849 = vmatprep.mubr.f32.mxu0 %v15132_v14  ;;  %v8996_v51 = vld [vmem:[%s18273_s5 + $0x1b0] sm:$0xff]  ;;  %18719 = vst [vmem:[#allocation61_spill] sm:$0xff] %v15160_v9  ;;  %v18721_v37 = vsel %vm15164_vm1, 4294967295, %v18720_v37  ;;  %v402_v14 = vadd.s32 72, %v14079_v46  ;;  %v15173_v28 = vsel %vm18476_vm15, %v1744_v47, %v1745_v19  ;;  %v1748_v40 = vrot.slane %v14612_v60, 1 }
 0x307   : > { %12393 = vmatprep.subr.bf16.mxu0 %v12392_v5  ;;  %18722 = vst [vmem:[#allocation62_spill] sm:$0xff] %v18721_v37  ;;  %18723 = vst [vmem:[#allocation63_spill] sm:$0xff] %v15173_v28  ;;  %v18725_v47 = vmov 0  ;;  %v15199_v37 = vld [vmem:[%s18270_s2] ss:$0 sm:$0xff] }
 0x308   : > { %v1250_v19 = vmul.f32 %v15199_v37, %v1211_v39  ;;  %v15218_v39 = vsel %vm18476_vm15, %v1747_v57, %v1748_v40 }
 0x309   : > { %10850 = vmatmul.mubr.msk.f32.gmra.mrb[4].mxu0 %vm15137_vm0, %v15145_v36  ;;  %v12400_v36 = vpack.c.bf16 %v8997_v58, %v8996_v51  ;;  %vm15191_vm0 = vcmp.ne.s32.totalorder %v478_v31, 15  ;;  %v492_v51 = vand.u32 15, %v402_v14  ;;  %v404_v58 = vadd.s32 88, %v14079_v46  ;;  %v9000_v14 = vld [vmem:[%s18273_s5 + $0x1d0] sm:$0xff]  ;;  %18729 = vst [vmem:[#allocation67_spill] sm:$0xff] %v15218_v39 }
 0x30a   : > { %10852 = vmatprep.mubr.f32.mxu0 %v15160_v9  ;;  %12395 = vmatpush3.bf16.msra.mxu0 %v12392_v5  ;;  %v8999_v5 = vld [vmem:[%s18273_s5 + $0x1c8] sm:$0xff]  ;;  %v18726_v47 = vsel %vm15191_vm0, 4294967295, %v18725_v47  ;;  %v1749_v31 = vrot.slane %v14617_v17, 1  ;;  %v406_v9 = vadd.s32 104, %v14079_v46 }
 0x30b   : > { %12397 = vmatprep.subr.bf16.mxu0 %v12396_v6  ;;  %18727 = vst [vmem:[#allocation65_spill] sm:$0xff] %v18726_v47  ;;  %v15230_v47 = vld [vmem:[%s18271_s3] ss:$0 sm:$0xff] }
 0x30d   : > { %10853 = vmatmul.mubr.msk.f32.gmra.mrb[6].mxu0 %vm15164_vm1, %v15173_v28  ;;  %v12404_v28 = vpack.c.bf16 %v8999_v5, %v8998_v11  ;;  %vm15222_vm1 = vcmp.ne.s32.totalorder %v492_v51, 15  ;;  %v18730_v11 = vmov 0  ;;  %v506_v5 = vand.u32 15, %v404_v58  ;;  %v9003_v58 = vld [vmem:[%s18273_s5 + $0x1e8] sm:$0xff] }
 0x30e   : > { %10855 = vmatprep.mubr.f32.mxu0 %v15187_v20  ;;  %12399 = vmatpush3.bf16.msra.mxu0 %v12396_v6  ;;  %v15204_v20 = vsel %vm18476_vm15, %v1746_v33, %v1747_v57  ;;  %v9001_v6 = vld [vmem:[%s18273_s5 + $0x1d8] sm:$0xff]  ;;  %v1750_v33 = vrot.slane %v14628_v61, 1  ;;  %v18731_v11 = vsel %vm15222_vm1, 4294967295, %v18730_v11  ;;  %v15233_v57 = vadd.f32 %v15230_v47, %v1250_v19 }
 0x30f   : > { %12401 = vmatprep.subr.bf16.mxu0 %v12400_v36  ;;  %18728 = vst [vmem:[#allocation66_spill] sm:$0xff] %v15204_v20  ;;  %18732 = vst [vmem:[#allocation68_spill] sm:$0xff] %v18731_v11  ;;  %v12408_v17 = vpack.c.bf16 %v9001_v6, %v9000_v14  ;;  %v15237_v51 = vsel %vm18476_vm15, %v1748_v40, %v1749_v31  ;;  %v1752_v40 = vrot.slane %v14642_v18, 1  ;;  %v18735_v14 = vmov 0 }
 0x310   : > { %18733 = vst [vmem:[#allocation69_spill] sm:$0xff] %v15237_v51  ;;  %v15251_v19 = vsel %vm18476_vm15, %v1749_v31, %v1750_v33  ;;  %v520_v6 = vand.u32 15, %v406_v9  ;;  %v8893_v11 = vmul.f32 -1.442695, %v15233_v57  ;;  %v9005_v9 = vld [vmem:[%s18273_s5 + $0x1f8] sm:$0xff] }
 0x311   : > { %10856 = vmatmul.mubr.msk.f32.gmra.mrb[8].mxu0 %vm15191_vm0, %v15204_v20  ;;  %18734 = vst [vmem:[#allocation70_spill] sm:$0xff] %v15251_v19  ;;  %vm15255_vm0 = vcmp.ne.s32.totalorder %v506_v5, 15  ;;  %v408_v20 = vadd.s32 120, %v14079_v46  ;;  %v9004_v5 = vld [vmem:[%s18273_s5 + $0x1f0] sm:$0xff] }
 0x312   : > { %10858 = vmatprep.mubr.f32.mxu0 %v15218_v39  ;;  %12403 = vmatpush3.bf16.msra.mxu0 %v12400_v36  ;;  %v1751_v39 = vrot.slane %v14632_v12, 1  ;;  %v9002_v36 = vld [vmem:[%s18273_s5 + $0x1e0] sm:$0xff]  ;;  %v18736_v14 = vsel %vm15255_vm0, 4294967295, %v18735_v14  ;;  %13625 = vpow2.f32 %v8893_v11  ;;  %v1756_v11 = vrot.slane %v14671_v48, 1 }
 0x313   : > { %12405 = vmatprep.subr.bf16.mxu0 %v12404_v28  ;;  %18737 = vst [vmem:[#allocation71_spill] sm:$0xff] %v18736_v14  ;;  %v12412_v12 = vpack.c.bf16 %v9003_v58, %v9002_v36  ;;  %v18740_v36 = vmov 0  ;;  %v534_v58 = vand.u32 15, %v408_v20  ;;  %v9039_v20 = vld [vmem:[%s18273_s5 + $0x208] sm:$0xff] }
 0x314   : > { %v15263_v31 = vsel %vm18476_vm15, %v1750_v33, %v1751_v39  ;;  %v1754_v33 = vrot.slane %v14661_v38, 1 }
 0x315   : > { %10859 = vmatmul.mubr.msk.f32.gmra.mrb[10].mxu0 %vm15222_vm1, %v15237_v51  ;;  %18738 = vst [vmem:[#allocation72_spill] sm:$0xff] %v15263_v31  ;;  %v1753_v51 = vrot.slane %v14648_v41, 1  ;;  %vm15281_vm1 = vcmp.ne.s32.totalorder %v520_v6, 15  ;;  %v12416_v41 = vpack.c.bf16 %v9005_v9, %v9004_v5  ;;  %v9038_v6 = vld [vmem:[%s18273_s5 + $0x200] sm:$0xff]  ;;  %v412_v9 = vadd.s32 152, %v14079_v46 }
 0x316   : > { %10861 = vmatprep.mubr.f32.mxu0 %v15251_v19  ;;  %12407 = vmatpush3.bf16.msra.mxu0 %v12404_v28  ;;  %v15277_v28 = vsel %vm18476_vm15, %v1751_v39, %v1752_v40  ;;  %v18741_v36 = vsel %vm15281_vm1, 4294967295, %v18740_v36  ;;  %v410_v19 = vadd.s32 136, %v14079_v46  ;;  %v1755_v39 = vrot.slane %v14665_v8, 1 }
 0x317   : > { %12409 = vmatprep.subr.bf16.mxu0 %v12408_v17  ;;  %18739 = vst [vmem:[#allocation73_spill] sm:$0xff] %v15277_v28  ;;  %18742 = vst [vmem:[#allocation74_spill] sm:$0xff] %v18741_v36  ;;  %v15288_v14 = vsel %vm18476_vm15, %v1752_v40, %v1753_v51  ;;  %v18745_v40 = vmov 0 }
 0x318   : > { %18743 = vst [vmem:[#allocation75_spill] sm:$0xff] %v15288_v14  ;;  %v548_v5 = vand.u32 15, %v410_v19  ;;  %v15315_v36 = vsel %vm18476_vm15, %v1754_v33, %v1755_v39  ;;  %v1758_v19 = vrot.slane %v14679_v62, 1 }
 0x319   : > { %10862 = vmatmul.mubr.msk.f32.gmra.mrb[12].mxu0 %vm15255_vm0, %v15263_v31  ;;  %vm15306_vm0 = vcmp.ne.s32.totalorder %v534_v58, 15  ;;  %18748 = vst [vmem:[#allocation78_spill] sm:$0xff] %v15315_v36  ;;  %v15323_v58 = vsel %vm18476_vm15, %v1755_v39, %v1756_v11  ;;  %v1759_v39 = vrot.slane %v14682_v44, 1 }
 0x31a   : > { %10864 = vmatprep.mubr.f32.mxu0 %v15277_v28  ;;  %12411 = vmatpush3.bf16.msra.mxu0 %v12408_v17  ;;  %v15302_v17 = vsel %vm18476_vm15, %v1753_v51, %v1754_v33  ;;  %v18746_v40 = vsel %vm15306_vm0, 4294967295, %v18745_v40  ;;  %v15311_v28 = vpack.c.bf16 %v9039_v20, %v9038_v6  ;;  %v1757_v51 = vrot.slane %v14674_v45, 1  ;;  %18749 = vst [vmem:[#allocation79_spill] sm:$0xff] %v15323_v58 }
 0x31b   : > { %12413 = vmatprep.subr.bf16.mxu0 %v12412_v12  ;;  %18744 = vst [vmem:[#allocation76_spill] sm:$0xff] %v15302_v17  ;;  %18747 = vst [vmem:[#allocation77_spill] sm:$0xff] %v18746_v40  ;;  %v562_v33 = vand.u32 15, %v412_v9  ;;  %v414_v6 = vadd.s32 168, %v14079_v46  ;;  %v1760_v9 = vrot.slane %v14687_v56, 1 }
 0x31c   : > { %v15335_v20 = vsel %vm18476_vm15, %v1756_v11, %v1757_v51  ;;  %v13626_v40 = vpop.eup %13625 }
 0x31d   : > { %10865 = vmatmul.mubr.msk.f32.gmra.mrb[14].mxu0 %vm15281_vm1, %v15288_v14  ;;  %vm15327_vm1 = vcmp.ne.s32.totalorder %v548_v5, 15  ;;  %18753 = vst [vmem:[#allocation81_spill] sm:$0xff] %v15335_v20  ;;  %v15343_v5 = vsel %vm18476_vm15, %v1757_v51, %v1758_v19  ;;  %v576_v11 = vand.u32 15, %v414_v6  ;;  %v15362_v51 = vsel %vm18476_vm15, %v1759_v39, %v1760_v9 }
 0x31e   : > { %10867 = vmatprep.mubr.f32.mxu0 %v15302_v17  ;;  %12415 = vmatpush3.bf16.msra.mxu0 %v12412_v12  ;;  %v18750_v12 = vmov 0  ;;  %18754 = vst [vmem:[#allocation82_spill] sm:$0xff] %v15343_v5  ;;  %18758 = vst [vmem:[#allocation84_spill] sm:$0xff] %v15362_v51  ;;  %v18759_v6 = vmov 0 }
 0x31f   : > { %12417 = vmatprep.subr.bf16.mxu0 %v12416_v41  ;;  %v18751_v12 = vsel %vm15327_vm1, 4294967295, %v18750_v12 }
 0x320   : > { %18752 = vst [vmem:[#allocation80_spill] sm:$0xff] %v18751_v12  ;;  %v1761_v12 = vrot.slane %v14690_v2, 1 }
 0x321   : > { %10868 = vmatmul.mubr.msk.f32.gmra.mrb[16].mxu0 %vm15306_vm0, %v15315_v36  ;;  %vm15347_vm0 = vcmp.ne.s32.totalorder %v562_v33, 15  ;;  %v15354_v36 = vsel %vm18476_vm15, %v1758_v19, %v1759_v39  ;;  %v1762_v33 = vrot.slane %v14695_v52, 1 }
 0x322   : > { %10870 = vmatprep.mubr.f32.mxu0 %v15323_v58  ;;  %12419 = vmatpush3.bf16.msra.mxu0 %v12416_v41  ;;  %v18755_v41 = vmov 0  ;;  %v416_v58 = vadd.s32 184, %v14079_v46 }
 0x323   : > { %12421 = vmatprep.subr.bf16.mxu0 %v15311_v28  ;;  %v18756_v41 = vsel %vm15347_vm0, 4294967295, %v18755_v41  ;;  %v15381_v39 = vsel %vm18476_vm15, %v1761_v12, %v1762_v33 }
 0x324   : > { %18757 = vst [vmem:[#allocation83_spill] sm:$0xff] %v18756_v41  ;;  %v590_v19 = vand.u32 15, %v416_v58  ;;  %v1763_v41 = vrot.slane %v14698_v43, 1  ;;  %18763 = vst [vmem:[#allocation87_spill] sm:$0xff] %v15381_v39  ;;  %v18764_v58 = vmov 0 }
 0x325   : > { %10871 = vmatmul.mubr.msk.f32.gmra.mrb[18].mxu0 %vm15327_vm1, %v15335_v20  ;;  %v1417_v20 = vadd.f32 1.0, %v13626_v40  ;;  %vm15366_vm1 = vcmp.ne.s32.totalorder %v576_v11, 15  ;;  %v15373_v40 = vsel %vm18476_vm15, %v1760_v9, %v1761_v12  ;;  %v1764_v11 = vrot.slane %v14703_v22, 1 }
 0x326   : > { %10873 = vmatprep.mubr.f32.mxu0 %v15343_v5  ;;  %v18760_v6 = vsel %vm15366_vm1, 4294967295, %v18759_v6  ;;  %v418_v5 = vadd.s32 200, %v14079_v46  ;;  %18762 = vst [vmem:[#allocation86_spill] sm:$0xff] %v15373_v40 }
 0x327   : > { %18761 = vst [vmem:[#allocation85_spill] sm:$0xff] %v18760_v6  ;;  %13627 = vrcp.f32 %v1417_v20  ;;  %v15392_v20 = vsel %vm18476_vm15, %v1762_v33, %v1763_v41  ;;  %v1765_v6 = vrot.slane %v14706_v34, 1  ;;  %v15400_v12 = vsel %vm18476_vm15, %v1763_v41, %v1764_v11 }
 0x328   : > { %v604_v9 = vand.u32 15, %v418_v5  ;;  %18767 = vst [vmem:[#allocation89_spill] sm:$0xff] %v15392_v20  ;;  %18768 = vst [vmem:[#allocation90_spill] sm:$0xff] %v15400_v12  ;;  %v18769_v5 = vmov 0 }
 0x329   : > { %10874 = vmatmul.mubr.msk.f32.gmra.mrb[20].mxu0 %vm15347_vm0, %v15354_v36  ;;  %vm15385_vm0 = vcmp.ne.s32.totalorder %v590_v19, 15  ;;  %v1766_v19 = vrot.slane %v14711_v35, 1 }
 0x32a   : > { %10876 = vmatprep.mubr.f32.mxu0 %v15362_v51  ;;  %v18765_v58 = vsel %vm15385_vm0, 4294967295, %v18764_v58  ;;  %v420_v51 = vadd.s32 216, %v14079_v46 }
 0x32b   : > { %18766 = vst [vmem:[#allocation88_spill] sm:$0xff] %v18765_v58  ;;  %v1767_v58 = vrot.slane %v14715_v10, 1  ;;  %v15419_v41 = vsel %vm18476_vm15, %v1765_v6, %v1766_v19 }
 0x32c   : > { %v618_v33 = vand.u32 15, %v420_v51  ;;  %18773 = vst [vmem:[#allocation93_spill] sm:$0xff] %v15419_v41  ;;  %v18774_v51 = vmov 0 }
 0x32d   : > { %10877 = vmatmul.mubr.msk.f32.gmra.mrb[22].mxu0 %vm15366_vm1, %v15373_v40  ;;  %vm15404_vm1 = vcmp.ne.s32.totalorder %v604_v9, 15  ;;  %v15411_v40 = vsel %vm18476_vm15, %v1764_v11, %v1765_v6  ;;  %v1768_v9 = vrot.slane %v14719_v15, 1 }
 0x32e   : > { %10879 = vmatprep.mubr.f32.mxu0 %v15381_v39  ;;  %v18770_v5 = vsel %vm15404_vm1, 4294967295, %v18769_v5  ;;  %v422_v39 = vadd.s32 232, %v14079_v46  ;;  %18772 = vst [vmem:[#allocation92_spill] sm:$0xff] %v15411_v40 }
 0x32f   : > { %18771 = vst [vmem:[#allocation91_spill] sm:$0xff] %v18770_v5  ;;  %v15430_v5 = vsel %vm18476_vm15, %v1766_v19, %v1767_v58  ;;  %v15438_v6 = vsel %vm18476_vm15, %v1767_v58, %v1768_v9  ;;  %v18778_v19 = vmov 0 }
 0x330   : > { %v632_v11 = vand.u32 15, %v422_v39  ;;  %18777 = vst [vmem:[#allocation95_spill] sm:$0xff] %v15438_v6 }
 0x331   : > { %10880 = vmatmul.mubr.msk.f32.gmra.mrb[24].mxu0 %vm15385_vm0, %v15392_v20  ;;  %vm15423_vm0 = vcmp.ne.s32.totalorder %v618_v33, 15  ;;  %v424_v20 = vadd.s32 248, %v14079_v46  ;;  %v15441_v33 = vrot.slane %v14727_v4, 1 }
 0x332   : > { %10882 = vmatprep.mubr.f32.mxu0 %v15400_v12  ;;  %v13628_v12 = vpop.eup %13627  ;;  %v18775_v51 = vsel %vm15423_vm0, 4294967295, %v18774_v51 }
 0x333   : > { %18776 = vst [vmem:[#allocation94_spill] sm:$0xff] %v18775_v51  ;;  %v15444_v39 = vmul.f32 %v13628_v12, %v15233_v57  ;;  %v1803_v12 = vsel %vm18476_vm15, %v15441_v33, %v15094_v3  ;;  %v9042_v3 = vld [vmem:[%s18273_s5 + $0x220] sm:$0xff] }
 0x335   : > { %10883 = vmatmul.mubr.msk.f32.gmra.mrb[26].mxu0 %vm15404_vm1, %v15411_v40  ;;  %v1769_v40 = vrot.slane %v14724_v26, 1  ;;  %vm15447_vm1 = vcmp.ne.s32.totalorder %v632_v11, 15  ;;  %v15464_v58 = vrot.slane %v15444_v39, 7 }
 0x336   : > { %10885 = vmatprep.mubr.f32.mxu0 %v15419_v41  ;;  %v18779_v19 = vsel %vm15447_vm1, 4294967295, %v18778_v19  ;;  %v646_v41 = vand.u32 15, %v424_v20  ;;  %v18784_v20 = vmov 0 }
 0x337   : > { %18780 = vst [vmem:[#allocation96_spill] sm:$0xff] %v18779_v19  ;;  %v15453_v51 = vsel %vm18476_vm15, %v1768_v9, %v1769_v40  ;;  %v15461_v57 = vsel %vm18476_vm15, %v1769_v40, %v15441_v33  ;;  %18783 = vst [vmem:[#allocation99_spill] sm:$0xff] %v15464_v58  ;;  %v9040_v9 = vld [vmem:[%s18273_s5 + $0x210] sm:$0xff]  ;;  %v9041_v40 = vld [vmem:[%s18273_s5 + $0x218] sm:$0xff] }
 0x338   : > { %18781 = vst [vmem:[#allocation97_spill] sm:$0xff] %v15453_v51  ;;  %18782 = vst [vmem:[#allocation98_spill] sm:$0xff] %v15461_v57  ;;  %v12424_v11 = vpack.c.bf16 %v9041_v40, %v9040_v9  ;;  %v9043_v19 = vld [vmem:[%s18273_s5 + $0x228] sm:$0xff]  ;;  %v9044_v9 = vld [vmem:[%s18273_s5 + $0x230] sm:$0xff] }
 0x339   : > { %10886 = vmatmul.mubr.msk.f32.gmra.mrb[28].mxu0 %vm15423_vm0, %v15430_v5  ;;  %vm15467_vm0 = vcmp.ne.s32.totalorder %v646_v41, 15  ;;  %v9045_v40 = vld [vmem:[%s18273_s5 + $0x238] sm:$0xff] }
 0x33a   : > { %10888 = vmatprep.mubr.f32.mxu0 %v15438_v6  ;;  %v18785_v20 = vsel %vm15467_vm0, 4294967295, %v18784_v20 }
 0x33b   : > { %18786 = vst [vmem:[#allocation100_spill] sm:$0xff] %v18785_v20 }
 0x33d   : > { %10889 = vmatmul.mubr.msk.f32.gmra.mrb[30].mxu0 %vm15447_vm1, %v15453_v51  ;;  %vm18787_vm1 = vcmp.lt.s32.totalorder %v14079_v46, 1 }
 0x33e   : > { %10891 = vmatprep.mubr.f32.mxu0 %v15461_v57  ;;  %v2752_v41 = vsel %vm18787_vm1, %v15464_v58, %v14755_v24  ;;  %v1210_v24 = vmul.f32 %v14388_v32, %v14265_v7  ;;  %v9046_v32 = vld [vmem:[%s18273_s5 + $0x240] sm:$0xff] }
 0x340   : > { %v1249_v7 = vmul.f32 %v15199_v37, %v1210_v24  ;;  %v9048_v37 = vld [vmem:[%s18273_s5 + $0x250] sm:$0xff] }
 0x341   : > { %10892 = vmatmul.mubr.msk.f32.gmra.mrb[32].mxu0 %vm15467_vm0, %v1803_v12  ;;  %v12428_v12 = vpack.c.bf16 %v9043_v19, %v9042_v3  ;;  %v9049_v19 = vld [vmem:[%s18273_s5 + $0x258] sm:$0xff] }
 0x342   : > { %10926 = vmatprep.mubr.msk.f32.mxu0 %vm14738_vm2, %v2752_v41  ;;  %v18788_v41 = vld [vmem:[#allocation23_spill] sm:$0xff]  ;;  %v12440_v24 = vpack.c.bf16 %v9049_v19, %v9048_v37  ;;  %v9053_v37 = vld [vmem:[%s18273_s5 + $0x278] sm:$0xff]  ;;  %v18793_v19 = vld [vmem:[#allocation28_spill] sm:$0xff] }
 0x345   : > { %10927 = vmatmul.mubr.f32.vlgmr.msra.gmra.mrb[2].mxu0 %v14790_v25  ;;  %v12432_v25 = vpack.c.bf16 %v9045_v40, %v9044_v9  ;;  %v9051_v9 = vld [vmem:[%s18273_s5 + $0x268] sm:$0xff]  ;;  %v18790_v40 = vld [vmem:[#allocation25_spill] sm:$0xff] }
 0x346   : > { %12423 = vmatpush3.bf16.msra.mxu0 %v15311_v28  ;;  %10929 = vmatprep.mubr.msk.f32.mxu0 %vm14759_vm3, %v14803_v23  ;;  %v9047_v23 = vld [vmem:[%s18273_s5 + $0x248] sm:$0xff]  ;;  %v1288_v28 = vadd.f32 %v15230_v47, %v1249_v7  ;;  %v9050_v47 = vld [vmem:[%s18273_s5 + $0x260] sm:$0xff]  ;;  %v18791_v7 = vld [vmem:[#allocation26_spill] sm:$0xff] }
 0x347   : > { %12425 = vmatprep.subr.bf16.mxu0 %v12424_v11  ;;  %v12436_v3 = vpack.c.bf16 %v9047_v23, %v9046_v32  ;;  %v9052_v23 = vld [vmem:[%s18273_s5 + $0x270] sm:$0xff] }
 0x348   : > { %v18796_v32 = vld [vmem:[#allocation33_spill] sm:$0xff] }
 0x349   : > { %10930 = vmatmul.mubr.f32.gmra.mrb[4].mxu0 %v14817_v53 }
 0x34a   : > { %10932 = vmatprep.mubr.msk.f32.mxu0 %vm14782_vm4, %v14829_v1  ;;  %12427 = vmatpush3.bf16.msra.mxu0 %v12424_v11 }
 0x34b   : > { %12429 = vmatprep.subr.bf16.mxu0 %v12428_v12 }
 0x34d   : > { %10933 = vmatmul.mubr.f32.gmra.mrb[6].mxu0 %v14842_v0 }
 0x34e   : > { %10935 = vmatprep.mubr.msk.f32.mxu0 %vm14809_vm5, %v14854_v30  ;;  %12431 = vmatpush3.bf16.msra.mxu0 %v12428_v12  ;;  %v8892_v12 = vmul.f32 -1.442695, %v1288_v28 }
 0x34f   : > { %12433 = vmatprep.subr.bf16.mxu0 %v12432_v25 }
 0x350   : > { %13629 = vpow2.f32 %v8892_v12  ;;  %v9054_v12 = vld [vmem:[%s18273_s5 + $0x280] sm:$0xff] }
 0x351   : > { %10936 = vmatmul.mubr.f32.gmra.mrb[8].mxu0 %v14867_v63 }
 0x352   : > { %10938 = vmatprep.mubr.msk.f32.mxu0 %vm14835_vm6, %v18788_v41  ;;  %12435 = vmatpush3.bf16.msra.mxu0 %v12432_v25  ;;  %v12444_v25 = vpack.c.bf16 %v9051_v9, %v9050_v47  ;;  %v9055_v47 = vld [vmem:[%s18273_s5 + $0x288] sm:$0xff]  ;;  %v18805_v9 = vld [vmem:[#allocation42_spill] sm:$0xff] }
 0x353   : > { %12437 = vmatprep.subr.bf16.mxu0 %v12436_v3  ;;  %v12452_v11 = vpack.c.bf16 %v9055_v47, %v9054_v12  ;;  %v18803_v12 = vld [vmem:[#allocation40_spill] sm:$0xff] }
 0x354   : > { %v18812_v47 = vld [vmem:[#allocation44_spill] sm:$0xff] }
 0x355   : > { %10939 = vmatmul.mubr.f32.gmra.mrb[10].mxu0 %v18790_v40  ;;  %vm18813_vm1 = vnez %v18812_v47 }
 0x356   : > { %10941 = vmatprep.mubr.msk.f32.mxu0 %vm14860_vm7, %v18791_v7  ;;  %12439 = vmatpush3.bf16.msra.mxu0 %v12436_v3  ;;  %v12448_v3 = vpack.c.bf16 %v9053_v37, %v9052_v23  ;;  %v18797_v23 = vld [vmem:[#allocation34_spill] sm:$0xff] }
 0x357   : > { %12441 = vmatprep.subr.bf16.mxu0 %v12440_v24 }
 0x359   : > { %10942 = vmatmul.mubr.f32.gmra.mrb[12].mxu0 %v18793_v19  ;;  %v18799_v19 = vld [vmem:[#allocation36_spill] sm:$0xff] }
 0x35a   : > { %10944 = vmatprep.mubr.msk.f32.mxu0 %vm14885_vm8, %v14929_v55  ;;  %12443 = vmatpush3.bf16.msra.mxu0 %v12440_v24  ;;  %v13630_v24 = vpop.eup %13629 }
 0x35b   : > { %12445 = vmatprep.subr.bf16.mxu0 %v12444_v25  ;;  %v1416_v55 = vadd.f32 1.0, %v13630_v24 }
 0x35d   : > { %10945 = vmatmul.mubr.f32.gmra.mrb[14].mxu0 %v14944_v16  ;;  %v18800_v16 = vld [vmem:[#allocation37_spill] sm:$0xff]  ;;  %13631 = vrcp.f32 %v1416_v55  ;;  %v18810_v55 = vld [vmem:[#allocation48_spill] sm:$0xff] }
 0x35e   : > { %10947 = vmatprep.mubr.msk.f32.mxu0 %vm14910_vm9, %v14950_v29  ;;  %12447 = vmatpush3.bf16.msra.mxu0 %v12444_v25  ;;  %v18802_v25 = vld [vmem:[#allocation39_spill] sm:$0xff] }
 0x35f   : > { %12449 = vmatprep.subr.bf16.mxu0 %v12448_v3 }
 0x361   : > { %10948 = vmatmul.mubr.f32.gmra.mrb[16].mxu0 %v18796_v32 }
 0x362   : > { %10950 = vmatprep.mubr.msk.f32.mxu0 %vm14935_vm10, %v18797_v23  ;;  %12451 = vmatpush3.bf16.msra.mxu0 %v12448_v3  ;;  %v18807_v3 = vld [vmem:[#allocation45_spill] sm:$0xff]  ;;  %v18819_v23 = vld [vmem:[#allocation19_spill] sm:$0xff] }
 0x363   : > { %12453 = vmatprep.subr.bf16.mxu0 %v12452_v11 }
 0x365   : > { %10951 = vmatmul.mubr.f32.gmra.mrb[18].mxu0 %v18799_v19  ;;  %v18808_v19 = vld [vmem:[#allocation46_spill] sm:$0xff] }
 0x366   : > { %10953 = vmatprep.mubr.msk.f32.mxu0 %vm14956_vm11, %v18800_v16 }
 0x367   : > { %v13632_v24 = vpop.eup %13631 }
 0x368   : > { %v15585_v7 = vmul.f32 %v13632_v24, %v1288_v28  ;;  %v18822_v28 = vld [vmem:[#allocation50_spill] sm:$0xff] }
 0x369   : > { %10954 = vmatmul.mubr.f32.gmra.mrb[20].mxu0 %v18802_v25  ;;  %v18811_v25 = vld [vmem:[#allocation49_spill] sm:$0xff] }
 0x36a   : > { %10956 = vmatprep.mubr.msk.f32.mxu0 %vm14976_vm12, %v18803_v12  ;;  %v2719_v37 = vrot.slane %v15585_v7, 7  ;;  %v18816_v12 = vld [vmem:[#allocation47_spill] sm:$0xff] }
 0x36b   : > { %vm18817_vm15 = vnez %v18816_v12  ;;  %v9056_v12 = vld [vmem:[%s18273_s5 + $0x290] sm:$0xff] }
 0x36d   : > { %10957 = vmatmul.mubr.f32.gmra.mrb[22].mxu0 %v18805_v9  ;;  %v18814_v9 = vld [vmem:[#allocation51_spill] sm:$0xff] }
 0x36e   : > { %10959 = vmatprep.mubr.msk.f32.mxu0 %vm14995_vm13, %v15027_v21  ;;  %v18815_v21 = vld [vmem:[#allocation52_spill] sm:$0xff]  ;;  %vm18823_vm13 = vnez %v18822_v28  ;;  %v9058_v28 = vld [vmem:[%s18273_s5 + $0x2a0] sm:$0xff] }
 0x371   : > { %10960 = vmatmul.mubr.f32.gmra.mrb[24].mxu0 %v18807_v3  ;;  %v18818_v3 = vld [vmem:[#allocation53_spill] sm:$0xff] }
 0x372   : > { %10962 = vmatprep.mubr.msk.f32.mxu0 %vm15014_vm14, %v18808_v19  ;;  %vm18820_vm14 = vcmp.lt.s32.totalorder %v14079_v46, 1 }
 0x375   : > { %10963 = vmatmul.mubr.f32.gmra.mrb[26].mxu0 %v18810_v55  ;;  %v15599_v55 = vsel %vm18820_vm14, %v18819_v23, %v2719_v37  ;;  %v18825_v23 = vld [vmem:[#allocation4_spill] sm:$0xff] }
 0x376   : > { %10965 = vmatprep.mubr.msk.f32.mxu0 %vm18813_vm1, %v18811_v25  ;;  %18821 = vst [vmem:[#allocation23_spill] sm:$0xff] %v15599_v55  ;;  %vm18824_vm1 = vmmov %vm18820_vm14 }
 0x377   : > { %v15607_v24 = vsel %vm18824_vm1, %v2719_v37, %v15464_v58  ;;  %v9059_v37 = vld [vmem:[%s18273_s5 + $0x2a8] sm:$0xff]  ;;  %v18826_v58 = vld [vmem:[#allocation5_spill] sm:$0xff] }
 0x379   : > { %10966 = vmatmul.mubr.f32.gmra.mrb[28].mxu0 %v18814_v9 }
 0x37a   : > { %10968 = vmatprep.mubr.msk.f32.mxu0 %vm18817_vm15, %v18815_v21  ;;  %v12460_v21 = vpack.c.bf16 %v9059_v37, %v9058_v28  ;;  %v18828_v28 = vld [vmem:[#allocation7_spill] sm:$0xff] }
 0x37d   : > { %10969 = vmatmul.mubr.f32.gmra.mrb[30].mxu0 %v18818_v3  ;;  %v9057_v3 = vld [vmem:[%s18273_s5 + $0x298] sm:$0xff] }
 0x37e   : > { %10971 = vmatprep.mubr.msk.f32.mxu0 %vm18823_vm13, %v15599_v55  ;;  %v12456_v47 = vpack.c.bf16 %v9057_v3, %v9056_v12  ;;  %v18827_v55 = vld [vmem:[#allocation6_spill] sm:$0xff]  ;;  %v9063_v3 = vld [vmem:[%s18273_s5 + $0x2c8] sm:$0xff] }
 0x37f   : > { %v9061_v12 = vld [vmem:[%s18273_s5 + $0x2b8] sm:$0xff] }
 0x381   : > { %10972 = vmatmul.mubr.f32.gmra.mrb[32].mxu0 %v15607_v24 }
 0x382   : > { %11006 = vmatprep.mubr.f32.mxu0 %v18825_v23  ;;  %v9060_v23 = vld [vmem:[%s18273_s5 + $0x2b0] sm:$0xff] }
 0x385   : > { %11007 = vmatmul.mubr.f32.vlgmr.msra.gmra.mrb[2].mxu0 %v18826_v58  ;;  %v12464_v58 = vpack.c.bf16 %v9061_v12, %v9060_v23  ;;  %v9065_v23 = vld [vmem:[%s18273_s5 + $0x2d8] sm:$0xff]  ;;  %v18829_v12 = vld [vmem:[#allocation9_spill] sm:$0xff] }
 0x386   : > { %12455 = vmatpush3.bf16.msra.mxu0 %v12452_v11  ;;  %11009 = vmatprep.mubr.f32.mxu0 %v18827_v55  ;;  %v9062_v11 = vld [vmem:[%s18273_s5 + $0x2c0] sm:$0xff] }
 0x387   : > { %12457 = vmatprep.subr.bf16.mxu0 %v12456_v47  ;;  %v12468_v37 = vpack.c.bf16 %v9063_v3, %v9062_v11  ;;  %v9067_v11 = vld [vmem:[%s18273_s5 + $0x2e8] sm:$0xff]  ;;  %v18830_v3 = vld [vmem:[#allocation11_spill] sm:$0xff] }
 0x389   : > { %11010 = vmatmul.mubr.f32.gmra.mrb[4].mxu0 %v14579_v42 }
 0x38a   : > { %11012 = vmatprep.mubr.f32.mxu0 %v14586_v49  ;;  %12459 = vmatpush3.bf16.msra.mxu0 %v12456_v47  ;;  %v9064_v47 = vld [vmem:[%s18273_s5 + $0x2d0] sm:$0xff] }
 0x38b   : > { %12461 = vmatprep.subr.bf16.mxu0 %v12460_v21 }
 0x38d   : > { %11013 = vmatmul.mubr.f32.gmra.mrb[6].mxu0 %v18828_v28  ;;  %v12472_v28 = vpack.c.bf16 %v9065_v23, %v9064_v47  ;;  %v9069_v47 = vld [vmem:[%s18273_s5 + $0x2f8] sm:$0xff]  ;;  %v18831_v23 = vld [vmem:[#allocation12_spill] sm:$0xff] }
 0x38e   : > { %11015 = vmatprep.mubr.f32.mxu0 %v14601_v54  ;;  %12463 = vmatpush3.bf16.msra.mxu0 %v12460_v21  ;;  %v9066_v21 = vld [vmem:[%s18273_s5 + $0x2e0] sm:$0xff] }
 0x38f   : > { %12465 = vmatprep.subr.bf16.mxu0 %v12464_v58 }
 0x391   : > { %11016 = vmatmul.mubr.f32.gmra.mrb[8].mxu0 %v14612_v60  ;;  %v12476_v60 = vpack.c.bf16 %v9067_v11, %v9066_v21  ;;  %v9103_v21 = vld [vmem:[%s18273_s5 + $0x308] sm:$0xff] }
 0x392   : > { %11018 = vmatprep.mubr.f32.mxu0 %v18829_v12  ;;  %12467 = vmatpush3.bf16.msra.mxu0 %v12464_v58  ;;  %v9068_v58 = vld [vmem:[%s18273_s5 + $0x2f0] sm:$0xff] }
 0x393   : > { %12469 = vmatprep.subr.bf16.mxu0 %v12468_v37 }
 0x395   : > { %11019 = vmatmul.mubr.f32.gmra.mrb[10].mxu0 %v14628_v61  ;;  %v12480_v61 = vpack.c.bf16 %v9069_v47, %v9068_v58  ;;  %v9106_v47 = vld [vmem:[%s18273_s5 + $0x320] sm:$0xff] }
 0x396   : > { %11021 = vmatprep.mubr.f32.mxu0 %v18830_v3  ;;  %12471 = vmatpush3.bf16.msra.mxu0 %v12468_v37  ;;  %v9102_v37 = vld [vmem:[%s18273_s5 + $0x300] sm:$0xff] }
 0x397   : > { %12473 = vmatprep.subr.bf16.mxu0 %v12472_v28  ;;  %v12484_v11 = vpack.c.bf16 %v9103_v21, %v9102_v37  ;;  %v9107_v37 = vld [vmem:[%s18273_s5 + $0x328] sm:$0xff] }
 0x398   : > { %v18833_v21 = vld [vmem:[#allocation60_spill] sm:$0xff] }
 0x399   : > { %11022 = vmatmul.mubr.f32.gmra.mrb[12].mxu0 %v14642_v18 }
 0x39a   : > { %11024 = vmatprep.mubr.f32.mxu0 %v18831_v23  ;;  %12475 = vmatpush3.bf16.msra.mxu0 %v12472_v28  ;;  %v18832_v28 = vld [vmem:[#allocation58_spill] sm:$0xff] }
 0x39b   : > { %12477 = vmatprep.subr.bf16.mxu0 %v12476_v60 }
 0x39d   : > { %11025 = vmatmul.mubr.f32.gmra.mrb[14].mxu0 %v14661_v38 }
 0x39e   : > { %11027 = vmatprep.mubr.f32.mxu0 %v14665_v8  ;;  %12479 = vmatpush3.bf16.msra.mxu0 %v12476_v60  ;;  %v9104_v60 = vld [vmem:[%s18273_s5 + $0x310] sm:$0xff] }
 0x39f   : > { %12481 = vmatprep.subr.bf16.mxu0 %v12480_v61 }
 0x3a1   : > { %11028 = vmatmul.mubr.f32.gmra.mrb[16].mxu0 %v14671_v48 }
 0x3a2   : > { %11030 = vmatprep.mubr.f32.mxu0 %v14674_v45  ;;  %12483 = vmatpush3.bf16.msra.mxu0 %v12480_v61  ;;  %v9105_v61 = vld [vmem:[%s18273_s5 + $0x318] sm:$0xff] }
 0x3a3   : > { %12485 = vmatprep.subr.bf16.mxu0 %v12484_v11  ;;  %v12488_v58 = vpack.c.bf16 %v9105_v61, %v9104_v60  ;;  %v9108_v60 = vld [vmem:[%s18273_s5 + $0x330] sm:$0xff]  ;;  %v9109_v61 = vld [vmem:[%s18273_s5 + $0x338] sm:$0xff] }
 0x3a5   : > { %11031 = vmatmul.mubr.f32.gmra.mrb[18].mxu0 %v14679_v62 }
 0x3a6   : > { %11033 = vmatprep.mubr.f32.mxu0 %v14682_v44 }
 0x3a9   : > { %11034 = vmatmul.mubr.f32.gmra.mrb[20].mxu0 %v14687_v56 }
 0x3aa   : > { %11036 = vmatprep.mubr.f32.mxu0 %v14690_v2 }
 0x3ad   : > { %11037 = vmatmul.mubr.f32.gmra.mrb[22].mxu0 %v14695_v52 }
 0x3ae   : > { %11039 = vmatprep.mubr.f32.mxu0 %v14698_v43 }
 0x3b1   : > { %11040 = vmatmul.mubr.f32.gmra.mrb[24].mxu0 %v14703_v22 }
 0x3b2   : > { %11042 = vmatprep.mubr.f32.mxu0 %v14706_v34 }
 0x3b5   : > { %11043 = vmatmul.mubr.f32.gmra.mrb[26].mxu0 %v14711_v35  ;;  %v18840_v35 = vld [vmem:[#allocation64_spill] sm:$0xff] }
 0x3b6   : > { %11045 = vmatprep.mubr.f32.mxu0 %v14715_v10  ;;  %v18838_v10 = vld [vmem:[#allocation59_spill] sm:$0xff] }
 0x3b7   : > { %vm18839_vm1 = vnez %v18838_v10 }
 0x3b9   : > { %11046 = vmatmul.mubr.f32.gmra.mrb[28].mxu0 %v14719_v15  ;;  %v12492_v15 = vpack.c.bf16 %v9107_v37, %v9106_v47  ;;  %v9110_v47 = vld [vmem:[%s18273_s5 + $0x340] sm:$0xff]  ;;  %v9111_v37 = vld [vmem:[%s18273_s5 + $0x348] sm:$0xff] }
 0x3ba   : > { %11048 = vmatprep.mubr.f32.mxu0 %v14724_v26  ;;  %v18836_v26 = vld [vmem:[#allocation61_spill] sm:$0xff]  ;;  %v12500_v10 = vpack.c.bf16 %v9111_v37, %v9110_v47  ;;  %v9115_v47 = vld [vmem:[%s18273_s5 + $0x368] sm:$0xff] }
 0x3bb   : > { %v18849_v37 = vld [vmem:[#allocation68_spill] sm:$0xff] }
 0x3bd   : > { %11049 = vmatmul.mubr.f32.gmra.mrb[30].mxu0 %v14727_v4  ;;  %v18834_v4 = vld [vmem:[#allocation56_spill] sm:$0xff] }
 0x3be   : > { %11051 = vmatprep.mubr.f32.mxu0 %v15585_v7  ;;  %vm18835_vm14 = vnez %v18834_v4  ;;  %v18842_v4 = vld [vmem:[#allocation62_spill] sm:$0xff] }
 0x3c1   : > { %11052 = vmatmul.mubr.f32.gmra.mrb[32].mxu0 %v15444_v39 }
 0x3c2   : > { %11086 = vmatprep.mubr.f32.mxu0 %v18832_v28  ;;  %v18837_v28 = vld [vmem:[#allocation63_spill] sm:$0xff] }
 0x3c5   : > { %11087 = vmatmul.mubr.msk.f32.vlgmr.msra.gmra.mrb[2].mxu0 %vm18835_vm14, %v18833_v21  ;;  %v18841_v21 = vld [vmem:[#allocation66_spill] sm:$0xff]  ;;  %vm18843_vm14 = vnez %v18842_v4 }
 0x3c6   : > { %12487 = vmatpush3.bf16.msra.mxu0 %v12484_v11  ;;  %11089 = vmatprep.mubr.f32.mxu0 %v18836_v26  ;;  %v12496_v11 = vpack.c.bf16 %v9109_v61, %v9108_v60  ;;  %v18844_v26 = vld [vmem:[#allocation67_spill] sm:$0xff]  ;;  %v9113_v60 = vld [vmem:[%s18273_s5 + $0x358] sm:$0xff]  ;;  %v18845_v61 = vld [vmem:[#allocation69_spill] sm:$0xff] }
 0x3c7   : > { %12489 = vmatprep.subr.bf16.mxu0 %v12488_v58 }
 0x3c9   : > { %11090 = vmatmul.mubr.msk.f32.gmra.mrb[4].mxu0 %vm18839_vm1, %v18837_v28  ;;  %v18848_v28 = vld [vmem:[#allocation70_spill] sm:$0xff] }
 0x3ca   : > { %11092 = vmatprep.mubr.f32.mxu0 %v18840_v35  ;;  %12491 = vmatpush3.bf16.msra.mxu0 %v12488_v58  ;;  %v9112_v58 = vld [vmem:[%s18273_s5 + $0x350] sm:$0xff] }
 0x3cb   : > { %12493 = vmatprep.subr.bf16.mxu0 %v12492_v15  ;;  %v18846_v35 = vld [vmem:[#allocation65_spill] sm:$0xff]  ;;  %v12504_v4 = vpack.c.bf16 %v9113_v60, %v9112_v58  ;;  %v9117_v58 = vld [vmem:[%s18273_s5 + $0x378] sm:$0xff]  ;;  %v18852_v60 = vld [vmem:[#allocation71_spill] sm:$0xff] }
 0x3cc   : > { %vm18847_vm1 = vnez %v18846_v35 }
 0x3cd   : > { %11093 = vmatmul.mubr.msk.f32.gmra.mrb[6].mxu0 %vm18843_vm14, %v18841_v21  ;;  %vm18850_vm14 = vnez %v18849_v37 }
 0x3ce   : > { %11095 = vmatprep.mubr.f32.mxu0 %v18844_v26  ;;  %12495 = vmatpush3.bf16.msra.mxu0 %v12492_v15  ;;  %v9114_v15 = vld [vmem:[%s18273_s5 + $0x360] sm:$0xff]  ;;  %v18851_v26 = vld [vmem:[#allocation73_spill] sm:$0xff] }
 0x3cf   : > { %12497 = vmatprep.subr.bf16.mxu0 %v12496_v11  ;;  %v12508_v35 = vpack.c.bf16 %v9115_v47, %v9114_v15  ;;  %v9151_v15 = vld [vmem:[%s18273_s5 + $0x388] sm:$0xff]  ;;  %v18854_v47 = vld [vmem:[#allocation78_spill] sm:$0xff] }
 0x3d1   : > { %11096 = vmatmul.mubr.msk.f32.gmra.mrb[8].mxu0 %vm18847_vm1, %v18845_v61  ;;  %vm18853_vm1 = vnez %v18852_v60 }
 0x3d2   : > { %11098 = vmatprep.mubr.f32.mxu0 %v18848_v28  ;;  %12499 = vmatpush3.bf16.msra.mxu0 %v12496_v11  ;;  %v9116_v11 = vld [vmem:[%s18273_s5 + $0x370] sm:$0xff] }
 0x3d3   : > { %12501 = vmatprep.subr.bf16.mxu0 %v12500_v10  ;;  %v12512_v37 = vpack.c.bf16 %v9117_v58, %v9116_v11  ;;  %v18861_v11 = vld [vmem:[#allocation82_spill] sm:$0xff]  ;;  %v18862_v58 = vld [vmem:[#allocation80_spill] sm:$0xff] }
 0x3d4   : > { %vm18863_vm13 = vnez %v18862_v58  ;;  %v18876_v58 = vld [vmem:[#allocation93_spill] sm:$0xff] }
 0x3d5   : > { %11099 = vmatmul.mubr.msk.f32.gmra.mrb[10].mxu0 %vm18850_vm14, %v15263_v31  ;;  %v18857_v31 = vld [vmem:[#allocation79_spill] sm:$0xff] }
 0x3d6   : > { %11101 = vmatprep.mubr.f32.mxu0 %v18851_v26  ;;  %12503 = vmatpush3.bf16.msra.mxu0 %v12500_v10  ;;  %v9150_v10 = vld [vmem:[%s18273_s5 + $0x380] sm:$0xff]  ;;  %v18855_v26 = vld [vmem:[#allocation74_spill] sm:$0xff] }
 0x3d7   : > { %12505 = vmatprep.subr.bf16.mxu0 %v12504_v4  ;;  %vm18856_vm14 = vnez %v18855_v26  ;;  %v12516_v60 = vpack.c.bf16 %v9151_v15, %v9150_v10  ;;  %v18865_v26 = vld [vmem:[#allocation86_spill] sm:$0xff]  ;;  %v18869_v10 = vld [vmem:[#allocation89_spill] sm:$0xff] }
 0x3d8   : > { %v18870_v15 = vld [vmem:[#allocation85_spill] sm:$0xff] }
 0x3d9   : > { %11102 = vmatmul.mubr.msk.f32.gmra.mrb[12].mxu0 %vm18853_vm1, %v15288_v14  ;;  %v18864_v14 = vld [vmem:[#allocation84_spill] sm:$0xff]  ;;  %vm18871_vm15 = vnez %v18870_v15  ;;  %v15796_v15 = vrot.slane %v15444_v39, 1 }
 0x3da   : > { %11104 = vmatprep.mubr.f32.mxu0 %v15302_v17  ;;  %12507 = vmatpush3.bf16.msra.mxu0 %v12504_v4  ;;  %v18858_v4 = vld [vmem:[#allocation81_spill] sm:$0xff] }
 0x3db   : > { %12509 = vmatprep.subr.bf16.mxu0 %v12508_v35  ;;  %v18859_v17 = vld [vmem:[#allocation77_spill] sm:$0xff]  ;;  %18881 = vst [vmem:[#allocation25_spill] sm:$0xff] %v15796_v15 }
 0x3dc   : > { %vm18860_vm1 = vnez %v18859_v17  ;;  %v18872_v17 = vld [vmem:[#allocation90_spill] sm:$0xff] }
 0x3dd   : > { %11105 = vmatmul.mubr.msk.f32.gmra.mrb[14].mxu0 %vm18856_vm14, %v18854_v47  ;;  %v18866_v47 = vld [vmem:[#allocation83_spill] sm:$0xff] }
 0x3de   : > { %11107 = vmatprep.mubr.f32.mxu0 %v18857_v31  ;;  %12511 = vmatpush3.bf16.msra.mxu0 %v12508_v35  ;;  %vm18867_vm14 = vnez %v18866_v47  ;;  %v18868_v35 = vld [vmem:[#allocation87_spill] sm:$0xff]  ;;  %v2815_v47 = vrot.slane %v15585_v7, 1 }
 0x3df   : > { %12513 = vmatprep.subr.bf16.mxu0 %v12512_v37 }
 0x3e1   : > { %11108 = vmatmul.mubr.msk.f32.gmra.mrb[16].mxu0 %vm18860_vm1, %v18858_v4 }
 0x3e2   : > { %11110 = vmatprep.mubr.f32.mxu0 %v18861_v11  ;;  %12515 = vmatpush3.bf16.msra.mxu0 %v12512_v37  ;;  %v18873_v37 = vld [vmem:[#allocation92_spill] sm:$0xff] }
 0x3e3   : > { %12517 = vmatprep.subr.bf16.mxu0 %v12516_v60  ;;  %v18874_v11 = vld [vmem:[#allocation88_spill] sm:$0xff] }
 0x3e4   : > { %vm18875_vm1 = vnez %v18874_v11 }
 0x3e5   : > { %11111 = vmatmul.mubr.msk.f32.gmra.mrb[18].mxu0 %vm18863_vm13, %v15354_v36 }
 0x3e6   : > { %11113 = vmatprep.mubr.f32.mxu0 %v18864_v14  ;;  %v18877_v14 = vld [vmem:[#allocation91_spill] sm:$0xff] }
 0x3e7   : > { %vm18878_vm13 = vnez %v18877_v14  ;;  %v18884_v14 = vld [vmem:[#allocation96_spill] sm:$0xff] }
 0x3e9   : > { %11114 = vmatmul.mubr.msk.f32.gmra.mrb[20].mxu0 %vm18867_vm14, %v18865_v26 }
 0x3ea   : > { %11116 = vmatprep.mubr.f32.mxu0 %v18868_v35  ;;  %v18879_v35 = vld [vmem:[#allocation94_spill] sm:$0xff] }
 0x3eb   : > { %vm18880_vm14 = vnez %v18879_v35  ;;  %v18888_v35 = vld [vmem:[#allocation55_spill] sm:$0xff] }
 0x3ed   : > { %11117 = vmatmul.mubr.msk.f32.gmra.mrb[22].mxu0 %vm18871_vm15, %v18869_v10 }
 0x3ee   : > { %11119 = vmatprep.mubr.f32.mxu0 %v18872_v17 }
 0x3f1   : > { %11120 = vmatmul.mubr.msk.f32.gmra.mrb[24].mxu0 %vm18875_vm1, %v18873_v37  ;;  %vm18882_vm1 = vcmp.lt.s32.totalorder %v14079_v46, 7 }
 0x3f2   : > { %11122 = vmatprep.mubr.f32.mxu0 %v18876_v58  ;;  %v15802_v11 = vsel %vm18882_vm1, %v15441_v33, %v2815_v47  ;;  %vm18886_vm15 = vmmov %vm18882_vm1  ;;  %v9152_v33 = vld [vmem:[%s18273_s5 + $0x390] sm:$0xff] }
 0x3f3   : > { %18883 = vst [vmem:[#allocation33_spill] sm:$0xff] %v15802_v11 }
 0x3f5   : > { %11123 = vmatmul.mubr.msk.f32.gmra.mrb[26].mxu0 %vm18878_vm13, %v15430_v5  ;;  %vm18885_vm13 = vnez %v18884_v14  ;;  %v9153_v14 = vld [vmem:[%s18273_s5 + $0x398] sm:$0xff] }
 0x3f6   : > { %11125 = vmatprep.mubr.f32.mxu0 %v15438_v6  ;;  %v15810_v6 = vsel %vm18886_vm15, %v2815_v47, %v15796_v15  ;;  %v18890_v47 = vld [vmem:[#allocation20_spill] sm:$0xff]  ;;  %vm18892_vm15 = vcmp.lt.s32.totalorder %v14079_v46, 1 }
 0x3f7   : > { %18887 = vst [vmem:[#allocation37_spill] sm:$0xff] %v15810_v6 }
 0x3f9   : > { %11126 = vmatmul.mubr.msk.f32.gmra.mrb[28].mxu0 %vm18880_vm14, %v15453_v51  ;;  %vm18889_vm14 = vmmov %vm18882_vm1  ;;  %v9155_v51 = vld [vmem:[%s18273_s5 + $0x3a8] sm:$0xff] }
 0x3fa   : > { %11128 = vmatprep.mubr.f32.mxu0 %v15461_v57  ;;  %v2848_v57 = vsel %vm18889_vm14, %v15796_v15, %v18888_v35  ;;  %v12520_v35 = vpack.c.bf16 %v9153_v14, %v9152_v33  ;;  %v9154_v15 = vld [vmem:[%s18273_s5 + $0x3a0] sm:$0xff]  ;;  %v9156_v14 = vld [vmem:[%s18273_s5 + $0x3b0] sm:$0xff]  ;;  %v19148_v33 = vld [vmem:[#allocation32_spill] sm:$0xff] }
 0x3fd   : > { %11129 = vmatmul.mubr.msk.f32.gmra.mrb[30].mxu0 %vm18885_vm13, %v15802_v11  ;;  %v18891_v11 = vld [vmem:[#allocation18_spill] sm:$0xff] }
 0x3fe   : > { %11131 = vmatprep.mubr.f32.mxu0 %v15810_v6  ;;  %v3798_v6 = vsel %vm18892_vm15, %v18891_v11, %v18890_v47  ;;  %v9163_v47 = vld [vmem:[%s18273_s5 + $0x3e8] sm:$0xff] }
 0x401   : > { %11132 = vmatmul.mubr.msk.f32.gmra.mrb[32].mxu0 %vm15467_vm0, %v2848_v57  ;;  %v12524_v57 = vpack.c.bf16 %v9155_v51, %v9154_v15  ;;  %v9159_v51 = vld [vmem:[%s18273_s5 + $0x3c8] sm:$0xff]  ;;  %v18893_v15 = vld [vmem:[#allocation26_spill] sm:$0xff] }
 0x402   : > { %11166 = vmatprep.mubr.msk.f32.mxu0 %vm14738_vm2, %v3798_v6  ;;  %v9157_v6 = vld [vmem:[%s18273_s5 + $0x3b8] sm:$0xff] }
 0x405   : > { %11167 = vmatmul.mubr.f32.vlgmr.msra.gmra.mrb[2].mxu0 %v14817_v53  ;;  %v12528_v53 = vpack.c.bf16 %v9157_v6, %v9156_v14  ;;  %v9164_v6 = vld [vmem:[%s18273_s5 + $0x3f0] sm:$0xff] }
 0x406   : > { %12519 = vmatpush3.bf16.msra.mxu0 %v12516_v60  ;;  %11169 = vmatprep.mubr.msk.f32.mxu0 %vm14759_vm3, %v14829_v1  ;;  %v9158_v1 = vld [vmem:[%s18273_s5 + $0x3c0] sm:$0xff]  ;;  %v9161_v60 = vld [vmem:[%s18273_s5 + $0x3d8] sm:$0xff] }
 0x407   : > { %12521 = vmatprep.subr.bf16.mxu0 %v12520_v35 }
 0x409   : > { %11170 = vmatmul.mubr.f32.gmra.mrb[4].mxu0 %v14842_v0  ;;  %v12532_v0 = vpack.c.bf16 %v9159_v51, %v9158_v1  ;;  %v18898_v1 = vld [vmem:[#allocation31_spill] sm:$0xff] }
 0x40a   : > { %11172 = vmatprep.mubr.msk.f32.mxu0 %vm14782_vm4, %v14854_v30  ;;  %12523 = vmatpush3.bf16.msra.mxu0 %v12520_v35  ;;  %v9160_v30 = vld [vmem:[%s18273_s5 + $0x3d0] sm:$0xff]  ;;  %v18895_v35 = vld [vmem:[#allocation28_spill] sm:$0xff] }
 0x40b   : > { %12525 = vmatprep.subr.bf16.mxu0 %v12524_v57 }
 0x40d   : > { %11173 = vmatmul.mubr.f32.gmra.mrb[6].mxu0 %v14867_v63  ;;  %v12536_v63 = vpack.c.bf16 %v9161_v60, %v9160_v30  ;;  %v9167_v60 = vld [vmem:[%s18273_s5 + $0x408] sm:$0xff] }
 0x40e   : > { %11175 = vmatprep.mubr.msk.f32.mxu0 %vm14809_vm5, %v18788_v41  ;;  %12527 = vmatpush3.bf16.msra.mxu0 %v12524_v57  ;;  %v9162_v41 = vld [vmem:[%s18273_s5 + $0x3e0] sm:$0xff]  ;;  %v18896_v57 = vld [vmem:[#allocation29_spill] sm:$0xff] }
 0x40f   : > { %12529 = vmatprep.subr.bf16.mxu0 %v12528_v53 }
 0x411   : > { %11176 = vmatmul.mubr.f32.gmra.mrb[8].mxu0 %v18790_v40  ;;  %v12540_v40 = vpack.c.bf16 %v9163_v47, %v9162_v41 }
 0x412   : > { %11178 = vmatprep.mubr.msk.f32.mxu0 %vm14835_vm6, %v18893_v15  ;;  %12531 = vmatpush3.bf16.msra.mxu0 %v12528_v53  ;;  %v9165_v53 = vld [vmem:[%s18273_s5 + $0x3f8] sm:$0xff] }
 0x413   : > { %12533 = vmatprep.subr.bf16.mxu0 %v12532_v0  ;;  %v12544_v30 = vpack.c.bf16 %v9165_v53, %v9164_v6  ;;  %v18900_v15 = vld [vmem:[#allocation34_spill] sm:$0xff]  ;;  %v18908_v53 = vld [vmem:[#allocation43_spill] sm:$0xff] }
 0x415   : > { %11179 = vmatmul.mubr.f32.gmra.mrb[10].mxu0 %v18895_v35  ;;  %v18904_v35 = vld [vmem:[#allocation39_spill] sm:$0xff] }
 0x416   : > { %11181 = vmatprep.mubr.msk.f32.mxu0 %vm14860_vm7, %v18896_v57  ;;  %12535 = vmatpush3.bf16.msra.mxu0 %v12532_v0  ;;  %v9166_v0 = vld [vmem:[%s18273_s5 + $0x400] sm:$0xff]  ;;  %v18905_v57 = vld [vmem:[#allocation40_spill] sm:$0xff] }
 0x417   : > { %12537 = vmatprep.subr.bf16.mxu0 %v12536_v63 }
 0x419   : > { %11182 = vmatmul.mubr.f32.gmra.mrb[12].mxu0 %v18898_v1  ;;  %v18910_v1 = vld [vmem:[#allocation45_spill] sm:$0xff] }
 0x41a   : > { %11184 = vmatprep.mubr.msk.f32.mxu0 %vm14885_vm8, %v14950_v29  ;;  %12539 = vmatpush3.bf16.msra.mxu0 %v12536_v63  ;;  %v12548_v29 = vpack.c.bf16 %v9167_v60, %v9166_v0  ;;  %v18902_v63 = vld [vmem:[#allocation36_spill] sm:$0xff]  ;;  %v18911_v0 = vld [vmem:[#allocation38_spill] sm:$0xff] }
 0x41b   : > { %12541 = vmatprep.subr.bf16.mxu0 %v12540_v40  ;;  %vm18912_vm14 = vnez %v18911_v0  ;;  %v18916_v60 = vld [vmem:[#allocation52_spill] sm:$0xff] }
 0x41d   : > { %11185 = vmatmul.mubr.f32.gmra.mrb[14].mxu0 %v18796_v32  ;;  %v18907_v32 = vld [vmem:[#allocation42_spill] sm:$0xff] }
 0x41e   : > { %11187 = vmatprep.mubr.msk.f32.mxu0 %vm14910_vm9, %v18900_v15  ;;  %12543 = vmatpush3.bf16.msra.mxu0 %v12540_v40  ;;  %v18917_v15 = vld [vmem:[#allocation44_spill] sm:$0xff] }
 0x41f   : > { %12545 = vmatprep.subr.bf16.mxu0 %v12544_v30  ;;  %vm18918_vm15 = vnez %v18917_v15 }
 0x421   : > { %11188 = vmatmul.mubr.f32.gmra.mrb[16].mxu0 %v18902_v63  ;;  %v18919_v63 = vld [vmem:[#allocation53_spill] sm:$0xff] }
 0x422   : > { %11190 = vmatprep.mubr.msk.f32.mxu0 %vm14935_vm10, %v18800_v16  ;;  %12547 = vmatpush3.bf16.msra.mxu0 %v12544_v30  ;;  %v18913_v16 = vld [vmem:[#allocation48_spill] sm:$0xff]  ;;  %v18914_v30 = vld [vmem:[#allocation41_spill] sm:$0xff] }
 0x423   : > { %12549 = vmatprep.subr.bf16.mxu0 %v12548_v29  ;;  %vm18915_vm1 = vnez %v18914_v30 }
 0x425   : > { %11191 = vmatmul.mubr.f32.gmra.mrb[18].mxu0 %v18904_v35  ;;  %v18920_v35 = vld [vmem:[#allocation23_spill] sm:$0xff] }
 0x426   : > { %11193 = vmatprep.mubr.msk.f32.mxu0 %vm14956_vm11, %v18905_v57  ;;  %v18921_v57 = vld [vmem:[#allocation47_spill] sm:$0xff] }
 0x429   : > { %11194 = vmatmul.mubr.f32.gmra.mrb[20].mxu0 %v18907_v32 }
 0x42a   : > { %11196 = vmatprep.mubr.msk.f32.mxu0 %vm14976_vm12, %v18908_v53  ;;  %vm18922_vm12 = vnez %v18921_v57  ;;  %v9169_v53 = vld [vmem:[%s18273_s5 + $0x418] sm:$0xff] }
 0x42d   : > { %11197 = vmatmul.mubr.f32.gmra.mrb[22].mxu0 %v18910_v1  ;;  %v9170_v1 = vld [vmem:[%s18273_s5 + $0x420] sm:$0xff] }
 0x42e   : > { %11199 = vmatprep.mubr.msk.f32.mxu0 %vm18912_vm14, %v18808_v19  ;;  %v18923_v19 = vld [vmem:[#allocation99_spill] sm:$0xff]  ;;  %vm18924_vm14 = vcmp.lt.s32.totalorder %v14079_v46, 1 }
 0x42f   : > { %v3768_v32 = vsel %vm18924_vm14, %v18923_v19, %v18891_v11  ;;  %v18928_v19 = vld [vmem:[#allocation8_spill] sm:$0xff] }
 0x431   : > { %11200 = vmatmul.mubr.f32.gmra.mrb[24].mxu0 %v18913_v16  ;;  %v9171_v16 = vld [vmem:[%s18273_s5 + $0x428] sm:$0xff] }
 0x432   : > { %11202 = vmatprep.mubr.msk.f32.mxu0 %vm18915_vm1, %v18811_v25  ;;  %v18925_v25 = vld [vmem:[#allocation50_spill] sm:$0xff] }
 0x433   : > { %vm18926_vm1 = vnez %v18925_v25 }
 0x435   : > { %11203 = vmatmul.mubr.f32.gmra.mrb[26].mxu0 %v18814_v9  ;;  %v9168_v9 = vld [vmem:[%s18273_s5 + $0x410] sm:$0xff] }
 0x436   : > { %11205 = vmatprep.mubr.msk.f32.mxu0 %vm18918_vm15, %v18916_v60  ;;  %v12556_v60 = vpack.c.bf16 %v9171_v16, %v9170_v1  ;;  %v9179_v1 = vld [vmem:[%s18273_s5 + $0x468] sm:$0xff] }
 0x439   : > { %11206 = vmatmul.mubr.f32.gmra.mrb[28].mxu0 %v18919_v63  ;;  %v9173_v63 = vld [vmem:[%s18273_s5 + $0x438] sm:$0xff] }
 0x43a   : > { %11208 = vmatprep.mubr.msk.f32.mxu0 %vm18922_vm12, %v18920_v35  ;;  %v18927_v35 = vld [vmem:[#allocation7_spill] sm:$0xff] }
 0x43d   : > { %11209 = vmatmul.mubr.f32.gmra.mrb[30].mxu0 %v15607_v24  ;;  %v12552_v24 = vpack.c.bf16 %v9169_v53, %v9168_v9  ;;  %v9177_v9 = vld [vmem:[%s18273_s5 + $0x458] sm:$0xff] }
 0x43e   : > { %11211 = vmatprep.mubr.msk.f32.mxu0 %vm18926_vm1, %v3768_v32  ;;  %v18929_v53 = vld [vmem:[#allocation10_spill] sm:$0xff] }
 0x441   : > { %11212 = vmatmul.mubr.f32.gmra.mrb[32].mxu0 %v18891_v11 }
 0x442   : > { %11246 = vmatprep.mubr.f32.mxu0 %v18827_v55  ;;  %v9172_v55 = vld [vmem:[%s18273_s5 + $0x430] sm:$0xff] }
 0x445   : > { %11247 = vmatmul.mubr.f32.vlgmr.msra.gmra.mrb[2].mxu0 %v14579_v42  ;;  %v12560_v42 = vpack.c.bf16 %v9173_v63, %v9172_v55  ;;  %v18949_v55 = vld [vmem:[#allocation73_spill] sm:$0xff]  ;;  %v18950_v63 = vld [vmem:[#allocation75_spill] sm:$0xff] }
 0x446   : > { %12551 = vmatpush3.bf16.msra.mxu0 %v12548_v29  ;;  %11249 = vmatprep.mubr.f32.mxu0 %v14586_v49  ;;  %v9174_v49 = vld [vmem:[%s18273_s5 + $0x440] sm:$0xff]  ;;  %v9175_v29 = vld [vmem:[%s18273_s5 + $0x448] sm:$0xff] }
 0x447   : > { %12553 = vmatprep.subr.bf16.mxu0 %v12552_v24  ;;  %v12564_v32 = vpack.c.bf16 %v9175_v29, %v9174_v49  ;;  %v18955_v49 = vld [vmem:[#allocation71_spill] sm:$0xff]  ;;  %v18960_v29 = vld [vmem:[#allocation77_spill] sm:$0xff] }
 0x449   : > { %11250 = vmatmul.mubr.f32.gmra.mrb[4].mxu0 %v18927_v35  ;;  %v18951_v35 = vld [vmem:[#allocation68_spill] sm:$0xff] }
 0x44a   : > { %11252 = vmatprep.mubr.f32.mxu0 %v14601_v54  ;;  %12555 = vmatpush3.bf16.msra.mxu0 %v12552_v24  ;;  %v9176_v54 = vld [vmem:[%s18273_s5 + $0x450] sm:$0xff] }
 0x44b   : > { %12557 = vmatprep.subr.bf16.mxu0 %v12556_v60  ;;  %v12568_v24 = vpack.c.bf16 %v9177_v9, %v9176_v54  ;;  %v18965_v54 = vld [vmem:[#allocation87_spill] sm:$0xff] }
 0x44c   : > { %v18972_v9 = vld [vmem:[#allocation95_spill] sm:$0xff] }
 0x44d   : > { %11253 = vmatmul.mubr.f32.gmra.mrb[6].mxu0 %v18928_v19  ;;  %v18962_v19 = vld [vmem:[#allocation84_spill] sm:$0xff] }
 0x44e   : > { %11255 = vmatprep.mubr.f32.mxu0 %v18829_v12  ;;  %12559 = vmatpush3.bf16.msra.mxu0 %v12556_v60  ;;  %v9178_v12 = vld [vmem:[%s18273_s5 + $0x460] sm:$0xff]  ;;  %v9181_v60 = vld [vmem:[%s18273_s5 + $0x478] sm:$0xff] }
 0x44f   : > { %12561 = vmatprep.subr.bf16.mxu0 %v12560_v42  ;;  %v12572_v16 = vpack.c.bf16 %v9179_v1, %v9178_v12  ;;  %v18980_v12 = vld [vmem:[#allocation37_spill] sm:$0xff] }
 0x451   : > { %11256 = vmatmul.mubr.f32.gmra.mrb[8].mxu0 %v18929_v53  ;;  %v18974_v53 = vld [vmem:[#allocation91_spill] sm:$0xff] }
 0x452   : > { %11258 = vmatprep.mubr.f32.mxu0 %v18830_v3  ;;  %12563 = vmatpush3.bf16.msra.mxu0 %v12560_v42  ;;  %v9180_v3 = vld [vmem:[%s18273_s5 + $0x470] sm:$0xff]  ;;  %v18953_v42 = vld [vmem:[#allocation76_spill] sm:$0xff] }
 0x453   : > { %12565 = vmatprep.subr.bf16.mxu0 %v12564_v32 }
 0x455   : > { %11259 = vmatmul.mubr.f32.gmra.mrb[10].mxu0 %v14642_v18  ;;  %v12576_v18 = vpack.c.bf16 %v9181_v60, %v9180_v3  ;;  %v4786_v60 = vld [vmem:[%s18276_s8] sm:$0xff] }
 0x456   : > { %11261 = vmatprep.mubr.f32.mxu0 %v18831_v23  ;;  %12567 = vmatpush3.bf16.msra.mxu0 %v12564_v32  ;;  %v18947_v23 = vld [vmem:[#allocation65_spill] sm:$0xff]  ;;  %v18963_v32 = vld [vmem:[#allocation80_spill] sm:$0xff] }
 0x457   : > { %12569 = vmatprep.subr.bf16.mxu0 %v12568_v24  ;;  %vm18948_vm15 = vnez %v18947_v23 }
 0x459   : > { %11262 = vmatmul.mubr.f32.gmra.mrb[12].mxu0 %v14661_v38  ;;  %v18930_v38 = vld [vmem:[#allocation13_spill] sm:$0xff] }
 0x45a   : > { %11264 = vmatprep.mubr.f32.mxu0 %v14665_v8  ;;  %12571 = vmatpush3.bf16.msra.mxu0 %v12568_v24  ;;  %v18931_v8 = vld [vmem:[#allocation14_spill] sm:$0xff] }
 0x45b   : > { %12573 = vmatprep.subr.bf16.mxu0 %v12572_v16  ;;  %v18976_v24 = vld [vmem:[#allocation98_spill] sm:$0xff] }
 0x45d   : > { %11265 = vmatmul.mubr.f32.gmra.mrb[14].mxu0 %v14671_v48  ;;  %v18932_v48 = vld [vmem:[#allocation15_spill] sm:$0xff] }
 0x45e   : > { %11267 = vmatprep.mubr.f32.mxu0 %v14674_v45  ;;  %12575 = vmatpush3.bf16.msra.mxu0 %v12572_v16  ;;  %v18933_v45 = vld [vmem:[#allocation16_spill] sm:$0xff]  ;;  %v18985_v16 = vld [vmem:[#allocation57_spill] sm:$0xff] }
 0x45f   : > { %12577 = vmatprep.subr.bf16.mxu0 %v12576_v18 }
 0x461   : > { %11268 = vmatmul.mubr.f32.gmra.mrb[16].mxu0 %v14679_v62  ;;  %v18934_v62 = vld [vmem:[#allocation17_spill] sm:$0xff] }
 0x462   : > { %11270 = vmatprep.mubr.f32.mxu0 %v14682_v44  ;;  %12579 = vmatpush3.bf16.msra.mxu0 %v12576_v18  ;;  %v18935_v44 = vmov 0.0   ;;  %v4787_v18 = vld [vmem:[%s18276_s8 + $0x8] sm:$0xff] }
 0x465   : > { %11271 = vmatmul.mubr.f32.gmra.mrb[18].mxu0 %v14687_v56  ;;  %v18936_v56 = vld [vmem:[#allocation61_spill] sm:$0xff] }
 0x466   : > { %11273 = vmatprep.mubr.f32.mxu0 %v14690_v2  ;;  %v18937_v2 = vld [vmem:[#allocation63_spill] sm:$0xff] }
 0x469   : > { %11274 = vmatmul.mubr.f32.gmra.mrb[20].mxu0 %v14695_v52  ;;  %v18938_v52 = vld [vmem:[#allocation56_spill] sm:$0xff] }
 0x46a   : > { %11276 = vmatprep.mubr.f32.mxu0 %v14698_v43  ;;  %vm18939_vm14 = vnez %v18938_v52  ;;  %v18940_v43 = vld [vmem:[#allocation64_spill] sm:$0xff] }
 0x46d   : > { %11277 = vmatmul.mubr.f32.gmra.mrb[22].mxu0 %v14703_v22  ;;  %v18941_v22 = vld [vmem:[#allocation59_spill] sm:$0xff] }
 0x46e   : > { %11279 = vmatprep.mubr.f32.mxu0 %v14706_v34  ;;  %vm18942_vm1 = vnez %v18941_v22  ;;  %v18943_v34 = vld [vmem:[#allocation67_spill] sm:$0xff] }
 0x471   : > { %11280 = vmatmul.mubr.f32.gmra.mrb[24].mxu0 %v18930_v38  ;;  %v16088_v38 = vpack.c.bf16 %v4787_v18, %v4786_v60 }
 0x472   : > { %11282 = vmatprep.mubr.f32.mxu0 %v18931_v8  ;;  %v18987_v8 = vmov 0.0|0.0  }
 0x473   : > { %12582 = vmatpush3.bf16.msra.mxu1 %v16088_v38 }
 0x474   : > { %12583 = vmatprep.subr.bf16.mxu1 %v18987_v8 }
 0x475   : > { %11283 = vmatmul.mubr.f32.gmra.mrb[26].mxu0 %v18932_v48  ;;  %v4788_v48 = vld [vmem:[%s18276_s8 + $0x10] sm:$0xff] }
 0x476   : > { %11285 = vmatprep.mubr.f32.mxu0 %v18933_v45  ;;  %v4789_v45 = vld [vmem:[%s18276_s8 + $0x18] sm:$0xff] }
 0x479   : > { %11286 = vmatmul.mubr.f32.gmra.mrb[28].mxu0 %v18934_v62  ;;  %v16098_v62 = vpack.c.bf16 %v4789_v45, %v4788_v48 }
 0x47a   : > { %11288 = vmatprep.mubr.f32.mxu0 %v15585_v7  ;;  %v18946_v7 = vld [vmem:[#allocation72_spill] sm:$0xff] }
 0x47b   : > { %12585 = vmatpush3.bf16.msra.mxu1 %v16098_v62 }
 0x47c   : > { %12586 = vmatprep.subr.bf16.mxu1 %v18987_v8 }
 0x47d   : > { %11289 = vmatmul.mubr.f32.gmra.mrb[30].mxu0 %v15444_v39  ;;  %v18944_v39 = vld [vmem:[#allocation62_spill] sm:$0xff] }
 0x47e   : > { %11291 = vmatprep.mubr.f32.mxu0 %v18935_v44  ;;  %vm18945_vm12 = vnez %v18944_v39 }
 0x481   : > { %11292 = vmatmul.mubr.f32.gmra.mrb[32].mxu0 %v18935_v44 }
 0x482   : > { %11326 = vmatprep.mubr.f32.mxu0 %v18936_v56  ;;  %v4790_v56 = vld [vmem:[%s18276_s8 + $0x20] sm:$0xff] }
 0x485   : > { %11327 = vmatmul.mubr.msk.f32.vlgmr.msra.gmra.mrb[2].mxu0 %vm18939_vm14, %v18937_v2  ;;  %vm18952_vm14 = vnez %v18951_v35  ;;  %v4791_v2 = vld [vmem:[%s18276_s8 + $0x28] sm:$0xff] }
 0x486   : > { %11329 = vmatprep.mubr.f32.mxu0 %v18940_v43  ;;  %v16108_v43 = vpack.c.bf16 %v4791_v2, %v4790_v56 }
 0x488   : > { %12588 = vmatpush3.bf16.msra.mxu1 %v16108_v43 }
 0x489   : > { %11330 = vmatmul.mubr.msk.f32.gmra.mrb[4].mxu0 %vm18942_vm1, %v18841_v21  ;;  %v18954_v21 = vld [vmem:[#allocation78_spill] sm:$0xff]  ;;  %vm18956_vm1 = vnez %v18955_v49  ;;  %12589 = vmatprep.subr.bf16.mxu1 %v18987_v8 }
 0x48a   : > { %11332 = vmatprep.mubr.f32.mxu0 %v18943_v34  ;;  %v4792_v34 = vld [vmem:[%s18276_s8 + $0x30] sm:$0xff] }
 0x48d   : > { %11333 = vmatmul.mubr.msk.f32.gmra.mrb[6].mxu0 %vm18945_vm12, %v18845_v61  ;;  %v18959_v61 = vld [vmem:[#allocation82_spill] sm:$0xff] }
 0x48e   : > { %11335 = vmatprep.mubr.f32.mxu0 %v18848_v28  ;;  %v18957_v28 = vld [vmem:[#allocation74_spill] sm:$0xff] }
 0x48f   : > { %vm18958_vm12 = vnez %v18957_v28 }
 0x491   : > { %11336 = vmatmul.mubr.msk.f32.gmra.mrb[8].mxu0 %vm18948_vm15, %v18946_v7  ;;  %vm18961_vm15 = vnez %v18960_v29  ;;  %v4793_v7 = vld [vmem:[%s18276_s8 + $0x38] sm:$0xff] }
 0x492   : > { %11338 = vmatprep.mubr.f32.mxu0 %v18949_v55  ;;  %v16118_v55 = vpack.c.bf16 %v4793_v7, %v4792_v34 }
 0x494   : > { %12591 = vmatpush3.bf16.msra.mxu1 %v16118_v55 }
 0x495   : > { %11339 = vmatmul.mubr.msk.f32.gmra.mrb[10].mxu0 %vm18952_vm14, %v18950_v63  ;;  %vm18964_vm14 = vnez %v18963_v32  ;;  %12592 = vmatprep.subr.bf16.mxu1 %v18987_v8  ;;  %v4794_v63 = vld [vmem:[%s18276_s8 + $0x40] sm:$0xff] }
 0x496   : > { %11341 = vmatprep.mubr.f32.mxu0 %v18953_v42  ;;  %v4795_v42 = vld [vmem:[%s18276_s8 + $0x48] sm:$0xff] }
 0x499   : > { %11342 = vmatmul.mubr.msk.f32.gmra.mrb[12].mxu0 %vm18956_vm1, %v18954_v21  ;;  %v4796_v21 = vld [vmem:[%s18276_s8 + $0x50] sm:$0xff] }
 0x49a   : > { %11344 = vmatprep.mubr.f32.mxu0 %v18857_v31  ;;  %v18966_v31 = vld [vmem:[#allocation83_spill] sm:$0xff] }
 0x49b   : > { %vm18967_vm1 = vnez %v18966_v31 }
 0x49d   : > { %11345 = vmatmul.mubr.msk.f32.gmra.mrb[14].mxu0 %vm18958_vm12, %v18858_v4  ;;  %v18968_v4 = vld [vmem:[#allocation85_spill] sm:$0xff] }
 0x49e   : > { %11347 = vmatprep.mubr.f32.mxu0 %v18959_v61  ;;  %vm18969_vm12 = vnez %v18968_v4  ;;  %v16131_v61 = vpack.c.bf16 %v4795_v42, %v4794_v63 }
 0x4a0   : > { %12594 = vmatpush3.bf16.msra.mxu1 %v16131_v61 }
 0x4a1   : > { %11348 = vmatmul.mubr.msk.f32.gmra.mrb[16].mxu0 %vm18961_vm15, %v15354_v36  ;;  %v18970_v36 = vld [vmem:[#allocation88_spill] sm:$0xff]  ;;  %12595 = vmatprep.subr.bf16.mxu1 %v18987_v8 }
 0x4a2   : > { %11350 = vmatprep.mubr.f32.mxu0 %v18962_v19  ;;  %vm18971_vm15 = vnez %v18970_v36  ;;  %v4797_v19 = vld [vmem:[%s18276_s8 + $0x58] sm:$0xff] }
 0x4a5   : > { %11351 = vmatmul.mubr.msk.f32.gmra.mrb[18].mxu0 %vm18964_vm14, %v18865_v26  ;;  %v18973_v26 = vld [vmem:[#allocation97_spill] sm:$0xff]  ;;  %vm18975_vm14 = vnez %v18974_v53 }
 0x4a6   : > { %11353 = vmatprep.mubr.f32.mxu0 %v18965_v54  ;;  %v16137_v54 = vpack.c.bf16 %v4797_v19, %v4796_v21 }
 0x4a8   : > { %12597 = vmatpush3.bf16.msra.mxu1 %v16137_v54 }
 0x4a9   : > { %11354 = vmatmul.mubr.msk.f32.gmra.mrb[20].mxu0 %vm18967_vm1, %v18869_v10  ;;  %v18977_v10 = vld [vmem:[#allocation33_spill] sm:$0xff]  ;;  %12598 = vmatprep.subr.bf16.mxu1 %v18987_v8 }
 0x4aa   : > { %11356 = vmatprep.mubr.f32.mxu0 %v18872_v17  ;;  %v18978_v17 = vld [vmem:[#allocation94_spill] sm:$0xff] }
 0x4ab   : > { %vm18979_vm1 = vnez %v18978_v17 }
 0x4ad   : > { %11357 = vmatmul.mubr.msk.f32.gmra.mrb[22].mxu0 %vm18969_vm12, %v18873_v37  ;;  %v18981_v37 = vld [vmem:[#allocation54_spill] sm:$0xff]  ;;  %vm18983_vm12 = vcmp.lt.s32.totalorder %v14079_v46, 7 }
 0x4ae   : > { %11359 = vmatprep.mubr.f32.mxu0 %v18876_v58  ;;  %v18982_v58 = vld [vmem:[#allocation25_spill] sm:$0xff] }
 0x4af   : > { %v3864_v1 = vsel %vm18983_vm12, %v18982_v58, %v18981_v37 }
 0x4b1   : > { %11360 = vmatmul.mubr.msk.f32.gmra.mrb[24].mxu0 %vm18971_vm15, %v15430_v5 }
 0x4b2   : > { %11362 = vmatprep.mubr.f32.mxu0 %v18972_v9  ;;  %v4798_v9 = vld [vmem:[%s18276_s8 + $0x60] sm:$0xff] }
 0x4b5   : > { %11363 = vmatmul.mubr.msk.f32.gmra.mrb[26].mxu0 %vm18975_vm14, %v18973_v26  ;;  %vm18986_vm14 = vmmov %vm18983_vm12  ;;  %v4799_v26 = vld [vmem:[%s18276_s8 + $0x68] sm:$0xff]  ;;  %vm18988_vm12 = vmmov 0  }
 0x4b6   : > { %11365 = vmatprep.mubr.f32.mxu0 %v18976_v24  ;;  %v3894_v3 = vsel %vm18986_vm14, %v18981_v37, %v18985_v16  ;;  %v16147_v24 = vpack.c.bf16 %v4799_v26, %v4798_v9  ;;  %vm18999_vm14 = vcmp.lt.s32.totalorder %v14079_v46, 1 }
 0x4b8   : > { %12600 = vmatpush3.bf16.msra.mxu1 %v16147_v24 }
 0x4b9   : > { %11366 = vmatmul.mubr.msk.f32.gmra.mrb[28].mxu0 %vm18979_vm1, %v18977_v10  ;;  %v4800_v10 = vld [vmem:[%s18276_s8 + $0x70] sm:$0xff]  ;;  %12601 = vmatprep.subr.bf16.mxu1 %v18987_v8 }
 0x4ba   : > { %11368 = vmatprep.mubr.f32.mxu0 %v18980_v12  ;;  %v4801_v12 = vld [vmem:[%s18276_s8 + $0x78] sm:$0xff] }
 0x4bb   : > { %v16157_v58 = vpack.c.bf16 %v4801_v12, %v4800_v10 }
 0x4bd   : > { %11369 = vmatmul.mubr.msk.f32.gmra.mrb[30].mxu0 %vm18885_vm13, %v3864_v1  ;;  %12603 = vmatpush3.bf16.msra.mxu1 %v16157_v58 }
 0x4be   : > { %11371 = vmatprep.mubr.f32.mxu0 %v18981_v37  ;;  %12604 = vmatprep.subr.bf16.mxu1 %v18987_v8 }
 0x4c1   : > { %11372 = vmatmul.mubr.msk.f32.gmra.mrb[32].mxu0 %vm15467_vm0, %v3894_v3 }
 0x4c2   : > { %11476 = vmatprep.mubr.f32.mxu0 %v18935_v44 }
 0x558   : > { %v16162_v1 = vpop.f32.mrb[2].mxu0 }
 0x559   : > { %v16164_v16 = vpop.f32.mrb[3].mxu0 }
 0x55a   : > { %v4749_v3 = vadd.f32 %v16162_v1, %v16164_v16 }
 0x55c   : > { %v16168_v60 = vpop.f32.mrb[4].mxu0 }
 0x55d   : > { %v16170_v18 = vpop.f32.mrb[5].mxu0 }
 0x55e   : > { %v4750_v48 = vadd.f32 %v4749_v3, %v16170_v18 }
 0x560   : > { %v16173_v45 = vpop.f32.mrb[6].mxu0  ;;  %v4751_v56 = vadd.f32 %v16168_v60, %v4750_v48 }
 0x561   : > { %v16176_v2 = vpop.f32.mrb[7].mxu0 }
 0x562   : > { %v4752_v34 = vadd.f32 %v4751_v56, %v16176_v2 }
 0x564   : > { %v16179_v7 = vpop.f32.mrb[8].mxu0  ;;  %v4753_v63 = vadd.f32 %v16173_v45, %v4752_v34 }
 0x565   : > { %v16182_v42 = vpop.f32.mrb[9].mxu0 }
 0x566   : > { %v4754_v21 = vadd.f32 %v4753_v63, %v16182_v42 }
 0x568   : > { %v16185_v19 = vpop.f32.mrb[10].mxu0  ;;  %v4755_v9 = vadd.f32 %v16179_v7, %v4754_v21 }
 0x569   : > { %v16188_v26 = vpop.f32.mrb[11].mxu0 }
 0x56a   : > { %v4756_v10 = vadd.f32 %v4755_v9, %v16188_v26 }
 0x56c   : > { %v16191_v12 = vpop.f32.mrb[12].mxu0  ;;  %v4757_v3 = vadd.f32 %v16185_v19, %v4756_v10 }
 0x56d   : > { %v16194_v48 = vpop.f32.mrb[13].mxu0 }
 0x56e   : > { %v4758_v56 = vadd.f32 %v4757_v3, %v16194_v48 }
 0x570   : > { %v16197_v34 = vpop.f32.mrb[14].mxu0  ;;  %v4759_v63 = vadd.f32 %v16191_v12, %v4758_v56 }
 0x571   : > { %v16200_v20 = vpop.f32.mrb[15].mxu0 }
 0x572   : > { %v4760_v21 = vadd.f32 %v4759_v63, %v16200_v20 }
 0x574   : > { %v16203_v5 = vpop.f32.mrb[16].mxu0  ;;  %v4761_v9 = vadd.f32 %v16197_v34, %v4760_v21 }
 0x575   : > { %v16206_v17 = vpop.f32.mrb[17].mxu0 }
 0x576   : > { %v4762_v10 = vadd.f32 %v4761_v9, %v16206_v17 }
 0x578   : > { %v16209_v53 = vpop.f32.mrb[18].mxu0  ;;  %v4763_v3 = vadd.f32 %v16203_v5, %v4762_v10 }
 0x579   : > { %v16212_v36 = vpop.f32.mrb[19].mxu0 }
 0x57a   : > { %v4764_v56 = vadd.f32 %v4763_v3, %v16212_v36 }
 0x57c   : > { %v16215_v4 = vpop.f32.mrb[20].mxu0  ;;  %v4765_v63 = vadd.f32 %v16209_v53, %v4764_v56 }
 0x57d   : > { %v16218_v31 = vpop.f32.mrb[21].mxu0 }
 0x57e   : > { %v4766_v21 = vadd.f32 %v4765_v63, %v16218_v31 }
 0x580   : > { %v16221_v32 = vpop.f32.mrb[22].mxu0  ;;  %v4767_v9 = vadd.f32 %v16215_v4, %v4766_v21 }
 0x581   : > { %v16224_v29 = vpop.f32.mrb[23].mxu0 }
 0x582   : > { %v4768_v10 = vadd.f32 %v4767_v9, %v16224_v29 }
 0x584   : > { %v16227_v28 = vpop.f32.mrb[24].mxu0  ;;  %v4769_v3 = vadd.f32 %v16221_v32, %v4768_v10 }
 0x585   : > { %v16230_v49 = vpop.f32.mrb[25].mxu0 }
 0x586   : > { %v4770_v56 = vadd.f32 %v4769_v3, %v16230_v49 }
 0x588   : > { %v16233_v35 = vpop.f32.mrb[26].mxu0  ;;  %v4771_v63 = vadd.f32 %v16227_v28, %v4770_v56 }
 0x589   : > { %v16236_v23 = vpop.f32.mrb[27].mxu0 }
 0x58a   : > { %v4772_v21 = vadd.f32 %v4771_v63, %v16236_v23 }
 0x58c   : > { %v16239_v39 = vpop.f32.mrb[28].mxu0  ;;  %v4773_v9 = vadd.f32 %v16233_v35, %v4772_v21 }
 0x58d   : > { %v16242_v22 = vpop.f32.mrb[29].mxu0 }
 0x58e   : > { %v4774_v10 = vadd.f32 %v4773_v9, %v16242_v22 }
 0x590   : > { %v16245_v52 = vpop.f32.mrb[30].mxu0  ;;  %v4775_v3 = vadd.f32 %v16239_v39, %v4774_v10 }
 0x591   : > { %v4698_v37 = vpop.f32.mrb[31].mxu0 }
 0x592   : > { %v4776_v25 = vadd.f32 %v4775_v3, %v4698_v37 }
 0x594   : > { %v11373_v57 = vpop.f32.mrb[32].mxu0  ;;  %v4777_v56 = vadd.f32 %v16245_v52, %v4776_v25 }
 0x595   : > { %v4708_v15 = vpop.f32.mrb[33].mxu0 }
 0x596   : > { %v4778_v30 = vadd.f32 %v4777_v56, %v4708_v15 }
 0x598   : > { %v4779_v63 = vadd.f32 %v11373_v57, %v4778_v30 }
 0x59a   : > { %v4780_v0 = vrot.slane %v4779_v63, 4 }
 0x59c   : > { %v4781_v40 = vadd.f32 %v4780_v0, %v4779_v63 }
 0x59e   : > { %v4782_v6 = vrot.slane %v4781_v40, 2 }
 0x5a0   : > { %v4783_v21 = vadd.f32 %v4782_v6, %v4781_v40 }
 0x5a2   : > { %v4784_v47 = vrot.slane %v4783_v21, 1 }
 0x5a4   : > { %v4785_v41 = vadd.f32 %v4784_v47, %v4783_v21  ;;  %v18989_v47 = vld [vmem:[#allocation3_spill] sm:$0xff] }
 0x5a6   : > { %11407 = vmatmul.mubr.f32.vlgmr.msra.gmra.mrb[2].mxu1 %v4785_v41 }
 0x5a7   : > { %12606 = vmatpush3.bf16.msra.mxu1 %v16088_v38  ;;  %11441 = vmatprep.mubr.msk.f32.mxu1 %vm18988_vm12, %v18935_v44  ;;  %vm19000_vm12 = vmmov %vm18999_vm14 }
 0x5a8   : > { %12607 = vmatprep.subr.bf16.mxu1 %v18987_v8 }
 0x5ab   : > { %12609 = vmatpush3.bf16.msra.mxu1 %v16098_v62 }
 0x5ac   : > { %12610 = vmatprep.subr.bf16.mxu1 %v18987_v8 }
 0x5af   : > { %12612 = vmatpush3.bf16.msra.mxu1 %v16108_v43 }
 0x5b0   : > { %12613 = vmatprep.subr.bf16.mxu1 %v18987_v8 }
 0x5b3   : > { %12615 = vmatpush3.bf16.msra.mxu1 %v16118_v55 }
 0x5b4   : > { %12616 = vmatprep.subr.bf16.mxu1 %v18987_v8 }
 0x5b7   : > { %12618 = vmatpush3.bf16.msra.mxu1 %v16131_v61 }
 0x5b8   : > { %12619 = vmatprep.subr.bf16.mxu1 %v18987_v8 }
 0x5bb   : > { %12621 = vmatpush3.bf16.msra.mxu1 %v16137_v54 }
 0x5bc   : > { %12622 = vmatprep.subr.bf16.mxu1 %v18987_v8 }
 0x5bf   : > { %12624 = vmatpush3.bf16.msra.mxu1 %v16147_v24 }
 0x5c0   : > { %12625 = vmatprep.subr.bf16.mxu1 %v18987_v8 }
 0x5c3   : > { %12627 = vmatpush3.bf16.msra.mxu1 %v16157_v58 }
 0x679   : > { %v4868_v41 = vpop.f32.mrb[2].mxu1 }
 0x67a   : > { %v4875_v6 = vrot.slane %v4868_v41, %v18989_v47  ;;  %v11408_v40 = vpop.f32.mrb[3].mxu1 }
 0x67c   : > { %v16268_v0 = vsub.f32 %v16164_v16, %v4875_v6  ;;  %v16271_v30 = vsub.f32 %v16162_v1, %v4875_v6  ;;  %v16274_v25 = vsub.f32 %v16170_v18, %v4875_v6  ;;  %v16277_v38 = vsub.f32 %v16168_v60, %v4875_v6 }
 0x67d   : > { %v16280_v8 = vsub.f32 %v16176_v2, %v4875_v6  ;;  %v16283_v62 = vsub.f32 %v16173_v45, %v4875_v6  ;;  %v16286_v43 = vsub.f32 %v16182_v42, %v4875_v6  ;;  %v16289_v55 = vsub.f32 %v16179_v7, %v4875_v6 }
 0x67e   : > { %v16292_v61 = vsub.f32 %v16188_v26, %v4875_v6  ;;  %v16295_v54 = vsub.f32 %v16185_v19, %v4875_v6  ;;  %v16298_v24 = vsub.f32 %v16194_v48, %v4875_v6  ;;  %v16301_v58 = vsub.f32 %v16191_v12, %v4875_v6 }
 0x67f   : > { %v16304_v1 = vsub.f32 %v16200_v20, %v4875_v6  ;;  %v16307_v16 = vsub.f32 %v16197_v34, %v4875_v6  ;;  %v16310_v60 = vsub.f32 %v16206_v17, %v4875_v6  ;;  %v16313_v18 = vsub.f32 %v16203_v5, %v4875_v6 }
 0x680   : > { %v16316_v45 = vsub.f32 %v16212_v36, %v4875_v6  ;;  %v16319_v2 = vsub.f32 %v16209_v53, %v4875_v6  ;;  %v16322_v7 = vsub.f32 %v16218_v31, %v4875_v6  ;;  %v16325_v20 = vsub.f32 %v16215_v4, %v4875_v6 }
 0x681   : > { %v16328_v42 = vsub.f32 %v16224_v29, %v4875_v6  ;;  %v16331_v17 = vsub.f32 %v16221_v32, %v4875_v6  ;;  %v16334_v5 = vsub.f32 %v16230_v49, %v4875_v6  ;;  %v16337_v36 = vsub.f32 %v16227_v28, %v4875_v6 }
 0x682   : > { %v16340_v53 = vsub.f32 %v16236_v23, %v4875_v6  ;;  %v16343_v31 = vsub.f32 %v16233_v35, %v4875_v6  ;;  %v16346_v4 = vsub.f32 %v16242_v22, %v4875_v6  ;;  %v16349_v29 = vsub.f32 %v16239_v39, %v4875_v6 }
 0x683   : > { %v16351_v32 = vsub.f32 %v4698_v37, %v4875_v6  ;;  %v16354_v49 = vsub.f32 %v16245_v52, %v4875_v6  ;;  %v16356_v19 = vsub.f32 %v4708_v15, %v4875_v6  ;;  %v16358_v28 = vsub.f32 %v11373_v57, %v4875_v6 }
 0x684   : > { %v4908_v23 = vmul.f32 %v16268_v0, %v16268_v0  ;;  %v4909_v35 = vmul.f32 %v16271_v30, %v16271_v30  ;;  %v4910_v22 = vmul.f32 %v16274_v25, %v16274_v25  ;;  %v4911_v37 = vmul.f32 %v16277_v38, %v16277_v38 }
 0x685   : > { %v4912_v15 = vmul.f32 %v16280_v8, %v16280_v8  ;;  %v4913_v57 = vmul.f32 %v16283_v62, %v16283_v62  ;;  %v4914_v48 = vmul.f32 %v16286_v43, %v16286_v43  ;;  %v4915_v9 = vmul.f32 %v16289_v55, %v16289_v55 }
 0x686   : > { %v4940_v39 = vadd.f32 %v4909_v35, %v4908_v23  ;;  %v4916_v3 = vmul.f32 %v16292_v61, %v16292_v61  ;;  %v4917_v63 = vmul.f32 %v16295_v54, %v16295_v54  ;;  %v4918_v41 = vmul.f32 %v16298_v24, %v16298_v24 }
 0x687   : > { %v4919_v40 = vmul.f32 %v16301_v58, %v16301_v58  ;;  %v4920_v35 = vmul.f32 %v16304_v1, %v16304_v1 }
 0x688   : > { %v4941_v26 = vadd.f32 %v4940_v39, %v4910_v22  ;;  %v4921_v39 = vmul.f32 %v16307_v16, %v16307_v16 }
 0x68a   : > { %v4942_v52 = vadd.f32 %v4941_v26, %v4911_v37  ;;  %v4922_v26 = vmul.f32 %v16310_v60, %v16310_v60 }
 0x68c   : > { %v4943_v12 = vadd.f32 %v4942_v52, %v4912_v15  ;;  %v4923_v52 = vmul.f32 %v16313_v18, %v16313_v18 }
 0x68e   : > { %v4944_v34 = vadd.f32 %v4943_v12, %v4913_v57  ;;  %v4924_v12 = vmul.f32 %v16316_v45, %v16316_v45 }
 0x690   : > { %v4945_v10 = vadd.f32 %v4944_v34, %v4914_v48  ;;  %v4925_v34 = vmul.f32 %v16319_v2, %v16319_v2 }
 0x692   : > { %v4946_v56 = vadd.f32 %v4945_v10, %v4915_v9  ;;  %v4926_v10 = vmul.f32 %v16322_v7, %v16322_v7 }
 0x694   : > { %v4947_v21 = vadd.f32 %v4946_v56, %v4916_v3  ;;  %v4927_v56 = vmul.f32 %v16325_v20, %v16325_v20 }
 0x696   : > { %v4948_v6 = vadd.f32 %v4947_v21, %v4917_v63  ;;  %v4928_v21 = vmul.f32 %v16328_v42, %v16328_v42 }
 0x698   : > { %v4949_v23 = vadd.f32 %v4948_v6, %v4918_v41  ;;  %v4929_v6 = vmul.f32 %v16331_v17, %v16331_v17 }
 0x69a   : > { %v4950_v22 = vadd.f32 %v4949_v23, %v4919_v40  ;;  %v4930_v23 = vmul.f32 %v16334_v5, %v16334_v5 }
 0x69c   : > { %v4951_v37 = vadd.f32 %v4950_v22, %v4920_v35  ;;  %v4931_v22 = vmul.f32 %v16337_v36, %v16337_v36 }
 0x69e   : > { %v4952_v15 = vadd.f32 %v4951_v37, %v4921_v39  ;;  %v4932_v37 = vmul.f32 %v16340_v53, %v16340_v53 }
 0x6a0   : > { %v4953_v57 = vadd.f32 %v4952_v15, %v4922_v26  ;;  %v4933_v15 = vmul.f32 %v16343_v31, %v16343_v31 }
 0x6a2   : > { %v4954_v48 = vadd.f32 %v4953_v57, %v4923_v52  ;;  %v4934_v57 = vmul.f32 %v16346_v4, %v16346_v4 }
 0x6a4   : > { %v4955_v9 = vadd.f32 %v4954_v48, %v4924_v12  ;;  %v4935_v48 = vmul.f32 %v16349_v29, %v16349_v29 }
 0x6a6   : > { %v4956_v3 = vadd.f32 %v4955_v9, %v4925_v34  ;;  %v4936_v9 = vmul.f32 %v16351_v32, %v16351_v32 }
 0x6a8   : > { %v4957_v63 = vadd.f32 %v4956_v3, %v4926_v10  ;;  %v4937_v3 = vmul.f32 %v16354_v49, %v16354_v49 }
 0x6aa   : > { %v4958_v41 = vadd.f32 %v4957_v63, %v4927_v56  ;;  %v4938_v63 = vmul.f32 %v16356_v19, %v16356_v19 }
 0x6ac   : > { %v4959_v40 = vadd.f32 %v4958_v41, %v4928_v21  ;;  %v4939_v41 = vmul.f32 %v16358_v28, %v16358_v28 }
 0x6ae   : > { %v4960_v35 = vadd.f32 %v4959_v40, %v4929_v6 }
 0x6b0   : > { %v4961_v39 = vadd.f32 %v4960_v35, %v4930_v23 }
 0x6b2   : > { %v4962_v26 = vadd.f32 %v4961_v39, %v4931_v22 }
 0x6b4   : > { %v4963_v52 = vadd.f32 %v4962_v26, %v4932_v37 }
 0x6b6   : > { %v4964_v12 = vadd.f32 %v4963_v52, %v4933_v15  ;;  %v9248_v15 = vld [vmem:[%s18277_s9 + $0x80] sm:$0xff]  ;;  %v9249_v52 = vld [vmem:[%s18277_s9 + $0x88] sm:$0xff] }
 0x6b8   : > { %v4965_v34 = vadd.f32 %v4964_v12, %v4934_v57  ;;  %v12628_v57 = vpack.c.bf16 %v9249_v52, %v9248_v15  ;;  %v9250_v12 = vld [vmem:[%s18277_s9 + $0x90] sm:$0xff]  ;;  %v9257_v15 = vld [vmem:[%s18277_s9 + $0xc8] sm:$0xff] }
 0x6ba   : > { %v4966_v10 = vadd.f32 %v4965_v34, %v4935_v48  ;;  %12629 = vmatprep.subr.bf16.mxu0 %v12628_v57  ;;  %v9251_v48 = vld [vmem:[%s18277_s9 + $0x98] sm:$0xff] }
 0x6bb   : > { %12631 = vmatpush3.bf16.msra.mxu0 %v12628_v57  ;;  %v12632_v34 = vpack.c.bf16 %v9251_v48, %v9250_v12  ;;  %v5648_v12 = vld [vmem:[%s18277_s9 + $0x30] sm:$0xff]  ;;  %v5649_v48 = vld [vmem:[%s18277_s9 + $0x38] sm:$0xff] }
 0x6bc   : > { %v4967_v56 = vadd.f32 %v4966_v10, %v4936_v9  ;;  %v5642_v9 = vld [vmem:[%s18277_s9] sm:$0xff]  ;;  %v5643_v10 = vld [vmem:[%s18277_s9 + $0x8] sm:$0xff] }
 0x6bd   : > { %12633 = vmatprep.subr.bf16.mxu0 %v12632_v34 }
 0x6be   : > { %v4968_v21 = vadd.f32 %v4967_v56, %v4937_v3  ;;  %v9252_v3 = vld [vmem:[%s18277_s9 + $0xa0] sm:$0xff]  ;;  %v12660_v56 = vpack.c.bf16 %v5643_v10, %v5642_v9  ;;  %v9259_v9 = vld [vmem:[%s18277_s9 + $0xd8] sm:$0xff]  ;;  %v12672_v10 = vpack.c.bf16 %v5649_v48, %v5648_v12  ;;  %v5655_v48 = vld [vmem:[%s18277_s9 + $0x68] sm:$0xff] }
 0x6bf   : > { %12635 = vmatpush3.bf16.msra.mxu0 %v12632_v34  ;;  %v9258_v34 = vld [vmem:[%s18277_s9 + $0xd0] sm:$0xff]  ;;  %v5654_v12 = vld [vmem:[%s18277_s9 + $0x60] sm:$0xff] }
 0x6c0   : > { %v4969_v6 = vadd.f32 %v4968_v21, %v4938_v63  ;;  %v9253_v63 = vld [vmem:[%s18277_s9 + $0xa8] sm:$0xff]  ;;  %v5644_v21 = vld [vmem:[%s18277_s9 + $0x10] sm:$0xff]  ;;  %12661 = vmatprep.subr.bf16.mxu1 %v12660_v56 }
 0x6c2   : > { %v4970_v40 = vadd.f32 %v4969_v6, %v4939_v41  ;;  %v5645_v41 = vld [vmem:[%s18277_s9 + $0x18] sm:$0xff]  ;;  %v12636_v6 = vpack.c.bf16 %v9253_v63, %v9252_v3  ;;  %v12648_v3 = vpack.c.bf16 %v9259_v9, %v9258_v34  ;;  %v5651_v63 = vld [vmem:[%s18277_s9 + $0x48] sm:$0xff]  ;;  %v12684_v34 = vpack.c.bf16 %v5655_v48, %v5654_v12  ;;  %v5656_v9 = vld [vmem:[%s18277_s9 + $0x70] sm:$0xff] }
 0x6c4   : > { %v4971_v23 = vrot.slane %v4970_v40, 4  ;;  %12637 = vmatprep.subr.bf16.mxu0 %v12636_v6 }
 0x6c5   : > { %12639 = vmatpush3.bf16.msra.mxu0 %v12636_v6 }
 0x6c6   : > { %v4972_v35 = vadd.f32 %v4971_v23, %v4970_v40  ;;  %v12664_v40 = vpack.c.bf16 %v5645_v41, %v5644_v21  ;;  %v9254_v23 = vld [vmem:[%s18277_s9 + $0xb0] sm:$0xff]  ;;  %v9260_v21 = vld [vmem:[%s18277_s9 + $0xe0] sm:$0xff]  ;;  %v9261_v41 = vld [vmem:[%s18277_s9 + $0xe8] sm:$0xff] }
 0x6c8   : > { %v4973_v22 = vrot.slane %v4972_v35, 2 }
 0x6ca   : > { %v4974_v39 = vadd.f32 %v4973_v22, %v4972_v35  ;;  %v9255_v35 = vld [vmem:[%s18277_s9 + $0xb8] sm:$0xff]  ;;  %v5646_v22 = vld [vmem:[%s18277_s9 + $0x20] sm:$0xff] }
 0x6cc   : > { %v4975_v37 = vrot.slane %v4974_v39, 1 }
 0x6ce   : > { %v4976_v26 = vadd.f32 %v4975_v37, %v4974_v39  ;;  %v12640_v39 = vpack.c.bf16 %v9255_v35, %v9254_v23  ;;  %v5647_v37 = vld [vmem:[%s18277_s9 + $0x28] sm:$0xff]  ;;  %v12652_v35 = vpack.c.bf16 %v9261_v41, %v9260_v21 }
 0x6cf   : > { %v12668_v52 = vpack.c.bf16 %v5647_v37, %v5646_v22  ;;  %v5652_v22 = vld [vmem:[%s18277_s9 + $0x50] sm:$0xff] }
 0x6d0   : > { %11442 = vmatmul.mubr.f32.vlgmr.msra.gmra.mrb[4].mxu1 %v4976_v26  ;;  %v9256_v26 = vld [vmem:[%s18277_s9 + $0xc0] sm:$0xff]  ;;  %12641 = vmatprep.subr.bf16.mxu0 %v12640_v39  ;;  %v9262_v37 = vld [vmem:[%s18277_s9 + $0xf0] sm:$0xff] }
 0x6d1   : > { %12663 = vmatpush3.bf16.msra.mxu1 %v12660_v56  ;;  %v12644_v57 = vpack.c.bf16 %v9257_v15, %v9256_v26  ;;  %12643 = vmatpush3.bf16.msra.mxu0 %v12640_v39  ;;  %v5650_v56 = vld [vmem:[%s18277_s9 + $0x40] sm:$0xff]  ;;  %v5653_v39 = vld [vmem:[%s18277_s9 + $0x58] sm:$0xff] }
 0x6d2   : > { %12665 = vmatprep.subr.bf16.mxu1 %v12664_v40  ;;  %v12676_v23 = vpack.c.bf16 %v5651_v63, %v5650_v56  ;;  %v9263_v26 = vld [vmem:[%s18277_s9 + $0xf8] sm:$0xff]  ;;  %v12680_v15 = vpack.c.bf16 %v5653_v39, %v5652_v22  ;;  %v9296_v56 = vld [vmem:[%s18277_s9 + $0x100] sm:$0xff]  ;;  %v9297_v63 = vld [vmem:[%s18277_s9 + $0x108] sm:$0xff] }
 0x6d3   : > { %12645 = vmatprep.subr.bf16.mxu0 %v12644_v57  ;;  %v16527_v21 = vpack.c.bf16 %v9297_v63, %v9296_v56 }
 0x6d5   : > { %12667 = vmatpush3.bf16.msra.mxu1 %v12664_v40  ;;  %12647 = vmatpush3.bf16.msra.mxu0 %v12644_v57  ;;  %v12656_v57 = vpack.c.bf16 %v9263_v26, %v9262_v37 }
 0x6d6   : > { %12669 = vmatprep.subr.bf16.mxu1 %v12668_v52  ;;  %12649 = vmatprep.subr.bf16.mxu0 %v12648_v3 }
 0x6d9   : > { %12671 = vmatpush3.bf16.msra.mxu1 %v12668_v52  ;;  %12651 = vmatpush3.bf16.msra.mxu0 %v12648_v3 }
 0x6da   : > { %12673 = vmatprep.subr.bf16.mxu1 %v12672_v10  ;;  %12653 = vmatprep.subr.bf16.mxu0 %v12652_v35 }
 0x6dd   : > { %12675 = vmatpush3.bf16.msra.mxu1 %v12672_v10  ;;  %12655 = vmatpush3.bf16.msra.mxu0 %v12652_v35  ;;  %v5657_v10 = vld [vmem:[%s18277_s9 + $0x78] sm:$0xff]  ;;  %v16540_v35 = vld [vmem:[%s18274_s6] ss:$0 sm:$0xff] }
 0x6de   : > { %12677 = vmatprep.subr.bf16.mxu1 %v12676_v23  ;;  %12657 = vmatprep.subr.bf16.mxu0 %v12656_v57  ;;  %v12688_v3 = vpack.c.bf16 %v5657_v10, %v5656_v9 }
 0x6e1   : > { %12679 = vmatpush3.bf16.msra.mxu1 %v12676_v23  ;;  %12659 = vmatpush3.bf16.msra.mxu0 %v12656_v57 }
 0x6e2   : > { %12681 = vmatprep.subr.bf16.mxu1 %v12680_v15 }
 0x6e4   : > { %11477 = vmatmul.mubr.f32.vlgmr.msra.gmra.mrb[34].mxu0 %v18935_v44 }
 0x6e5   : > { %12683 = vmatpush3.bf16.msra.mxu1 %v12680_v15 }
 0x6e6   : > { %12685 = vmatprep.subr.bf16.mxu1 %v12684_v34 }
 0x6e9   : > { %12687 = vmatpush3.bf16.msra.mxu1 %v12684_v34 }
 0x6ea   : > { %12689 = vmatprep.subr.bf16.mxu1 %v12688_v3 }
 0x6ed   : > { %12691 = vmatpush3.bf16.msra.mxu1 %v12688_v3 }
 0x6ee   : > { %12693 = vmatprep.subr.bf16.mxu1 %v16527_v21 }
 0x7a3   : > { %v5043_v6 = vpop.f32.mrb[4].mxu1 }
 0x7a4   : > { %v11443_v40 = vpop.f32.mrb[5].mxu1  ;;  %v5044_v52 = vadd.f32 1e-08, %v5043_v6 }
 0x7a6   : > { %13633 = vrsqrt.f32 %v5044_v52 }
 0x7b0   : > { %v13634_v41 = vpop.eup %13633 }
 0x7b1   : > { %v16531_v6 = vrot.slane %v13634_v41, %v18989_v47  ;;  %v16547_v47 = vld [vmem:[%s18275_s7] ss:$0 sm:$0xff] }
 0x7b3   : > { %v5082_v40 = vmul.f32 %v16531_v6, %v16356_v19  ;;  %v5083_v23 = vmul.f32 %v16531_v6, %v16358_v28  ;;  %v5052_v28 = vmul.f32 %v16531_v6, %v16268_v0  ;;  %v5053_v26 = vmul.f32 %v16531_v6, %v16271_v30 }
 0x7b4   : > { %v5054_v15 = vmul.f32 %v16531_v6, %v16274_v25  ;;  %v5055_v52 = vmul.f32 %v16531_v6, %v16277_v38  ;;  %v5056_v57 = vmul.f32 %v16531_v6, %v16280_v8  ;;  %v5057_v0 = vmul.f32 %v16531_v6, %v16283_v62 }
 0x7b5   : > { %v5121_v22 = vmul.f32 %v16540_v35, %v5082_v40  ;;  %v5122_v39 = vmul.f32 %v16540_v35, %v5083_v23  ;;  %v5091_v12 = vmul.f32 %v16540_v35, %v5052_v28  ;;  %v5092_v48 = vmul.f32 %v16540_v35, %v5053_v26 }
 0x7b6   : > { %v5093_v34 = vmul.f32 %v16540_v35, %v5054_v15  ;;  %v5094_v30 = vmul.f32 %v16540_v35, %v5055_v52  ;;  %v5058_v25 = vmul.f32 %v16531_v6, %v16286_v43  ;;  %v5095_v9 = vmul.f32 %v16540_v35, %v5056_v57 }
 0x7b7   : > { %v16550_v37 = vadd.f32 %v16547_v47, %v5121_v22  ;;  %v16553_v19 = vadd.f32 %v16547_v47, %v5122_v39  ;;  %v16575_v38 = vadd.f32 %v16547_v47, %v5091_v12  ;;  %v16578_v8 = vadd.f32 %v16547_v47, %v5092_v48 }
 0x7b8   : > { %v5059_v10 = vmul.f32 %v16531_v6, %v16289_v55  ;;  %v16583_v3 = vadd.f32 %v16547_v47, %v5093_v34  ;;  %v5060_v62 = vmul.f32 %v16531_v6, %v16292_v61  ;;  %v5096_v56 = vmul.f32 %v16540_v35, %v5057_v0 }
 0x7b9   : > { %18990 = vst [vmem:[#allocation46_spill] sm:$0xff] %v16550_v37  ;;  %v16589_v43 = vadd.f32 %v16547_v47, %v5094_v30  ;;  %v5061_v63 = vmul.f32 %v16531_v6, %v16295_v54  ;;  %v5097_v41 = vmul.f32 %v16540_v35, %v5058_v25  ;;  %v16595_v40 = vadd.f32 %v16547_v47, %v5095_v9 }
 0x7ba   : > { %v9216_v55 = vmul.f32 -1.442695, %v16575_v38  ;;  %v5062_v23 = vmul.f32 %v16531_v6, %v16298_v24  ;;  %v9217_v61 = vmul.f32 -1.442695, %v16578_v8  ;;  %v5063_v22 = vmul.f32 %v16531_v6, %v16301_v58 }
 0x7bb   : > { %v5064_v39 = vmul.f32 %v16531_v6, %v16304_v1  ;;  %v5098_v54 = vmul.f32 %v16540_v35, %v5059_v10  ;;  %v9218_v28 = vmul.f32 -1.442695, %v16583_v3  ;;  %v5065_v26 = vmul.f32 %v16531_v6, %v16307_v16 }
 0x7bc   : > { %v5099_v15 = vmul.f32 %v16540_v35, %v5060_v62  ;;  %v16611_v52 = vadd.f32 %v16547_v47, %v5096_v56  ;;  %v9219_v24 = vmul.f32 -1.442695, %v16589_v43  ;;  %v5100_v57 = vmul.f32 %v16540_v35, %v5061_v63 }
 0x7bd   : > { %v16616_v58 = vadd.f32 %v16547_v47, %v5097_v41  ;;  %13635 = vpow2.f32 %v9216_v55  ;;  %v9220_v1 = vmul.f32 -1.442695, %v16595_v40  ;;  %v5101_v12 = vmul.f32 %v16540_v35, %v5062_v23 }
 0x7be   : > { %13637 = vpow2.f32 %v9217_v61  ;;  %v5102_v16 = vmul.f32 %v16540_v35, %v5063_v22  ;;  %v16622_v48 = vadd.f32 %v16547_v47, %v5098_v54  ;;  %v5103_v34 = vmul.f32 %v16540_v35, %v5064_v39 }
 0x7bf   : > { %13639 = vpow2.f32 %v9218_v28  ;;  %v16626_v0 = vadd.f32 %v16547_v47, %v5099_v15  ;;  %v9221_v30 = vmul.f32 -1.442695, %v16611_v52  ;;  %v5104_v25 = vmul.f32 %v16540_v35, %v5065_v26 }
 0x7c0   : > { %13641 = vpow2.f32 %v9219_v24  ;;  %v16631_v9 = vadd.f32 %v16547_v47, %v5100_v57  ;;  %v9222_v10 = vmul.f32 -1.442695, %v16616_v58  ;;  %v16635_v62 = vadd.f32 %v16547_v47, %v5101_v12 }
 0x7c1   : > { %13643 = vpow2.f32 %v9220_v1  ;;  %v5066_v56 = vmul.f32 %v16531_v6, %v16310_v60  ;;  %v16640_v63 = vadd.f32 %v16547_v47, %v5102_v16  ;;  %v9223_v41 = vmul.f32 -1.442695, %v16622_v48 }
 0x7c2   : > { %v5067_v55 = vmul.f32 %v16531_v6, %v16313_v18  ;;  %v16646_v23 = vadd.f32 %v16547_v47, %v5103_v34  ;;  %13645 = vpow2.f32 %v9221_v30  ;;  %v9224_v61 = vmul.f32 -1.442695, %v16626_v0 }
 0x7c3   : > { %v16650_v22 = vadd.f32 %v16547_v47, %v5104_v25  ;;  %13647 = vpow2.f32 %v9222_v10  ;;  %v9225_v60 = vmul.f32 -1.442695, %v16631_v9  ;;  %v9226_v39 = vmul.f32 -1.442695, %v16635_v62 }
 0x7c4   : > { %v5068_v28 = vmul.f32 %v16531_v6, %v16316_v45  ;;  %v5105_v18 = vmul.f32 %v16540_v35, %v5066_v56  ;;  %13649 = vpow2.f32 %v9223_v41  ;;  %v9227_v26 = vmul.f32 -1.442695, %v16640_v63 }
 0x7c5   : > { %v5081_v24 = vmul.f32 %v16531_v6, %v16354_v49  ;;  %v5106_v57 = vmul.f32 %v16540_v35, %v5067_v55  ;;  %13651 = vpow2.f32 %v9224_v61  ;;  %v9228_v1 = vmul.f32 -1.442695, %v16646_v23 }
 0x7c6   : > { %13653 = vpow2.f32 %v9225_v60  ;;  %v9229_v16 = vmul.f32 -1.442695, %v16650_v22  ;;  %v5069_v45 = vmul.f32 %v16531_v6, %v16319_v2  ;;  %v5070_v30 = vmul.f32 %v16531_v6, %v16322_v7 }
 0x7c7   : > { %v13636_v54 = vpop.eup %13635  ;;  %13655 = vpow2.f32 %v9226_v39  ;;  %v5107_v49 = vmul.f32 %v16540_v35, %v5068_v28  ;;  %v16669_v56 = vadd.f32 %v16547_v47, %v5105_v18  ;;  %v5120_v55 = vmul.f32 %v16540_v35, %v5081_v24 }
 0x7c8   : > { %v13638_v15 = vpop.eup %13637  ;;  %v5258_v25 = vadd.f32 1.0, %v13636_v54  ;;  %13657 = vpow2.f32 %v9227_v26  ;;  %v16673_v61 = vadd.f32 %v16547_v47, %v5106_v57  ;;  %v5071_v39 = vmul.f32 %v16531_v6, %v16325_v20 }
 0x7c9   : > { %v13640_v12 = vpop.eup %13639  ;;  %v5259_v41 = vadd.f32 1.0, %v13638_v15  ;;  %13659 = vpow2.f32 %v9228_v1  ;;  %v5072_v54 = vmul.f32 %v16531_v6, %v16328_v42  ;;  %v5108_v26 = vmul.f32 %v16540_v35, %v5069_v45 }
 0x7ca   : > { %v13642_v34 = vpop.eup %13641  ;;  %v5260_v2 = vadd.f32 1.0, %v13640_v12  ;;  %13661 = vpow2.f32 %v9229_v16  ;;  %v16681_v15 = vadd.f32 %v16547_v47, %v5107_v49  ;;  %v9230_v24 = vmul.f32 -1.442695, %v16669_v56 }
 0x7cb   : > { %v13644_v10 = vpop.eup %13643  ;;  %v5261_v60 = vadd.f32 1.0, %v13642_v34  ;;  %13663 = vrcp.f32 %v5258_v25  ;;  %v5109_v57 = vmul.f32 %v16540_v35, %v5070_v30  ;;  %v16686_v1 = vadd.f32 %v16547_v47, %v5120_v55 }
 0x7cc   : > { %v13646_v7 = vpop.eup %13645  ;;  %v5262_v28 = vadd.f32 1.0, %v13644_v10  ;;  %13665 = vrcp.f32 %v5259_v41  ;;  %v9231_v20 = vmul.f32 -1.442695, %v16673_v61  ;;  %v5073_v34 = vmul.f32 %v16531_v6, %v16331_v17 }
 0x7cd   : > { %v13648_v18 = vpop.eup %13647  ;;  %13667 = vrcp.f32 %v5260_v2  ;;  %v5263_v12 = vadd.f32 1.0, %v13646_v7  ;;  %v5074_v45 = vmul.f32 %v16531_v6, %v16334_v5  ;;  %v5110_v30 = vmul.f32 %v16540_v35, %v5071_v39 }
 0x7ce   : > { %v13650_v42 = vpop.eup %13649  ;;  %13669 = vrcp.f32 %v5261_v60  ;;  %v5264_v25 = vadd.f32 1.0, %v13648_v18  ;;  %v16695_v49 = vadd.f32 %v16547_v47, %v5108_v26  ;;  %v9232_v41 = vmul.f32 -1.442695, %v16681_v15 }
 0x7cf   : > { %v13652_v16 = vpop.eup %13651  ;;  %13671 = vrcp.f32 %v5262_v28  ;;  %v5111_v2 = vmul.f32 %v16540_v35, %v5072_v54  ;;  %v16700_v60 = vadd.f32 %v16547_v47, %v5109_v57  ;;  %v9245_v17 = vmul.f32 -1.442695, %v16686_v1 }
 0x7d0   : > { %v13654_v10 = vpop.eup %13653  ;;  %13673 = vpow2.f32 %v9230_v24  ;;  %v5265_v7 = vadd.f32 1.0, %v13650_v42  ;;  %v5075_v39 = vmul.f32 %v16531_v6, %v16337_v36  ;;  %v5076_v18 = vmul.f32 %v16531_v6, %v16340_v53 }
 0x7d1   : > { %v13656_v55 = vpop.eup %13655  ;;  %13675 = vpow2.f32 %v9231_v20  ;;  %v5266_v26 = vadd.f32 1.0, %v13652_v16  ;;  %v5112_v54 = vmul.f32 %v16540_v35, %v5073_v34  ;;  %v16709_v57 = vadd.f32 %v16547_v47, %v5110_v30 }
 0x7d2   : > { %v13658_v5 = vpop.eup %13657  ;;  %13677 = vrcp.f32 %v5263_v12  ;;  %v9233_v20 = vmul.f32 -1.442695, %v16695_v49  ;;  %v5113_v12 = vmul.f32 %v16540_v35, %v5074_v45  ;;  %v16714_v44 = vadd.f32 %v16547_v47, %v5111_v2 }
 0x7d3   : > { %v13660_v28 = vpop.eup %13659  ;;  %13679 = vrcp.f32 %v5264_v25  ;;  %v9234_v36 = vmul.f32 -1.442695, %v16700_v60  ;;  %v5077_v16 = vmul.f32 %v16531_v6, %v16343_v31  ;;  %v5267_v34 = vadd.f32 1.0, %v13654_v10 }
 0x7d4   : > { %v13662_v24 = vpop.eup %13661  ;;  %13681 = vpow2.f32 %v9232_v41  ;;  %v5114_v41 = vmul.f32 %v16540_v35, %v5075_v39  ;;  %v5268_v37 = vadd.f32 1.0, %v13656_v55  ;;  %v9235_v31 = vmul.f32 -1.442695, %v16709_v57 }
 0x7d5   : > { %v13664_v42 = vpop.eup %13663  ;;  %13683 = vpow2.f32 %v9245_v17  ;;  %v16727_v17 = vadd.f32 %v16547_v47, %v5112_v54  ;;  %v16736_v55 = vadd.f32 %v16547_v47, %v5113_v12  ;;  %v5269_v54 = vadd.f32 1.0, %v13658_v5 }
 0x7d6   : > { %v13666_v53 = vpop.eup %13665  ;;  %13685 = vrcp.f32 %v5265_v7  ;;  %v16720_v25 = vmul.f32 %v13664_v42, %v16575_v38  ;;  %v5115_v7 = vmul.f32 %v16540_v35, %v5076_v18  ;;  %v5079_v18 = vmul.f32 %v16531_v6, %v16349_v29 }
 0x7d7   : > { %v13668_v30 = vpop.eup %13667  ;;  %13687 = vrcp.f32 %v5266_v26  ;;  %v16724_v45 = vmul.f32 %v13666_v53, %v16578_v8  ;;  %v9236_v8 = vmul.f32 -1.442695, %v16714_v44  ;;  %v5078_v26 = vmul.f32 %v16531_v6, %v16346_v4 }
 0x7d8   : > { %18991 = vst [vmem:[#allocation49_spill] sm:$0xff] %v16720_v25  ;;  %v13670_v2 = vpop.eup %13669  ;;  %13689 = vpow2.f32 %v9233_v20  ;;  %v16731_v10 = vmul.f32 %v13668_v30, %v16583_v3  ;;  %11479 = vmatprep.mubr.f32.mxu0 %v16720_v25  ;;  %v5270_v20 = vadd.f32 1.0, %v13660_v28  ;;  %v9237_v4 = vmul.f32 -1.442695, %v16727_v17 }
 0x7d9   : > { %18992 = vst [vmem:[#allocation51_spill] sm:$0xff] %v16724_v45  ;;  %v13672_v38 = vpop.eup %13671  ;;  %13691 = vpow2.f32 %v9234_v36  ;;  %11480 = vmatmul.mubr.f32.gmra.mrb[36].mxu0 %v16724_v45  ;;  %v16746_v42 = vmul.f32 %v13670_v2, %v16589_v43  ;;  %v16749_v36 = vadd.f32 %v16547_v47, %v5114_v41  ;;  %v16757_v29 = vadd.f32 %v16547_v47, %v5115_v7 }
 0x7da   : > { %18993 = vst [vmem:[#allocation19_spill] sm:$0xff] %v16731_v10  ;;  %v13674_v39 = vpop.eup %13673  ;;  %13693 = vrcp.f32 %v5267_v34  ;;  %11482 = vmatprep.mubr.f32.mxu0 %v16731_v10  ;;  %v16753_v5 = vmul.f32 %v13672_v38, %v16595_v40  ;;  %v5116_v34 = vmul.f32 %v16540_v35, %v5077_v16  ;;  %v5080_v28 = vmul.f32 %v16531_v6, %v16351_v32 }
 0x7db   : > { %v13676_v3 = vpop.eup %13675  ;;  %13695 = vrcp.f32 %v5268_v37  ;;  %v9238_v37 = vmul.f32 -1.442695, %v16736_v55  ;;  %v5271_v30 = vadd.f32 1.0, %v13662_v24  ;;  %v5117_v41 = vmul.f32 %v16540_v35, %v5078_v26 }
 0x7dc   : > { %v13678_v12 = vpop.eup %13677  ;;  %13697 = vpow2.f32 %v9235_v31  ;;  %18994 = vst [vmem:[#allocation4_spill] sm:$0xff] %v16753_v5  ;;  %v5272_v16 = vadd.f32 1.0, %v13674_v39  ;;  %v9239_v38 = vmul.f32 -1.442695, %v16749_v36  ;;  %v5118_v6 = vmul.f32 %v16540_v35, %v5079_v18 }
 0x7dd   : > { %v13680_v53 = vpop.eup %13679  ;;  %13699 = vpow2.f32 %v9236_v8  ;;  %11483 = vmatmul.mubr.f32.gmra.mrb[38].mxu0 %v16746_v42  ;;  %v16766_v2 = vmul.f32 %v13678_v12, %v16611_v52  ;;  %v16774_v24 = vadd.f32 %v16547_v47, %v5116_v34  ;;  %v9240_v8 = vmul.f32 -1.442695, %v16757_v29 }
 0x7de   : > { %v13682_v43 = vpop.eup %13681  ;;  %13701 = vrcp.f32 %v5269_v54  ;;  %11485 = vmatprep.mubr.f32.mxu0 %v16753_v5  ;;  %v16770_v7 = vmul.f32 %v13680_v53, %v16616_v58  ;;  %v5119_v39 = vmul.f32 %v16540_v35, %v5080_v28  ;;  %v5273_v26 = vadd.f32 1.0, %v13676_v3 }
 0x7df   : > { %v13684_v40 = vpop.eup %13683  ;;  %13703 = vrcp.f32 %v5270_v20  ;;  %v16781_v54 = vadd.f32 %v16547_v47, %v5117_v41  ;;  %v5274_v18 = vadd.f32 1.0, %v13682_v43  ;;  %v16790_v3 = vadd.f32 %v16547_v47, %v5118_v6 }
 0x7e0   : > { %v13686_v31 = vpop.eup %13685  ;;  %13705 = vpow2.f32 %v9237_v4  ;;  %v5287_v4 = vadd.f32 1.0, %v13684_v40  ;;  %v9241_v34 = vmul.f32 -1.442695, %v16774_v24  ;;  %v16796_v28 = vadd.f32 %v16547_v47, %v5119_v39 }
 0x7e1   : > { %v13688_v32 = vpop.eup %13687  ;;  %13707 = vpow2.f32 %v9238_v37  ;;  %11486 = vmatmul.mubr.f32.gmra.mrb[40].mxu0 %v16766_v2  ;;  %v16784_v20 = vmul.f32 %v13686_v31, %v16622_v48 }
 0x7e2   : > { %v13690_v52 = vpop.eup %13689  ;;  %13709 = vrcp.f32 %v5271_v30  ;;  %11488 = vmatprep.mubr.f32.mxu0 %v16770_v7  ;;  %v16787_v53 = vmul.f32 %v13688_v32, %v16626_v0  ;;  %v9242_v0 = vmul.f32 -1.442695, %v16781_v54 }
 0x7e3   : > { %v13692_v58 = vpop.eup %13691  ;;  %13711 = vrcp.f32 %v5272_v16  ;;  %v5275_v43 = vadd.f32 1.0, %v13690_v52 }
 0x7e4   : > { %v13694_v12 = vpop.eup %13693  ;;  %13713 = vpow2.f32 %v9239_v38  ;;  %v5276_v41 = vadd.f32 1.0, %v13692_v58  ;;  %v9243_v38 = vmul.f32 -1.442695, %v16790_v3 }
 0x7e5   : > { %v13696_v35 = vpop.eup %13695  ;;  %13715 = vpow2.f32 %v9240_v8  ;;  %11489 = vmatmul.mubr.f32.gmra.mrb[42].mxu0 %v16784_v20  ;;  %v16800_v30 = vmul.f32 %v13694_v12, %v16631_v9  ;;  %v9244_v9 = vmul.f32 -1.442695, %v16796_v28 }
 0x7e6   : > { %v13698_v37 = vpop.eup %13697  ;;  %13717 = vrcp.f32 %v5273_v26  ;;  %11491 = vmatprep.mubr.f32.mxu0 %v16787_v53  ;;  %v16803_v16 = vmul.f32 %v13696_v35, %v16635_v62 }
 0x7e7   : > { %v13700_v48 = vpop.eup %13699  ;;  %13719 = vrcp.f32 %v5274_v18  ;;  %v5277_v32 = vadd.f32 1.0, %v13698_v37 }
 0x7e8   : > { %v13702_v40 = vpop.eup %13701  ;;  %13721 = vrcp.f32 %v5287_v4  ;;  %v5278_v52 = vadd.f32 1.0, %v13700_v48 }
 0x7e9   : > { %v13704_v31 = vpop.eup %13703  ;;  %13723 = vpow2.f32 %v9241_v34  ;;  %11492 = vmatmul.mubr.f32.gmra.mrb[44].mxu0 %v16800_v30  ;;  %v16810_v8 = vmul.f32 %v13702_v40, %v16640_v63 }
 0x7ea   : > { %v13706_v47 = vpop.eup %13705  ;;  %13725 = vrcp.f32 %v5275_v43  ;;  %11494 = vmatprep.mubr.f32.mxu0 %v16803_v16  ;;  %v16813_v39 = vmul.f32 %v13704_v31, %v16646_v23  ;;  %v9298_v31 = vld [vmem:[%s18277_s9 + $0x110] sm:$0xff] }
 0x7eb   : > { %v13708_v6 = vpop.eup %13707  ;;  %13727 = vpow2.f32 %v9242_v0  ;;  %18995 = vst [vmem:[#allocation5_spill] sm:$0xff] %v16810_v8  ;;  %v5279_v18 = vadd.f32 1.0, %v13706_v47 }
 0x7ec   : > { %v13710_v62 = vpop.eup %13709  ;;  %13729 = vrcp.f32 %v5276_v41  ;;  %18996 = vst [vmem:[#allocation6_spill] sm:$0xff] %v16813_v39  ;;  %v5280_v35 = vadd.f32 1.0, %v13708_v6 }
 0x7ed   : > { %v13712_v26 = vpop.eup %13711  ;;  %13731 = vpow2.f32 %v9243_v38  ;;  %11495 = vmatmul.mubr.f32.gmra.mrb[46].mxu0 %v16810_v8  ;;  %v16818_v63 = vmul.f32 %v13710_v62, %v16650_v22  ;;  %v9299_v38 = vld [vmem:[%s18277_s9 + $0x118] sm:$0xff] }
 0x7ee   : > { %v13714_v58 = vpop.eup %13713  ;;  %13733 = vrcp.f32 %v5277_v32  ;;  %11497 = vmatprep.mubr.f32.mxu0 %v16813_v39  ;;  %v16821_v23 = vmul.f32 %v13712_v26, %v16669_v56 }
 0x7ef   : > { %v13716_v12 = vpop.eup %13715  ;;  %13735 = vpow2.f32 %v9244_v9  ;;  %v5281_v43 = vadd.f32 1.0, %v13714_v58 }
 0x7f0   : > { %v13718_v4 = vpop.eup %13717  ;;  %13737 = vrcp.f32 %v5278_v52  ;;  %v5282_v41 = vadd.f32 1.0, %v13716_v12  ;;  %v12696_v52 = vpack.c.bf16 %v9299_v38, %v9298_v31  ;;  %v9300_v12 = vld [vmem:[%s18277_s9 + $0x120] sm:$0xff] }
 0x7f1   : > { %v13720_v34 = vpop.eup %13719  ;;  %11498 = vmatmul.mubr.f32.gmra.mrb[48].mxu0 %v16818_v63  ;;  %13739 = vrcp.f32 %v5279_v18  ;;  %v16826_v0 = vmul.f32 %v13718_v4, %v16673_v61  ;;  %v5453_v18 = vrot.slane %v16724_v45, 7 }
 0x7f2   : > { %v13722_v37 = vpop.eup %13721  ;;  %11500 = vmatprep.mubr.f32.mxu0 %v16821_v23  ;;  %13741 = vrcp.f32 %v5280_v35  ;;  %v16832_v56 = vmul.f32 %v13720_v34, %v16681_v15 }
 0x7f3   : > { %v13724_v48 = vpop.eup %13723  ;;  %v16829_v22 = vmul.f32 %v13722_v37, %v16686_v1  ;;  %v16844_v1 = vrot.slane %v16720_v25, 7  ;;  %13743 = vrcp.f32 %v5281_v43  ;;  %v16873_v37 = vrot.slane %v16731_v10, 7 }
 0x7f4   : > { %v13726_v40 = vpop.eup %13725  ;;  %v5283_v15 = vadd.f32 1.0, %v13724_v48  ;;  %13745 = vrcp.f32 %v5282_v41  ;;  %v5467_v51 = vrot.slane %v16826_v0, 7 }
 0x7f5   : > { %18997 = vst [vmem:[#allocation9_spill] sm:$0xff] %v16829_v22  ;;  %v13728_v47 = vpop.eup %13727  ;;  %v16841_v61 = vrot.slane %v16829_v22, 7  ;;  %11501 = vmatmul.mubr.f32.gmra.mrb[50].mxu0 %v16826_v0  ;;  %v16849_v9 = vmul.f32 %v13726_v40, %v16695_v49  ;;  %v9301_v49 = vld [vmem:[%s18277_s9 + $0x128] sm:$0xff]  ;;  %v5511_v34 = vsel %vm19000_vm12, %v18891_v11, %v16844_v1  ;;  %19001 = vst [vmem:[#allocation12_spill] sm:$0xff] %v16873_v37 }
 0x7f6   : > { %v13730_v32 = vpop.eup %13729  ;;  %11503 = vmatprep.mubr.f32.mxu0 %v16832_v56  ;;  %v5284_v58 = vadd.f32 1.0, %v13728_v47  ;;  %13747 = vrcp.f32 %v5283_v15  ;;  %v12700_v40 = vpack.c.bf16 %v9301_v49, %v9300_v12  ;;  %v9302_v47 = vld [vmem:[%s18277_s9 + $0x130] sm:$0xff]  ;;  %v16902_v15 = vsel %vm19000_vm12, %v5453_v18, %v16873_v37 }
 0x7f7   : > { %18998 = vst [vmem:[#allocation11_spill] sm:$0xff] %v16841_v61  ;;  %v13732_v6 = vpop.eup %13731  ;;  %v5513_v62 = vsel %vm18999_vm14, %v16841_v61, %v18891_v11  ;;  %v16865_v35 = vmul.f32 %v13730_v32, %v16700_v60  ;;  %vm19002_vm14 = vmmov %vm19000_vm12  ;;  %v5457_v12 = vrot.slane %v16766_v2, 7 }
 0x7f8   : > { %v13734_v26 = vpop.eup %13733  ;;  %11556 = vmatprep.mubr.msk.f32.mxu1 %vm14738_vm2, %v5513_v62  ;;  %v5285_v48 = vadd.f32 1.0, %v13732_v6  ;;  %13749 = vrcp.f32 %v5284_v58  ;;  %v16886_v38 = vsel %vm19002_vm14, %v16844_v1, %v5453_v18  ;;  %v5456_v6 = vrot.slane %v16753_v5, 7  ;;  %vm19003_vm14 = vmmov %vm19000_vm12 }
 0x7f9   : > { %v13736_v4 = vpop.eup %13735  ;;  %11557 = vmatmul.mubr.f32.vlgmr.msra.gmra.mrb[6].mxu1 %v18891_v11  ;;  %11504 = vmatmul.mubr.f32.gmra.mrb[52].mxu0 %v16849_v9  ;;  %v16880_v60 = vmul.f32 %v13734_v26, %v16709_v57  ;;  %v9303_v57 = vld [vmem:[%s18277_s9 + $0x138] sm:$0xff]  ;;  %v9310_v11 = vld [vmem:[%s18277_s9 + $0x170] sm:$0xff] }
 0x7fa   : > { %v13738_v43 = vpop.eup %13737  ;;  %12695 = vmatpush3.bf16.msra.mxu1 %v16527_v21  ;;  %11559 = vmatprep.mubr.msk.f32.mxu1 %vm14759_vm3, %v5511_v34  ;;  %v5286_v31 = vadd.f32 1.0, %v13736_v4  ;;  %v5455_v21 = vrot.slane %v16746_v42, 7  ;;  %13751 = vrcp.f32 %v5285_v48  ;;  %v12704_v26 = vpack.c.bf16 %v9303_v57, %v9302_v47  ;;  %v9306_v47 = vld [vmem:[%s18277_s9 + $0x150] sm:$0xff] }
 0x7fb   : > { %12697 = vmatprep.subr.bf16.mxu1 %v12696_v52  ;;  %11506 = vmatprep.mubr.f32.mxu0 %v16865_v35  ;;  %v13740_v41 = vpop.eup %13739  ;;  %v16896_v32 = vmul.f32 %v13738_v43, %v16714_v44  ;;  %v5458_v34 = vrot.slane %v16770_v7, 7 }
 0x7fc   : > { %v13742_v62 = vpop.eup %13741  ;;  %v16910_v44 = vmul.f32 %v13740_v41, %v16727_v17  ;;  %13753 = vrcp.f32 %v5286_v31  ;;  %v16916_v18 = vsel %vm19003_vm14, %v16873_v37, %v5455_v21  ;;  %v9305_v17 = vld [vmem:[%s18277_s9 + $0x148] sm:$0xff]  ;;  %v16931_v4 = vsel %vm19000_vm12, %v5455_v21, %v5456_v6  ;;  %vm19004_vm14 = vmmov %vm19000_vm12 }
 0x7fd   : > { %11560 = vmatmul.mubr.f32.gmra.mrb[8].mxu1 %v16886_v38  ;;  %11507 = vmatmul.mubr.f32.gmra.mrb[54].mxu0 %v16880_v60  ;;  %v13744_v58 = vpop.eup %13743  ;;  %v16926_v49 = vmul.f32 %v13742_v62, %v16736_v55  ;;  %v16944_v31 = vsel %vm19004_vm14, %v5456_v6, %v5457_v12  ;;  %v5459_v21 = vrot.slane %v16784_v20, 7  ;;  %v16959_v57 = vsel %vm19000_vm12, %v5457_v12, %v5458_v34  ;;  %vm19005_vm14 = vmmov %vm19000_vm12 }
 0x7fe   : > { %11562 = vmatprep.mubr.msk.f32.mxu1 %vm14782_vm4, %v16902_v15  ;;  %12699 = vmatpush3.bf16.msra.mxu1 %v12696_v52  ;;  %v9304_v52 = vld [vmem:[%s18277_s9 + $0x140] sm:$0xff]  ;;  %v13746_v43 = vpop.eup %13745  ;;  %v16939_v48 = vmul.f32 %v13744_v58, %v16749_v36  ;;  %v9307_v36 = vld [vmem:[%s18277_s9 + $0x158] sm:$0xff]  ;;  %v5460_v6 = vrot.slane %v16787_v53, 7 }
 0x7ff   : > { %12701 = vmatprep.subr.bf16.mxu1 %v12700_v40  ;;  %11509 = vmatprep.mubr.f32.mxu0 %v16896_v32  ;;  %v12708_v55 = vpack.c.bf16 %v9305_v17, %v9304_v52  ;;  %v16972_v12 = vsel %vm19005_vm14, %v5458_v34, %v5459_v21  ;;  %v5461_v17 = vrot.slane %v16800_v30, 7  ;;  %v5462_v34 = vrot.slane %v16803_v16, 7  ;;  %vm19007_vm14 = vmmov %vm19000_vm12 }
 0x800   : > { %v13748_v41 = vpop.eup %13747 }
 0x801   : > { %11563 = vmatmul.mubr.f32.gmra.mrb[10].mxu1 %v16916_v18  ;;  %11510 = vmatmul.mubr.f32.gmra.mrb[56].mxu0 %v16910_v44  ;;  %v16967_v58 = vmul.f32 %v13748_v41, %v16774_v24  ;;  %v9309_v24 = vld [vmem:[%s18277_s9 + $0x168] sm:$0xff]  ;;  %v16987_v41 = vsel %vm19000_vm12, %v5459_v21, %v5460_v6  ;;  %v17000_v21 = vsel %vm19007_vm14, %v5460_v6, %v5461_v17  ;;  %v5464_v6 = vrot.slane %v16813_v39, 7  ;;  %vm19009_vm14 = vmmov %vm19000_vm12 }
 0x802   : > { %11565 = vmatprep.mubr.msk.f32.mxu1 %vm14809_vm5, %v16931_v4  ;;  %12703 = vmatpush3.bf16.msra.mxu1 %v12700_v40  ;;  %v16954_v40 = vmul.f32 %v13746_v43, %v16757_v29  ;;  %v13750_v62 = vpop.eup %13749  ;;  %v12712_v29 = vpack.c.bf16 %v9307_v36, %v9306_v47  ;;  %v9308_v43 = vld [vmem:[%s18277_s9 + $0x160] sm:$0xff] }
 0x803   : > { %12705 = vmatprep.subr.bf16.mxu1 %v12704_v26  ;;  %11512 = vmatprep.mubr.f32.mxu0 %v16926_v49 }
 0x804   : > { %v13752_v52 = vpop.eup %13751 }
 0x805   : > { %11566 = vmatmul.mubr.f32.gmra.mrb[12].mxu1 %v16944_v31  ;;  %11513 = vmatmul.mubr.f32.gmra.mrb[58].mxu0 %v16939_v48  ;;  %v16995_v36 = vmul.f32 %v13752_v52, %v16790_v3  ;;  %v17015_v52 = vsel %vm19000_vm12, %v5461_v17, %v5462_v34  ;;  %v5465_v17 = vrot.slane %v16818_v63, 7 }
 0x806   : > { %11568 = vmatprep.mubr.msk.f32.mxu1 %vm14835_vm6, %v16959_v57  ;;  %12707 = vmatpush3.bf16.msra.mxu1 %v12704_v26  ;;  %v16982_v26 = vmul.f32 %v13750_v62, %v16781_v54  ;;  %v13754_v47 = vpop.eup %13753  ;;  %v12716_v54 = vpack.c.bf16 %v9309_v24, %v9308_v43  ;;  %v5463_v62 = vrot.slane %v16810_v8, 7  ;;  %v9344_v24 = vld [vmem:[%s18277_s9 + $0x180] sm:$0xff] }
 0x807   : > { %12709 = vmatprep.subr.bf16.mxu1 %v12708_v55  ;;  %11515 = vmatprep.mubr.f32.mxu0 %v16954_v40  ;;  %19006 = vst [vmem:[#allocation58_spill] sm:$0xff] %v16995_v36  ;;  %v17010_v3 = vmul.f32 %v13754_v47, %v16796_v28  ;;  %v9345_v47 = vld [vmem:[%s18277_s9 + $0x188] sm:$0xff] }
 0x808   : > { %v17025_v43 = vsel %vm19009_vm14, %v5462_v34, %v5463_v62  ;;  %vm19013_vm14 = vmmov %vm19000_vm12 }
 0x809   : > { %11569 = vmatmul.mubr.f32.gmra.mrb[14].mxu1 %v16972_v12  ;;  %11516 = vmatmul.mubr.f32.gmra.mrb[60].mxu0 %v16967_v58  ;;  %19008 = vst [vmem:[#allocation60_spill] sm:$0xff] %v17010_v3  ;;  %19010 = vst [vmem:[#allocation66_spill] sm:$0xff] %v17025_v43  ;;  %v17048_v37 = vsel %vm19013_vm14, %v5464_v6, %v5465_v17 }
 0x80a   : > { %11571 = vmatprep.mubr.msk.f32.mxu1 %vm14860_vm7, %v16987_v41  ;;  %12711 = vmatpush3.bf16.msra.mxu1 %v12708_v55  ;;  %v9311_v55 = vld [vmem:[%s18277_s9 + $0x178] sm:$0xff]  ;;  %19014 = vst [vmem:[#allocation70_spill] sm:$0xff] %v17048_v37  ;;  %vm19016_vm14 = vmmov %vm19000_vm12 }
 0x80b   : > { %12713 = vmatprep.subr.bf16.mxu1 %v12712_v29  ;;  %11518 = vmatprep.mubr.f32.mxu0 %v16982_v26  ;;  %v12720_v28 = vpack.c.bf16 %v9311_v55, %v9310_v11  ;;  %v5466_v11 = vrot.slane %v16821_v23, 7  ;;  %v17044_v55 = vpack.c.bf16 %v9345_v47, %v9344_v24  ;;  %v5470_v24 = vrot.slane %v16865_v35, 7 }
 0x80d   : > { %11572 = vmatmul.mubr.f32.gmra.mrb[16].mxu1 %v17000_v21  ;;  %11519 = vmatmul.mubr.f32.gmra.mrb[62].mxu0 %v16995_v36 }
 0x80e   : > { %11574 = vmatprep.mubr.msk.f32.mxu1 %vm14885_vm8, %v17015_v52  ;;  %12715 = vmatpush3.bf16.msra.mxu1 %v12712_v29  ;;  %v17037_v29 = vsel %vm19000_vm12, %v5463_v62, %v5464_v6  ;;  %v17054_v62 = vsel %vm19000_vm12, %v5465_v17, %v5466_v11  ;;  %v5469_v6 = vrot.slane %v16849_v9, 7 }
 0x80f   : > { %12717 = vmatprep.subr.bf16.mxu1 %v12716_v54  ;;  %11521 = vmatprep.mubr.f32.mxu0 %v17010_v3  ;;  %19011 = vst [vmem:[#allocation69_spill] sm:$0xff] %v17037_v29 }
 0x811   : > { %11575 = vmatmul.mubr.f32.gmra.mrb[18].mxu1 %v17025_v43  ;;  %11522 = vmatmul.mubr.f32.gmra.mrb[64].mxu0 %v16829_v22  ;;  %v5468_v43 = vrot.slane %v16832_v56, 7 }
 0x812   : > { %11577 = vmatprep.mubr.msk.f32.mxu1 %vm14910_vm9, %v17037_v29  ;;  %12719 = vmatpush3.bf16.msra.mxu1 %v12716_v54  ;;  %v17063_v54 = vsel %vm19016_vm14, %v5466_v11, %v5467_v51  ;;  %v5471_v11 = vrot.slane %v16880_v60, 7 }
 0x813   : > { %12721 = vmatprep.subr.bf16.mxu1 %v12720_v28  ;;  %19017 = vst [vmem:[#allocation79_spill] sm:$0xff] %v17063_v54  ;;  %v17069_v17 = vsel %vm19000_vm12, %v5467_v51, %v5468_v43  ;;  %v5472_v51 = vrot.slane %v16896_v32, 7 }
 0x814   : > { %19018 = vst [vmem:[#allocation81_spill] sm:$0xff] %v17069_v17 }
 0x815   : > { %11578 = vmatmul.mubr.f32.gmra.mrb[20].mxu1 %v17048_v37 }
 0x816   : > { %11580 = vmatprep.mubr.msk.f32.mxu1 %vm14935_vm10, %v17054_v62  ;;  %12723 = vmatpush3.bf16.msra.mxu1 %v12720_v28  ;;  %vm19020_vm10 = vmmov %vm19000_vm12 }
 0x817   : > { %12725 = vmatprep.subr.bf16.mxu1 %v17044_v55  ;;  %v17077_v28 = vsel %vm19020_vm10, %v5468_v43, %v5469_v6  ;;  %vm19022_vm14 = vmmov %vm19020_vm10  ;;  %v5473_v43 = vrot.slane %v16910_v44, 7 }
 0x818   : > { %19021 = vst [vmem:[#allocation86_spill] sm:$0xff] %v17077_v28  ;;  %v17083_v34 = vsel %vm19022_vm14, %v5469_v6, %v5470_v24  ;;  %v5474_v6 = vrot.slane %v16926_v49, 7 }
 0x819   : > { %11581 = vmatmul.mubr.f32.gmra.mrb[22].mxu1 %v17063_v54  ;;  %19023 = vst [vmem:[#allocation89_spill] sm:$0xff] %v17083_v34  ;;  %v19024_v54 = vld [vmem:[#allocation35_spill] sm:$0xff] }
 0x81a   : > { %11583 = vmatprep.mubr.msk.f32.mxu1 %vm14956_vm11, %v17069_v17  ;;  %vm19025_vm12 = vnez %v19024_v54  ;;  %vm19026_vm11 = vmmov %vm19020_vm10  ;;  %v19029_v17 = vld [vmem:[#allocation38_spill] sm:$0xff]  ;;  %v19142_v14 = vld [vmem:[#allocation79_spill] sm:$0xff] }
 0x81b   : > { %v17091_v47 = vsel %vm19026_vm11, %v5470_v24, %v5471_v11  ;;  %vm19030_vm14 = vnez %v19029_v17  ;;  %v5475_v24 = vrot.slane %v16939_v48, 7  ;;  %vm19033_vm11 = vmmov %vm19020_vm10 }
 0x81c   : > { %19027 = vst [vmem:[#allocation90_spill] sm:$0xff] %v17091_v47 }
 0x81d   : > { %11584 = vmatmul.mubr.f32.gmra.mrb[24].mxu1 %v17077_v28  ;;  %v17097_v28 = vsel %vm19020_vm10, %v5471_v11, %v5472_v51  ;;  %v5476_v11 = vrot.slane %v16954_v40, 7 }
 0x81e   : > { %11586 = vmatprep.mubr.msk.f32.mxu1 %vm19025_vm12, %v17083_v34  ;;  %19028 = vst [vmem:[#allocation92_spill] sm:$0xff] %v17097_v28  ;;  %vm19031_vm12 = vmmov %vm19020_vm10  ;;  %v19035_v34 = vld [vmem:[#allocation41_spill] sm:$0xff] }
 0x81f   : > { %v17105_v54 = vsel %vm19031_vm12, %v5472_v51, %v5473_v43  ;;  %vm19036_vm10 = vnez %v19035_v34  ;;  %v5477_v51 = vrot.slane %v16967_v58, 7  ;;  %vm19039_vm12 = vmmov %vm19033_vm11 }
 0x820   : > { %19032 = vst [vmem:[#allocation93_spill] sm:$0xff] %v17105_v54 }
 0x821   : > { %11587 = vmatmul.mubr.f32.gmra.mrb[26].mxu1 %v17091_v47  ;;  %v17111_v47 = vsel %vm19033_vm11, %v5473_v43, %v5474_v6  ;;  %v5478_v43 = vrot.slane %v16982_v26, 7 }
 0x822   : > { %11589 = vmatprep.mubr.msk.f32.mxu1 %vm19030_vm14, %v17097_v28  ;;  %19034 = vst [vmem:[#allocation55_spill] sm:$0xff] %v17111_v47  ;;  %vm19037_vm14 = vmmov %vm19033_vm11  ;;  %v19040_v28 = vld [vmem:[#allocation44_spill] sm:$0xff] }
 0x823   : > { %v17119_v17 = vsel %vm19037_vm14, %v5474_v6, %v5475_v24  ;;  %vm19041_vm11 = vnez %v19040_v28  ;;  %v5479_v6 = vrot.slane %v16995_v36, 7 }
 0x824   : > { %19038 = vst [vmem:[#allocation20_spill] sm:$0xff] %v17119_v17 }
 0x825   : > { %11590 = vmatmul.mubr.f32.gmra.mrb[28].mxu1 %v17105_v54  ;;  %v17125_v54 = vsel %vm19039_vm12, %v5475_v24, %v5476_v11  ;;  %v5480_v24 = vrot.slane %v17010_v3, 7 }
 0x826   : > { %11592 = vmatprep.mubr.msk.f32.mxu1 %vm19036_vm10, %v17111_v47  ;;  %vm19042_vm10 = vmmov %vm19039_vm12  ;;  %v19046_v47 = vld [vmem:[#allocation47_spill] sm:$0xff] }
 0x827   : > { %v17133_v34 = vsel %vm19042_vm10, %v5476_v11, %v5477_v51  ;;  %vm19044_vm14 = vmmov %vm19042_vm10  ;;  %vm19047_vm12 = vnez %v19046_v47  ;;  %v17152_v11 = vsel %vm19042_vm10, %v5479_v6, %v5480_v24  ;;  %v17163_v47 = vrot.slane %v16720_v25, 1 }
 0x828   : > { %19043 = vst [vmem:[#allocation26_spill] sm:$0xff] %v17133_v34  ;;  %19050 = vst [vmem:[#allocation31_spill] sm:$0xff] %v17152_v11  ;;  %v17179_v25 = vrot.slane %v16731_v10, 1 }
 0x829   : > { %11593 = vmatmul.mubr.f32.gmra.mrb[30].mxu1 %v17119_v17  ;;  %v17139_v17 = vsel %vm19044_vm14, %v5477_v51, %v5478_v43  ;;  %vm19053_vm9 = vmmov %vm19042_vm10  ;;  %19055 = vst [vmem:[#allocation36_spill] sm:$0xff] %v17163_v47 }
 0x82a   : > { %11595 = vmatprep.mubr.msk.f32.mxu1 %vm19041_vm11, %v17125_v54  ;;  %19045 = vst [vmem:[#allocation28_spill] sm:$0xff] %v17139_v17  ;;  %vm19048_vm11 = vmmov %vm19042_vm10  ;;  %v17160_v51 = vsel %vm19053_vm9, %v5480_v24, %v16841_v61  ;;  %vm19057_vm9 = vcmp.lt.s32.totalorder %v14079_v46, 7  ;;  %v9348_v61 = vld [vmem:[%s18277_s9 + $0x1a0] sm:$0xff] }
 0x82b   : > { %v17147_v28 = vsel %vm19048_vm11, %v5478_v43, %v5479_v6  ;;  %19054 = vst [vmem:[#allocation34_spill] sm:$0xff] %v17160_v51  ;;  %v9346_v43 = vld [vmem:[%s18277_s9 + $0x190] sm:$0xff]  ;;  %v9347_v6 = vld [vmem:[%s18277_s9 + $0x198] sm:$0xff]  ;;  %19058 = vst [vmem:[#allocation39_spill] sm:$0xff] %v17179_v25 }
 0x82c   : > { %19049 = vst [vmem:[#allocation29_spill] sm:$0xff] %v17147_v28  ;;  %vm19061_vm10 = vmmov %vm19057_vm9 }
 0x82d   : > { %11596 = vmatmul.mubr.f32.gmra.mrb[32].mxu1 %v17133_v34  ;;  %v19051_v34 = vld [vmem:[#allocation50_spill] sm:$0xff] }
 0x82e   : > { %11598 = vmatprep.mubr.msk.f32.mxu1 %vm19047_vm12, %v17139_v17  ;;  %vm19052_vm14 = vnez %v19051_v34  ;;  %v5549_v34 = vrot.slane %v16724_v45, 1  ;;  %v19059_v45 = vld [vmem:[#allocation56_spill] sm:$0xff] }
 0x82f   : > { %vm19060_vm11 = vnez %v19059_v45  ;;  %v9351_v45 = vld [vmem:[%s18277_s9 + $0x1b8] sm:$0xff] }
 0x830   : > { %v17200_v17 = vsel %vm19057_vm9, %v5549_v34, %v17179_v25 }
 0x831   : > { %11599 = vmatmul.mubr.f32.gmra.mrb[34].mxu1 %v17147_v28  ;;  %v12728_v28 = vpack.c.bf16 %v9347_v6, %v9346_v43  ;;  %v17192_v43 = vsel %vm19061_vm10, %v17163_v47, %v5549_v34  ;;  %v5551_v6 = vrot.slane %v16746_v42, 1  ;;  %19063 = vst [vmem:[#allocation42_spill] sm:$0xff] %v17200_v17  ;;  %v5553_v34 = vrot.slane %v16766_v2, 1 }
 0x832   : > { %11601 = vmatprep.mubr.msk.f32.mxu1 %vm19052_vm14, %v17152_v11  ;;  %v19056_v11 = vld [vmem:[#allocation54_spill] sm:$0xff]  ;;  %19062 = vst [vmem:[#allocation40_spill] sm:$0xff] %v17192_v43  ;;  %vm19102_vm14 = vmmov %vm19057_vm9 }
 0x833   : > { %v5607_v24 = vsel %vm19057_vm9, %v19056_v11, %v17163_v47  ;;  %v9350_v47 = vld [vmem:[%s18277_s9 + $0x1b0] sm:$0xff] }
 0x835   : > { %11602 = vmatmul.mubr.f32.gmra.mrb[36].mxu1 %v17160_v51  ;;  %v9349_v51 = vld [vmem:[%s18277_s9 + $0x1a8] sm:$0xff] }
 0x836   : > { %11636 = vmatprep.mubr.f32.mxu1 %v19056_v11  ;;  %v12732_v10 = vpack.c.bf16 %v9349_v51, %v9348_v61  ;;  %v12736_v51 = vpack.c.bf16 %v9351_v45, %v9350_v47  ;;  %v5555_v47 = vrot.slane %v16784_v20, 1 }
 0x839   : > { %11637 = vmatmul.mubr.msk.f32.vlgmr.msra.gmra.mrb[6].mxu1 %vm19060_vm11, %v5607_v24  ;;  %v5552_v24 = vrot.slane %v16753_v5, 1  ;;  %vm19066_vm11 = vmmov %vm19057_vm9  ;;  %v5554_v5 = vrot.slane %v16770_v7, 1 }
 0x83a   : > { %12727 = vmatpush3.bf16.msra.mxu1 %v17044_v55  ;;  %11639 = vmatprep.mubr.f32.mxu1 %v17192_v43  ;;  %v19064_v55 = vld [vmem:[#allocation59_spill] sm:$0xff]  ;;  %v17215_v61 = vsel %vm19066_vm11, %v17179_v25, %v5551_v6  ;;  %v9353_v25 = vld [vmem:[%s18277_s9 + $0x1c8] sm:$0xff] }
 0x83b   : > { %12729 = vmatprep.subr.bf16.mxu1 %v12728_v28  ;;  %vm19065_vm10 = vnez %v19064_v55  ;;  %19067 = vst [vmem:[#allocation43_spill] sm:$0xff] %v17215_v61  ;;  %v17221_v43 = vsel %vm19057_vm9, %v5551_v6, %v5552_v24  ;;  %v9352_v55 = vld [vmem:[%s18277_s9 + $0x1c0] sm:$0xff]  ;;  %v17241_v6 = vsel %vm19057_vm9, %v5553_v34, %v5554_v5 }
 0x83c   : > { %19068 = vst [vmem:[#allocation45_spill] sm:$0xff] %v17221_v43  ;;  %19073 = vst [vmem:[#allocation52_spill] sm:$0xff] %v17241_v6 }
 0x83d   : > { %11640 = vmatmul.mubr.msk.f32.gmra.mrb[8].mxu1 %vm19065_vm10, %v17200_v17  ;;  %v19069_v17 = vld [vmem:[#allocation62_spill] sm:$0xff]  ;;  %vm19071_vm10 = vmmov %vm19057_vm9 }
 0x83e   : > { %11642 = vmatprep.mubr.f32.mxu1 %v17215_v61  ;;  %12731 = vmatpush3.bf16.msra.mxu1 %v12728_v28  ;;  %vm19070_vm11 = vnez %v19069_v17  ;;  %v17235_v45 = vsel %vm19071_vm10, %v5552_v24, %v5553_v34  ;;  %v12740_v28 = vpack.c.bf16 %v9353_v25, %v9352_v55  ;;  %v5556_v61 = vrot.slane %v16787_v53, 1  ;;  %v9354_v17 = vld [vmem:[%s18277_s9 + $0x1d0] sm:$0xff]  ;;  %v9355_v24 = vld [vmem:[%s18277_s9 + $0x1d8] sm:$0xff] }
 0x83f   : > { %12733 = vmatprep.subr.bf16.mxu1 %v12732_v10  ;;  %19072 = vst [vmem:[#allocation48_spill] sm:$0xff] %v17235_v45  ;;  %v12744_v55 = vpack.c.bf16 %v9355_v24, %v9354_v17 }
 0x840   : > { %v17261_v34 = vsel %vm19057_vm9, %v5555_v47, %v5556_v61 }
 0x841   : > { %11643 = vmatmul.mubr.msk.f32.gmra.mrb[10].mxu1 %vm19070_vm11, %v17221_v43  ;;  %v19074_v43 = vld [vmem:[#allocation65_spill] sm:$0xff]  ;;  %vm19076_vm11 = vmmov %vm19057_vm9  ;;  %19078 = vst [vmem:[#allocation23_spill] sm:$0xff] %v17261_v34 }
 0x842   : > { %11645 = vmatprep.mubr.f32.mxu1 %v17235_v45  ;;  %12735 = vmatpush3.bf16.msra.mxu1 %v12732_v10  ;;  %vm19075_vm10 = vnez %v19074_v43  ;;  %v17255_v25 = vsel %vm19076_vm11, %v5554_v5, %v5555_v47  ;;  %v5557_v10 = vrot.slane %v16800_v30, 1  ;;  %v5558_v45 = vrot.slane %v16803_v16, 1  ;;  %v9356_v43 = vld [vmem:[%s18277_s9 + $0x1e0] sm:$0xff]  ;;  %v9357_v5 = vld [vmem:[%s18277_s9 + $0x1e8] sm:$0xff] }
 0x843   : > { %12737 = vmatprep.subr.bf16.mxu1 %v12736_v51  ;;  %19077 = vst [vmem:[#allocation53_spill] sm:$0xff] %v17255_v25  ;;  %v9247_v47 = vmul.f32 -1.442695, %v16553_v19  ;;  %v12748_v24 = vpack.c.bf16 %v9357_v5, %v9356_v43 }
 0x845   : > { %11646 = vmatmul.mubr.msk.f32.gmra.mrb[12].mxu1 %vm19075_vm10, %v17241_v6  ;;  %v19079_v6 = vld [vmem:[#allocation68_spill] sm:$0xff]  ;;  %vm19081_vm10 = vmmov %vm19057_vm9  ;;  %13755 = vpow2.f32 %v9247_v47 }
 0x846   : > { %11648 = vmatprep.mubr.f32.mxu1 %v17255_v25  ;;  %12739 = vmatpush3.bf16.msra.mxu1 %v12736_v51  ;;  %vm19080_vm11 = vnez %v19079_v6  ;;  %v17275_v17 = vsel %vm19081_vm10, %v5556_v61, %v5557_v10  ;;  %v5559_v51 = vrot.slane %v16810_v8, 1  ;;  %v17282_v25 = vsel %vm19057_vm9, %v5557_v10, %v5558_v45  ;;  %v9358_v61 = vld [vmem:[%s18277_s9 + $0x1f0] sm:$0xff] }
 0x847   : > { %12741 = vmatprep.subr.bf16.mxu1 %v12740_v28  ;;  %19082 = vst [vmem:[#allocation99_spill] sm:$0xff] %v17275_v17  ;;  %19083 = vst [vmem:[#allocation7_spill] sm:$0xff] %v17282_v25  ;;  %v5560_v6 = vrot.slane %v16813_v39, 1  ;;  %v5561_v10 = vrot.slane %v16818_v63, 1  ;;  %v5562_v39 = vrot.slane %v16821_v23, 1 }
 0x849   : > { %11649 = vmatmul.mubr.msk.f32.gmra.mrb[14].mxu1 %vm19080_vm11, %v17261_v34  ;;  %v9359_v34 = vld [vmem:[%s18277_s9 + $0x1f8] sm:$0xff]  ;;  %vm19086_vm11 = vmmov %vm19057_vm9  ;;  %v17324_v47 = vsel %vm19057_vm9, %v5561_v10, %v5562_v39 }
 0x84a   : > { %11651 = vmatprep.mubr.f32.mxu1 %v17275_v17  ;;  %12743 = vmatpush3.bf16.msra.mxu1 %v12740_v28  ;;  %v19084_v28 = vld [vmem:[#allocation71_spill] sm:$0xff]  ;;  %v17296_v43 = vsel %vm19086_vm11, %v5558_v45, %v5559_v51  ;;  %v12752_v5 = vpack.c.bf16 %v9359_v34, %v9358_v61  ;;  %v17302_v17 = vsel %vm19057_vm9, %v5559_v51, %v5560_v6  ;;  %v9393_v45 = vld [vmem:[%s18277_s9 + $0x208] sm:$0xff]  ;;  %v5563_v34 = vrot.slane %v16826_v0, 1 }
 0x84b   : > { %12745 = vmatprep.subr.bf16.mxu1 %v12744_v55  ;;  %vm19085_vm10 = vnez %v19084_v28  ;;  %19087 = vst [vmem:[#allocation8_spill] sm:$0xff] %v17296_v43  ;;  %19088 = vst [vmem:[#allocation10_spill] sm:$0xff] %v17302_v17  ;;  %v9392_v28 = vld [vmem:[%s18277_s9 + $0x200] sm:$0xff]  ;;  %v5564_v61 = vrot.slane %v16832_v56, 1 }
 0x84c   : > { %v17320_v51 = vpack.c.bf16 %v9393_v45, %v9392_v28  ;;  %19093 = vst [vmem:[#allocation14_spill] sm:$0xff] %v17324_v47  ;;  %v5566_v28 = vrot.slane %v16865_v35, 1  ;;  %v19098_v45 = vld [vmem:[#allocation80_spill] sm:$0xff] }
 0x84d   : > { %11652 = vmatmul.mubr.msk.f32.gmra.mrb[16].mxu1 %vm19085_vm10, %v17282_v25  ;;  %vm19091_vm10 = vmmov %vm19057_vm9 }
 0x84e   : > { %11654 = vmatprep.mubr.f32.mxu1 %v17296_v43  ;;  %12747 = vmatpush3.bf16.msra.mxu1 %v12744_v55  ;;  %v19089_v43 = vld [vmem:[#allocation74_spill] sm:$0xff]  ;;  %v17316_v55 = vsel %vm19091_vm10, %v5560_v6, %v5561_v10  ;;  %vm19096_vm10 = vmmov %vm19057_vm9 }
 0x84f   : > { %12749 = vmatprep.subr.bf16.mxu1 %v12748_v24  ;;  %vm19090_vm11 = vnez %v19089_v43  ;;  %19092 = vst [vmem:[#allocation13_spill] sm:$0xff] %v17316_v55  ;;  %v19094_v43 = vld [vmem:[#allocation77_spill] sm:$0xff]  ;;  %v17332_v6 = vsel %vm19096_vm10, %v5562_v39, %v5563_v34  ;;  %v13756_v10 = vpop.eup %13755  ;;  %vm19100_vm10 = vmmov %vm19057_vm9 }
 0x850   : > { %19097 = vst [vmem:[#allocation15_spill] sm:$0xff] %v17332_v6 }
 0x851   : > { %11655 = vmatmul.mubr.msk.f32.gmra.mrb[18].mxu1 %vm19090_vm11, %v17302_v17  ;;  %vm19095_vm11 = vnez %v19094_v43  ;;  %v5567_v43 = vrot.slane %v16880_v60, 1 }
 0x852   : > { %11657 = vmatprep.mubr.f32.mxu1 %v17316_v55  ;;  %12751 = vmatpush3.bf16.msra.mxu1 %v12748_v24  ;;  %v5565_v55 = vrot.slane %v16849_v9, 1  ;;  %v17339_v24 = vsel %vm19057_vm9, %v5563_v34, %v5564_v61 }
 0x853   : > { %12753 = vmatprep.subr.bf16.mxu1 %v12752_v5 }
 0x854   : > { %v17347_v39 = vsel %vm19100_vm10, %v5564_v61, %v5565_v55  ;;  %v17353_v34 = vsel %vm19102_vm14, %v5565_v55, %v5566_v28  ;;  %v5569_v61 = vrot.slane %v16910_v44, 1  ;;  %v5570_v55 = vrot.slane %v16926_v49, 1 }
 0x855   : > { %11658 = vmatmul.mubr.msk.f32.gmra.mrb[20].mxu1 %vm19095_vm11, %v17324_v47  ;;  %vm19099_vm11 = vnez %v19098_v45  ;;  %19101 = vst [vmem:[#allocation16_spill] sm:$0xff] %v17347_v39  ;;  %19103 = vst [vmem:[#allocation17_spill] sm:$0xff] %v17353_v34  ;;  %v19104_v47 = vld [vmem:[#allocation83_spill] sm:$0xff] }
 0x856   : > { %11660 = vmatprep.mubr.f32.mxu1 %v17332_v6  ;;  %12755 = vmatpush3.bf16.msra.mxu1 %v12752_v5  ;;  %v5289_v5 = vadd.f32 1.0, %v13756_v10  ;;  %v5568_v6 = vrot.slane %v16896_v32, 1  ;;  %vm19105_vm9 = vnez %v19104_v47 }
 0x857   : > { %12757 = vmatprep.subr.bf16.mxu1 %v17320_v51 }
 0x858   : > { %13757 = vrcp.f32 %v5289_v5  ;;  %v17367_v10 = vsel %vm19100_vm10, %v5567_v43, %v5568_v6 }
 0x859   : > { %11661 = vmatmul.mubr.msk.f32.gmra.mrb[22].mxu1 %vm19099_vm11, %v17339_v24  ;;  %vm19106_vm11 = vmmov %vm19100_vm10  ;;  %19108 = vst [vmem:[#allocation63_spill] sm:$0xff] %v17367_v10 }
 0x85a   : > { %11663 = vmatprep.mubr.f32.mxu1 %v17347_v39  ;;  %v17361_v45 = vsel %vm19106_vm11, %v5566_v28, %v5567_v43  ;;  %v19109_v39 = vld [vmem:[#allocation85_spill] sm:$0xff]  ;;  %v5571_v28 = vrot.slane %v16939_v48, 1  ;;  %v5572_v43 = vrot.slane %v16954_v40, 1 }
 0x85b   : > { %19107 = vst [vmem:[#allocation61_spill] sm:$0xff] %v17361_v45  ;;  %vm19110_vm14 = vnez %v19109_v39 }
 0x85d   : > { %11664 = vmatmul.mubr.msk.f32.gmra.mrb[24].mxu1 %vm19105_vm9, %v17353_v34  ;;  %vm19111_vm9 = vmmov %vm19100_vm10  ;;  %v5574_v34 = vrot.slane %v16982_v26, 1 }
 0x85e   : > { %11666 = vmatprep.mubr.f32.mxu1 %v17361_v45  ;;  %v17375_v47 = vsel %vm19111_vm9, %v5568_v6, %v5569_v61  ;;  %vm19113_vm11 = vmmov %vm19111_vm9  ;;  %v5573_v6 = vrot.slane %v16967_v58, 1  ;;  %v19121_v45 = vld [vmem:[#allocation91_spill] sm:$0xff] }
 0x85f   : > { %19112 = vst [vmem:[#allocation64_spill] sm:$0xff] %v17375_v47  ;;  %v17381_v5 = vsel %vm19113_vm11, %v5569_v61, %v5570_v55  ;;  %vm19116_vm10 = vmmov %vm19111_vm9  ;;  %v17399_v61 = vsel %vm19111_vm9, %v5571_v28, %v5572_v43  ;;  %vm19122_vm11 = vnez %v19121_v45  ;;  %v9395_v45 = vld [vmem:[%s18277_s9 + $0x218] sm:$0xff] }
 0x860   : > { %19114 = vst [vmem:[#allocation67_spill] sm:$0xff] %v17381_v5  ;;  %v17389_v39 = vsel %vm19116_vm10, %v5570_v55, %v5571_v28  ;;  %19120 = vst [vmem:[#allocation76_spill] sm:$0xff] %v17399_v61  ;;  %v5576_v28 = vrot.slane %v17010_v3, 1 }
 0x861   : > { %11667 = vmatmul.mubr.msk.f32.gmra.mrb[26].mxu1 %vm19110_vm14, %v17367_v10  ;;  %19117 = vst [vmem:[#allocation72_spill] sm:$0xff] %v17389_v39  ;;  %v17392_v10 = vpop.f32.mrb[34].mxu0  ;;  %vm19123_vm10 = vmmov %vm19111_vm9 }
 0x862   : > { %11669 = vmatprep.mubr.f32.mxu1 %v17375_v47  ;;  %19118 = vst [vmem:[#allocation73_spill] sm:$0xff] %v17392_v10  ;;  %v17395_v47 = vpop.f32.mrb[35].mxu0  ;;  %v17407_v55 = vsel %vm19123_vm10, %v5572_v43, %v5573_v6  ;;  %v5575_v10 = vrot.slane %v16995_v36, 1  ;;  %vm19132_vm10 = vmmov %vm19111_vm9 }
 0x863   : > { %19119 = vst [vmem:[#allocation75_spill] sm:$0xff] %v17395_v47  ;;  %19124 = vst [vmem:[#allocation78_spill] sm:$0xff] %v17407_v55 }
 0x864   : > { %v17424_v43 = vsel %vm19111_vm9, %v5574_v34, %v5575_v10 }
 0x865   : > { %11670 = vmatmul.mubr.msk.f32.gmra.mrb[28].mxu1 %vm18971_vm15, %v17381_v5  ;;  %v13758_v5 = vpop.eup %13757  ;;  %vm19125_vm15 = vmmov %vm19111_vm9  ;;  %19127 = vst [vmem:[#allocation82_spill] sm:$0xff] %v17424_v43 }
 0x866   : > { %11672 = vmatprep.mubr.f32.mxu1 %v17389_v39  ;;  %v17413_v47 = vsel %vm19125_vm15, %v5573_v6, %v5574_v34  ;;  %v17417_v39 = vmul.f32 %v13758_v5, %v16553_v19  ;;  %vm19129_vm15 = vmmov %vm19111_vm9  ;;  %v9394_v19 = vld [vmem:[%s18277_s9 + $0x210] sm:$0xff] }
 0x867   : > { %v17432_v6 = vsel %vm19129_vm15, %v5575_v10, %v5576_v28  ;;  %vm19136_vm15 = vcmp.lt.s32.totalorder %v14079_v46, 1 }
 0x868   : > { %19130 = vst [vmem:[#allocation87_spill] sm:$0xff] %v17432_v6  ;;  %v17443_v34 = vrot.slane %v17417_v39, 7 }
 0x869   : > { %11673 = vmatmul.mubr.msk.f32.gmra.mrb[30].mxu1 %vm19122_vm11, %v17399_v61  ;;  %v17427_v61 = vrot.slane %v16829_v22, 1 }
 0x86a   : > { %11675 = vmatprep.mubr.f32.mxu1 %v17407_v55  ;;  %19134 = vst [vmem:[#allocation97_spill] sm:$0xff] %v17443_v34 }
 0x86b   : > { %19128 = vst [vmem:[#allocation84_spill] sm:$0xff] %v17427_v61  ;;  %v17440_v5 = vsel %vm19132_vm10, %v5576_v28, %v17427_v61  ;;  %v5609_v10 = vsel %vm19111_vm9, %v17427_v61, %v19056_v11  ;;  %v12760_v11 = vpack.c.bf16 %v9395_v45, %v9394_v19  ;;  %v9396_v61 = vld [vmem:[%s18277_s9 + $0x220] sm:$0xff]  ;;  %v9398_v45 = vld [vmem:[%s18277_s9 + $0x230] sm:$0xff]  ;;  %v9399_v19 = vld [vmem:[%s18277_s9 + $0x238] sm:$0xff] }
 0x86c   : > { %19133 = vst [vmem:[#allocation95_spill] sm:$0xff] %v17440_v5  ;;  %v13771_v28 = vld [vmem:[%s13905_s30 + $0x30] sm:$0xff] }
 0x86d   : > { %11676 = vmatmul.mubr.msk.f32.gmra.mrb[32].mxu1 %vm18979_vm1, %v17413_v47 }
 0x86e   : > { %11678 = vmatprep.mubr.f32.mxu1 %v17424_v43 }
 0x871   : > { %11679 = vmatmul.mubr.msk.f32.gmra.mrb[34].mxu1 %vm18885_vm13, %v17432_v6  ;;  %v9397_v6 = vld [vmem:[%s18277_s9 + $0x228] sm:$0xff] }
 0x872   : > { %11681 = vmatprep.mubr.f32.mxu1 %v17440_v5  ;;  %v6494_v5 = vsel %vm19136_vm15, %v17443_v34, %v16844_v1  ;;  %v12764_v1 = vpack.c.bf16 %v9397_v6, %v9396_v61  ;;  %v9403_v6 = vld [vmem:[%s18277_s9 + $0x258] sm:$0xff]  ;;  %vm19149_vm15 = vnez %v19148_v33 }
 0x873   : > { %v19161_v33 = vld [vmem:[#allocation26_spill] sm:$0xff] }
 0x875   : > { %11682 = vmatmul.mubr.msk.f32.gmra.mrb[36].mxu1 %vm15467_vm0, %v5609_v10 }
 0x876   : > { %11716 = vmatprep.mubr.msk.f32.mxu1 %vm14738_vm2, %v6494_v5  ;;  %v19137_v5 = vld [vmem:[#allocation46_spill] sm:$0xff] }
 0x877   : > { %v9246_v10 = vmul.f32 -1.442695, %v19137_v5 }
 0x879   : > { %11717 = vmatmul.mubr.f32.vlgmr.msra.gmra.mrb[6].mxu1 %v16886_v38  ;;  %v12768_v38 = vpack.c.bf16 %v9399_v19, %v9398_v45  ;;  %v9404_v45 = vld [vmem:[%s18277_s9 + $0x260] sm:$0xff]  ;;  %v9405_v19 = vld [vmem:[%s18277_s9 + $0x268] sm:$0xff]  ;;  %13759 = vpow2.f32 %v9246_v10 }
 0x87a   : > { %12759 = vmatpush3.bf16.msra.mxu1 %v17320_v51  ;;  %11719 = vmatprep.mubr.msk.f32.mxu1 %vm14759_vm3, %v16902_v15  ;;  %v9400_v15 = vld [vmem:[%s18277_s9 + $0x240] sm:$0xff]  ;;  %v9401_v51 = vld [vmem:[%s18277_s9 + $0x248] sm:$0xff] }
 0x87b   : > { %12761 = vmatprep.subr.bf16.mxu1 %v12760_v11  ;;  %v12772_v61 = vpack.c.bf16 %v9401_v51, %v9400_v15  ;;  %v9406_v15 = vld [vmem:[%s18277_s9 + $0x270] sm:$0xff]  ;;  %v9407_v51 = vld [vmem:[%s18277_s9 + $0x278] sm:$0xff]  ;;  %v9408_v10 = vld [vmem:[%s18277_s9 + $0x280] sm:$0xff] }
 0x87d   : > { %11720 = vmatmul.mubr.f32.gmra.mrb[8].mxu1 %v16916_v18 }
 0x87e   : > { %11722 = vmatprep.mubr.msk.f32.mxu1 %vm14782_vm4, %v16931_v4  ;;  %12763 = vmatpush3.bf16.msra.mxu1 %v12760_v11  ;;  %v9402_v11 = vld [vmem:[%s18277_s9 + $0x250] sm:$0xff] }
 0x87f   : > { %12765 = vmatprep.subr.bf16.mxu1 %v12764_v1 }
 0x881   : > { %11723 = vmatmul.mubr.f32.gmra.mrb[10].mxu1 %v16944_v31 }
 0x882   : > { %11725 = vmatprep.mubr.msk.f32.mxu1 %vm14809_vm5, %v16959_v57  ;;  %12767 = vmatpush3.bf16.msra.mxu1 %v12764_v1  ;;  %v12776_v1 = vpack.c.bf16 %v9403_v6, %v9402_v11  ;;  %v19138_v11 = vld [vmem:[#allocation66_spill] sm:$0xff] }
 0x883   : > { %12769 = vmatprep.subr.bf16.mxu1 %v12768_v38 }
 0x885   : > { %11726 = vmatmul.mubr.f32.gmra.mrb[12].mxu1 %v16972_v12 }
 0x886   : > { %11728 = vmatprep.mubr.msk.f32.mxu1 %vm14835_vm6, %v16987_v41  ;;  %12771 = vmatpush3.bf16.msra.mxu1 %v12768_v38  ;;  %v12780_v38 = vpack.c.bf16 %v9405_v19, %v9404_v45  ;;  %v9409_v45 = vld [vmem:[%s18277_s9 + $0x288] sm:$0xff]  ;;  %v19140_v19 = vld [vmem:[#allocation27_spill] sm:$0xff] }
 0x887   : > { %12773 = vmatprep.subr.bf16.mxu1 %v12772_v61  ;;  %vm19141_vm10 = vnez %v19140_v19  ;;  %v12788_v6 = vpack.c.bf16 %v9409_v45, %v9408_v10  ;;  %v19151_v10 = vld [vmem:[#allocation92_spill] sm:$0xff]  ;;  %v19152_v45 = vld [vmem:[#allocation35_spill] sm:$0xff]  ;;  %v19154_v19 = vld [vmem:[#allocation93_spill] sm:$0xff] }
 0x889   : > { %11729 = vmatmul.mubr.f32.gmra.mrb[14].mxu1 %v17000_v21 }
 0x88a   : > { %11731 = vmatprep.mubr.msk.f32.mxu1 %vm14860_vm7, %v17015_v52  ;;  %12775 = vmatpush3.bf16.msra.mxu1 %v12772_v61  ;;  %v12784_v61 = vpack.c.bf16 %v9407_v51, %v9406_v15  ;;  %v19143_v15 = vld [vmem:[#allocation81_spill] sm:$0xff]  ;;  %v19144_v51 = vld [vmem:[#allocation30_spill] sm:$0xff] }
 0x88b   : > { %12777 = vmatprep.subr.bf16.mxu1 %v12776_v1  ;;  %vm19145_vm9 = vnez %v19144_v51  ;;  %v19155_v51 = vld [vmem:[#allocation55_spill] sm:$0xff] }
 0x88d   : > { %11732 = vmatmul.mubr.f32.gmra.mrb[16].mxu1 %v19138_v11  ;;  %v19146_v11 = vld [vmem:[#allocation86_spill] sm:$0xff] }
 0x88e   : > { %11734 = vmatprep.mubr.msk.f32.mxu1 %vm14885_vm8, %v17037_v29  ;;  %12779 = vmatpush3.bf16.msra.mxu1 %v12776_v1  ;;  %v13760_v1 = vpop.eup %13759 }
 0x88f   : > { %12781 = vmatprep.subr.bf16.mxu1 %v12780_v38  ;;  %v5288_v29 = vadd.f32 1.0, %v13760_v1 }
 0x891   : > { %11735 = vmatmul.mubr.f32.gmra.mrb[18].mxu1 %v17048_v37  ;;  %v19147_v37 = vld [vmem:[#allocation89_spill] sm:$0xff]  ;;  %13761 = vrcp.f32 %v5288_v29 }
 0x892   : > { %11737 = vmatprep.mubr.msk.f32.mxu1 %vm19141_vm10, %v17054_v62  ;;  %12783 = vmatpush3.bf16.msra.mxu1 %v12780_v38  ;;  %v19150_v38 = vld [vmem:[#allocation90_spill] sm:$0xff]  ;;  %vm19153_vm10 = vnez %v19152_v45  ;;  %v19162_v45 = vld [vmem:[#allocation28_spill] sm:$0xff] }
 0x893   : > { %12785 = vmatprep.subr.bf16.mxu1 %v12784_v61 }
 0x895   : > { %11738 = vmatmul.mubr.f32.gmra.mrb[20].mxu1 %v19142_v14 }
 0x896   : > { %11740 = vmatprep.mubr.msk.f32.mxu1 %vm19145_vm9, %v19143_v15  ;;  %12787 = vmatpush3.bf16.msra.mxu1 %v12784_v61  ;;  %v19156_v15 = vld [vmem:[#allocation38_spill] sm:$0xff]  ;;  %v19158_v61 = vld [vmem:[#allocation20_spill] sm:$0xff] }
 0x897   : > { %12789 = vmatprep.subr.bf16.mxu1 %v12788_v6  ;;  %vm19157_vm9 = vnez %v19156_v15  ;;  %v19166_v15 = vld [vmem:[#allocation29_spill] sm:$0xff] }
 0x899   : > { %11741 = vmatmul.mubr.f32.gmra.mrb[22].mxu1 %v19146_v11  ;;  %v19159_v11 = vld [vmem:[#allocation41_spill] sm:$0xff] }
 0x89a   : > { %11743 = vmatprep.mubr.msk.f32.mxu1 %vm19149_vm15, %v19147_v37  ;;  %vm19160_vm8 = vnez %v19159_v11 }
 0x89b   : > { %v13762_v1 = vpop.eup %13761 }
 0x89c   : > { %v17557_v29 = vmul.f32 %v13762_v1, %v19137_v5  ;;  %v19171_v1 = vld [vmem:[#allocation34_spill] sm:$0xff] }
 0x89d   : > { %11744 = vmatmul.mubr.f32.gmra.mrb[24].mxu1 %v19150_v38  ;;  %v19168_v38 = vld [vmem:[#allocation31_spill] sm:$0xff] }
 0x89e   : > { %11746 = vmatprep.mubr.msk.f32.mxu1 %vm19153_vm10, %v19151_v10  ;;  %v19163_v10 = vld [vmem:[#allocation44_spill] sm:$0xff] }
 0x89f   : > { %vm19164_vm10 = vnez %v19163_v10 }
 0x8a1   : > { %11747 = vmatmul.mubr.f32.gmra.mrb[26].mxu1 %v19154_v19 }
 0x8a2   : > { %11749 = vmatprep.mubr.msk.f32.mxu1 %vm19157_vm9, %v19155_v51 }
 0x8a5   : > { %11750 = vmatmul.mubr.f32.gmra.mrb[28].mxu1 %v19158_v61  ;;  %v6461_v61 = vrot.slane %v17557_v29, 7 }
 0x8a6   : > { %11752 = vmatprep.mubr.msk.f32.mxu1 %vm19160_vm8, %v17125_v54  ;;  %vm19173_vm8 = vcmp.lt.s32.totalorder %v14079_v46, 1 }
 0x8a7   : > { %vm19178_vm9 = vmmov %vm19173_vm8 }
 0x8a9   : > { %11753 = vmatmul.mubr.f32.gmra.mrb[30].mxu1 %v19161_v33  ;;  %v19172_v33 = vld [vmem:[#allocation11_spill] sm:$0xff] }
 0x8aa   : > { %11755 = vmatprep.mubr.msk.f32.mxu1 %vm19164_vm10, %v19162_v45  ;;  %v17578_v10 = vsel %vm19173_vm8, %v19172_v33, %v6461_v61  ;;  %v9411_v33 = vld [vmem:[%s18277_s9 + $0x298] sm:$0xff] }
 0x8ab   : > { %19174 = vst [vmem:[#allocation25_spill] sm:$0xff] %v17578_v10 }
 0x8ac   : > { %v17563_v19 = vpop.f32.mrb[36].mxu0 }
 0x8ad   : > { %19165 = vst [vmem:[#allocation98_spill] sm:$0xff] %v17563_v19  ;;  %11756 = vmatmul.mubr.f32.gmra.mrb[32].mxu1 %v19166_v15  ;;  %v17567_v51 = vpop.f32.mrb[37].mxu0  ;;  %v19176_v15 = vld [vmem:[#allocation50_spill] sm:$0xff] }
 0x8ae   : > { %19167 = vst [vmem:[#allocation33_spill] sm:$0xff] %v17567_v51  ;;  %11758 = vmatprep.mubr.msk.f32.mxu1 %vm19047_vm12, %v19168_v38  ;;  %vm19177_vm10 = vnez %v19176_v15  ;;  %v17588_v51 = vsel %vm19178_vm9, %v6461_v61, %v17443_v34  ;;  %v19182_v15 = vld [vmem:[#allocation49_spill] sm:$0xff]  ;;  %v9412_v61 = vld [vmem:[%s18277_s9 + $0x2a0] sm:$0xff]  ;;  %v9413_v34 = vld [vmem:[%s18277_s9 + $0x2a8] sm:$0xff] }
 0x8af   : > { %19179 = vst [vmem:[#allocation3_spill] sm:$0xff] %v17588_v51  ;;  %v19184_v38 = vld [vmem:[#allocation51_spill] sm:$0xff] }
 0x8b0   : > { %v17572_v5 = vpop.f32.mrb[38].mxu0 }
 0x8b1   : > { %19170 = vst [vmem:[#allocation37_spill] sm:$0xff] %v17572_v5  ;;  %11759 = vmatmul.mubr.f32.gmra.mrb[34].mxu1 %v19171_v1  ;;  %v17580_v19 = vpop.f32.mrb[39].mxu0  ;;  %v9410_v5 = vld [vmem:[%s18277_s9 + $0x290] sm:$0xff] }
 0x8b2   : > { %19175 = vst [vmem:[#allocation57_spill] sm:$0xff] %v17580_v19  ;;  %11761 = vmatprep.mubr.msk.f32.mxu1 %vm19177_vm10, %v17578_v10  ;;  %v12792_v10 = vpack.c.bf16 %v9411_v33, %v9410_v5  ;;  %v9414_v5 = vld [vmem:[%s18277_s9 + $0x2b0] sm:$0xff]  ;;  %v9415_v33 = vld [vmem:[%s18277_s9 + $0x2b8] sm:$0xff] }
 0x8b4   : > { %v17596_v11 = vpop.f32.mrb[40].mxu0 }
 0x8b5   : > { %19180 = vst [vmem:[#allocation100_spill] sm:$0xff] %v17596_v11  ;;  %11762 = vmatmul.mubr.f32.gmra.mrb[36].mxu1 %v17588_v51  ;;  %v17599_v19 = vpop.f32.mrb[41].mxu0  ;;  %v19186_v51 = vld [vmem:[#allocation19_spill] sm:$0xff] }
 0x8b6   : > { %19181 = vst [vmem:[#allocation46_spill] sm:$0xff] %v17599_v19  ;;  %11796 = vmatprep.mubr.f32.mxu1 %v19182_v15  ;;  %v12796_v15 = vpack.c.bf16 %v9413_v34, %v9412_v61  ;;  %v9416_v34 = vld [vmem:[%s18277_s9 + $0x2c0] sm:$0xff]  ;;  %v9417_v61 = vld [vmem:[%s18277_s9 + $0x2c8] sm:$0xff] }
 0x8b8   : > { %v17608_v1 = vpop.f32.mrb[42].mxu0 }
 0x8b9   : > { %19183 = vst [vmem:[#allocation79_spill] sm:$0xff] %v17608_v1  ;;  %11797 = vmatmul.mubr.f32.vlgmr.msra.gmra.mrb[6].mxu1 %v19184_v38  ;;  %v17611_v11 = vpop.f32.mrb[43].mxu0 }
 0x8ba   : > { %19185 = vst [vmem:[#allocation89_spill] sm:$0xff] %v17611_v11  ;;  %12791 = vmatpush3.bf16.msra.mxu1 %v12788_v6  ;;  %11799 = vmatprep.mubr.f32.mxu1 %v19186_v51  ;;  %v19189_v11 = vld [vmem:[#allocation4_spill] sm:$0xff]  ;;  %v12800_v6 = vpack.c.bf16 %v9415_v33, %v9414_v5  ;;  %v9418_v5 = vld [vmem:[%s18277_s9 + $0x2d0] sm:$0xff]  ;;  %v9419_v33 = vld [vmem:[%s18277_s9 + $0x2d8] sm:$0xff] }
 0x8bb   : > { %12793 = vmatprep.subr.bf16.mxu1 %v12792_v10 }
 0x8bc   : > { %v17620_v19 = vpop.f32.mrb[44].mxu0 }
 0x8bd   : > { %19187 = vst [vmem:[#allocation28_spill] sm:$0xff] %v17620_v19  ;;  %11800 = vmatmul.mubr.f32.gmra.mrb[8].mxu1 %v16746_v42  ;;  %v17623_v38 = vpop.f32.mrb[45].mxu0 }
 0x8be   : > { %19188 = vst [vmem:[#allocation11_spill] sm:$0xff] %v17623_v38  ;;  %11802 = vmatprep.mubr.f32.mxu1 %v19189_v11  ;;  %12795 = vmatpush3.bf16.msra.mxu1 %v12792_v10  ;;  %v12804_v10 = vpack.c.bf16 %v9417_v61, %v9416_v34  ;;  %v9420_v61 = vld [vmem:[%s18277_s9 + $0x2e0] sm:$0xff] }
 0x8bf   : > { %12797 = vmatprep.subr.bf16.mxu1 %v12796_v15 }
 0x8c0   : > { %v17632_v1 = vpop.f32.mrb[46].mxu0 }
 0x8c1   : > { %19190 = vst [vmem:[#allocation49_spill] sm:$0xff] %v17632_v1  ;;  %11803 = vmatmul.mubr.f32.gmra.mrb[10].mxu1 %v16766_v2  ;;  %v17635_v19 = vpop.f32.mrb[47].mxu0 }
 0x8c2   : > { %19191 = vst [vmem:[#allocation51_spill] sm:$0xff] %v17635_v19  ;;  %11805 = vmatprep.mubr.f32.mxu1 %v16770_v7  ;;  %12799 = vmatpush3.bf16.msra.mxu1 %v12796_v15  ;;  %v12808_v15 = vpack.c.bf16 %v9419_v33, %v9418_v5  ;;  %v9421_v19 = vld [vmem:[%s18277_s9 + $0x2e8] sm:$0xff]  ;;  %v9422_v33 = vld [vmem:[%s18277_s9 + $0x2f0] sm:$0xff] }
 0x8c3   : > { %12801 = vmatprep.subr.bf16.mxu1 %v12800_v6 }
 0x8c4   : > { %v17644_v38 = vpop.f32.mrb[48].mxu0 }
 0x8c5   : > { %19192 = vst [vmem:[#allocation19_spill] sm:$0xff] %v17644_v38  ;;  %11806 = vmatmul.mubr.f32.gmra.mrb[12].mxu1 %v16784_v20  ;;  %v17647_v1 = vpop.f32.mrb[49].mxu0 }
 0x8c6   : > { %19193 = vst [vmem:[#allocation4_spill] sm:$0xff] %v17647_v1  ;;  %11808 = vmatprep.mubr.f32.mxu1 %v16787_v53  ;;  %12803 = vmatpush3.bf16.msra.mxu1 %v12800_v6  ;;  %v12812_v6 = vpack.c.bf16 %v9421_v19, %v9420_v61  ;;  %v9456_v61 = vld [vmem:[%s18277_s9 + $0x300] sm:$0xff] }
 0x8c7   : > { %12805 = vmatprep.subr.bf16.mxu1 %v12804_v10 }
 0x8c8   : > { %v17650_v34 = vpop.f32.mrb[50].mxu0 }
 0x8c9   : > { %19194 = vst [vmem:[#allocation101_spill] sm:$0xff] %v17650_v34  ;;  %11809 = vmatmul.mubr.f32.gmra.mrb[14].mxu1 %v16800_v30  ;;  %v17659_v38 = vpop.f32.mrb[51].mxu0  ;;  %v9423_v34 = vld [vmem:[%s18277_s9 + $0x2f8] sm:$0xff] }
 0x8ca   : > { %19195 = vst [vmem:[#allocation102_spill] sm:$0xff] %v17659_v38  ;;  %11811 = vmatprep.mubr.f32.mxu1 %v16803_v16  ;;  %12807 = vmatpush3.bf16.msra.mxu1 %v12804_v10  ;;  %v19198_v38 = vld [vmem:[#allocation6_spill] sm:$0xff]  ;;  %v12816_v10 = vpack.c.bf16 %v9423_v34, %v9422_v33 }
 0x8cb   : > { %12809 = vmatprep.subr.bf16.mxu1 %v12808_v15 }
 0x8cc   : > { %v17662_v5 = vpop.f32.mrb[52].mxu0 }
 0x8cd   : > { %19196 = vst [vmem:[#allocation103_spill] sm:$0xff] %v17662_v5  ;;  %11812 = vmatmul.mubr.f32.gmra.mrb[16].mxu1 %v16810_v8  ;;  %v17671_v1 = vpop.f32.mrb[53].mxu0  ;;  %v9457_v5 = vld [vmem:[%s18277_s9 + $0x308] sm:$0xff] }
 0x8ce   : > { %19197 = vst [vmem:[#allocation104_spill] sm:$0xff] %v17671_v1  ;;  %11814 = vmatprep.mubr.f32.mxu1 %v19198_v38  ;;  %12811 = vmatpush3.bf16.msra.mxu1 %v12808_v15  ;;  %v12820_v15 = vpack.c.bf16 %v9457_v5, %v9456_v61  ;;  %v19215_v1 = vld [vmem:[#allocation43_spill] sm:$0xff] }
 0x8cf   : > { %12813 = vmatprep.subr.bf16.mxu1 %v12812_v6 }
 0x8d0   : > { %v17674_v19 = vpop.f32.mrb[54].mxu0 }
 0x8d1   : > { %19199 = vst [vmem:[#allocation6_spill] sm:$0xff] %v17674_v19  ;;  %11815 = vmatmul.mubr.f32.gmra.mrb[18].mxu1 %v16818_v63  ;;  %v17683_v8 = vpop.f32.mrb[55].mxu0 }
 0x8d2   : > { %19200 = vst [vmem:[#allocation105_spill] sm:$0xff] %v17683_v8  ;;  %11817 = vmatprep.mubr.f32.mxu1 %v16821_v23  ;;  %12815 = vmatpush3.bf16.msra.mxu1 %v12812_v6 }
 0x8d3   : > { %12817 = vmatprep.subr.bf16.mxu1 %v12816_v10 }
 0x8d4   : > { %v17686_v34 = vpop.f32.mrb[56].mxu0 }
 0x8d5   : > { %19201 = vst [vmem:[#allocation106_spill] sm:$0xff] %v17686_v34  ;;  %11818 = vmatmul.mubr.f32.gmra.mrb[20].mxu1 %v16826_v0  ;;  %v17689_v33 = vpop.f32.mrb[57].mxu0  ;;  %v19213_v34 = vld [vmem:[#allocation56_spill] sm:$0xff] }
 0x8d6   : > { %19202 = vst [vmem:[#allocation107_spill] sm:$0xff] %v17689_v33  ;;  %11820 = vmatprep.mubr.f32.mxu1 %v16832_v56  ;;  %12819 = vmatpush3.bf16.msra.mxu1 %v12816_v10  ;;  %v19212_v33 = vld [vmem:[#allocation42_spill] sm:$0xff]  ;;  %vm19214_vm8 = vnez %v19213_v34 }
 0x8d7   : > { %12821 = vmatprep.subr.bf16.mxu1 %v12820_v15  ;;  %v19221_v34 = vld [vmem:[#allocation62_spill] sm:$0xff] }
 0x8d8   : > { %v17692_v19 = vpop.f32.mrb[58].mxu0 }
 0x8d9   : > { %19203 = vst [vmem:[#allocation108_spill] sm:$0xff] %v17692_v19  ;;  %11821 = vmatmul.mubr.f32.gmra.mrb[22].mxu1 %v16849_v9  ;;  %v17695_v8 = vpop.f32.mrb[59].mxu0 }
 0x8da   : > { %19204 = vst [vmem:[#allocation109_spill] sm:$0xff] %v17695_v8  ;;  %11823 = vmatprep.mubr.f32.mxu1 %v16865_v35 }
 0x8dc   : > { %v17698_v6 = vpop.f32.mrb[60].mxu0 }
 0x8dd   : > { %19205 = vst [vmem:[#allocation110_spill] sm:$0xff] %v17698_v6  ;;  %11824 = vmatmul.mubr.f32.gmra.mrb[24].mxu1 %v16880_v60  ;;  %v17701_v5 = vpop.f32.mrb[61].mxu0  ;;  %v9461_v6 = vld [vmem:[%s18277_s9 + $0x328] sm:$0xff] }
 0x8de   : > { %19206 = vst [vmem:[#allocation111_spill] sm:$0xff] %v17701_v5  ;;  %11826 = vmatprep.mubr.f32.mxu1 %v16896_v32  ;;  %v9460_v5 = vld [vmem:[%s18277_s9 + $0x320] sm:$0xff] }
 0x8e0   : > { %v17704_v61 = vpop.f32.mrb[62].mxu0 }
 0x8e1   : > { %19207 = vst [vmem:[#allocation112_spill] sm:$0xff] %v17704_v61  ;;  %11827 = vmatmul.mubr.f32.gmra.mrb[26].mxu1 %v16910_v44  ;;  %v17707_v10 = vpop.f32.mrb[63].mxu0 }
 0x8e2   : > { %19208 = vst [vmem:[#allocation113_spill] sm:$0xff] %v17707_v10  ;;  %11829 = vmatprep.mubr.f32.mxu1 %v16926_v49  ;;  %v19211_v10 = vld [vmem:[#allocation40_spill] sm:$0xff] }
 0x8e4   : > { %v17710_v19 = vpop.f32.mrb[64].mxu0 }
 0x8e5   : > { %19209 = vst [vmem:[#allocation114_spill] sm:$0xff] %v17710_v19  ;;  %11830 = vmatmul.mubr.f32.gmra.mrb[28].mxu1 %v16939_v48  ;;  %v17713_v8 = vpop.f32.mrb[65].mxu0  ;;  %v9458_v19 = vld [vmem:[%s18277_s9 + $0x310] sm:$0xff] }
 0x8e6   : > { %19210 = vst [vmem:[#allocation115_spill] sm:$0xff] %v17713_v8  ;;  %11832 = vmatprep.mubr.f32.mxu1 %v16954_v40  ;;  %v9459_v8 = vld [vmem:[%s18277_s9 + $0x318] sm:$0xff] }
 0x8e7   : > { %v12824_v61 = vpack.c.bf16 %v9459_v8, %v9458_v19  ;;  %v9462_v8 = vld [vmem:[%s18277_s9 + $0x330] sm:$0xff]  ;;  %v9463_v19 = vld [vmem:[%s18277_s9 + $0x338] sm:$0xff] }
 0x8e9   : > { %11833 = vmatmul.mubr.f32.gmra.mrb[30].mxu1 %v16967_v58 }
 0x8ea   : > { %11835 = vmatprep.mubr.f32.mxu1 %v16982_v26 }
 0x8ed   : > { %11836 = vmatmul.mubr.f32.gmra.mrb[32].mxu1 %v16995_v36  ;;  %v19219_v36 = vld [vmem:[#allocation48_spill] sm:$0xff] }
 0x8ee   : > { %11838 = vmatprep.mubr.f32.mxu1 %v17010_v3  ;;  %v19217_v3 = vld [vmem:[#allocation59_spill] sm:$0xff] }
 0x8ef   : > { %vm19218_vm9 = vnez %v19217_v3 }
 0x8f1   : > { %11839 = vmatmul.mubr.f32.gmra.mrb[34].mxu1 %v16829_v22  ;;  %v12828_v22 = vpack.c.bf16 %v9461_v6, %v9460_v5  ;;  %v9465_v6 = vld [vmem:[%s18277_s9 + $0x348] sm:$0xff] }
 0x8f2   : > { %11841 = vmatprep.mubr.f32.mxu1 %v17557_v29  ;;  %v19220_v5 = vld [vmem:[#allocation52_spill] sm:$0xff] }
 0x8f5   : > { %11842 = vmatmul.mubr.f32.gmra.mrb[36].mxu1 %v17417_v39 }
 0x8f6   : > { %11876 = vmatprep.mubr.f32.mxu1 %v19211_v10  ;;  %v19216_v10 = vld [vmem:[#allocation45_spill] sm:$0xff] }
 0x8f9   : > { %11877 = vmatmul.mubr.msk.f32.vlgmr.msra.gmra.mrb[6].mxu1 %vm19214_vm8, %v19212_v33  ;;  %v9464_v33 = vld [vmem:[%s18277_s9 + $0x340] sm:$0xff]  ;;  %vm19222_vm8 = vnez %v19221_v34 }
 0x8fa   : > { %12823 = vmatpush3.bf16.msra.mxu1 %v12820_v15  ;;  %11879 = vmatprep.mubr.f32.mxu1 %v19215_v1  ;;  %v12832_v15 = vpack.c.bf16 %v9463_v19, %v9462_v8  ;;  %v19223_v1 = vld [vmem:[#allocation53_spill] sm:$0xff]  ;;  %v12836_v3 = vpack.c.bf16 %v9465_v6, %v9464_v33  ;;  %v9467_v8 = vld [vmem:[%s18277_s9 + $0x358] sm:$0xff]  ;;  %v19224_v19 = vld [vmem:[#allocation23_spill] sm:$0xff] }
 0x8fb   : > { %12825 = vmatprep.subr.bf16.mxu1 %v12824_v61  ;;  %v9469_v33 = vld [vmem:[%s18277_s9 + $0x368] sm:$0xff] }
 0x8fc   : > { %v19228_v6 = vld [vmem:[#allocation68_spill] sm:$0xff] }
 0x8fd   : > { %11880 = vmatmul.mubr.msk.f32.gmra.mrb[8].mxu1 %vm19218_vm9, %v19216_v10  ;;  %v19227_v10 = vld [vmem:[#allocation99_spill] sm:$0xff] }
 0x8fe   : > { %11882 = vmatprep.mubr.f32.mxu1 %v19219_v36  ;;  %12827 = vmatpush3.bf16.msra.mxu1 %v12824_v61  ;;  %v9466_v61 = vld [vmem:[%s18277_s9 + $0x350] sm:$0xff] }
 0x8ff   : > { %12829 = vmatprep.subr.bf16.mxu1 %v12828_v22  ;;  %v19225_v36 = vld [vmem:[#allocation65_spill] sm:$0xff]  ;;  %v12840_v34 = vpack.c.bf16 %v9467_v8, %v9466_v61  ;;  %v9471_v61 = vld [vmem:[%s18277_s9 + $0x378] sm:$0xff]  ;;  %v19231_v8 = vld [vmem:[#allocation71_spill] sm:$0xff] }
 0x900   : > { %vm19226_vm9 = vnez %v19225_v36 }
 0x901   : > { %11883 = vmatmul.mubr.msk.f32.gmra.mrb[10].mxu1 %vm19222_vm8, %v19220_v5  ;;  %vm19229_vm8 = vnez %v19228_v6 }
 0x902   : > { %11885 = vmatprep.mubr.f32.mxu1 %v19223_v1  ;;  %12831 = vmatpush3.bf16.msra.mxu1 %v12828_v22  ;;  %v9468_v22 = vld [vmem:[%s18277_s9 + $0x360] sm:$0xff]  ;;  %v19230_v1 = vld [vmem:[#allocation8_spill] sm:$0xff] }
 0x903   : > { %12833 = vmatprep.subr.bf16.mxu1 %v12832_v15  ;;  %v12844_v36 = vpack.c.bf16 %v9469_v33, %v9468_v22  ;;  %v9505_v22 = vld [vmem:[%s18277_s9 + $0x388] sm:$0xff]  ;;  %v19234_v33 = vld [vmem:[#allocation14_spill] sm:$0xff] }
 0x905   : > { %11886 = vmatmul.mubr.msk.f32.gmra.mrb[12].mxu1 %vm19226_vm9, %v19224_v19  ;;  %vm19232_vm9 = vnez %v19231_v8 }
 0x906   : > { %11888 = vmatprep.mubr.f32.mxu1 %v19227_v10  ;;  %12835 = vmatpush3.bf16.msra.mxu1 %v12832_v15  ;;  %v9470_v15 = vld [vmem:[%s18277_s9 + $0x370] sm:$0xff] }
 0x907   : > { %12837 = vmatprep.subr.bf16.mxu1 %v12836_v3  ;;  %v19233_v10 = vld [vmem:[#allocation13_spill] sm:$0xff]  ;;  %v12848_v6 = vpack.c.bf16 %v9471_v61, %v9470_v15  ;;  %v19240_v15 = vld [vmem:[#allocation16_spill] sm:$0xff] }
 0x908   : > { %v19241_v61 = vld [vmem:[#allocation17_spill] sm:$0xff] }
 0x909   : > { %11889 = vmatmul.mubr.msk.f32.gmra.mrb[14].mxu1 %vm19229_vm8, %v17282_v25  ;;  %v19237_v25 = vld [vmem:[#allocation15_spill] sm:$0xff] }
 0x90a   : > { %11891 = vmatprep.mubr.f32.mxu1 %v19230_v1  ;;  %12839 = vmatpush3.bf16.msra.mxu1 %v12836_v3  ;;  %v9504_v3 = vld [vmem:[%s18277_s9 + $0x380] sm:$0xff]  ;;  %v19235_v1 = vld [vmem:[#allocation74_spill] sm:$0xff] }
 0x90b   : > { %12841 = vmatprep.subr.bf16.mxu1 %v12840_v34  ;;  %vm19236_vm8 = vnez %v19235_v1  ;;  %v12852_v8 = vpack.c.bf16 %v9505_v22, %v9504_v3  ;;  %v19245_v1 = vld [vmem:[#allocation63_spill] sm:$0xff]  ;;  %v17829_v22 = vrot.slane %v17417_v39, 1 }
 0x90c   : > { %v19249_v3 = vld [vmem:[#allocation67_spill] sm:$0xff] }
 0x90d   : > { %11892 = vmatmul.mubr.msk.f32.gmra.mrb[16].mxu1 %vm19232_vm9, %v17302_v17  ;;  %v19244_v17 = vld [vmem:[#allocation61_spill] sm:$0xff]  ;;  %19258 = vst [vmem:[#allocation40_spill] sm:$0xff] %v17829_v22 }
 0x90e   : > { %11894 = vmatprep.mubr.f32.mxu1 %v19233_v10  ;;  %12843 = vmatpush3.bf16.msra.mxu1 %v12840_v34  ;;  %v19238_v34 = vld [vmem:[#allocation77_spill] sm:$0xff]  ;;  %v19242_v10 = vld [vmem:[#allocation80_spill] sm:$0xff] }
 0x90f   : > { %12845 = vmatprep.subr.bf16.mxu1 %v12844_v36  ;;  %vm19239_vm9 = vnez %v19238_v34  ;;  %vm19243_vm10 = vnez %v19242_v10  ;;  %v19251_v34 = vld [vmem:[#allocation72_spill] sm:$0xff]  ;;  %v9507_v10 = vld [vmem:[%s18277_s9 + $0x398] sm:$0xff] }
 0x911   : > { %11895 = vmatmul.mubr.msk.f32.gmra.mrb[18].mxu1 %vm19236_vm8, %v19234_v33  ;;  %v19246_v33 = vld [vmem:[#allocation83_spill] sm:$0xff] }
 0x912   : > { %11897 = vmatprep.mubr.f32.mxu1 %v19237_v25  ;;  %12847 = vmatpush3.bf16.msra.mxu1 %v12844_v36  ;;  %vm19247_vm8 = vnez %v19246_v33  ;;  %v19248_v36 = vld [vmem:[#allocation64_spill] sm:$0xff]  ;;  %v6557_v33 = vrot.slane %v17557_v29, 1 }
 0x913   : > { %12849 = vmatprep.subr.bf16.mxu1 %v12848_v6 }
 0x915   : > { %11898 = vmatmul.mubr.msk.f32.gmra.mrb[20].mxu1 %vm19239_vm9, %v17339_v24 }
 0x916   : > { %11900 = vmatprep.mubr.f32.mxu1 %v19240_v15  ;;  %12851 = vmatpush3.bf16.msra.mxu1 %v12848_v6  ;;  %v19252_v6 = vld [vmem:[#allocation76_spill] sm:$0xff] }
 0x917   : > { %12853 = vmatprep.subr.bf16.mxu1 %v12852_v8  ;;  %v19253_v15 = vld [vmem:[#allocation88_spill] sm:$0xff] }
 0x918   : > { %vm19254_vm9 = vnez %v19253_v15  ;;  %v19260_v15 = vld [vmem:[#allocation84_spill] sm:$0xff] }
 0x919   : > { %11901 = vmatmul.mubr.msk.f32.gmra.mrb[22].mxu1 %vm19243_vm10, %v19241_v61 }
 0x91a   : > { %11903 = vmatprep.mubr.f32.mxu1 %v19244_v17 }
 0x91d   : > { %11904 = vmatmul.mubr.msk.f32.gmra.mrb[24].mxu1 %vm19247_vm8, %v19245_v1  ;;  %v19266_v1 = vld [vmem:[#allocation36_spill] sm:$0xff] }
 0x91e   : > { %11906 = vmatprep.mubr.f32.mxu1 %v19248_v36  ;;  %v19256_v36 = vld [vmem:[#allocation87_spill] sm:$0xff] }
 0x921   : > { %11907 = vmatmul.mubr.msk.f32.gmra.mrb[26].mxu1 %vm19110_vm14, %v19249_v3 }
 0x922   : > { %11909 = vmatprep.mubr.f32.mxu1 %v19251_v34  ;;  %v19259_v34 = vld [vmem:[#allocation95_spill] sm:$0xff] }
 0x925   : > { %11910 = vmatmul.mubr.msk.f32.gmra.mrb[28].mxu1 %vm19254_vm9, %v19252_v6  ;;  %vm19261_vm9 = vcmp.lt.s32.totalorder %v14079_v46, 7 }
 0x926   : > { %11912 = vmatprep.mubr.f32.mxu1 %v17407_v55  ;;  %v17835_v55 = vsel %vm19261_vm9, %v19260_v15, %v6557_v33  ;;  %v9506_v15 = vld [vmem:[%s18277_s9 + $0x390] sm:$0xff] }
 0x927   : > { %19262 = vst [vmem:[#allocation42_spill] sm:$0xff] %v17835_v55 }
 0x929   : > { %11913 = vmatmul.mubr.msk.f32.gmra.mrb[30].mxu1 %vm19122_vm11, %v17413_v47  ;;  %vm19264_vm11 = vmmov %vm19261_vm9 }
 0x92a   : > { %11915 = vmatprep.mubr.f32.mxu1 %v17424_v43  ;;  %v17843_v43 = vsel %vm19264_vm11, %v6557_v33, %v17829_v22  ;;  %v19268_v33 = vld [vmem:[#allocation12_spill] sm:$0xff]  ;;  %vm19270_vm11 = vcmp.lt.s32.totalorder %v14079_v46, 1 }
 0x92b   : > { %19265 = vst [vmem:[#allocation52_spill] sm:$0xff] %v17843_v43 }
 0x92d   : > { %11916 = vmatmul.mubr.msk.f32.gmra.mrb[32].mxu1 %vm18979_vm1, %v19256_v36  ;;  %vm19267_vm1 = vmmov %vm19261_vm9  ;;  %v9509_v36 = vld [vmem:[%s18277_s9 + $0x3a8] sm:$0xff] }
 0x92e   : > { %11918 = vmatprep.mubr.f32.mxu1 %v19259_v34  ;;  %v6590_v34 = vsel %vm19267_vm1, %v17829_v22, %v19266_v1  ;;  %v12856_v1 = vpack.c.bf16 %v9507_v10, %v9506_v15  ;;  %v9508_v22 = vld [vmem:[%s18277_s9 + $0x3a0] sm:$0xff]  ;;  %v9519_v15 = vld [vmem:[%s18277_s9 + $0x3f8] sm:$0xff]  ;;  %v9533_v10 = vld [vmem:[%s18277_s9 + $0x468] sm:$0xff] }
 0x931   : > { %11919 = vmatmul.mubr.msk.f32.gmra.mrb[34].mxu1 %vm18885_vm13, %v17835_v55  ;;  %v19269_v55 = vld [vmem:[#allocation18_spill] sm:$0xff] }
 0x932   : > { %11921 = vmatprep.mubr.f32.mxu1 %v17843_v43  ;;  %v7540_v43 = vsel %vm19270_vm11, %v19269_v55, %v19268_v33  ;;  %v19275_v33 = vld [vmem:[#allocation70_spill] sm:$0xff] }
 0x935   : > { %11922 = vmatmul.mubr.msk.f32.gmra.mrb[36].mxu1 %vm15467_vm0, %v6590_v34  ;;  %v12860_v34 = vpack.c.bf16 %v9509_v36, %v9508_v22  ;;  %v19273_v36 = vld [vmem:[#allocation69_spill] sm:$0xff] }
 0x936   : > { %11956 = vmatprep.mubr.msk.f32.mxu1 %vm14738_vm2, %v7540_v43  ;;  %v9511_v43 = vld [vmem:[%s18277_s9 + $0x3b8] sm:$0xff]  ;;  %v19297_v22 = vld [vmem:[#allocation29_spill] sm:$0xff] }
 0x937   : > { %v12864_v13 = vpack.c.bf16 %v9511_v43, %v9510_v50  ;;  %v9520_v50 = vld [vmem:[%s18277_s9 + $0x400] sm:$0xff]  ;;  %v9521_v43 = vld [vmem:[%s18277_s9 + $0x408] sm:$0xff] }
 0x939   : > { %11957 = vmatmul.mubr.f32.vlgmr.msra.gmra.mrb[6].mxu1 %v16916_v18  ;;  %v9512_v18 = vld [vmem:[%s18277_s9 + $0x3c0] sm:$0xff] }
 0x93a   : > { %12855 = vmatpush3.bf16.msra.mxu1 %v12852_v8  ;;  %11959 = vmatprep.mubr.msk.f32.mxu1 %vm14759_vm3, %v16931_v4  ;;  %v9513_v4 = vld [vmem:[%s18277_s9 + $0x3c8] sm:$0xff]  ;;  %v19272_v8 = vld [vmem:[#allocation66_spill] sm:$0xff] }
 0x93b   : > { %12857 = vmatprep.subr.bf16.mxu1 %v12856_v1  ;;  %v12868_v27 = vpack.c.bf16 %v9513_v4, %v9512_v18  ;;  %v19279_v18 = vld [vmem:[#allocation27_spill] sm:$0xff]  ;;  %v19281_v4 = vld [vmem:[#allocation86_spill] sm:$0xff] }
 0x93c   : > { %vm19280_vm3 = vnez %v19279_v18 }
 0x93d   : > { %11960 = vmatmul.mubr.f32.gmra.mrb[8].mxu1 %v16944_v31  ;;  %v9514_v31 = vld [vmem:[%s18277_s9 + $0x3d0] sm:$0xff] }
 0x93e   : > { %11962 = vmatprep.mubr.msk.f32.mxu1 %vm14782_vm4, %v16959_v57  ;;  %12859 = vmatpush3.bf16.msra.mxu1 %v12856_v1  ;;  %v9515_v57 = vld [vmem:[%s18277_s9 + $0x3d8] sm:$0xff]  ;;  %v19276_v1 = vld [vmem:[#allocation24_spill] sm:$0xff] }
 0x93f   : > { %12861 = vmatprep.subr.bf16.mxu1 %v12860_v34  ;;  %v12872_v59 = vpack.c.bf16 %v9515_v57, %v9514_v31  ;;  %vm19277_vm2 = vnez %v19276_v1  ;;  %v19284_v31 = vld [vmem:[#allocation90_spill] sm:$0xff]  ;;  %v19285_v57 = vld [vmem:[#allocation92_spill] sm:$0xff]  ;;  %v8501_v1 = vld [vmem:[%s18269_s1 + $0x50] sm:$0xff] }
 0x941   : > { %11963 = vmatmul.mubr.f32.gmra.mrb[10].mxu1 %v16972_v12  ;;  %v9516_v12 = vld [vmem:[%s18277_s9 + $0x3e0] sm:$0xff] }
 0x942   : > { %11965 = vmatprep.mubr.msk.f32.mxu1 %vm14809_vm5, %v16987_v41  ;;  %12863 = vmatpush3.bf16.msra.mxu1 %v12860_v34  ;;  %v9517_v41 = vld [vmem:[%s18277_s9 + $0x3e8] sm:$0xff] }
 0x943   : > { %12865 = vmatprep.subr.bf16.mxu1 %v12864_v13 }
 0x945   : > { %11966 = vmatmul.mubr.f32.gmra.mrb[12].mxu1 %v17000_v21  ;;  %v12876_v21 = vpack.c.bf16 %v9517_v41, %v9516_v12  ;;  %v19289_v12 = vld [vmem:[#allocation35_spill] sm:$0xff]  ;;  %v19291_v41 = vld [vmem:[#allocation20_spill] sm:$0xff] }
 0x946   : > { %11968 = vmatprep.mubr.msk.f32.mxu1 %vm14835_vm6, %v17015_v52  ;;  %12867 = vmatpush3.bf16.msra.mxu1 %v12864_v13  ;;  %v9518_v52 = vld [vmem:[%s18277_s9 + $0x3f0] sm:$0xff]  ;;  %vm19290_vm5 = vnez %v19289_v12 }
 0x947   : > { %12869 = vmatprep.subr.bf16.mxu1 %v12868_v27  ;;  %v12880_v34 = vpack.c.bf16 %v9519_v15, %v9518_v52  ;;  %v19278_v13 = vld [vmem:[#allocation81_spill] sm:$0xff]  ;;  %v19299_v52 = vld [vmem:[#allocation44_spill] sm:$0xff]  ;;  %v19301_v15 = vld [vmem:[#allocation34_spill] sm:$0xff] }
 0x948   : > { %vm19300_vm1 = vnez %v19299_v52  ;;  %v8500_v52 = vld [vmem:[%s18269_s1 + $0x48] sm:$0xff] }
 0x949   : > { %11969 = vmatmul.mubr.f32.gmra.mrb[14].mxu1 %v19272_v8  ;;  %v19292_v8 = vld [vmem:[#allocation38_spill] sm:$0xff] }
 0x94a   : > { %11971 = vmatprep.mubr.msk.f32.mxu1 %vm14860_vm7, %v19273_v36  ;;  %12871 = vmatpush3.bf16.msra.mxu1 %v12868_v27  ;;  %v19282_v27 = vld [vmem:[#allocation30_spill] sm:$0xff]  ;;  %vm19293_vm6 = vnez %v19292_v8  ;;  %v19295_v36 = vld [vmem:[#allocation41_spill] sm:$0xff] }
 0x94b   : > { %12873 = vmatprep.subr.bf16.mxu1 %v12872_v59  ;;  %vm19283_vm4 = vnez %v19282_v27  ;;  %vm19296_vm7 = vnez %v19295_v36  ;;  %v9525_v27 = vld [vmem:[%s18277_s9 + $0x428] sm:$0xff]  ;;  %v8498_v8 = vld [vmem:[%s18269_s1 + $0x38] sm:$0xff]  ;;  %v19321_v36 = vld [vmem:[#allocation53_spill] sm:$0xff] }
 0x94d   : > { %11972 = vmatmul.mubr.f32.gmra.mrb[16].mxu1 %v19275_v33  ;;  %v19302_v33 = vld [vmem:[#allocation25_spill] sm:$0xff] }
 0x94e   : > { %11974 = vmatprep.mubr.msk.f32.mxu1 %vm19277_vm2, %v17054_v62  ;;  %12875 = vmatpush3.bf16.msra.mxu1 %v12872_v59  ;;  %v12884_v62 = vpack.c.bf16 %v9521_v43, %v9520_v50  ;;  %v19288_v59 = vld [vmem:[#allocation55_spill] sm:$0xff]  ;;  %v9522_v43 = vld [vmem:[%s18277_s9 + $0x410] sm:$0xff] }
 0x94f   : > { %12877 = vmatprep.subr.bf16.mxu1 %v12876_v21 }
 0x951   : > { %11975 = vmatmul.mubr.f32.gmra.mrb[18].mxu1 %v19142_v14  ;;  %v19287_v14 = vld [vmem:[#allocation93_spill] sm:$0xff] }
 0x952   : > { %11977 = vmatprep.mubr.msk.f32.mxu1 %vm19280_vm3, %v19278_v13  ;;  %12879 = vmatpush3.bf16.msra.mxu1 %v12876_v21  ;;  %v19298_v21 = vld [vmem:[#allocation31_spill] sm:$0xff]  ;;  %v9523_v13 = vld [vmem:[%s18277_s9 + $0x418] sm:$0xff] }
 0x953   : > { %12881 = vmatprep.subr.bf16.mxu1 %v12880_v34  ;;  %v12888_v18 = vpack.c.bf16 %v9523_v13, %v9522_v43  ;;  %v8503_v43 = vld [vmem:[%s18269_s1 + $0x60] sm:$0xff]  ;;  %v8504_v13 = vld [vmem:[%s18269_s1 + $0x68] sm:$0xff] }
 0x955   : > { %11978 = vmatmul.mubr.f32.gmra.mrb[20].mxu1 %v19281_v4  ;;  %v9524_v4 = vld [vmem:[%s18277_s9 + $0x420] sm:$0xff] }
 0x956   : > { %11980 = vmatprep.mubr.msk.f32.mxu1 %vm19283_vm4, %v19147_v37  ;;  %12883 = vmatpush3.bf16.msra.mxu1 %v12880_v34  ;;  %v19294_v37 = vld [vmem:[#allocation26_spill] sm:$0xff]  ;;  %v19304_v34 = vld [vmem:[#allocation3_spill] sm:$0xff] }
 0x957   : > { %12885 = vmatprep.subr.bf16.mxu1 %v12884_v62 }
 0x959   : > { %11981 = vmatmul.mubr.f32.gmra.mrb[22].mxu1 %v19284_v31  ;;  %v12892_v31 = vpack.c.bf16 %v9525_v27, %v9524_v4  ;;  %v19330_v4 = vld [vmem:[#allocation68_spill] sm:$0xff]  ;;  %v19332_v27 = vld [vmem:[#allocation13_spill] sm:$0xff] }
 0x95a   : > { %11983 = vmatprep.mubr.msk.f32.mxu1 %vm19149_vm15, %v19285_v57  ;;  %vm19306_vm15 = vmmov %vm19270_vm11  ;;  %v9531_v57 = vld [vmem:[%s18277_s9 + $0x458] sm:$0xff]  ;;  %vm19331_vm4 = vnez %v19330_v4 }
 0x95d   : > { %11984 = vmatmul.mubr.f32.gmra.mrb[24].mxu1 %v19287_v14  ;;  %v19309_v14 = vld [vmem:[#allocation5_spill] sm:$0xff] }
 0x95e   : > { %11986 = vmatprep.mubr.msk.f32.mxu1 %vm19290_vm5, %v19288_v59  ;;  %v9535_v59 = vld [vmem:[%s18277_s9 + $0x478] sm:$0xff] }
 0x961   : > { %11987 = vmatmul.mubr.f32.gmra.mrb[26].mxu1 %v19291_v41  ;;  %v8492_v41 = vld [vmem:[%s18269_s1 + $0x8] sm:$0xff] }
 0x962   : > { %11989 = vmatprep.mubr.msk.f32.mxu1 %vm19293_vm6, %v17125_v54  ;;  %v19305_v54 = vld [vmem:[#allocation97_spill] sm:$0xff] }
 0x963   : > { %v7510_v50 = vsel %vm19306_vm15, %v19305_v54, %v19269_v55  ;;  %v19325_v54 = vld [vmem:[#allocation7_spill] sm:$0xff] }
 0x965   : > { %11990 = vmatmul.mubr.f32.gmra.mrb[28].mxu1 %v19294_v37  ;;  %v19319_v37 = vld [vmem:[#allocation59_spill] sm:$0xff] }
 0x966   : > { %11992 = vmatprep.mubr.msk.f32.mxu1 %vm19296_vm7, %v19162_v45  ;;  %v19307_v45 = vld [vmem:[#allocation50_spill] sm:$0xff]  ;;  %vm19320_vm11 = vnez %v19319_v37 }
 0x967   : > { %vm19308_vm9 = vnez %v19307_v45  ;;  %v19328_v45 = vld [vmem:[#allocation8_spill] sm:$0xff]  ;;  %v13780_v37 = vld [vmem:[%s13905_s30 + $0x78] sm:$0xff] }
 0x969   : > { %11993 = vmatmul.mubr.f32.gmra.mrb[30].mxu1 %v19297_v22 }
 0x96a   : > { %11995 = vmatprep.mubr.msk.f32.mxu1 %vm19300_vm1, %v19298_v21  ;;  %v8499_v21 = vld [vmem:[%s18269_s1 + $0x40] sm:$0xff] }
 0x96d   : > { %11996 = vmatmul.mubr.f32.gmra.mrb[32].mxu1 %v19301_v15  ;;  %v19322_v15 = vld [vmem:[#allocation62_spill] sm:$0xff] }
 0x96e   : > { %11998 = vmatprep.mubr.msk.f32.mxu1 %vm19047_vm12, %v19302_v33  ;;  %vm19323_vm2 = vnez %v19322_v15  ;;  %v19324_v33 = vld [vmem:[#allocation99_spill] sm:$0xff] }
 0x96f   : > { %v13785_v15 = vld [vmem:[%s13905_s30 + $0xa0] sm:$0xff] }
 0x971   : > { %11999 = vmatmul.mubr.f32.gmra.mrb[34].mxu1 %v19304_v34  ;;  %v8502_v34 = vld [vmem:[%s18269_s1 + $0x58] sm:$0xff] }
 0x972   : > { %12001 = vmatprep.mubr.msk.f32.mxu1 %vm19308_vm9, %v7510_v50  ;;  %v19326_v50 = vld [vmem:[#allocation65_spill] sm:$0xff] }
 0x973   : > { %vm19327_vm3 = vnez %v19326_v50  ;;  %v13791_v50 = vld [vmem:[%s13905_s30 + $0xd0] sm:$0xff] }
 0x975   : > { %12002 = vmatmul.mubr.f32.gmra.mrb[36].mxu1 %v19269_v55  ;;  %v9526_v55 = vld [vmem:[%s18277_s9 + $0x430] sm:$0xff] }
 0x976   : > { %12036 = vmatprep.mubr.f32.mxu1 %v19186_v51  ;;  %v9527_v51 = vld [vmem:[%s18277_s9 + $0x438] sm:$0xff] }
 0x979   : > { %12037 = vmatmul.mubr.f32.vlgmr.msra.gmra.mrb[6].mxu1 %v16746_v42  ;;  %v12896_v42 = vpack.c.bf16 %v9527_v51, %v9526_v55  ;;  %v8505_v55 = vld [vmem:[%s18269_s1 + $0x70] sm:$0xff]  ;;  %v8506_v51 = vld [vmem:[%s18269_s1 + $0x78] sm:$0xff] }
 0x97a   : > { %12887 = vmatpush3.bf16.msra.mxu1 %v12884_v62  ;;  %12039 = vmatprep.mubr.f32.mxu1 %v19189_v11  ;;  %v9528_v11 = vld [vmem:[%s18277_s9 + $0x440] sm:$0xff]  ;;  %v9529_v62 = vld [vmem:[%s18277_s9 + $0x448] sm:$0xff] }
 0x97b   : > { %12889 = vmatprep.subr.bf16.mxu1 %v12888_v18 }
 0x97d   : > { %12040 = vmatmul.mubr.f32.gmra.mrb[8].mxu1 %v16766_v2  ;;  %v12900_v2 = vpack.c.bf16 %v9529_v62, %v9528_v11  ;;  %v19334_v11 = vld [vmem:[#allocation71_spill] sm:$0xff]  ;;  %v12944_v62 = vpack.c.bf16 %v8506_v51, %v8505_v55 }
 0x97e   : > { %12042 = vmatprep.mubr.f32.mxu1 %v16770_v7  ;;  %12891 = vmatpush3.bf16.msra.mxu1 %v12888_v18  ;;  %v9530_v7 = vld [vmem:[%s18277_s9 + $0x450] sm:$0xff]  ;;  %v19329_v18 = vld [vmem:[#allocation10_spill] sm:$0xff]  ;;  %vm19335_vm5 = vnez %v19334_v11  ;;  %v19366_v51 = vld [vmem:[#allocation75_spill] sm:$0xff] }
 0x97f   : > { %12893 = vmatprep.subr.bf16.mxu1 %v12892_v31 }
 0x981   : > { %12043 = vmatmul.mubr.f32.gmra.mrb[10].mxu1 %v16784_v20  ;;  %v12904_v20 = vpack.c.bf16 %v9531_v57, %v9530_v7  ;;  %v19338_v7 = vld [vmem:[#allocation16_spill] sm:$0xff]  ;;  %v19339_v57 = vld [vmem:[#allocation77_spill] sm:$0xff] }
 0x982   : > { %12045 = vmatprep.mubr.f32.mxu1 %v16787_v53  ;;  %12895 = vmatpush3.bf16.msra.mxu1 %v12892_v31  ;;  %v9532_v53 = vld [vmem:[%s18277_s9 + $0x460] sm:$0xff]  ;;  %v12940_v31 = vpack.c.bf16 %v8504_v13, %v8503_v43  ;;  %vm19340_vm7 = vnez %v19339_v57  ;;  %v13794_v43 = vld [vmem:[%s13905_s30 + $0xe8] sm:$0xff]  ;;  %v13795_v13 = vld [vmem:[%s13905_s30 + $0xf0] sm:$0xff] }
 0x983   : > { %12897 = vmatprep.subr.bf16.mxu1 %v12896_v42  ;;  %v19368_v57 = vld [vmem:[#allocation33_spill] sm:$0xff] }
 0x985   : > { %12046 = vmatmul.mubr.f32.gmra.mrb[12].mxu1 %v16800_v30  ;;  %v12908_v30 = vpack.c.bf16 %v9533_v10, %v9532_v53  ;;  %v19343_v53 = vld [vmem:[#allocation64_spill] sm:$0xff] }
 0x986   : > { %12048 = vmatprep.mubr.f32.mxu1 %v16803_v16  ;;  %12899 = vmatpush3.bf16.msra.mxu1 %v12896_v42  ;;  %v9534_v16 = vld [vmem:[%s18277_s9 + $0x470] sm:$0xff]  ;;  %v19333_v42 = vld [vmem:[#allocation14_spill] sm:$0xff] }
 0x987   : > { %12901 = vmatprep.subr.bf16.mxu1 %v12900_v2  ;;  %v12912_v12 = vpack.c.bf16 %v9535_v59, %v9534_v16  ;;  %v19351_v16 = vld [vmem:[#allocation87_spill] sm:$0xff] }
 0x988   : > { %v19352_v59 = vld [vmem:[#allocation91_spill] sm:$0xff] }
 0x989   : > { %12049 = vmatmul.mubr.f32.gmra.mrb[14].mxu1 %v19309_v14  ;;  %v19370_v14 = vld [vmem:[#allocation57_spill] sm:$0xff] }
 0x98a   : > { %12051 = vmatprep.mubr.f32.mxu1 %v19198_v38  ;;  %12903 = vmatpush3.bf16.msra.mxu1 %v12900_v2  ;;  %v8491_v38 = vld [vmem:[%s18269_s1] sm:$0xff]  ;;  %v19336_v2 = vld [vmem:[#allocation74_spill] sm:$0xff] }
 0x98b   : > { %12905 = vmatprep.subr.bf16.mxu1 %v12904_v20  ;;  %vm19337_vm6 = vnez %v19336_v2 }
 0x98d   : > { %12052 = vmatmul.mubr.f32.gmra.mrb[16].mxu1 %v16818_v63  ;;  %v12916_v63 = vpack.c.bf16 %v8492_v41, %v8491_v38  ;;  %v19356_v38 = vld [vmem:[#allocation94_spill] sm:$0xff] }
 0x98e   : > { %12054 = vmatprep.mubr.f32.mxu1 %v16821_v23  ;;  %12907 = vmatpush3.bf16.msra.mxu1 %v12904_v20  ;;  %v19310_v23 = vld [vmem:[#allocation58_spill] sm:$0xff]  ;;  %v19341_v20 = vld [vmem:[#allocation63_spill] sm:$0xff] }
 0x98f   : > { %12909 = vmatprep.subr.bf16.mxu1 %v12908_v30  ;;  %v19359_v41 = vld [vmem:[#allocation54_spill] sm:$0xff] }
 0x991   : > { %12055 = vmatmul.mubr.f32.gmra.mrb[18].mxu1 %v16826_v0  ;;  %v19311_v0 = vld [vmem:[#allocation60_spill] sm:$0xff] }
 0x992   : > { %12057 = vmatprep.mubr.f32.mxu1 %v16832_v56  ;;  %12911 = vmatpush3.bf16.msra.mxu1 %v12908_v30  ;;  %v19312_v56 = vld [vmem:[#allocation9_spill] sm:$0xff]  ;;  %v19350_v30 = vld [vmem:[#allocation82_spill] sm:$0xff] }
 0x993   : > { %12913 = vmatprep.subr.bf16.mxu1 %v12912_v12 }
 0x995   : > { %12058 = vmatmul.mubr.f32.gmra.mrb[20].mxu1 %v16849_v9  ;;  %v19313_v9 = vmov 0.0  }
 0x996   : > { %12060 = vmatprep.mubr.f32.mxu1 %v16865_v35  ;;  %12915 = vmatpush3.bf16.msra.mxu1 %v12912_v12  ;;  %v8493_v35 = vld [vmem:[%s18269_s1 + $0x10] sm:$0xff]  ;;  %v19355_v12 = vld [vmem:[#allocation42_spill] sm:$0xff] }
 0x997   : > { %12917 = vmatprep.subr.bf16.mxu1 %v12916_v63 }
 0x999   : > { %12061 = vmatmul.mubr.f32.gmra.mrb[22].mxu1 %v16880_v60  ;;  %v8494_v60 = vld [vmem:[%s18269_s1 + $0x18] sm:$0xff] }
 0x99a   : > { %12063 = vmatprep.mubr.f32.mxu1 %v16896_v32  ;;  %v19314_v32 = vld [vmem:[#allocation43_spill] sm:$0xff] }
 0x99d   : > { %12064 = vmatmul.mubr.f32.gmra.mrb[24].mxu1 %v16910_v44  ;;  %v12920_v44 = vpack.c.bf16 %v8494_v60, %v8493_v35  ;;  %v13766_v35 = vld [vmem:[%s13905_s30 + $0x8] sm:$0xff]  ;;  %v13767_v60 = vld [vmem:[%s13905_s30 + $0x10] sm:$0xff] }
 0x99e   : > { %12066 = vmatprep.mubr.f32.mxu1 %v16926_v49  ;;  %v8495_v49 = vld [vmem:[%s18269_s1 + $0x20] sm:$0xff] }
 0x9a1   : > { %12067 = vmatmul.mubr.f32.gmra.mrb[26].mxu1 %v16939_v48  ;;  %v8496_v48 = vld [vmem:[%s18269_s1 + $0x28] sm:$0xff] }
 0x9a2   : > { %12069 = vmatprep.mubr.f32.mxu1 %v16954_v40  ;;  %v19315_v40 = vld [vmem:[#allocation45_spill] sm:$0xff] }
 0x9a5   : > { %12070 = vmatmul.mubr.f32.gmra.mrb[28].mxu1 %v16967_v58  ;;  %v19316_v58 = vld [vmem:[#allocation56_spill] sm:$0xff] }
 0x9a6   : > { %12072 = vmatprep.mubr.f32.mxu1 %v16982_v26  ;;  %vm19317_vm12 = vnez %v19316_v58  ;;  %v19318_v26 = vld [vmem:[#allocation48_spill] sm:$0xff]  ;;  %v13775_v58 = vld [vmem:[%s13905_s30 + $0x50] sm:$0xff] }
 0x9a9   : > { %12073 = vmatmul.mubr.f32.gmra.mrb[30].mxu1 %v19310_v23 }
 0x9aa   : > { %12075 = vmatprep.mubr.f32.mxu1 %v19311_v0  ;;  %v19363_v0 = vld [vmem:[#allocation39_spill] sm:$0xff] }
 0x9ad   : > { %12076 = vmatmul.mubr.f32.gmra.mrb[32].mxu1 %v19312_v56 }
 0x9ae   : > { %12078 = vmatprep.mubr.f32.mxu1 %v17557_v29  ;;  %v8497_v29 = vld [vmem:[%s18269_s1 + $0x30] sm:$0xff] }
 0x9af   : > { %v12928_v22 = vpack.c.bf16 %v8498_v8, %v8497_v29  ;;  %v13778_v29 = vld [vmem:[%s13905_s30 + $0x68] sm:$0xff]  ;;  %v13779_v8 = vld [vmem:[%s13905_s30 + $0x70] sm:$0xff] }
 0x9b1   : > { %12079 = vmatmul.mubr.f32.gmra.mrb[34].mxu1 %v17417_v39  ;;  %v12924_v39 = vpack.c.bf16 %v8496_v48, %v8495_v49  ;;  %v13772_v49 = vld [vmem:[%s13905_s30 + $0x38] sm:$0xff]  ;;  %v13773_v48 = vld [vmem:[%s13905_s30 + $0x40] sm:$0xff] }
 0x9b2   : > { %12081 = vmatprep.mubr.f32.mxu1 %v19313_v9 }
 0x9b5   : > { %12082 = vmatmul.mubr.f32.gmra.mrb[36].mxu1 %v19313_v9  ;;  %v13765_v9 = vld [vmem:[%s13905_s30] sm:$0xff] }
 0x9b6   : > { %12116 = vmatprep.mubr.f32.mxu1 %v19314_v32  ;;  %v13768_v32 = vld [vmem:[%s13905_s30 + $0x18] sm:$0xff] }
 0x9b9   : > { %12117 = vmatmul.mubr.msk.f32.vlgmr.msra.gmra.mrb[6].mxu1 %vm19317_vm12, %v19315_v40  ;;  %v13774_v40 = vld [vmem:[%s13905_s30 + $0x48] sm:$0xff] }
 0x9ba   : > { %12919 = vmatpush3.bf16.msra.mxu1 %v12916_v63  ;;  %12119 = vmatprep.mubr.f32.mxu1 %v19318_v26  ;;  %v19360_v63 = vld [vmem:[#allocation40_spill] sm:$0xff]  ;;  %v13776_v26 = vld [vmem:[%s13905_s30 + $0x58] sm:$0xff] }
 0x9bb   : > { %12921 = vmatprep.subr.bf16.mxu1 %v12920_v44 }
 0x9bd   : > { %12120 = vmatmul.mubr.msk.f32.gmra.mrb[8].mxu1 %vm19320_vm11, %v19220_v5  ;;  %v12932_v5 = vpack.c.bf16 %v8500_v52, %v8499_v21  ;;  %v13783_v21 = vld [vmem:[%s13905_s30 + $0x90] sm:$0xff]  ;;  %v13784_v52 = vld [vmem:[%s13905_s30 + $0x98] sm:$0xff] }
 0x9be   : > { %12122 = vmatprep.mubr.f32.mxu1 %v19321_v36  ;;  %12923 = vmatpush3.bf16.msra.mxu1 %v12920_v44  ;;  %v13769_v44 = vld [vmem:[%s13905_s30 + $0x20] sm:$0xff] }
 0x9bf   : > { %12925 = vmatprep.subr.bf16.mxu1 %v12924_v39  ;;  %v13781_v36 = vld [vmem:[%s13905_s30 + $0x80] sm:$0xff] }
 0x9c1   : > { %12123 = vmatmul.mubr.msk.f32.gmra.mrb[10].mxu1 %vm19323_vm2, %v19224_v19  ;;  %v12936_v19 = vpack.c.bf16 %v8502_v34, %v8501_v1  ;;  %v13788_v1 = vld [vmem:[%s13905_s30 + $0xb8] sm:$0xff]  ;;  %v13789_v34 = vld [vmem:[%s13905_s30 + $0xc0] sm:$0xff] }
 0x9c2   : > { %12125 = vmatprep.mubr.f32.mxu1 %v19324_v33  ;;  %12927 = vmatpush3.bf16.msra.mxu1 %v12924_v39  ;;  %v13777_v39 = vld [vmem:[%s13905_s30 + $0x60] sm:$0xff]  ;;  %v13786_v33 = vld [vmem:[%s13905_s30 + $0xa8] sm:$0xff] }
 0x9c3   : > { %12929 = vmatprep.subr.bf16.mxu1 %v12928_v22 }
 0x9c5   : > { %12126 = vmatmul.mubr.msk.f32.gmra.mrb[12].mxu1 %vm19327_vm3, %v19325_v54  ;;  %v13790_v54 = vld [vmem:[%s13905_s30 + $0xc8] sm:$0xff] }
 0x9c6   : > { %12128 = vmatprep.mubr.f32.mxu1 %v19328_v45  ;;  %12931 = vmatpush3.bf16.msra.mxu1 %v12928_v22  ;;  %v13782_v22 = vld [vmem:[%s13905_s30 + $0x88] sm:$0xff]  ;;  %v13792_v45 = vld [vmem:[%s13905_s30 + $0xd8] sm:$0xff] }
 0x9c7   : > { %12933 = vmatprep.subr.bf16.mxu1 %v12932_v5 }
 0x9c9   : > { %12129 = vmatmul.mubr.msk.f32.gmra.mrb[14].mxu1 %vm19331_vm4, %v19329_v18  ;;  %v13796_v18 = vld [vmem:[%s13905_s30 + $0xf8] sm:$0xff] }
 0x9ca   : > { %12131 = vmatprep.mubr.f32.mxu1 %v19332_v27  ;;  %12935 = vmatpush3.bf16.msra.mxu1 %v12932_v5  ;;  %v13787_v5 = vld [vmem:[%s13905_s30 + $0xb0] sm:$0xff] }
 0x9cb   : > { %12937 = vmatprep.subr.bf16.mxu1 %v12936_v19  ;;  %v19365_v27 = vld [vmem:[#allocation73_spill] sm:$0xff] }
 0x9cd   : > { %12132 = vmatmul.mubr.msk.f32.gmra.mrb[16].mxu1 %vm19335_vm5, %v19333_v42 }
 0x9ce   : > { %12134 = vmatprep.mubr.f32.mxu1 %v19237_v25  ;;  %12939 = vmatpush3.bf16.msra.mxu1 %v12936_v19  ;;  %v13793_v19 = vld [vmem:[%s13905_s30 + $0xe0] sm:$0xff] }
 0x9cf   : > { %12941 = vmatprep.subr.bf16.mxu1 %v12940_v31 }
 0x9d1   : > { %12135 = vmatmul.mubr.msk.f32.gmra.mrb[18].mxu1 %vm19337_vm6, %v17339_v24  ;;  %v19345_v24 = vld [vmem:[#allocation72_spill] sm:$0xff] }
 0x9d2   : > { %12137 = vmatprep.mubr.f32.mxu1 %v19338_v7  ;;  %12943 = vmatpush3.bf16.msra.mxu1 %v12940_v31 }
 0x9d3   : > { %12945 = vmatprep.subr.bf16.mxu1 %v12944_v62 }
 0x9d5   : > { %12138 = vmatmul.mubr.msk.f32.gmra.mrb[20].mxu1 %vm19340_vm7, %v19241_v61  ;;  %v19348_v61 = vld [vmem:[#allocation88_spill] sm:$0xff] }
 0x9d6   : > { %12140 = vmatprep.mubr.f32.mxu1 %v19244_v17  ;;  %12947 = vmatpush3.bf16.msra.mxu1 %v12944_v62  ;;  %v19347_v17 = vld [vmem:[#allocation78_spill] sm:$0xff]  ;;  %vm19349_vm1 = vnez %v19348_v61 }
 0x9d7   : > { %v19367_v62 = vld [vmem:[#allocation98_spill] sm:$0xff] }
 0x9d9   : > { %12141 = vmatmul.mubr.msk.f32.gmra.mrb[22].mxu1 %vm19243_vm10, %v19341_v20  ;;  %vm19353_vm10 = vnez %v19352_v59 }
 0x9da   : > { %12143 = vmatprep.mubr.f32.mxu1 %v19343_v53  ;;  %v19369_v53 = vld [vmem:[#allocation37_spill] sm:$0xff] }
 0x9dd   : > { %12144 = vmatmul.mubr.msk.f32.gmra.mrb[24].mxu1 %vm19247_vm8, %v19249_v3  ;;  %v19354_v3 = vld [vmem:[#allocation95_spill] sm:$0xff]  ;;  %vm19357_vm8 = vnez %v19356_v38 }
 0x9de   : > { %12146 = vmatprep.mubr.f32.mxu1 %v19345_v24 }
 0x9e1   : > { %12147 = vmatmul.mubr.msk.f32.gmra.mrb[26].mxu1 %vm19110_vm14, %v19252_v6  ;;  %v19358_v6 = vld [vmem:[#allocation52_spill] sm:$0xff]  ;;  %vm19361_vm14 = vcmp.lt.s32.totalorder %v14079_v46, 7 }
 0x9e2   : > { %12149 = vmatprep.mubr.f32.mxu1 %v19347_v17  ;;  %vm19364_vm15 = vmmov %vm19361_vm14  ;;  %v13770_v46 = vld [vmem:[%s13905_s30 + $0x28] sm:$0xff] }
 0x9e3   : > { %v7636_v56 = vsel %vm19364_vm15, %v19359_v41, %v19363_v0 }
 0x9e5   : > { %12150 = vmatmul.mubr.msk.f32.gmra.mrb[28].mxu1 %vm19349_vm1, %v17413_v47  ;;  %v7606_v47 = vsel %vm19361_vm14, %v19360_v63, %v19359_v41 }
 0x9e6   : > { %12152 = vmatprep.mubr.f32.mxu1 %v19350_v30  ;;  %v19371_v30 = vld [vmem:[#allocation100_spill] sm:$0xff] }
 0x9e9   : > { %12153 = vmatmul.mubr.msk.f32.gmra.mrb[30].mxu1 %vm19353_vm10, %v19351_v16 }
 0x9ea   : > { %12155 = vmatprep.mubr.f32.mxu1 %v19354_v3  ;;  %v19372_v3 = vld [vmem:[#allocation46_spill] sm:$0xff] }
 0x9ed   : > { %12156 = vmatmul.mubr.msk.f32.gmra.mrb[32].mxu1 %vm19357_vm8, %v19355_v12 }
 0x9ee   : > { %12158 = vmatprep.mubr.f32.mxu1 %v19358_v6  ;;  %v19373_v6 = vld [vmem:[#allocation79_spill] sm:$0xff] }
 0x9f1   : > { %12159 = vmatmul.mubr.msk.f32.gmra.mrb[34].mxu1 %vm18885_vm13, %v7606_v47  ;;  %v19374_v47 = vld [vmem:[#allocation89_spill] sm:$0xff] }
 0x9f2   : > { %12161 = vmatprep.mubr.f32.mxu1 %v19359_v41 }
 0x9f5   : > { %12162 = vmatmul.mubr.msk.f32.gmra.mrb[36].mxu1 %vm15467_vm0, %v7636_v56  ;;  %v19375_v56 = vld [vmem:[#allocation28_spill] sm:$0xff] }
 0x9f6   : > { %12196 = vmatprep.mubr.f32.mxu1 %v13765_v9 }
 0x9f9   : > { %12197 = vmatmul.mubr.f32.vlgmr.msra.gmra.mrb[6].mxu1 %v13766_v35 }
 0x9fa   : > { %12199 = vmatprep.mubr.f32.mxu1 %v13767_v60  ;;  %v19376_v60 = vld [vmem:[#allocation11_spill] sm:$0xff] }
 0x9fd   : > { %12200 = vmatmul.mubr.f32.gmra.mrb[8].mxu1 %v13768_v32 }
 0x9fe   : > { %12202 = vmatprep.mubr.f32.mxu1 %v13769_v44 }
 0xa01   : > { %12203 = vmatmul.mubr.f32.gmra.mrb[10].mxu1 %v13770_v46  ;;  %v19377_v46 = vld [vmem:[#allocation49_spill] sm:$0xff] }
 0xa02   : > { %12205 = vmatprep.mubr.f32.mxu1 %v13771_v28 }
 0xa05   : > { %12206 = vmatmul.mubr.f32.gmra.mrb[12].mxu1 %v13772_v49 }
 0xa06   : > { %12208 = vmatprep.mubr.f32.mxu1 %v13773_v48  ;;  %v19378_v48 = vld [vmem:[#allocation51_spill] sm:$0xff] }
 0xa09   : > { %12209 = vmatmul.mubr.f32.gmra.mrb[14].mxu1 %v13774_v40 }
 0xa0a   : > { %12211 = vmatprep.mubr.f32.mxu1 %v13775_v58 }
 0xa0d   : > { %12212 = vmatmul.mubr.f32.gmra.mrb[16].mxu1 %v13776_v26  ;;  %v19379_v26 = vld [vmem:[#allocation19_spill] sm:$0xff] }
 0xa0e   : > { %12214 = vmatprep.mubr.f32.mxu1 %v13777_v39 }
 0xa11   : > { %12215 = vmatmul.mubr.f32.gmra.mrb[18].mxu1 %v13778_v29 }
 0xa12   : > { %12217 = vmatprep.mubr.f32.mxu1 %v13779_v8  ;;  %v19380_v8 = vld [vmem:[#allocation4_spill] sm:$0xff] }
 0xa15   : > { %12218 = vmatmul.mubr.f32.gmra.mrb[20].mxu1 %v13780_v37 }
 0xa16   : > { %12220 = vmatprep.mubr.f32.mxu1 %v13781_v36 }
 0xa19   : > { %12221 = vmatmul.mubr.f32.gmra.mrb[22].mxu1 %v13782_v22  ;;  %v19381_v22 = vld [vmem:[#allocation101_spill] sm:$0xff] }
 0xa1a   : > { %12223 = vmatprep.mubr.f32.mxu1 %v13783_v21 }
 0xa1d   : > { %12224 = vmatmul.mubr.f32.gmra.mrb[24].mxu1 %v13784_v52 }
 0xa1e   : > { %12226 = vmatprep.mubr.f32.mxu1 %v13785_v15  ;;  %v19382_v15 = vld [vmem:[#allocation102_spill] sm:$0xff] }
 0xa21   : > { %12227 = vmatmul.mubr.f32.gmra.mrb[26].mxu1 %v13786_v33 }
 0xa22   : > { %12229 = vmatprep.mubr.f32.mxu1 %v13787_v5 }
 0xa25   : > { %12230 = vmatmul.mubr.f32.gmra.mrb[28].mxu1 %v13788_v1  ;;  %v19383_v1 = vld [vmem:[#allocation103_spill] sm:$0xff] }
 0xa26   : > { %12232 = vmatprep.mubr.f32.mxu1 %v13789_v34 }
 0xa29   : > { %12233 = vmatmul.mubr.f32.gmra.mrb[30].mxu1 %v13790_v54 }
 0xa2a   : > { %12235 = vmatprep.mubr.f32.mxu1 %v13791_v50  ;;  %v19384_v50 = vld [vmem:[#allocation104_spill] sm:$0xff] }
 0xa2d   : > { %12236 = vmatmul.mubr.f32.gmra.mrb[32].mxu1 %v13792_v45 }
 0xa2e   : > { %12238 = vmatprep.mubr.f32.mxu1 %v13793_v19 }
 0xa31   : > { %12239 = vmatmul.mubr.f32.gmra.mrb[34].mxu1 %v13794_v43  ;;  %v19385_v43 = vld [vmem:[#allocation6_spill] sm:$0xff] }
 0xa32   : > { %12241 = vmatprep.mubr.f32.mxu1 %v13795_v13 }
 0xa35   : > { %12242 = vmatmul.mubr.f32.gmra.mrb[36].mxu1 %v13796_v18 }
 0xacc   : > { %v12198_v4 = vpop.f32.mrb[6].mxu1 }
 0xacd   : > { %v12948_v31 = vadd.f32 %v12198_v4, %v19365_v27  ;;  %v8573_v55 = vpop.f32.mrb[7].mxu1  ;;  %v19386_v4 = vld [vmem:[#allocation105_spill] sm:$0xff] }
 0xace   : > { %v12949_v42 = vadd.f32 %v8573_v55, %v19366_v51  ;;  %v19387_v55 = vld [vmem:[#allocation106_spill] sm:$0xff] }
 0xacf   : > { %8765 = vst [vmem:[%s18199_s15 + $0x8] sm:$0xff] %v12948_v31 }
 0xad0   : > { %8764 = vst [vmem:[%s18199_s15] sm:$0xff] %v12949_v42  ;;  %v12201_v11 = vpop.f32.mrb[8].mxu1 }
 0xad1   : > { %v12950_v2 = vadd.f32 %v12201_v11, %v19367_v62  ;;  %v8583_v7 = vpop.f32.mrb[9].mxu1  ;;  %v19388_v11 = vld [vmem:[#allocation107_spill] sm:$0xff] }
 0xad2   : > { %v12951_v20 = vadd.f32 %v8583_v7, %v19368_v57  ;;  %v19389_v7 = vld [vmem:[#allocation108_spill] sm:$0xff] }
 0xad3   : > { %8767 = vst [vmem:[%s18199_s15 + $0x18] sm:$0xff] %v12950_v2 }
 0xad4   : > { %8766 = vst [vmem:[%s18199_s15 + $0x10] sm:$0xff] %v12951_v20  ;;  %v12204_v25 = vpop.f32.mrb[10].mxu1 }
 0xad5   : > { %v12952_v10 = vadd.f32 %v12204_v25, %v19369_v53  ;;  %v8593_v24 = vpop.f32.mrb[11].mxu1  ;;  %v19390_v25 = vld [vmem:[#allocation109_spill] sm:$0xff] }
 0xad6   : > { %v12953_v17 = vadd.f32 %v8593_v24, %v19370_v14  ;;  %v19391_v24 = vld [vmem:[#allocation110_spill] sm:$0xff] }
 0xad7   : > { %8769 = vst [vmem:[%s18199_s15 + $0x28] sm:$0xff] %v12952_v10 }
 0xad8   : > { %8768 = vst [vmem:[%s18199_s15 + $0x20] sm:$0xff] %v12953_v17  ;;  %v12207_v61 = vpop.f32.mrb[12].mxu1 }
 0xad9   : > { %v12954_v16 = vadd.f32 %v12207_v61, %v19371_v30  ;;  %v8603_v59 = vpop.f32.mrb[13].mxu1  ;;  %v19392_v61 = vld [vmem:[#allocation111_spill] sm:$0xff] }
 0xada   : > { %v12955_v12 = vadd.f32 %v8603_v59, %v19372_v3  ;;  %v19393_v59 = vld [vmem:[#allocation112_spill] sm:$0xff] }
 0xadb   : > { %8771 = vst [vmem:[%s18199_s15 + $0x38] sm:$0xff] %v12954_v16 }
 0xadc   : > { %8770 = vst [vmem:[%s18199_s15 + $0x30] sm:$0xff] %v12955_v12  ;;  %v12210_v38 = vpop.f32.mrb[14].mxu1 }
 0xadd   : > { %v12956_v41 = vadd.f32 %v12210_v38, %v19373_v6  ;;  %v8613_v63 = vpop.f32.mrb[15].mxu1  ;;  %v19394_v38 = vld [vmem:[#allocation113_spill] sm:$0xff] }
 0xade   : > { %v12957_v23 = vadd.f32 %v8613_v63, %v19374_v47  ;;  %v19395_v63 = vld [vmem:[#allocation114_spill] sm:$0xff] }
 0xadf   : > { %8773 = vst [vmem:[%s18199_s15 + $0x48] sm:$0xff] %v12956_v41 }
 0xae0   : > { %8772 = vst [vmem:[%s18199_s15 + $0x40] sm:$0xff] %v12957_v23  ;;  %v12213_v0 = vpop.f32.mrb[16].mxu1 }
 0xae1   : > { %v12958_v9 = vadd.f32 %v12213_v0, %v19375_v56  ;;  %v8623_v35 = vpop.f32.mrb[17].mxu1  ;;  %v19396_v0 = vld [vmem:[#allocation115_spill] sm:$0xff] }
 0xae2   : > { %v12959_v32 = vadd.f32 %v8623_v35, %v19376_v60 }
 0xae3   : > { %8775 = vst [vmem:[%s18199_s15 + $0x58] sm:$0xff] %v12958_v9 }
 0xae4   : > { %8774 = vst [vmem:[%s18199_s15 + $0x50] sm:$0xff] %v12959_v32  ;;  %v12216_v44 = vpop.f32.mrb[18].mxu1 }
 0xae5   : > { %v12960_v28 = vadd.f32 %v12216_v44, %v19377_v46  ;;  %v8633_v49 = vpop.f32.mrb[19].mxu1 }
 0xae6   : > { %v12961_v40 = vadd.f32 %v8633_v49, %v19378_v48 }
 0xae7   : > { %8777 = vst [vmem:[%s18199_s15 + $0x68] sm:$0xff] %v12960_v28 }
 0xae8   : > { %8776 = vst [vmem:[%s18199_s15 + $0x60] sm:$0xff] %v12961_v40  ;;  %v12219_v58 = vpop.f32.mrb[20].mxu1 }
 0xae9   : > { %v12962_v39 = vadd.f32 %v12219_v58, %v19379_v26  ;;  %v8643_v29 = vpop.f32.mrb[21].mxu1 }
 0xaea   : > { %v12963_v37 = vadd.f32 %v8643_v29, %v19380_v8 }
 0xaeb   : > { %8779 = vst [vmem:[%s18199_s15 + $0x78] sm:$0xff] %v12962_v39 }
 0xaec   : > { %8778 = vst [vmem:[%s18199_s15 + $0x70] sm:$0xff] %v12963_v37  ;;  %v12222_v36 = vpop.f32.mrb[22].mxu1 }
 0xaed   : > { %v12964_v21 = vadd.f32 %v12222_v36, %v19381_v22  ;;  %v8653_v52 = vpop.f32.mrb[23].mxu1 }
 0xaee   : > { %v12965_v33 = vadd.f32 %v8653_v52, %v19382_v15 }
 0xaef   : > { %8781 = vst [vmem:[%s18199_s15 + $0x88] sm:$0xff] %v12964_v21 }
 0xaf0   : > { %8780 = vst [vmem:[%s18199_s15 + $0x80] sm:$0xff] %v12965_v33  ;;  %v12225_v5 = vpop.f32.mrb[24].mxu1 }
 0xaf1   : > { %v12966_v34 = vadd.f32 %v12225_v5, %v19383_v1  ;;  %v8663_v54 = vpop.f32.mrb[25].mxu1 }
 0xaf2   : > { %v12967_v45 = vadd.f32 %v8663_v54, %v19384_v50 }
 0xaf3   : > { %8783 = vst [vmem:[%s18199_s15 + $0x98] sm:$0xff] %v12966_v34 }
 0xaf4   : > { %8782 = vst [vmem:[%s18199_s15 + $0x90] sm:$0xff] %v12967_v45  ;;  %v12228_v19 = vpop.f32.mrb[26].mxu1 }
 0xaf5   : > { %v12968_v13 = vadd.f32 %v12228_v19, %v19385_v43  ;;  %v8673_v18 = vpop.f32.mrb[27].mxu1 }
 0xaf6   : > { %v12969_v27 = vadd.f32 %v8673_v18, %v19386_v4 }
 0xaf7   : > { %8785 = vst [vmem:[%s18199_s15 + $0xa8] sm:$0xff] %v12968_v13 }
 0xaf8   : > { %8784 = vst [vmem:[%s18199_s15 + $0xa0] sm:$0xff] %v12969_v27  ;;  %v12231_v31 = vpop.f32.mrb[28].mxu1 }
 0xaf9   : > { %v12970_v51 = vadd.f32 %v12231_v31, %v19387_v55  ;;  %v8683_v42 = vpop.f32.mrb[29].mxu1 }
 0xafa   : > { %v12971_v62 = vadd.f32 %v8683_v42, %v19388_v11 }
 0xafb   : > { %8787 = vst [vmem:[%s18199_s15 + $0xb8] sm:$0xff] %v12970_v51 }
 0xafc   : > { %8786 = vst [vmem:[%s18199_s15 + $0xb0] sm:$0xff] %v12971_v62  ;;  %v12234_v2 = vpop.f32.mrb[30].mxu1 }
 0xafd   : > { %v12972_v57 = vadd.f32 %v12234_v2, %v19389_v7  ;;  %v8693_v20 = vpop.f32.mrb[31].mxu1 }
 0xafe   : > { %v12973_v53 = vadd.f32 %v8693_v20, %v19390_v25 }
 0xaff   : > { %8789 = vst [vmem:[%s18199_s15 + $0xc8] sm:$0xff] %v12972_v57 }
 0xb00   : > { %8788 = vst [vmem:[%s18199_s15 + $0xc0] sm:$0xff] %v12973_v53  ;;  %v12237_v10 = vpop.f32.mrb[32].mxu1 }
 0xb01   : > { %v12974_v14 = vadd.f32 %v12237_v10, %v19391_v24  ;;  %v8703_v17 = vpop.f32.mrb[33].mxu1 }
 0xb02   : > { %v12975_v30 = vadd.f32 %v8703_v17, %v19392_v61 }
 0xb03   : > { %8791 = vst [vmem:[%s18199_s15 + $0xd8] sm:$0xff] %v12974_v14 }
 0xb04   : > { %8790 = vst [vmem:[%s18199_s15 + $0xd0] sm:$0xff] %v12975_v30  ;;  %v12240_v16 = vpop.f32.mrb[34].mxu1 }
 0xb05   : > { %v12976_v3 = vadd.f32 %v12240_v16, %v19393_v59  ;;  %v8713_v12 = vpop.f32.mrb[35].mxu1 }
 0xb06   : > { %v12977_v6 = vadd.f32 %v8713_v12, %v19394_v38 }
 0xb07   : > { %8793 = vst [vmem:[%s18199_s15 + $0xe8] sm:$0xff] %v12976_v3 }
 0xb08   : > { %8792 = vst [vmem:[%s18199_s15 + $0xe0] sm:$0xff] %v12977_v6  ;;  %v12243_v41 = vpop.f32.mrb[36].mxu1 }
 0xb09   : > { %v12978_v47 = vadd.f32 %v12243_v41, %v19395_v63  ;;  %v8723_v23 = vpop.f32.mrb[37].mxu1 }
 0xb0a   : > { %v12979_v56 = vadd.f32 %v8723_v23, %v19396_v0 }
 0xb0b   : > { %8795 = vst [vmem:[%s18199_s15 + $0xf8] sm:$0xff] %v12978_v47 }
 0xb0c   : > { %8794 = vst [vmem:[%s18199_s15 + $0xf0] sm:$0xff] %v12979_v56 }
 0xb0d PF: > { %s20_s13 = sadd.s32 1, %s13803_s13  }
 0xb0e   : > { %p17_p4 = scmp.ge.s32.totalorder %s20_s13, 4  }
 0xb10   :  { %19 = sbr.rel (!%p17_p4) target bundleno = 1 (0x1), region = 106 }

</bundles_post_ra>
